<compile_context>
chip_gen: v6e
topology: v6e:2x2x1
jax: 0.10.0
libtpu: 0.0.40
codegen_flags: <defaults>
</compile_context>

<pallas_src>
import functools
import math

import jax
import jax.numpy as jnp
from jax.experimental import pallas as pl
from jax.experimental.pallas import tpu as pltpu

_SQRT2 = math.sqrt(2.0)


def _erf(x):
    # Abramowitz & Stegun 7.1.26 rational approximation (|err| < 1.5e-7), odd-extended.
    # Matches torch's exact (erf-based) nn.GELU to float32 precision with only
    # Pallas-friendly elementwise ops (exp on the EUP, the rest on the VPU).
    a1, a2, a3, a4, a5 = 0.254829592, -0.284496736, 1.421413741, -1.453152027, 1.061405429
    p = 0.3275911
    sign = jnp.where(x >= 0.0, 1.0, -1.0)
    ax = jnp.abs(x)
    t = 1.0 / (1.0 + p * ax)   # exact divide; pl.reciprocal(approx=True) would trade ~1e-3 acc
    poly = ((((a5 * t + a4) * t + a3) * t + a2) * t + a1) * t
    return sign * (1.0 - poly * jnp.exp(-ax * ax))


def _gelu(x):
    # torch nn.GELU() default (approximate='none'): 0.5 * x * (1 + erf(x / sqrt(2)))
    return 0.5 * x * (1.0 + _erf(x / _SQRT2))


def _layernorm_last(v, gamma, beta, eps=1e-5):
    mu = jnp.mean(v, axis=-1, keepdims=True)
    var = jnp.mean((v - mu) ** 2, axis=-1, keepdims=True)
    return (v - mu) * jax.lax.rsqrt(var + eps) * gamma + beta


def _ssm_kernel(num_layers, compute_dtype, *refs):
    """One batch TILE per grid step; all tensors are (TB, lanes) lane-dense slabs."""
    (x_ref, wc_ref, bc_ref, wt_ref, bt_ref, gt_ref, bet_ref,
     wo_ref, bo_ref, mavg_ref) = refs[:10]
    n_obs = 4 * num_layers + 2
    obs_refs = refs[10:10 + n_obs]
    out_ref = refs[10 + n_obs]

    f32 = jnp.float32
    cdt = compute_dtype
    F = bc_ref.shape[1]                    # D*D = 64

    mavg = mavg_ref[...]                   # (D*H, D*H) segment-averaging matrix, f32

    def seg_layernorm(h, gamma, beta, eps=1e-5):
        # Per-row LayerNorm(H) in the lane-dense layout: each 32-lane segment is one row.
        mean = jnp.dot(h, mavg, preferred_element_type=f32)     # broadcast segment mean
        d = h - mean
        var = jnp.dot(d * d, mavg, preferred_element_type=f32)  # broadcast segment var
        return d * jax.lax.rsqrt(var + eps) * gamma + beta

    x = x_ref[...].astype(cdt)                                                   # (TB, 64)

    # --- combine: per-row Linear(2D->D) with state_init folded into bc_eff -------------
    state_c = jnp.dot(x, wc_ref[...], preferred_element_type=f32) + bc_ref[...]  # (TB, 64)

    # --- transition: Linear(64->H) on the flattened state, GELU, LayerNorm(H) ----------
    t = jnp.dot(state_c.astype(cdt), wt_ref[...], preferred_element_type=f32) + bt_ref[...]
    t = _gelu(t)
    t = _layernorm_last(t, gt_ref[...], bet_ref[...])                            # (TB, H)

    # --- output_layer: Linear(H->64) => flattened (8,8) state, already lane-dense ------
    state = jnp.dot(t.astype(cdt), wo_ref[...], preferred_element_type=f32) + bo_ref[...]

    # --- observation MLP: per-row [Linear -> LayerNorm -> GELU] * L, final Linear ------
    h = state
    for l in range(num_layers):
        w = obs_refs[4 * l][...]
        b = obs_refs[4 * l + 1][...]
        g = obs_refs[4 * l + 2][...]
        be = obs_refs[4 * l + 3][...]
        h = jnp.dot(h.astype(cdt), w, preferred_element_type=f32) + b            # (TB, D*H)
        h = seg_layernorm(h, g, be)
        h = _gelu(h)
    w_last = obs_refs[4 * num_layers][...]
    b_last = obs_refs[4 * num_layers + 1][...]
    obs = jnp.dot(h.astype(cdt), w_last, preferred_element_type=f32) + b_last    # (TB, 64)

    # Packed lane-dense output: [obs | state] -> (TB, 128), full-width stores.
    out_ref[:, :F] = obs.astype(out_ref.dtype)
    out_ref[:, F:] = state.astype(out_ref.dtype)


def init_params(key, input_dim=8, hidden_dim=32, output_dim=8, num_layers=2):
    """Parameters in kernel-friendly layout: W as (in, out) = torch_W.T, biases (1, out)."""
    assert input_dim == output_dim == 8, "forward() shapes require input_dim == output_dim == 8"
    D, H, L = output_dim, hidden_dim, num_layers
    keys = iter(jax.random.split(key, 32))

    def linear_t(in_f, out_f):
        bound = 1.0 / math.sqrt(in_f)
        w = jax.random.uniform(next(keys), (out_f, in_f), jnp.float32, -bound, bound)
        b = jax.random.uniform(next(keys), (out_f,), jnp.float32, -bound, bound)
        return w.T, b.reshape(1, out_f)

    wc_t, bc = linear_t(2 * D, D)                 # combine: Linear(2D, D)
    wc_s, wc_x = wc_t[:D, :], wc_t[D:, :]
    wt_t, bt = linear_t(D * D, H)                 # transition: Linear(D*D, H)
    g_t = jnp.ones((1, H), jnp.float32)
    be_t = jnp.zeros((1, H), jnp.float32)
    wo_t, bo = linear_t(H, D * D)                 # output_layer: Linear(H, D*D)
    # state_init: module initializes it to zeros; use small random values here so the
    # folded state_init @ Wc_s + bc bias path is actually exercised by the check.
    s0 = 0.1 * jax.random.normal(next(keys), (D, D), jnp.float32)

    obs = []
    in_f = D
    for _ in range(L):                            # Linear -> LayerNorm -> GELU blocks
        w, b = linear_t(in_f, H)
        obs += [w, b, jnp.ones((1, H), jnp.float32), jnp.zeros((1, H), jnp.float32)]
        in_f = H
    w, b = linear_t(H, D)                         # final Linear(H, D)
    obs += [w, b]

    return dict(D=D, H=H, L=L, s0=s0, wc_s=wc_s, wc_x=wc_x, bc=bc,
                wt_t=wt_t, bt=bt, g_t=g_t, be_t=be_t, wo_t=wo_t, bo=bo, obs=obs)


def _kernel_operands(params, compute_dtype):
    """Build the replicated kernel operands: kron-expanded weights, folded/tiled biases."""
    D, H, L = params["D"], params["H"], params["L"]
    f32 = jnp.float32
    cdt = compute_dtype
    eyeD = jnp.eye(D, dtype=f32)

    wc_k = jnp.kron(eyeD, params["wc_x"]).astype(cdt)                       # (64, 64)
    bc_eff = (params["s0"] @ params["wc_s"] + params["bc"]).reshape(1, D * D).astype(f32)
    wt = params["wt_t"].astype(cdt)                                         # (64, H)
    bt = params["bt"].astype(f32)
    g_t = params["g_t"].astype(f32)
    be_t = params["be_t"].astype(f32)
    wo = params["wo_t"].astype(cdt)                                         # (H, 64)
    bo = params["bo"].astype(f32)
    # Segment-averaging matrix for per-row LayerNorm(H): kept in f32 for accurate stats.
    mavg = jnp.kron(eyeD, jnp.full((H, H), 1.0 / H, f32))                   # (D*H, D*H)

    obs = []
    p = params["obs"]
    for l in range(L):
        w, b, g, be = p[4 * l], p[4 * l + 1], p[4 * l + 2], p[4 * l + 3]
        obs += [jnp.kron(eyeD, w).astype(cdt),          # (D*in, D*H) block-diagonal
                jnp.tile(b, (1, D)).astype(f32),
                jnp.tile(g, (1, D)).astype(f32),
                jnp.tile(be, (1, D)).astype(f32)]
    w_last, b_last = p[4 * L], p[4 * L + 1]
    obs += [jnp.kron(eyeD, w_last).astype(cdt),         # (D*H, D*D)
            jnp.tile(b_last, (1, D)).astype(f32)]

    return [wc_k, bc_eff, wt, bt, g_t, be_t, wo, bo, mavg] + obs


def state_space_forward(params, x, *, block_batch=512, compute_dtype=jnp.float32):
    """x: (B, 1, 8, 8).  Returns (observation, state), each (B, 1, 8, 8) float32."""
    D, L = params["D"], params["L"]
    B = x.shape[0]
    F = D * D

    x_flat = x.astype(jnp.float32).reshape(B, F).astype(compute_dtype)      # lane-dense input

    tb = max(8, min(block_batch, B))
    tb = ((tb + 7) // 8) * 8
    b_pad = ((B + tb - 1) // tb) * tb
    if b_pad != B:
        x_flat = jnp.pad(x_flat, ((0, b_pad - B), (0, 0)))

    operands = _kernel_operands(params, compute_dtype)
    inputs = [x_flat] + operands

    def rep_spec(a):
        return pl.BlockSpec(a.shape, lambda i: (0,) * a.ndim)

    in_specs = ([pl.BlockSpec((tb, F), lambda i: (i, 0))]
                + [rep_spec(a) for a in operands])
    out_specs = pl.BlockSpec((tb, 2 * F), lambda i: (i, 0))
    out_shape = jax.ShapeDtypeStruct((b_pad, 2 * F), jnp.float32)

    packed = pl.pallas_call(
        functools.partial(_ssm_kernel, L, compute_dtype),
        grid=(b_pad // tb,),
        in_specs=in_specs,
        out_specs=out_specs,
        out_shape=out_shape,
        compiler_params=pltpu.CompilerParams(dimension_semantics=("parallel",)),
    )(*inputs)

    obs = packed[:B, :F].reshape(B, 1, D, D)
    state = packed[:B, F:].reshape(B, 1, D, D)
    return obs, state


def _ref_forward(params, x):
    """Pure-JAX reference mirroring the PyTorch forward, for correctness checking."""
    D, L = params["D"], params["L"]
    B = x.shape[0]
    xb = x.astype(jnp.float32).reshape(B, D, D)
    s0 = params["s0"]

    def ln(v, g, b, eps=1e-5):
        mu = jnp.mean(v, -1, keepdims=True)
        var = jnp.mean((v - mu) ** 2, -1, keepdims=True)
        return (v - mu) / jnp.sqrt(var + eps) * g + b

    gelu = lambda v: jax.nn.gelu(v, approximate=False)

    state_c = xb @ params["wc_x"] + s0 @ params["wc_s"] + params["bc"]
    t = state_c.reshape(B, D * D) @ params["wt_t"] + params["bt"]
    t = ln(gelu(t), params["g_t"], params["be_t"])
    o = t @ params["wo_t"] + params["bo"]
    state = o.reshape(B, D, D)

    h = state
    p = params["obs"]
    for l in range(L):
        h = ln(h @ p[4 * l] + p[4 * l + 1], p[4 * l + 2], p[4 * l + 3])
        h = gelu(h)
    obs = h @ p[4 * L] + p[4 * L + 1]
    return obs.reshape(B, 1, D, D), state.reshape(B, 1, D, D)


if __name__ == "__main__":
    key = jax.random.PRNGKey(0)
    pkey, xkey = jax.random.split(key)
    params = init_params(pkey, input_dim=8, hidden_dim=32, output_dim=8, num_layers=2)

    B = 512
    x = jax.random.normal(xkey, (B, 1, 8, 8), jnp.float32)

    ref_obs, ref_state = _ref_forward(params, x)

    # f32 path (all generations): 4 parallel grid steps of (128, 64) tiles.
    observation, state = state_space_forward(params, x, block_batch=128,
                                             compute_dtype=jnp.float32)
    jax.block_until_ready((observation, state))
    if not (bool(jnp.allclose(observation, ref_obs, atol=1e-3, rtol=1e-3))
            and bool(jnp.allclose(state, ref_state, atol=1e-3, rtol=1e-3))):
        raise AssertionError("f32 Pallas kernel does not match pure-JAX reference")

    # bf16 matmul-operand path (MXU-native on v6e/v7x); f32 LayerNorm stats/accumulation.
    obs16, state16 = state_space_forward(params, x, block_batch=128,
                                         compute_dtype=jnp.bfloat16)
    jax.block_until_ready((obs16, state16))
    if not (bool(jnp.allclose(obs16, ref_obs, atol=5e-2, rtol=5e-2))
            and bool(jnp.allclose(state16, ref_state, atol=5e-2, rtol=5e-2))):
        raise AssertionError("bf16 Pallas kernel deviates too far from reference")

    print("KERNEL_OK")
</pallas_src>

<mosaic_0001>
module attributes {stable_mosaic.version = 11 : i64} {
  func.func @_ssm_kernel(%arg0: i32, %arg1: memref<128x64xf32, #tpu.memory_space<vmem>>, %arg2: memref<64x64xf32, #tpu.memory_space<vmem>>, %arg3: memref<1x64xf32, #tpu.memory_space<vmem>>, %arg4: memref<64x32xf32, #tpu.memory_space<vmem>>, %arg5: memref<1x32xf32, #tpu.memory_space<vmem>>, %arg6: memref<1x32xf32, #tpu.memory_space<vmem>>, %arg7: memref<1x32xf32, #tpu.memory_space<vmem>>, %arg8: memref<32x64xf32, #tpu.memory_space<vmem>>, %arg9: memref<1x64xf32, #tpu.memory_space<vmem>>, %arg10: memref<256x256xf32, #tpu.memory_space<vmem>>, %arg11: memref<64x256xf32, #tpu.memory_space<vmem>>, %arg12: memref<1x256xf32, #tpu.memory_space<vmem>>, %arg13: memref<1x256xf32, #tpu.memory_space<vmem>>, %arg14: memref<1x256xf32, #tpu.memory_space<vmem>>, %arg15: memref<256x256xf32, #tpu.memory_space<vmem>>, %arg16: memref<1x256xf32, #tpu.memory_space<vmem>>, %arg17: memref<1x256xf32, #tpu.memory_space<vmem>>, %arg18: memref<1x256xf32, #tpu.memory_space<vmem>>, %arg19: memref<256x64xf32, #tpu.memory_space<vmem>>, %arg20: memref<1x64xf32, #tpu.memory_space<vmem>>, %arg21: memref<128x128xf32, #tpu.memory_space<vmem>>) attributes {dimension_semantics = [#tpu.dimension_semantics<parallel>], iteration_bounds = array<i64: 4>, scalar_prefetch = 0 : i64, scratch_operands = 0 : i64, tpu.core_type = #tpu.core_type<tc>, window_params = [{transform_indices = @transform_0, window_bounds = array<i64: 128, 64>}, {pipeline_mode = #tpu.pipeline_mode<synchronous>, transform_indices = @transform_1, window_bounds = array<i64: 64, 64>}, {pipeline_mode = #tpu.pipeline_mode<synchronous>, transform_indices = @transform_2, window_bounds = array<i64: 1, 64>}, {pipeline_mode = #tpu.pipeline_mode<synchronous>, transform_indices = @transform_3, window_bounds = array<i64: 64, 32>}, {pipeline_mode = #tpu.pipeline_mode<synchronous>, transform_indices = @transform_4, window_bounds = array<i64: 1, 32>}, {pipeline_mode = #tpu.pipeline_mode<synchronous>, transform_indices = @transform_5, window_bounds = array<i64: 1, 32>}, {pipeline_mode = #tpu.pipeline_mode<synchronous>, transform_indices = @transform_6, window_bounds = array<i64: 1, 32>}, {pipeline_mode = #tpu.pipeline_mode<synchronous>, transform_indices = @transform_7, window_bounds = array<i64: 32, 64>}, {pipeline_mode = #tpu.pipeline_mode<synchronous>, transform_indices = @transform_8, window_bounds = array<i64: 1, 64>}, {pipeline_mode = #tpu.pipeline_mode<synchronous>, transform_indices = @transform_9, window_bounds = array<i64: 256, 256>}, {pipeline_mode = #tpu.pipeline_mode<synchronous>, transform_indices = @transform_10, window_bounds = array<i64: 64, 256>}, {pipeline_mode = #tpu.pipeline_mode<synchronous>, transform_indices = @transform_11, window_bounds = array<i64: 1, 256>}, {pipeline_mode = #tpu.pipeline_mode<synchronous>, transform_indices = @transform_12, window_bounds = array<i64: 1, 256>}, {pipeline_mode = #tpu.pipeline_mode<synchronous>, transform_indices = @transform_13, window_bounds = array<i64: 1, 256>}, {pipeline_mode = #tpu.pipeline_mode<synchronous>, transform_indices = @transform_14, window_bounds = array<i64: 256, 256>}, {pipeline_mode = #tpu.pipeline_mode<synchronous>, transform_indices = @transform_15, window_bounds = array<i64: 1, 256>}, {pipeline_mode = #tpu.pipeline_mode<synchronous>, transform_indices = @transform_16, window_bounds = array<i64: 1, 256>}, {pipeline_mode = #tpu.pipeline_mode<synchronous>, transform_indices = @transform_17, window_bounds = array<i64: 1, 256>}, {pipeline_mode = #tpu.pipeline_mode<synchronous>, transform_indices = @transform_18, window_bounds = array<i64: 256, 64>}, {pipeline_mode = #tpu.pipeline_mode<synchronous>, transform_indices = @transform_19, window_bounds = array<i64: 1, 64>}, {transform_indices = @transform_20, window_bounds = array<i64: 128, 128>}]} {
    %c0 = arith.constant 0 : index
    %c0_0 = arith.constant 0 : index
    %0 = vector.load %arg10[%c0, %c0_0] : memref<256x256xf32, #tpu.memory_space<vmem>>, vector<256x256xf32>
    %c0_1 = arith.constant 0 : index
    %c0_2 = arith.constant 0 : index
    %1 = vector.load %arg1[%c0_1, %c0_2] : memref<128x64xf32, #tpu.memory_space<vmem>>, vector<128x64xf32>
    %c0_3 = arith.constant 0 : index
    %c0_4 = arith.constant 0 : index
    %2 = vector.load %arg2[%c0_3, %c0_4] : memref<64x64xf32, #tpu.memory_space<vmem>>, vector<64x64xf32>
    %cst = arith.constant dense<0.000000e+00> : vector<128x64xf32>
    %3 = tpu.matmul %1, %2, %cst {dimension_numbers = #tpu.dot_dimension_numbers<[1], [0], [0], [1], [0, 0, 1, 1], [], []>} : vector<128x64xf32>, vector<64x64xf32>, vector<128x64xf32> -> vector<128x64xf32>
    %c0_5 = arith.constant 0 : index
    %c0_6 = arith.constant 0 : index
    %4 = vector.load %arg3[%c0_5, %c0_6] : memref<1x64xf32, #tpu.memory_space<vmem>>, vector<1x64xf32>
    %5 = vector.broadcast %4 : vector<1x64xf32> to vector<128x64xf32>
    %6 = arith.addf %3, %5 : vector<128x64xf32>
    %c0_7 = arith.constant 0 : index
    %c0_8 = arith.constant 0 : index
    %7 = vector.load %arg4[%c0_7, %c0_8] : memref<64x32xf32, #tpu.memory_space<vmem>>, vector<64x32xf32>
    %cst_9 = arith.constant dense<0.000000e+00> : vector<128x32xf32>
    %8 = tpu.matmul %6, %7, %cst_9 {dimension_numbers = #tpu.dot_dimension_numbers<[1], [0], [0], [1], [0, 0, 1, 1], [], []>} : vector<128x64xf32>, vector<64x32xf32>, vector<128x32xf32> -> vector<128x32xf32>
    %c0_10 = arith.constant 0 : index
    %c0_11 = arith.constant 0 : index
    %9 = vector.load %arg5[%c0_10, %c0_11] : memref<1x32xf32, #tpu.memory_space<vmem>>, vector<1x32xf32>
    %10 = vector.broadcast %9 : vector<1x32xf32> to vector<128x32xf32>
    %11 = arith.addf %8, %10 : vector<128x32xf32>
    %cst_12 = arith.constant 5.000000e-01 : f32
    %12 = vector.broadcast %cst_12 : f32 to vector<128x32xf32>
    %13 = arith.mulf %12, %11 : vector<128x32xf32>
    %cst_13 = arith.constant 1.41421354 : f32
    %14 = vector.broadcast %cst_13 : f32 to vector<128x32xf32>
    %15 = arith.divf %11, %14 : vector<128x32xf32>
    %cst_14 = arith.constant 0.000000e+00 : f32
    %16 = vector.broadcast %cst_14 : f32 to vector<128x32xf32>
    %17 = arith.cmpf oge, %15, %16 : vector<128x32xf32>
    %cst_15 = arith.constant 1.000000e+00 : f32
    %cst_16 = arith.constant -1.000000e+00 : f32
    %18 = vector.broadcast %cst_15 : f32 to vector<128x32xf32>
    %19 = vector.broadcast %cst_16 : f32 to vector<128x32xf32>
    %20 = arith.select %17, %18, %19 : vector<128x32xi1>, vector<128x32xf32>
    %21 = math.absf %15 : vector<128x32xf32>
    %cst_17 = arith.constant 0.327591091 : f32
    %22 = vector.broadcast %cst_17 : f32 to vector<128x32xf32>
    %23 = arith.mulf %22, %21 : vector<128x32xf32>
    %cst_18 = arith.constant 1.000000e+00 : f32
    %24 = vector.broadcast %cst_18 : f32 to vector<128x32xf32>
    %25 = arith.addf %24, %23 : vector<128x32xf32>
    %cst_19 = arith.constant 1.000000e+00 : f32
    %26 = vector.broadcast %cst_19 : f32 to vector<128x32xf32>
    %27 = arith.divf %26, %25 : vector<128x32xf32>
    %cst_20 = arith.constant 1.06140542 : f32
    %28 = vector.broadcast %cst_20 : f32 to vector<128x32xf32>
    %29 = arith.mulf %28, %27 : vector<128x32xf32>
    %cst_21 = arith.constant -1.45315206 : f32
    %30 = vector.broadcast %cst_21 : f32 to vector<128x32xf32>
    %31 = arith.addf %29, %30 : vector<128x32xf32>
    %32 = arith.mulf %31, %27 : vector<128x32xf32>
    %cst_22 = arith.constant 1.42141378 : f32
    %33 = vector.broadcast %cst_22 : f32 to vector<128x32xf32>
    %34 = arith.addf %32, %33 : vector<128x32xf32>
    %35 = arith.mulf %34, %27 : vector<128x32xf32>
    %cst_23 = arith.constant -0.284496725 : f32
    %36 = vector.broadcast %cst_23 : f32 to vector<128x32xf32>
    %37 = arith.addf %35, %36 : vector<128x32xf32>
    %38 = arith.mulf %37, %27 : vector<128x32xf32>
    %cst_24 = arith.constant 0.254829586 : f32
    %39 = vector.broadcast %cst_24 : f32 to vector<128x32xf32>
    %40 = arith.addf %38, %39 : vector<128x32xf32>
    %41 = arith.mulf %40, %27 : vector<128x32xf32>
    %cst_25 = arith.constant 0.000000e+00 : f32
    %42 = vector.broadcast %cst_25 : f32 to vector<128x32xf32>
    %43 = arith.subf %42, %21 : vector<128x32xf32>
    %44 = arith.mulf %43, %21 : vector<128x32xf32>
    %45 = math.exp %44 : vector<128x32xf32>
    %46 = arith.mulf %41, %45 : vector<128x32xf32>
    %cst_26 = arith.constant 1.000000e+00 : f32
    %47 = vector.broadcast %cst_26 : f32 to vector<128x32xf32>
    %48 = arith.subf %47, %46 : vector<128x32xf32>
    %49 = arith.mulf %20, %48 : vector<128x32xf32>
    %cst_27 = arith.constant 1.000000e+00 : f32
    %50 = vector.broadcast %cst_27 : f32 to vector<128x32xf32>
    %51 = arith.addf %50, %49 : vector<128x32xf32>
    %52 = arith.mulf %13, %51 : vector<128x32xf32>
    %c0_28 = arith.constant 0 : index
    %c0_29 = arith.constant 0 : index
    %53 = vector.load %arg6[%c0_28, %c0_29] : memref<1x32xf32, #tpu.memory_space<vmem>>, vector<1x32xf32>
    %c0_30 = arith.constant 0 : index
    %c0_31 = arith.constant 0 : index
    %54 = vector.load %arg7[%c0_30, %c0_31] : memref<1x32xf32, #tpu.memory_space<vmem>>, vector<1x32xf32>
    %cst_32 = arith.constant dense<0.000000e+00> : vector<128xf32>
    %55 = vector.multi_reduction <add>, %52, %cst_32 [1] : vector<128x32xf32> to vector<128xf32>
    %56 = vector.shape_cast %55 : vector<128xf32> to vector<128x1xf32>
    %cst_33 = arith.constant 3.200000e+01 : f32
    %57 = vector.broadcast %cst_33 : f32 to vector<128x1xf32>
    %58 = arith.divf %56, %57 : vector<128x1xf32>
    %59 = vector.broadcast %58 : vector<128x1xf32> to vector<128x32xf32>
    %60 = arith.subf %52, %59 : vector<128x32xf32>
    %61 = arith.mulf %60, %60 : vector<128x32xf32>
    %cst_34 = arith.constant dense<0.000000e+00> : vector<128xf32>
    %62 = vector.multi_reduction <add>, %61, %cst_34 [1] : vector<128x32xf32> to vector<128xf32>
    %63 = vector.shape_cast %62 : vector<128xf32> to vector<128x1xf32>
    %cst_35 = arith.constant 3.200000e+01 : f32
    %64 = vector.broadcast %cst_35 : f32 to vector<128x1xf32>
    %65 = arith.divf %63, %64 : vector<128x1xf32>
    %66 = vector.broadcast %58 : vector<128x1xf32> to vector<128x32xf32>
    %67 = arith.subf %52, %66 : vector<128x32xf32>
    %cst_36 = arith.constant 9.99999974E-6 : f32
    %68 = vector.broadcast %cst_36 : f32 to vector<128x1xf32>
    %69 = arith.addf %65, %68 : vector<128x1xf32>
    %70 = math.rsqrt %69 : vector<128x1xf32>
    %71 = vector.broadcast %70 : vector<128x1xf32> to vector<128x32xf32>
    %72 = arith.mulf %67, %71 : vector<128x32xf32>
    %73 = vector.broadcast %53 : vector<1x32xf32> to vector<128x32xf32>
    %74 = arith.mulf %72, %73 : vector<128x32xf32>
    %75 = vector.broadcast %54 : vector<1x32xf32> to vector<128x32xf32>
    %76 = arith.addf %74, %75 : vector<128x32xf32>
    %c0_37 = arith.constant 0 : index
    %c0_38 = arith.constant 0 : index
    %77 = vector.load %arg8[%c0_37, %c0_38] : memref<32x64xf32, #tpu.memory_space<vmem>>, vector<32x64xf32>
    %cst_39 = arith.constant dense<0.000000e+00> : vector<128x64xf32>
    %78 = tpu.matmul %76, %77, %cst_39 {dimension_numbers = #tpu.dot_dimension_numbers<[1], [0], [0], [1], [0, 0, 1, 1], [], []>} : vector<128x32xf32>, vector<32x64xf32>, vector<128x64xf32> -> vector<128x64xf32>
    %c0_40 = arith.constant 0 : index
    %c0_41 = arith.constant 0 : index
    %79 = vector.load %arg9[%c0_40, %c0_41] : memref<1x64xf32, #tpu.memory_space<vmem>>, vector<1x64xf32>
    %80 = vector.broadcast %79 : vector<1x64xf32> to vector<128x64xf32>
    %81 = arith.addf %78, %80 : vector<128x64xf32>
    %c0_42 = arith.constant 0 : index
    %c0_43 = arith.constant 0 : index
    %82 = vector.load %arg11[%c0_42, %c0_43] : memref<64x256xf32, #tpu.memory_space<vmem>>, vector<64x256xf32>
    %c0_44 = arith.constant 0 : index
    %c0_45 = arith.constant 0 : index
    %83 = vector.load %arg12[%c0_44, %c0_45] : memref<1x256xf32, #tpu.memory_space<vmem>>, vector<1x256xf32>
    %c0_46 = arith.constant 0 : index
    %c0_47 = arith.constant 0 : index
    %84 = vector.load %arg13[%c0_46, %c0_47] : memref<1x256xf32, #tpu.memory_space<vmem>>, vector<1x256xf32>
    %c0_48 = arith.constant 0 : index
    %c0_49 = arith.constant 0 : index
    %85 = vector.load %arg14[%c0_48, %c0_49] : memref<1x256xf32, #tpu.memory_space<vmem>>, vector<1x256xf32>
    %cst_50 = arith.constant dense<0.000000e+00> : vector<128x256xf32>
    %86 = tpu.matmul %81, %82, %cst_50 {dimension_numbers = #tpu.dot_dimension_numbers<[1], [0], [0], [1], [0, 0, 1, 1], [], []>} : vector<128x64xf32>, vector<64x256xf32>, vector<128x256xf32> -> vector<128x256xf32>
    %87 = vector.broadcast %83 : vector<1x256xf32> to vector<128x256xf32>
    %88 = arith.addf %86, %87 : vector<128x256xf32>
    %cst_51 = arith.constant dense<0.000000e+00> : vector<128x256xf32>
    %89 = tpu.matmul %88, %0, %cst_51 {dimension_numbers = #tpu.dot_dimension_numbers<[1], [0], [0], [1], [0, 0, 1, 1], [], []>} : vector<128x256xf32>, vector<256x256xf32>, vector<128x256xf32> -> vector<128x256xf32>
    %90 = arith.subf %88, %89 : vector<128x256xf32>
    %91 = arith.mulf %90, %90 : vector<128x256xf32>
    %cst_52 = arith.constant dense<0.000000e+00> : vector<128x256xf32>
    %92 = tpu.matmul %91, %0, %cst_52 {dimension_numbers = #tpu.dot_dimension_numbers<[1], [0], [0], [1], [0, 0, 1, 1], [], []>} : vector<128x256xf32>, vector<256x256xf32>, vector<128x256xf32> -> vector<128x256xf32>
    %cst_53 = arith.constant 9.99999974E-6 : f32
    %93 = vector.broadcast %cst_53 : f32 to vector<128x256xf32>
    %94 = arith.addf %92, %93 : vector<128x256xf32>
    %95 = math.rsqrt %94 : vector<128x256xf32>
    %96 = arith.mulf %90, %95 : vector<128x256xf32>
    %97 = vector.broadcast %84 : vector<1x256xf32> to vector<128x256xf32>
    %98 = arith.mulf %96, %97 : vector<128x256xf32>
    %99 = vector.broadcast %85 : vector<1x256xf32> to vector<128x256xf32>
    %100 = arith.addf %98, %99 : vector<128x256xf32>
    %cst_54 = arith.constant 5.000000e-01 : f32
    %101 = vector.broadcast %cst_54 : f32 to vector<128x256xf32>
    %102 = arith.mulf %101, %100 : vector<128x256xf32>
    %cst_55 = arith.constant 1.41421354 : f32
    %103 = vector.broadcast %cst_55 : f32 to vector<128x256xf32>
    %104 = arith.divf %100, %103 : vector<128x256xf32>
    %cst_56 = arith.constant 0.000000e+00 : f32
    %105 = vector.broadcast %cst_56 : f32 to vector<128x256xf32>
    %106 = arith.cmpf oge, %104, %105 : vector<128x256xf32>
    %cst_57 = arith.constant 1.000000e+00 : f32
    %cst_58 = arith.constant -1.000000e+00 : f32
    %107 = vector.broadcast %cst_57 : f32 to vector<128x256xf32>
    %108 = vector.broadcast %cst_58 : f32 to vector<128x256xf32>
    %109 = arith.select %106, %107, %108 : vector<128x256xi1>, vector<128x256xf32>
    %110 = math.absf %104 : vector<128x256xf32>
    %cst_59 = arith.constant 0.327591091 : f32
    %111 = vector.broadcast %cst_59 : f32 to vector<128x256xf32>
    %112 = arith.mulf %111, %110 : vector<128x256xf32>
    %cst_60 = arith.constant 1.000000e+00 : f32
    %113 = vector.broadcast %cst_60 : f32 to vector<128x256xf32>
    %114 = arith.addf %113, %112 : vector<128x256xf32>
    %cst_61 = arith.constant 1.000000e+00 : f32
    %115 = vector.broadcast %cst_61 : f32 to vector<128x256xf32>
    %116 = arith.divf %115, %114 : vector<128x256xf32>
    %cst_62 = arith.constant 1.06140542 : f32
    %117 = vector.broadcast %cst_62 : f32 to vector<128x256xf32>
    %118 = arith.mulf %117, %116 : vector<128x256xf32>
    %cst_63 = arith.constant -1.45315206 : f32
    %119 = vector.broadcast %cst_63 : f32 to vector<128x256xf32>
    %120 = arith.addf %118, %119 : vector<128x256xf32>
    %121 = arith.mulf %120, %116 : vector<128x256xf32>
    %cst_64 = arith.constant 1.42141378 : f32
    %122 = vector.broadcast %cst_64 : f32 to vector<128x256xf32>
    %123 = arith.addf %121, %122 : vector<128x256xf32>
    %124 = arith.mulf %123, %116 : vector<128x256xf32>
    %cst_65 = arith.constant -0.284496725 : f32
    %125 = vector.broadcast %cst_65 : f32 to vector<128x256xf32>
    %126 = arith.addf %124, %125 : vector<128x256xf32>
    %127 = arith.mulf %126, %116 : vector<128x256xf32>
    %cst_66 = arith.constant 0.254829586 : f32
    %128 = vector.broadcast %cst_66 : f32 to vector<128x256xf32>
    %129 = arith.addf %127, %128 : vector<128x256xf32>
    %130 = arith.mulf %129, %116 : vector<128x256xf32>
    %cst_67 = arith.constant 0.000000e+00 : f32
    %131 = vector.broadcast %cst_67 : f32 to vector<128x256xf32>
    %132 = arith.subf %131, %110 : vector<128x256xf32>
    %133 = arith.mulf %132, %110 : vector<128x256xf32>
    %134 = math.exp %133 : vector<128x256xf32>
    %135 = arith.mulf %130, %134 : vector<128x256xf32>
    %cst_68 = arith.constant 1.000000e+00 : f32
    %136 = vector.broadcast %cst_68 : f32 to vector<128x256xf32>
    %137 = arith.subf %136, %135 : vector<128x256xf32>
    %138 = arith.mulf %109, %137 : vector<128x256xf32>
    %cst_69 = arith.constant 1.000000e+00 : f32
    %139 = vector.broadcast %cst_69 : f32 to vector<128x256xf32>
    %140 = arith.addf %139, %138 : vector<128x256xf32>
    %141 = arith.mulf %102, %140 : vector<128x256xf32>
    %c0_70 = arith.constant 0 : index
    %c0_71 = arith.constant 0 : index
    %142 = vector.load %arg15[%c0_70, %c0_71] : memref<256x256xf32, #tpu.memory_space<vmem>>, vector<256x256xf32>
    %c0_72 = arith.constant 0 : index
    %c0_73 = arith.constant 0 : index
    %143 = vector.load %arg16[%c0_72, %c0_73] : memref<1x256xf32, #tpu.memory_space<vmem>>, vector<1x256xf32>
    %c0_74 = arith.constant 0 : index
    %c0_75 = arith.constant 0 : index
    %144 = vector.load %arg17[%c0_74, %c0_75] : memref<1x256xf32, #tpu.memory_space<vmem>>, vector<1x256xf32>
    %c0_76 = arith.constant 0 : index
    %c0_77 = arith.constant 0 : index
    %145 = vector.load %arg18[%c0_76, %c0_77] : memref<1x256xf32, #tpu.memory_space<vmem>>, vector<1x256xf32>
    %cst_78 = arith.constant dense<0.000000e+00> : vector<128x256xf32>
    %146 = tpu.matmul %141, %142, %cst_78 {dimension_numbers = #tpu.dot_dimension_numbers<[1], [0], [0], [1], [0, 0, 1, 1], [], []>} : vector<128x256xf32>, vector<256x256xf32>, vector<128x256xf32> -> vector<128x256xf32>
    %147 = vector.broadcast %143 : vector<1x256xf32> to vector<128x256xf32>
    %148 = arith.addf %146, %147 : vector<128x256xf32>
    %cst_79 = arith.constant dense<0.000000e+00> : vector<128x256xf32>
    %149 = tpu.matmul %148, %0, %cst_79 {dimension_numbers = #tpu.dot_dimension_numbers<[1], [0], [0], [1], [0, 0, 1, 1], [], []>} : vector<128x256xf32>, vector<256x256xf32>, vector<128x256xf32> -> vector<128x256xf32>
    %150 = arith.subf %148, %149 : vector<128x256xf32>
    %151 = arith.mulf %150, %150 : vector<128x256xf32>
    %cst_80 = arith.constant dense<0.000000e+00> : vector<128x256xf32>
    %152 = tpu.matmul %151, %0, %cst_80 {dimension_numbers = #tpu.dot_dimension_numbers<[1], [0], [0], [1], [0, 0, 1, 1], [], []>} : vector<128x256xf32>, vector<256x256xf32>, vector<128x256xf32> -> vector<128x256xf32>
    %cst_81 = arith.constant 9.99999974E-6 : f32
    %153 = vector.broadcast %cst_81 : f32 to vector<128x256xf32>
    %154 = arith.addf %152, %153 : vector<128x256xf32>
    %155 = math.rsqrt %154 : vector<128x256xf32>
    %156 = arith.mulf %150, %155 : vector<128x256xf32>
    %157 = vector.broadcast %144 : vector<1x256xf32> to vector<128x256xf32>
    %158 = arith.mulf %156, %157 : vector<128x256xf32>
    %159 = vector.broadcast %145 : vector<1x256xf32> to vector<128x256xf32>
    %160 = arith.addf %158, %159 : vector<128x256xf32>
    %cst_82 = arith.constant 5.000000e-01 : f32
    %161 = vector.broadcast %cst_82 : f32 to vector<128x256xf32>
    %162 = arith.mulf %161, %160 : vector<128x256xf32>
    %cst_83 = arith.constant 1.41421354 : f32
    %163 = vector.broadcast %cst_83 : f32 to vector<128x256xf32>
    %164 = arith.divf %160, %163 : vector<128x256xf32>
    %cst_84 = arith.constant 0.000000e+00 : f32
    %165 = vector.broadcast %cst_84 : f32 to vector<128x256xf32>
    %166 = arith.cmpf oge, %164, %165 : vector<128x256xf32>
    %cst_85 = arith.constant 1.000000e+00 : f32
    %cst_86 = arith.constant -1.000000e+00 : f32
    %167 = vector.broadcast %cst_85 : f32 to vector<128x256xf32>
    %168 = vector.broadcast %cst_86 : f32 to vector<128x256xf32>
    %169 = arith.select %166, %167, %168 : vector<128x256xi1>, vector<128x256xf32>
    %170 = math.absf %164 : vector<128x256xf32>
    %cst_87 = arith.constant 0.327591091 : f32
    %171 = vector.broadcast %cst_87 : f32 to vector<128x256xf32>
    %172 = arith.mulf %171, %170 : vector<128x256xf32>
    %cst_88 = arith.constant 1.000000e+00 : f32
    %173 = vector.broadcast %cst_88 : f32 to vector<128x256xf32>
    %174 = arith.addf %173, %172 : vector<128x256xf32>
    %cst_89 = arith.constant 1.000000e+00 : f32
    %175 = vector.broadcast %cst_89 : f32 to vector<128x256xf32>
    %176 = arith.divf %175, %174 : vector<128x256xf32>
    %cst_90 = arith.constant 1.06140542 : f32
    %177 = vector.broadcast %cst_90 : f32 to vector<128x256xf32>
    %178 = arith.mulf %177, %176 : vector<128x256xf32>
    %cst_91 = arith.constant -1.45315206 : f32
    %179 = vector.broadcast %cst_91 : f32 to vector<128x256xf32>
    %180 = arith.addf %178, %179 : vector<128x256xf32>
    %181 = arith.mulf %180, %176 : vector<128x256xf32>
    %cst_92 = arith.constant 1.42141378 : f32
    %182 = vector.broadcast %cst_92 : f32 to vector<128x256xf32>
    %183 = arith.addf %181, %182 : vector<128x256xf32>
    %184 = arith.mulf %183, %176 : vector<128x256xf32>
    %cst_93 = arith.constant -0.284496725 : f32
    %185 = vector.broadcast %cst_93 : f32 to vector<128x256xf32>
    %186 = arith.addf %184, %185 : vector<128x256xf32>
    %187 = arith.mulf %186, %176 : vector<128x256xf32>
    %cst_94 = arith.constant 0.254829586 : f32
    %188 = vector.broadcast %cst_94 : f32 to vector<128x256xf32>
    %189 = arith.addf %187, %188 : vector<128x256xf32>
    %190 = arith.mulf %189, %176 : vector<128x256xf32>
    %cst_95 = arith.constant 0.000000e+00 : f32
    %191 = vector.broadcast %cst_95 : f32 to vector<128x256xf32>
    %192 = arith.subf %191, %170 : vector<128x256xf32>
    %193 = arith.mulf %192, %170 : vector<128x256xf32>
    %194 = math.exp %193 : vector<128x256xf32>
    %195 = arith.mulf %190, %194 : vector<128x256xf32>
    %cst_96 = arith.constant 1.000000e+00 : f32
    %196 = vector.broadcast %cst_96 : f32 to vector<128x256xf32>
    %197 = arith.subf %196, %195 : vector<128x256xf32>
    %198 = arith.mulf %169, %197 : vector<128x256xf32>
    %cst_97 = arith.constant 1.000000e+00 : f32
    %199 = vector.broadcast %cst_97 : f32 to vector<128x256xf32>
    %200 = arith.addf %199, %198 : vector<128x256xf32>
    %201 = arith.mulf %162, %200 : vector<128x256xf32>
    %c0_98 = arith.constant 0 : index
    %c0_99 = arith.constant 0 : index
    %202 = vector.load %arg19[%c0_98, %c0_99] : memref<256x64xf32, #tpu.memory_space<vmem>>, vector<256x64xf32>
    %c0_100 = arith.constant 0 : index
    %c0_101 = arith.constant 0 : index
    %203 = vector.load %arg20[%c0_100, %c0_101] : memref<1x64xf32, #tpu.memory_space<vmem>>, vector<1x64xf32>
    %cst_102 = arith.constant dense<0.000000e+00> : vector<128x64xf32>
    %204 = tpu.matmul %201, %202, %cst_102 {dimension_numbers = #tpu.dot_dimension_numbers<[1], [0], [0], [1], [0, 0, 1, 1], [], []>} : vector<128x256xf32>, vector<256x64xf32>, vector<128x64xf32> -> vector<128x64xf32>
    %205 = vector.broadcast %203 : vector<1x64xf32> to vector<128x64xf32>
    %206 = arith.addf %204, %205 : vector<128x64xf32>
    %c0_103 = arith.constant 0 : index
    %c0_104 = arith.constant 0 : index
    %207 = vector.load %arg21[%c0_103, %c0_104] : memref<128x128xf32, #tpu.memory_space<vmem>>, vector<128x64xf32>
    tpu.vector_store %arg21[%c0_103, %c0_104], %206 {strides = array<i32>} : memref<128x128xf32, #tpu.memory_space<vmem>>, vector<128x64xf32>,
    %c0_105 = arith.constant 0 : index
    %c64 = arith.constant 64 : index
    %208 = vector.load %arg21[%c0_105, %c64] : memref<128x128xf32, #tpu.memory_space<vmem>>, vector<128x64xf32>
    tpu.vector_store %arg21[%c0_105, %c64], %81 {strides = array<i32>} : memref<128x128xf32, #tpu.memory_space<vmem>>, vector<128x64xf32>,
    return
  }
  func.func @transform_0(%arg0: i32) -> (i32, i32) {
    %c0_i32 = arith.constant 0 : i32
    %c0_i32_0 = arith.constant 0 : i32
    return %arg0, %c0_i32 : i32, i32
  }
  func.func @transform_1(%arg0: i32) -> (i32, i32) {
    %c0_i32 = arith.constant 0 : i32
    %c0_i32_0 = arith.constant 0 : i32
    %c0_i32_1 = arith.constant 0 : i32
    return %c0_i32, %c0_i32_0 : i32, i32
  }
  func.func @transform_2(%arg0: i32) -> (i32, i32) {
    %c0_i32 = arith.constant 0 : i32
    %c0_i32_0 = arith.constant 0 : i32
    %c0_i32_1 = arith.constant 0 : i32
    return %c0_i32, %c0_i32_0 : i32, i32
  }
  func.func @transform_3(%arg0: i32) -> (i32, i32) {
    %c0_i32 = arith.constant 0 : i32
    %c0_i32_0 = arith.constant 0 : i32
    %c0_i32_1 = arith.constant 0 : i32
    return %c0_i32, %c0_i32_0 : i32, i32
  }
  func.func @transform_4(%arg0: i32) -> (i32, i32) {
    %c0_i32 = arith.constant 0 : i32
    %c0_i32_0 = arith.constant 0 : i32
    %c0_i32_1 = arith.constant 0 : i32
    return %c0_i32, %c0_i32_0 : i32, i32
  }
  func.func @transform_5(%arg0: i32) -> (i32, i32) {
    %c0_i32 = arith.constant 0 : i32
    %c0_i32_0 = arith.constant 0 : i32
    %c0_i32_1 = arith.constant 0 : i32
    return %c0_i32, %c0_i32_0 : i32, i32
  }
  func.func @transform_6(%arg0: i32) -> (i32, i32) {
    %c0_i32 = arith.constant 0 : i32
    %c0_i32_0 = arith.constant 0 : i32
    %c0_i32_1 = arith.constant 0 : i32
    return %c0_i32, %c0_i32_0 : i32, i32
  }
  func.func @transform_7(%arg0: i32) -> (i32, i32) {
    %c0_i32 = arith.constant 0 : i32
    %c0_i32_0 = arith.constant 0 : i32
    %c0_i32_1 = arith.constant 0 : i32
    return %c0_i32, %c0_i32_0 : i32, i32
  }
  func.func @transform_8(%arg0: i32) -> (i32, i32) {
    %c0_i32 = arith.constant 0 : i32
    %c0_i32_0 = arith.constant 0 : i32
    %c0_i32_1 = arith.constant 0 : i32
    return %c0_i32, %c0_i32_0 : i32, i32
  }
  func.func @transform_9(%arg0: i32) -> (i32, i32) {
    %c0_i32 = arith.constant 0 : i32
    %c0_i32_0 = arith.constant 0 : i32
    %c0_i32_1 = arith.constant 0 : i32
    return %c0_i32, %c0_i32_0 : i32, i32
  }
  func.func @transform_10(%arg0: i32) -> (i32, i32) {
    %c0_i32 = arith.constant 0 : i32
    %c0_i32_0 = arith.constant 0 : i32
    %c0_i32_1 = arith.constant 0 : i32
    return %c0_i32, %c0_i32_0 : i32, i32
  }
  func.func @transform_11(%arg0: i32) -> (i32, i32) {
    %c0_i32 = arith.constant 0 : i32
    %c0_i32_0 = arith.constant 0 : i32
    %c0_i32_1 = arith.constant 0 : i32
    return %c0_i32, %c0_i32_0 : i32, i32
  }
  func.func @transform_12(%arg0: i32) -> (i32, i32) {
    %c0_i32 = arith.constant 0 : i32
    %c0_i32_0 = arith.constant 0 : i32
    %c0_i32_1 = arith.constant 0 : i32
    return %c0_i32, %c0_i32_0 : i32, i32
  }
  func.func @transform_13(%arg0: i32) -> (i32, i32) {
    %c0_i32 = arith.constant 0 : i32
    %c0_i32_0 = arith.constant 0 : i32
    %c0_i32_1 = arith.constant 0 : i32
    return %c0_i32, %c0_i32_0 : i32, i32
  }
  func.func @transform_14(%arg0: i32) -> (i32, i32) {
    %c0_i32 = arith.constant 0 : i32
    %c0_i32_0 = arith.constant 0 : i32
    %c0_i32_1 = arith.constant 0 : i32
    return %c0_i32, %c0_i32_0 : i32, i32
  }
  func.func @transform_15(%arg0: i32) -> (i32, i32) {
    %c0_i32 = arith.constant 0 : i32
    %c0_i32_0 = arith.constant 0 : i32
    %c0_i32_1 = arith.constant 0 : i32
    return %c0_i32, %c0_i32_0 : i32, i32
  }
  func.func @transform_16(%arg0: i32) -> (i32, i32) {
    %c0_i32 = arith.constant 0 : i32
    %c0_i32_0 = arith.constant 0 : i32
    %c0_i32_1 = arith.constant 0 : i32
    return %c0_i32, %c0_i32_0 : i32, i32
  }
  func.func @transform_17(%arg0: i32) -> (i32, i32) {
    %c0_i32 = arith.constant 0 : i32
    %c0_i32_0 = arith.constant 0 : i32
    %c0_i32_1 = arith.constant 0 : i32
    return %c0_i32, %c0_i32_0 : i32, i32
  }
  func.func @transform_18(%arg0: i32) -> (i32, i32) {
    %c0_i32 = arith.constant 0 : i32
    %c0_i32_0 = arith.constant 0 : i32
    %c0_i32_1 = arith.constant 0 : i32
    return %c0_i32, %c0_i32_0 : i32, i32
  }
  func.func @transform_19(%arg0: i32) -> (i32, i32) {
    %c0_i32 = arith.constant 0 : i32
    %c0_i32_0 = arith.constant 0 : i32
    %c0_i32_1 = arith.constant 0 : i32
    return %c0_i32, %c0_i32_0 : i32, i32
  }
  func.func @transform_20(%arg0: i32) -> (i32, i32) {
    %c0_i32 = arith.constant 0 : i32
    %c0_i32_0 = arith.constant 0 : i32
    return %arg0, %c0_i32 : i32, i32
  }
}

</mosaic_0001>

<bundles_post_ra>
// kernel: tpu_custom_call.1
= control target key start
LH: loop header
LB: loop body
LE: loop exit
PB: predicated region body
PF: predicated region fallthrough
CT: control target
= control target key end

     0   :  { %s12106_s0 = inlined_call_operand.vmem [shape: f32[512,64], index: 0, kind: input, shape index: {}]   ;;  %s12107_s1 = inlined_call_operand.hbm [shape: f32[64,64], index: 1, kind: input, shape index: {}]   ;;  %s12108_s2 = inlined_call_operand.hbm [shape: f32[1,64], index: 2, kind: input, shape index: {}]   ;;  %s12109_s3 = inlined_call_operand.vmem [shape: f32[64,32], index: 3, kind: input, shape index: {}]   ;;  %s12110_s4 = inlined_call_operand.hbm [shape: f32[1,32], index: 4, kind: input, shape index: {}]   ;;  %s12111_s5 = inlined_call_operand.hbm [shape: f32[1,32], index: 5, kind: input, shape index: {}]   ;;  %s12112_s6 = inlined_call_operand.hbm [shape: f32[1,32], index: 6, kind: input, shape index: {}]   ;;  %s12113_s7 = inlined_call_operand.hbm [shape: f32[32,64], index: 7, kind: input, shape index: {}]   ;;  %s12114_s8 = inlined_call_operand.hbm [shape: f32[1,64], index: 8, kind: input, shape index: {}]   ;;  %s12115_s9 = inlined_call_operand.vmem [shape: f32[256,256], index: 9, kind: input, shape index: {}]   ;;  %s12116_s10 = inlined_call_operand.vmem [shape: f32[64,256], index: 10, kind: input, shape index: {}]   ;;  %s12117_s11 = inlined_call_operand.hbm [shape: f32[1,256], index: 11, kind: input, shape index: {}]   ;;  %s12118_s12 = inlined_call_operand.hbm [shape: f32[1,256], index: 12, kind: input, shape index: {}]   ;;  %s12119_s13 = inlined_call_operand.hbm [shape: f32[1,256], index: 13, kind: input, shape index: {}]   ;;  %s12120_s14 = inlined_call_operand.vmem [shape: f32[256,256], index: 14, kind: input, shape index: {}]   ;;  %s12121_s15 = inlined_call_operand.hbm [shape: f32[1,256], index: 15, kind: input, shape index: {}]   ;;  %s12122_s16 = inlined_call_operand.hbm [shape: f32[1,256], index: 16, kind: input, shape index: {}]   ;;  %s12123_s17 = inlined_call_operand.hbm [shape: f32[1,256], index: 17, kind: input, shape index: {}]   ;;  %s12124_s18 = inlined_call_operand.vmem [shape: f32[256,64], index: 18, kind: input, shape index: {}]   ;;  %s12125_s19 = inlined_call_operand.hbm [shape: f32[1,64], index: 19, kind: input, shape index: {}]   ;;  %s12126_s20 = inlined_call_operand.hbm [shape: f32[512,128], index: 20, kind: output, shape index: {}]  }
   0x1   :  { %12223 = sst [smem:[#allocation89_spill]] %s12106_s0 }
   0x2   :  { %12224 = sst [smem:[#allocation90_spill]] %s12107_s1 }
   0x3   :  { %12225 = sst [smem:[#allocation91_spill]] %s12108_s2 }
   0x4   :  { %12226 = sst [smem:[#allocation92_spill]] %s12109_s3 }
   0x5   :  { %12227 = sst [smem:[#allocation93_spill]] %s12110_s4 }
   0x6   :  { %12228 = sst [smem:[#allocation94_spill]] %s12111_s5 }
   0x7   :  { %12229 = sst [smem:[#allocation95_spill]] %s12113_s7 }
   0x8   :  { %12230 = sst [smem:[#allocation96_spill]] %s12126_s20 }
   0x9   :  { %25 = vsyncpa [#allocation3], 0 }
   0xa   :  { %26 = vsyncpa [#allocation6], 0 }
   0xb   :  { %27 = vsyncpa [#allocation9], 0 }
   0xc   :  { %28 = vsyncpa [#allocation12], 0 }
   0xd   :  { %29 = vsyncpa [#allocation15], 0 }
   0xe   :  { %30 = vsyncpa [#allocation18], 0 }
   0xf   :  { %31 = vsyncpa [#allocation21], 0 }
  0x10   :  { %32 = vsyncpa [#allocation24], 0 }
  0x11   :  { %33 = vsyncpa [#allocation4], 0 }
  0x12   :  { %35 = vsyncpa [#allocation4 + $0x1], 0  ;;  %s7643_s1 = smov 0   ;;  %s7645_s22 = smov 0  }
  0x13   :  { %s7647_s23 = smov 0   ;;  %s7649_s24 = smov 0  }
  0x14 LB: > { %12231 = sst [smem:[#allocation35_spill]] %s7502_s1  ;;  %s7664_s2 = sadd.s32 4294967295, %s7514_s24   ;;  %s7514_s24 = sphi %s7649_s24, %s12472_s24   ;;  %s7510_s23 = sphi %s7647_s23, %s12474_s23   ;;  %s7506_s22 = sphi %s7645_s22, %s12476_s22   ;;  %s7502_s1 = sphi %s7643_s1, %s12475_s1  }
  0x15   : > { %12232 = sst [smem:[#allocation36_spill]] %s7510_s23  ;;  %s5956_s25 = sadd.s32 4294967294, %s7514_s24  }
  0x16   : > { %12233 = sst [smem:[#allocation37_spill]] %s7514_s24  ;;  %s7668_s3 = sadd.s32 1, %s7514_s24  }
  0x17   : > { %12234 = sst [smem:[#allocation38_spill]] %s7668_s3  ;;  %s473_s26 = sadd.s32 1, %s7510_s23 }
  0x18   : > { %s470_s27 = ssub.s32 %s7514_s24, %s7668_s3  ;;  %p483_p0 = scmp.ne.s32.totalorder %s7510_s23, %s7506_s22 }
  0x19   : > { %p471_p1 = scmp.eq.s32.totalorder %s470_s27, 0  ;;  %p484_p2 = scmp.eq.s32.totalorder %s7664_s2, 3 }
  0x1a   : > { %p489_p3 = scmp.ne.s32.totalorder %s7506_s22, %s7502_s1  ;;  %p490_p4 = scmp.eq.s32.totalorder %s5956_s25, 3 }
  0x1b   : > { %s7679_s28 = scalar_select %p471_p1, %s7510_s23, %s473_s26  }
  0x1c   : > { %p7681_p5 = por %p484_p2, %p483_p0  ;;  %p7685_p6 = por %p490_p4, %p489_p3 }
  0x1d   : > { %12235 = sst [smem:[#allocation39_spill]] %s7679_s28  ;;  %p5957_p7 = scmp.ge.s32.totalorder %s7514_s24, 1 }
  0x1e   : > { %s12236_s4 = scalar_select %p7681_p5, 1, 0 }
  0x1f   : > { %s12237_s29 = scalar_select %p7685_p6, 1, 0 }
  0x20   : > { %p497_p8 = scmp.lt.s32.totalorder %s7514_s24, 5  ;;  %p12134_p9 = scmp.eq.s32.totalorder %s7664_s2, 0 }
  0x21   : > { %12238 = sst [smem:[#allocation40_spill]] %s12237_s29  ;;  %s7516_s0 = smov [#allocation5]  }
  0x22   : > { %p7692_p10 = pnand %p5957_p7, %p497_p8  ;;  %s523_s21 = sshll.u32 %s7516_s0, 4  ;;  %s524_s21 = int_to_ptr.vmem [resolvable:$true] %s523_s21 }
  0x23   : > { %s7517_s25 = smov [#allocation8]   ;;  %s7518_s28 = smov [#allocation11]  }
  0x24   : > { %s12239_s30 = scalar_select %p7692_p10, 1, 0 }
  0x25   : > { %p6385_p11 = pneg %p7692_p10  ;;  %s548_s26 = sshll.u32 %s7517_s25, 4  ;;  %s549_s26 = int_to_ptr.vmem [resolvable:$true] %s548_s26 }
  0x26   : > { %s569_s23 = sshll.u32 %s7518_s28, 4  ;;  %s7069_s0 = scalar_lea.vmem %s524_s21, 16  ;;  %s570_s23 = int_to_ptr.vmem [resolvable:$true] %s569_s23 }
  0x27   : > { %p7700_p12 = pnand %p12134_p9, %p6385_p11  ;;  %p7070_p0 = scmp.ne.s32.totalorder %s524_s21, %s7069_s0 }
  0x28   : > { %s7076_s25 = scalar_lea.vmem %s524_s21, 32  ;;  %p7077_p3 = scmp.lt.s32.totalorder %s524_s21, %s524_s21 }
  0x29   : > { %p7706_p13 = pneg %p7700_p12  ;;  %p7078_p4 = scmp.lt.s32.totalorder %s7076_s25, %s7069_s0 }
  0x2b   : > { %p7072_p1 = pnand %p7070_p0, %p7706_p13  ;;  %p7079_p7 = por %p7078_p4, %p7077_p3 }
  0x2d   : > { %p7073_p2 = pneg %p7072_p1 }
  0x2f   : > { %p7080_p8 = pnand %p7079_p7, %p7073_p2 }
  0x31   : > { %7083 = shalt.err (!%p7080_p8)
}
  0x32   : > { %s12242_s1 = sld [smem:[#allocation91_spill]]  ;;  %s7095_s24 = scalar_lea.vmem %s549_s26, 16 }
  0x33   : > { %p7096_p11 = scmp.ne.s32.totalorder %s549_s26, %s7095_s24  ;;  %s7102_s20 = scalar_lea.vmem %s549_s26, 32 }
  0x34   : > { %p7103_p0 = scmp.lt.s32.totalorder %s549_s26, %s549_s26  ;;  %p7104_p1 = scmp.lt.s32.totalorder %s7102_s20, %s7095_s24 }
  0x35   : > { %p7098_p9 = pnand %p7096_p11, %p7706_p13 }
  0x36   : > { %p7105_p5 = por %p7104_p1, %p7103_p0 }
  0x37   : > { %p7099_p6 = pneg %p7098_p9 }
  0x38   : > { %6391 = dma.hbm_to_vmem [thread:$0]  (!%p7700_p12), %s12242_s1, 16, %s524_s21, [#allocation6]  }
  0x39   : > { %p7106_p10 = pnand %p7105_p5, %p7099_p6 }
  0x3b   : > { %7109 = shalt.err (!%p7106_p10)
}
  0x3c   : > { %s12243_s5 = sld [smem:[#allocation94_spill]]  ;;  %s7121_s1 = scalar_lea.vmem %s570_s23, 512 }
  0x3d   : > { %p7122_p2 = scmp.ne.s32.totalorder %s570_s23, %s7121_s1  ;;  %p7129_p9 = scmp.lt.s32.totalorder %s570_s23, %s570_s23 }
  0x3e   : > { %p7130_p7 = scmp.lt.s32.totalorder %s7121_s1, %s7121_s1 }
  0x3f   : > { %p7124_p3 = pnand %p7122_p2, %p7706_p13 }
  0x40   : > { %p7131_p8 = por %p7130_p7, %p7129_p9 }
  0x41   : > { %p7125_p4 = pneg %p7124_p3 }
  0x42   : > { %6397 = dma.hbm_to_vmem [thread:$0]  (!%p7700_p12), %s12243_s5, 16, %s549_s26, [#allocation9]  }
  0x43   : > { %p7132_p11 = pnand %p7131_p8, %p7125_p4 }
  0x45   : > { %7135 = shalt.err (!%p7132_p11)
}
  0x46   : > { %s7519_s20 = smov 128   ;;  %s7520_s24 = smov 8  }
  0x47   : > { %s12244_s7 = sld [smem:[#allocation95_spill]]  ;;  %s7521_s26 = smov [#allocation14]  }
  0x48   : > { %s600_s28 = sshll.u32 %s7521_s26, 4  ;;  %s7522_s0 = smov [#allocation17]   ;;  %s601_s28 = int_to_ptr.vmem [resolvable:$true] %s600_s28 }
  0x49   : > { %s622_s25 = sshll.u32 %s7522_s0, 4  ;;  %s7147_s1 = scalar_lea.vmem %s601_s28, 32  ;;  %s623_s25 = int_to_ptr.vmem [resolvable:$true] %s622_s25 }
  0x4a   : > { %p7148_p5 = scmp.ne.s32.totalorder %s601_s28, %s7147_s1  ;;  %p7155_p0 = scmp.lt.s32.totalorder %s601_s28, %s601_s28 }
  0x4b   : > { %p7156_p1 = scmp.lt.s32.totalorder %s7147_s1, %s7147_s1 }
  0x4c   : > { %p7150_p6 = pnand %p7148_p5, %p7706_p13 }
  0x4d   : > { %6403 = dma.hbm_to_vmem [thread:$0]  (!%p7700_p12), %s12244_s7, 512, %s570_s23, [#allocation12], %s7519_s20, %s7519_s20, %s7520_s24  }
  0x4e   : > { %p7151_p10 = pneg %p7150_p6  ;;  %p7157_p2 = por %p7156_p1, %p7155_p0 }
  0x50   : > { %p7158_p3 = pnand %p7157_p2, %p7151_p10 }
  0x52   : > { %7161 = shalt.err (!%p7158_p3)
}
  0x53   : > { %6409 = dma.hbm_to_vmem [thread:$0]  (!%p7700_p12), %s12117_s11, 32, %s601_s28, [#allocation15]  }
  0x54   : > { %s7173_s23 = scalar_lea.vmem %s623_s25, 32  ;;  %p7181_p8 = scmp.lt.s32.totalorder %s623_s25, %s623_s25 }
  0x55   : > { %p7174_p4 = scmp.ne.s32.totalorder %s623_s25, %s7173_s23  ;;  %p7182_p11 = scmp.lt.s32.totalorder %s7173_s23, %s7173_s23 }
  0x57   : > { %p7176_p9 = pnand %p7174_p4, %p7706_p13  ;;  %p7183_p5 = por %p7182_p11, %p7181_p8 }
  0x59   : > { %p7177_p7 = pneg %p7176_p9 }
  0x5b   : > { %p7184_p6 = pnand %p7183_p5, %p7177_p7 }
  0x5d   : > { %7187 = shalt.err (!%p7184_p6)
}
  0x5e   : > { %6415 = dma.hbm_to_vmem [thread:$0]  (!%p7700_p12), %s12119_s13, 32, %s623_s25, [#allocation18]  }
  0x5f   : > { %s7523_s5 = smov [#allocation20]   ;;  %s7524_s0 = smov [#allocation2]  }
  0x60   : > { %s647_s28 = sshll.u32 %s7523_s5, 4  ;;  %s509_s1 = sshll.u32 %s7524_s0, 4  ;;  %s648_s28 = int_to_ptr.vmem [resolvable:$true] %s647_s28  ;;  %s510_s1 = int_to_ptr.vmem [resolvable:$true] %s509_s1 }
  0x61   : > { %s7199_s29 = scalar_lea.vmem %s648_s28, 32  ;;  %p7207_p2 = scmp.lt.s32.totalorder %s648_s28, %s648_s28 }
  0x62   : > { %p7200_p10 = scmp.ne.s32.totalorder %s648_s28, %s7199_s29  ;;  %p7208_p3 = scmp.lt.s32.totalorder %s7199_s29, %s7199_s29 }
  0x64   : > { %p7202_p0 = pnand %p7200_p10, %p7706_p13  ;;  %p7209_p4 = por %p7208_p3, %p7207_p2 }
  0x66   : > { %p7203_p1 = pneg %p7202_p0 }
  0x68   : > { %p7210_p9 = pnand %p7209_p4, %p7203_p1 }
  0x6a   : > { %7213 = shalt.err (!%p7210_p9)
}
  0x6b   : > { %6421 = dma.hbm_to_vmem [thread:$0]  (!%p7700_p12), %s12122_s16, 32, %s648_s28, [#allocation21]  }
  0x6c   : > { %s7225_s25 = scalar_lea.vmem %s510_s1, 1024  ;;  %p7233_p5 = scmp.lt.s32.totalorder %s510_s1, %s510_s1 }
  0x6d   : > { %p7226_p7 = scmp.ne.s32.totalorder %s510_s1, %s7225_s25  ;;  %p7234_p6 = scmp.lt.s32.totalorder %s7225_s25, %s7225_s25 }
  0x6f   : > { %p7228_p8 = pnand %p7226_p7, %p7706_p13  ;;  %p7235_p10 = por %p7234_p6, %p7233_p5 }
  0x71   : > { %p7229_p11 = pneg %p7228_p8 }
  0x73   : > { %p7236_p0 = pnand %p7235_p10, %p7229_p11 }
  0x75   : > { %7239 = shalt.err (!%p7236_p0)
}
  0x76   : > { %s12245_s0 = sld [smem:[#allocation90_spill]]  ;;  %s7525_s28 = smov [#allocation7]  }
  0x77   : > { %s537_s29 = sshll.u32 %s7525_s28, 4  ;;  %s7526_s23 = smov [#allocation10]   ;;  %s538_s29 = int_to_ptr.vmem [resolvable:$true] %s537_s29 }
  0x78   : > { %s559_s21 = sshll.u32 %s7526_s23, 4  ;;  %s7251_s7 = scalar_lea.vmem %s538_s29, 16  ;;  %s560_s21 = int_to_ptr.vmem [resolvable:$true] %s559_s21 }
  0x79   : > { %p7252_p1 = scmp.ne.s32.totalorder %s538_s29, %s7251_s7  ;;  %s7258_s25 = scalar_lea.vmem %s538_s29, 32 }
  0x7a   : > { %p7259_p4 = scmp.lt.s32.totalorder %s538_s29, %s538_s29  ;;  %p7260_p9 = scmp.lt.s32.totalorder %s7258_s25, %s7251_s7 }
  0x7b   : > { %p7254_p2 = pnand %p7252_p1, %p7706_p13 }
  0x7c   : > { %6388 = dma.hbm_to_vmem [thread:$0]  (!%p7700_p12), %s12245_s0, 1024, %s510_s1, [#allocation3], %s7519_s20, %s7519_s20, %s7520_s24  }
  0x7d   : > { %p7255_p3 = pneg %p7254_p2  ;;  %p7261_p7 = por %p7260_p9, %p7259_p4 }
  0x7f   : > { %p7262_p8 = pnand %p7261_p7, %p7255_p3 }
  0x81   : > { %7265 = shalt.err (!%p7262_p8)
}
  0x82   : > { %s12246_s24 = sld [smem:[#allocation93_spill]]  ;;  %s7277_s1 = scalar_lea.vmem %s560_s21, 16 }
  0x83   : > { %p7278_p11 = scmp.ne.s32.totalorder %s560_s21, %s7277_s1  ;;  %s7284_s5 = scalar_lea.vmem %s560_s21, 32 }
  0x84   : > { %p7285_p10 = scmp.lt.s32.totalorder %s560_s21, %s560_s21  ;;  %p7286_p0 = scmp.lt.s32.totalorder %s7284_s5, %s7277_s1 }
  0x85   : > { %p7280_p5 = pnand %p7278_p11, %p7706_p13 }
  0x86   : > { %p7287_p1 = por %p7286_p0, %p7285_p10 }
  0x87   : > { %p7281_p6 = pneg %p7280_p5 }
  0x88   : > { %6394 = dma.hbm_to_vmem [thread:$0]  (!%p7700_p12), %s12246_s24, 16, %s538_s29, [#allocation6]  }
  0x89   : > { %p7288_p2 = pnand %p7287_p1, %p7281_p6 }
  0x8b   : > { %7291 = shalt.err (!%p7288_p2)
}
  0x8c   : > { %6400 = dma.hbm_to_vmem [thread:$0]  (!%p7700_p12), %s12112_s6, 16, %s560_s21, [#allocation9]  }
  0x8d   : > { %s7527_s28 = smov [#allocation13]   ;;  %s7528_s23 = smov [#allocation16]  }
  0x8e   : > { %s583_s29 = sshll.u32 %s7527_s28, 4  ;;  %s611_s25 = sshll.u32 %s7528_s23, 4  ;;  %s584_s29 = int_to_ptr.vmem [resolvable:$true] %s583_s29  ;;  %s612_s25 = int_to_ptr.vmem [resolvable:$true] %s611_s25 }
  0x8f   : > { %s7303_s26 = scalar_lea.vmem %s584_s29, 16  ;;  %s7310_s20 = scalar_lea.vmem %s584_s29, 32 }
  0x90   : > { %p7304_p3 = scmp.ne.s32.totalorder %s584_s29, %s7303_s26  ;;  %p7311_p7 = scmp.lt.s32.totalorder %s584_s29, %s584_s29 }
  0x91   : > { %p7312_p8 = scmp.lt.s32.totalorder %s7310_s20, %s7303_s26 }
  0x92   : > { %p7306_p4 = pnand %p7304_p3, %p7706_p13 }
  0x93   : > { %p7313_p11 = por %p7312_p8, %p7311_p7 }
  0x94   : > { %p7307_p9 = pneg %p7306_p4 }
  0x96   : > { %p7314_p5 = pnand %p7313_p11, %p7307_p9 }
  0x98   : > { %7317 = shalt.err (!%p7314_p5)
}
  0x99   : > { %6406 = dma.hbm_to_vmem [thread:$0]  (!%p7700_p12), %s12114_s8, 16, %s584_s29, [#allocation12]  }
  0x9a   : > { %s7329_s1 = scalar_lea.vmem %s612_s25, 32  ;;  %p7337_p1 = scmp.lt.s32.totalorder %s612_s25, %s612_s25 }
  0x9b   : > { %p7330_p6 = scmp.ne.s32.totalorder %s612_s25, %s7329_s1  ;;  %p7338_p2 = scmp.lt.s32.totalorder %s7329_s1, %s7329_s1 }
  0x9d   : > { %p7332_p10 = pnand %p7330_p6, %p7706_p13  ;;  %p7339_p3 = por %p7338_p2, %p7337_p1 }
  0x9f   : > { %p7333_p0 = pneg %p7332_p10 }
  0xa1   : > { %p7340_p4 = pnand %p7339_p3, %p7333_p0 }
  0xa3   : > { %7343 = shalt.err (!%p7340_p4)
}
  0xa4   : > { %6412 = dma.hbm_to_vmem [thread:$0]  (!%p7700_p12), %s12118_s12, 32, %s612_s25, [#allocation15]  }
  0xa5   : > { %s7529_s0 = smov [#allocation19]   ;;  %s7530_s29 = smov [#allocation22]  }
  0xa6   : > { %s636_s28 = sshll.u32 %s7529_s0, 4  ;;  %s658_s23 = sshll.u32 %s7530_s29, 4  ;;  %s637_s28 = int_to_ptr.vmem [resolvable:$true] %s636_s28  ;;  %s659_s23 = int_to_ptr.vmem [resolvable:$true] %s658_s23 }
  0xa7   : > { %s7355_s26 = scalar_lea.vmem %s637_s28, 32  ;;  %p7363_p11 = scmp.lt.s32.totalorder %s637_s28, %s637_s28 }
  0xa8   : > { %p7356_p9 = scmp.ne.s32.totalorder %s637_s28, %s7355_s26  ;;  %p7364_p5 = scmp.lt.s32.totalorder %s7355_s26, %s7355_s26 }
  0xaa   : > { %p7358_p7 = pnand %p7356_p9, %p7706_p13  ;;  %p7365_p6 = por %p7364_p5, %p7363_p11 }
  0xac   : > { %p7359_p8 = pneg %p7358_p7 }
  0xae   : > { %p7366_p10 = pnand %p7365_p6, %p7359_p8 }
  0xb0   : > { %7369 = shalt.err (!%p7366_p10)
}
  0xb1   : > { %6418 = dma.hbm_to_vmem [thread:$0]  (!%p7700_p12), %s12121_s15, 32, %s637_s28, [#allocation18]  }
  0xb2   : > { %s7381_s25 = scalar_lea.vmem %s659_s23, 32  ;;  %p7389_p3 = scmp.lt.s32.totalorder %s659_s23, %s659_s23 }
  0xb3   : > { %p7382_p0 = scmp.ne.s32.totalorder %s659_s23, %s7381_s25  ;;  %p7390_p4 = scmp.lt.s32.totalorder %s7381_s25, %s7381_s25 }
  0xb5   : > { %p7384_p1 = pnand %p7382_p0, %p7706_p13  ;;  %p7391_p9 = por %p7390_p4, %p7389_p3 }
  0xb7   : > { %p7385_p2 = pneg %p7384_p1 }
  0xb9   : > { %p7392_p7 = pnand %p7391_p9, %p7385_p2 }
  0xbb   : > { %7395 = shalt.err (!%p7392_p7)
}
  0xbc   : > { %6424 = dma.hbm_to_vmem [thread:$0]  (!%p7700_p12), %s12123_s17, 32, %s659_s23, [#allocation21]  }
  0xbd   : > { %s7531_s5 = smov [#allocation23]  }
  0xbe   : > { %s672_s7 = sshll.u32 %s7531_s5, 4  ;;  %s673_s7 = int_to_ptr.vmem [resolvable:$true] %s672_s7 }
  0xbf   : > { %s7407_s0 = scalar_lea.vmem %s673_s7, 16  ;;  %s7414_s28 = scalar_lea.vmem %s673_s7, 32 }
  0xc0   : > { %p7408_p8 = scmp.ne.s32.totalorder %s673_s7, %s7407_s0  ;;  %p7415_p6 = scmp.lt.s32.totalorder %s673_s7, %s673_s7 }
  0xc1   : > { %p7416_p10 = scmp.lt.s32.totalorder %s7414_s28, %s7407_s0 }
  0xc2   : > { %p7410_p11 = pnand %p7408_p8, %p7706_p13 }
  0xc3   : > { %p7417_p0 = por %p7416_p10, %p7415_p6 }
  0xc4   : > { %p7411_p5 = pneg %p7410_p11 }
  0xc6   : > { %p7418_p1 = pnand %p7417_p0, %p7411_p5 }
  0xc8   : > { %7421 = shalt.err (!%p7418_p1)
}
  0xc9   : > { %6427 = dma.hbm_to_vmem [thread:$0]  (!%p7700_p12), %s12125_s19, 16, %s673_s7, [#allocation24]  }
  0xca   : > { %p12247_p2 = scmp.ne.s32.totalorder %s12239_s30, 0 }
  0xcc   : > { %694 = sbr.rel (%p12247_p2) target bundleno = 3004 (0xbbc), region = 100 }
  0xd1   : > { %p12248_p3 = scmp.eq.s32.totalorder %s7664_s2, 0 }
  0xd3   : > { %7465 = dma.done.wait (%p12248_p3), [#allocation3], 1024   ;;  %p12249_p13 = pmov %p12248_p3 }
  0xd4   : > { %p12250_p4 = pmov %p12248_p3 }
  0xd5   : > { %7467 = vsyncadd (%p12249_p13), [#allocation3], 4294966272 }
  0xd6   : > { %7469 = dma.done.wait (%p12250_p4), [#allocation6], 32   ;;  %p12251_p9 = pmov %p12248_p3 }
  0xd7   : > { %p12252_p7 = pmov %p12248_p3 }
  0xd8   : > { %7471 = vsyncadd (%p12251_p9), [#allocation6], 4294967264 }
  0xd9   : > { %7473 = dma.done.wait (%p12252_p7), [#allocation9], 32   ;;  %p12253_p12 = pmov %p12248_p3 }
  0xda   : > { %p12254_p8 = pmov %p12248_p3 }
  0xdb   : > { %7475 = vsyncadd (%p12253_p12), [#allocation9], 4294967264 }
  0xdc   : > { %7477 = dma.done.wait (%p12254_p8), [#allocation12], 528   ;;  %p12255_p11 = pmov %p12248_p3 }
  0xdd   : > { %p12256_p5 = pmov %p12248_p3 }
  0xde   : > { %7479 = vsyncadd (%p12255_p11), [#allocation12], 4294966768 }
  0xdf   : > { %7481 = dma.done.wait (%p12256_p5), [#allocation15], 64   ;;  %p12257_p6 = pmov %p12248_p3 }
  0xe0   : > { %p12258_p10 = pmov %p12248_p3 }
  0xe1   : > { %7483 = vsyncadd (%p12257_p6), [#allocation15], 4294967232 }
  0xe2   : > { %7485 = dma.done.wait (%p12258_p10), [#allocation18], 64   ;;  %p12259_p0 = pmov %p12248_p3 }
  0xe4   : > { %7487 = vsyncadd (%p12259_p0), [#allocation18], 4294967232  ;;  %p12260_p1 = pmov %p12259_p0 }
  0xe5   : > { %p12261_p2 = pmov %p12259_p0 }
  0xe6   : > { %7489 = dma.done.wait (%p12260_p1), [#allocation21], 64  }
  0xe7   : > { %7491 = vsyncadd (%p12261_p2), [#allocation21], 4294967232  ;;  %p12262_p3 = pmov %p12259_p0 }
  0xe8   : > { %p12263_p13 = pmov %p12259_p0 }
  0xe9   : > { %7493 = dma.done.wait (%p12262_p3), [#allocation24], 16  }
  0xea   : > { %7495 = vsyncadd (%p12263_p13), [#allocation24], 4294967280  ;;  %s5989_s3 = sshll.u32 %s7664_s2, 4  ;;  %s12264_s20 = sld [smem:[#allocation89_spill]]  ;;  %v898_v0 = vld [vmem:[#allocation2 + $0x38] sm:$0xff]  ;;  %v897_v1 = vld [vmem:[#allocation2 + $0x30] sm:$0xff] }
  0xeb   : > { %p805_p4 = scmp.lt.s32.totalorder %s5989_s3, 63  ;;  %vm906_vm0 = vcmask 523264   ;;  %6215 = vmatprep.subr.mxu0 %v898_v0  ;;  %v896_v2 = vld [vmem:[#allocation2 + $0x28] sm:$0xff]  ;;  %v895_v4 = vld [vmem:[#allocation2 + $0x20] sm:$0xff]  ;;  %v894_v5 = vld [vmem:[#allocation2 + $0x18] sm:$0xff]  ;;  %s12265_s1 = sld [smem:[#allocation92_spill]] }
  0xec   : > { %6216 = vmatpush3.msra.mxu0 %v898_v0  ;;  %v893_v6 = vld [vmem:[#allocation2 + $0x10] sm:$0xff]  ;;  %v892_v9 = vld [vmem:[#allocation2 + $0x8] sm:$0xff]  ;;  %v891_v11 = vld [vmem:[#allocation2] sm:$0xff]  ;;  %vm1743_vm12 = vcmask 261120   ;;  %s7534_s26 = smov 64   ;;  %s801_s23 = sand.u32 1, %s7506_s22  }
  0xed   : > { %s12478_s3 = smov (!%p805_p4, %s5989_s3), 63  ;;  %6217 = vmatprep.subr.mxu0 %v897_v1  ;;  %v5991_v33 = vld [vmem:[#allocation5] ss:$0 sm:$0xff]  ;;  %s6066_s25 = sshll.u32 %s7664_s2, 11 }
  0xee   : > { %s5990_s30 = sshll.u32 %s12478_s3, 3  ;;  %6218 = vmatpush3.msra.mxu0 %v897_v1  ;;  %v7926_v1 = vld [vmem:[#allocation7] ss:$0 sm:$0xff]  ;;  %s12066_s2 = scalar_lea.sflag [#allocation4], %s801_s23 }
  0xef   : > { %6219 = vmatprep.subr.mxu0 %v896_v2  ;;  %p12467_p7 = scmp.ne.s32.totalorder %s12236_s4, 0  ;;  %s7535_s3 = smov [#allocation25]  }
  0xf0   : > { %s7852_s24 = scalar_lea.vmem %s12264_s20, %s5990_s30  ;;  %6220 = vmatpush3.msra.mxu0 %v896_v2  ;;  %s5988_s20 = sshll.u32 %s801_s23, 7 }
  0xf1   : > { %v875_v3 = vld [vmem:[%s7852_s24] sm:$0xff]  ;;  %6221 = vmatprep.subr.mxu0 %v895_v4  ;;  %s12266_s5 = smov %s12265_s1  ;;  %v1107_v7 = vld [vmem:[%s12265_s1 + $0x38] sm:$0xff]  ;;  %v876_v13 = vld [vmem:[%s7852_s24 + $0x8] sm:$0xff]  ;;  %s7426_s30 = sshll.u32 %s7535_s3, 4  ;;  %s7427_s30 = int_to_ptr.vmem [resolvable:$false] %s7426_s30 }
  0xf2   : > { %6231 = vmatprep.mubr.msk.f32.mxu0 %vm906_vm0, %v875_v3  ;;  %6222 = vmatpush3.msra.mxu0 %v895_v4  ;;  %v1106_v8 = vld [vmem:[%s12266_s5 + $0x30] sm:$0xff]  ;;  %v1105_v10 = vld [vmem:[%s12266_s5 + $0x28] sm:$0xff]  ;;  %v1104_v12 = vld [vmem:[%s12266_s5 + $0x20] sm:$0xff]  ;;  %s7428_s27 = scalar_lea.vmem %s7427_s30, 4096 }
  0xf3   : > { %6223 = vmatprep.subr.mxu0 %v894_v5  ;;  %6255 = vmatprep.subr.mxu1 %v1107_v7  ;;  %v1103_v14 = vld [vmem:[%s12266_s5 + $0x18] sm:$0xff]  ;;  %v877_v15 = vld [vmem:[%s7852_s24 + $0x10] sm:$0xff]  ;;  %v879_v17 = vld [vmem:[%s7852_s24 + $0x20] sm:$0xff] }
  0xf4   : > { %6224 = vmatpush3.msra.mxu0 %v894_v5  ;;  %6256 = vmatpush3.msra.mxu1 %v1107_v7  ;;  %v878_v16 = vld [vmem:[%s7852_s24 + $0x18] sm:$0xff]  ;;  %v880_v18 = vld [vmem:[%s7852_s24 + $0x28] sm:$0xff]  ;;  %v881_v19 = vld [vmem:[%s7852_s24 + $0x30] sm:$0xff] }
  0xf5   : > { %6225 = vmatprep.subr.mxu0 %v893_v6  ;;  %6257 = vmatprep.subr.mxu1 %v1106_v8  ;;  %v882_v20 = vld [vmem:[%s7852_s24 + $0x38] sm:$0xff]  ;;  %v883_v21 = vld [vmem:[%s7852_s24 + $0x40] sm:$0xff]  ;;  %v884_v22 = vld [vmem:[%s7852_s24 + $0x48] sm:$0xff] }
  0xf6   : > { %6226 = vmatpush3.msra.mxu0 %v893_v6  ;;  %6258 = vmatpush3.msra.mxu1 %v1106_v8  ;;  %v885_v23 = vld [vmem:[%s7852_s24 + $0x50] sm:$0xff]  ;;  %v886_v24 = vld [vmem:[%s7852_s24 + $0x58] sm:$0xff]  ;;  %v887_v25 = vld [vmem:[%s7852_s24 + $0x60] sm:$0xff] }
  0xf7   : > { %6227 = vmatprep.subr.mxu0 %v892_v9  ;;  %6259 = vmatprep.subr.mxu1 %v1105_v10  ;;  %v888_v26 = vld [vmem:[%s7852_s24 + $0x68] sm:$0xff]  ;;  %v889_v27 = vld [vmem:[%s7852_s24 + $0x70] sm:$0xff]  ;;  %v890_v28 = vld [vmem:[%s7852_s24 + $0x78] sm:$0xff]  ;;  %s12465_s24 = sld [smem:[#allocation96_spill]] }
  0xf8   : > { %6228 = vmatpush3.msra.mxu0 %v892_v9  ;;  %6260 = vmatpush3.msra.mxu1 %v1105_v10  ;;  %v1102_v29 = vld [vmem:[%s12266_s5 + $0x10] sm:$0xff]  ;;  %v1101_v30 = vld [vmem:[%s12266_s5 + $0x8] sm:$0xff]  ;;  %v1100_v31 = vld [vmem:[%s12266_s5] sm:$0xff] }
  0xf9   : > { %6229 = vmatprep.subr.mxu0 %v891_v11  ;;  %6261 = vmatprep.subr.mxu1 %v1104_v12 }
  0xfa   : > { %6230 = vmatpush3.msra.mxu0 %v891_v11  ;;  %6262 = vmatpush3.msra.mxu1 %v1104_v12 }
  0xfb   : > { %6232 = vmatmul.mubr.msk.f32.vlgmr.msra.gmra.mxu0 %vm906_vm0, %v876_v13  ;;  %6263 = vmatprep.subr.mxu1 %v1103_v14 }
  0xfc   : > { %6234 = vmatprep.mubr.msk.f32.mxu0 %vm906_vm0, %v877_v15  ;;  %6264 = vmatpush3.msra.mxu1 %v1103_v14 }
  0xfd   : > { %6265 = vmatprep.subr.mxu1 %v1102_v29  ;;  %s12466_s0 = smov %s12465_s24  ;;  %s12056_s28 = scalar_lea.hbm %s12465_s24, %s6066_s25 }
  0xfe   : > { %6266 = vmatpush3.msra.mxu1 %v1102_v29 }
  0xff   : > { %6235 = vmatmul.mubr.msk.f32.gmra.mxu0 %vm906_vm0, %v878_v16  ;;  %6267 = vmatprep.subr.mxu1 %v1101_v30 }
 0x100   : > { %6237 = vmatprep.mubr.msk.f32.mxu0 %vm906_vm0, %v879_v17  ;;  %6268 = vmatpush3.msra.mxu1 %v1101_v30 }
 0x101   : > { %6269 = vmatprep.subr.mxu1 %v1100_v31 }
 0x102   : > { %6270 = vmatpush3.msra.mxu1 %v1100_v31 }
 0x103   : > { %6238 = vmatmul.mubr.msk.f32.gmra.mxu0 %vm906_vm0, %v880_v18 }
 0x104   : > { %6240 = vmatprep.mubr.msk.f32.mxu0 %vm906_vm0, %v881_v19 }
 0x107   : > { %6241 = vmatmul.mubr.msk.f32.gmra.mxu0 %vm906_vm0, %v882_v20 }
 0x108   : > { %6243 = vmatprep.mubr.msk.f32.mxu0 %vm906_vm0, %v883_v21 }
 0x10b   : > { %6244 = vmatmul.mubr.msk.f32.gmra.mxu0 %vm906_vm0, %v884_v22 }
 0x10c   : > { %6246 = vmatprep.mubr.msk.f32.mxu0 %vm906_vm0, %v885_v23 }
 0x10f   : > { %6247 = vmatmul.mubr.msk.f32.gmra.mxu0 %vm906_vm0, %v886_v24 }
 0x110   : > { %6249 = vmatprep.mubr.msk.f32.mxu0 %vm906_vm0, %v887_v25 }
 0x113   : > { %6250 = vmatmul.mubr.msk.f32.gmra.mxu0 %vm906_vm0, %v888_v26 }
 0x114   : > { %6252 = vmatprep.mubr.msk.f32.mxu0 %vm906_vm0, %v889_v27 }
 0x117   : > { %6253 = vmatmul.mubr.msk.f32.gmra.mxu0 %vm906_vm0, %v890_v28 }
 0x1bb   : > { %v6233_v32 = vpop.f32.mrf.mxu0 }
 0x1bc   : > { %v1027_v36 = vadd.f32 %v6233_v32, %v5991_v33 }
 0x1bd   : > { %v1021_v34 = vpop.f32.mrf.mxu0 }
 0x1be   : > { %v1022_v35 = vadd.f32 %v5991_v33, %v1021_v34 }
 0x1bf   : > { %v6236_v37 = vpop.f32.mrf.mxu0 }
 0x1c0   : > { %6271 = vmatprep.mubr.msk.f32.mxu1 %vm906_vm0, %v1022_v35  ;;  %v1037_v38 = vadd.f32 %v6236_v37, %v5991_v33  ;;  %v12138_v35 = vmov -1.0  }
 0x1c1   : > { %v1031_v39 = vpop.f32.mrf.mxu0  ;;  %6272 = vmatmul.mubr.msk.f32.vlgmr.msra.gmra.mxu1 %vm906_vm0, %v1027_v36 }
 0x1c2   : > { %v1032_v40 = vadd.f32 %v5991_v33, %v1031_v39 }
 0x1c3   : > { %v6239_v41 = vpop.f32.mrf.mxu0 }
 0x1c4   : > { %6274 = vmatprep.mubr.msk.f32.mxu1 %vm906_vm0, %v1032_v40  ;;  %v1047_v42 = vadd.f32 %v6239_v41, %v5991_v33 }
 0x1c5   : > { %v1041_v43 = vpop.f32.mrf.mxu0  ;;  %6275 = vmatmul.mubr.msk.f32.gmra.mxu1 %vm906_vm0, %v1037_v38 }
 0x1c6   : > { %v1042_v44 = vadd.f32 %v5991_v33, %v1041_v43 }
 0x1c7   : > { %v6242_v45 = vpop.f32.mrf.mxu0 }
 0x1c8   : > { %6277 = vmatprep.mubr.msk.f32.mxu1 %vm906_vm0, %v1042_v44  ;;  %v1057_v46 = vadd.f32 %v6242_v45, %v5991_v33 }
 0x1c9   : > { %v1051_v47 = vpop.f32.mrf.mxu0  ;;  %6278 = vmatmul.mubr.msk.f32.gmra.mxu1 %vm906_vm0, %v1047_v42 }
 0x1ca   : > { %v1052_v48 = vadd.f32 %v5991_v33, %v1051_v47 }
 0x1cb   : > { %v6245_v49 = vpop.f32.mrf.mxu0 }
 0x1cc   : > { %6280 = vmatprep.mubr.msk.f32.mxu1 %vm906_vm0, %v1052_v48  ;;  %v1067_v50 = vadd.f32 %v6245_v49, %v5991_v33 }
 0x1cd   : > { %v1061_v51 = vpop.f32.mrf.mxu0  ;;  %6281 = vmatmul.mubr.msk.f32.gmra.mxu1 %vm906_vm0, %v1057_v46 }
 0x1ce   : > { %v1062_v52 = vadd.f32 %v5991_v33, %v1061_v51 }
 0x1cf   : > { %v6248_v53 = vpop.f32.mrf.mxu0 }
 0x1d0   : > { %6283 = vmatprep.mubr.msk.f32.mxu1 %vm906_vm0, %v1062_v52  ;;  %v1077_v54 = vadd.f32 %v6248_v53, %v5991_v33 }
 0x1d1   : > { %v1071_v55 = vpop.f32.mrf.mxu0  ;;  %6284 = vmatmul.mubr.msk.f32.gmra.mxu1 %vm906_vm0, %v1067_v50 }
 0x1d2   : > { %v1072_v56 = vadd.f32 %v5991_v33, %v1071_v55 }
 0x1d3   : > { %v6251_v57 = vpop.f32.mrf.mxu0 }
 0x1d4   : > { %6286 = vmatprep.mubr.msk.f32.mxu1 %vm906_vm0, %v1072_v56  ;;  %v1087_v58 = vadd.f32 %v6251_v57, %v5991_v33 }
 0x1d5   : > { %v1081_v59 = vpop.f32.mrf.mxu0  ;;  %6287 = vmatmul.mubr.msk.f32.gmra.mxu1 %vm906_vm0, %v1077_v54 }
 0x1d6   : > { %v1082_v60 = vadd.f32 %v5991_v33, %v1081_v59 }
 0x1d7   : > { %v6254_v61 = vpop.f32.mrf.mxu0 }
 0x1d8   : > { %6289 = vmatprep.mubr.msk.f32.mxu1 %vm906_vm0, %v1082_v60  ;;  %v1097_v62 = vadd.f32 %v6254_v61, %v5991_v33 }
 0x1d9   : > { %v1091_v63 = vpop.f32.mrf.mxu0  ;;  %6290 = vmatmul.mubr.msk.f32.gmra.mxu1 %vm906_vm0, %v1087_v58 }
 0x1da   : > { %v1092_v0 = vadd.f32 %v5991_v33, %v1091_v63 }
 0x1dc   : > { %6292 = vmatprep.mubr.msk.f32.mxu1 %vm906_vm0, %v1092_v0 }
 0x1dd   : > { %6293 = vmatmul.mubr.msk.f32.gmra.mxu1 %vm906_vm0, %v1097_v62 }
 0x281   : > { %v6273_v2 = vpop.f32.mrf.mxu1 }
 0x282   : > { %v1235_v3 = vadd.f32 %v6273_v2, %v7926_v1 }
 0x283   : > { %v1229_v4 = vpop.f32.mrf.mxu1 }
 0x284   : > { %v1326_v5 = vmul.f32 0.70710677, %v1235_v3  ;;  %v1230_v6 = vadd.f32 %v7926_v1, %v1229_v4  ;;  %v7942_v31 = vmul.f32 0.5, %v1235_v3 }
 0x285   : > { %v6276_v7 = vpop.f32.mrf.mxu1 }
 0x286   : > { %v1374_v8 = vand.u32 2147483647, %v1326_v5  ;;  %v1325_v9 = vmul.f32 0.70710677, %v1230_v6  ;;  %v1245_v10 = vadd.f32 %v6276_v7, %v7926_v1  ;;  %vm1342_vm1 = vcmp.ge.f32.partialorder %v1326_v5, 0.0 }
 0x287   : > { %v1239_v11 = vpop.f32.mrf.mxu1  ;;  %v7945_v36 = vsel %vm1342_vm1, 1.0, %v12138_v35  ;;  %v7948_v43 = vmul.f32 0.5, %v1230_v6 }
 0x288   : > { %v1598_v12 = vsub.f32 0.0, %v1374_v8  ;;  %v1373_v13 = vand.u32 2147483647, %v1325_v9  ;;  %v7931_v14 = vmul.f32 0.70710677, %v1245_v10  ;;  %v7934_v15 = vadd.f32 %v7926_v1, %v1239_v11 }
 0x289   : > { %v6279_v16 = vpop.f32.mrf.mxu1  ;;  %v1390_v17 = vmul.f32 0.3275911, %v1374_v8  ;;  %vm1341_vm2 = vcmp.ge.f32.partialorder %v1325_v9, 0.0  ;;  %v7950_v44 = vmul.f32 0.5, %v1245_v10 }
 0x28a   : > { %v1597_v18 = vsub.f32 0.0, %v1373_v13  ;;  %v1614_v19 = vmul.f32 %v1598_v12, %v1374_v8  ;;  %v1376_v20 = vand.u32 2147483647, %v7931_v14  ;;  %v7938_v21 = vmul.f32 0.70710677, %v7934_v15 }
 0x28b   : > { %v1255_v22 = vadd.f32 %v6279_v16, %v7926_v1  ;;  %v1249_v23 = vpop.f32.mrf.mxu1  ;;  %v1389_v24 = vmul.f32 0.3275911, %v1373_v13  ;;  %v1406_v28 = vadd.f32 1.0, %v1390_v17  ;;  %v7959_v56 = vsel %vm1341_vm2, 1.0, %v12138_v35 }
 0x28c   : > { %v1613_v25 = vmul.f32 %v1597_v18, %v1373_v13  ;;  %v1600_v26 = vsub.f32 0.0, %v1376_v20  ;;  %v1392_v29 = vmul.f32 0.3275911, %v1376_v20  ;;  %v1375_v30 = vand.u32 2147483647, %v7938_v21 }
 0x28d   : > { %v6282_v27 = vpop.f32.mrf.mxu1  ;;  %v1631_v32 = vmul.f32 1.442695, %v1614_v19  ;;  %v1330_v33 = vmul.f32 0.70710677, %v1255_v22  ;;  %v1405_v37 = vadd.f32 1.0, %v1389_v24  ;;  %v1250_v39 = vadd.f32 %v7926_v1, %v1249_v23 }
 0x28e   : > { %v1599_v38 = vsub.f32 0.0, %v1375_v30  ;;  %v1629_v40 = vmul.f32 1.442695, %v1613_v25  ;;  %v1616_v41 = vmul.f32 %v1600_v26, %v1376_v20  ;;  %6514 = vrcp.f32 %v1406_v28 }
 0x28f   : > { %v1259_v34 = vpop.f32.mrf.mxu1  ;;  %v1408_v45 = vadd.f32 1.0, %v1392_v29  ;;  %v1378_v46 = vand.u32 2147483647, %v1330_v33  ;;  %6516 = vpow2.f32 %v1631_v32  ;;  %v1391_v47 = vmul.f32 0.3275911, %v1375_v30 }
 0x290   : > { %v1615_v48 = vmul.f32 %v1599_v38, %v1375_v30  ;;  %v7952_v49 = vmul.f32 0.70710677, %v1250_v39  ;;  %6518 = vrcp.f32 %v1405_v37  ;;  %v1265_v52 = vadd.f32 %v6282_v27, %v7926_v1 }
 0x291   : > { %v6285_v42 = vpop.f32.mrf.mxu1  ;;  %v1602_v51 = vsub.f32 0.0, %v1378_v46  ;;  %v1260_v53 = vadd.f32 %v7926_v1, %v1259_v34  ;;  %6520 = vpow2.f32 %v1629_v40  ;;  %v1635_v54 = vmul.f32 1.442695, %v1616_v41 }
 0x292   : > { %v1377_v55 = vand.u32 2147483647, %v7952_v49  ;;  %vm1344_vm3 = vcmp.ge.f32.partialorder %v7931_v14, 0.0  ;;  %6522 = vrcp.f32 %v1408_v45  ;;  %v1394_v57 = vmul.f32 0.3275911, %v1378_v46 }
 0x293   : > { %v1269_v50 = vpop.f32.mrf.mxu1  ;;  %v1332_v58 = vmul.f32 0.70710677, %v1265_v52  ;;  %v1407_v59 = vadd.f32 1.0, %v1391_v47  ;;  %v1633_v60 = vmul.f32 1.442695, %v1615_v48  ;;  %vm1346_vm4 = vcmp.ge.f32.partialorder %v1330_v33, 0.0 }
 0x294   : > { %v1601_v61 = vsub.f32 0.0, %v1377_v55  ;;  %v1618_v63 = vmul.f32 %v1602_v51, %v1378_v46  ;;  %v7962_v2 = vmul.f32 0.70710677, %v1260_v53  ;;  %v1275_v3 = vadd.f32 %v6285_v42, %v7926_v1 }
 0x295   : > { %v6288_v62 = vpop.f32.mrf.mxu1  ;;  %v1380_v0 = vand.u32 2147483647, %v1332_v58  ;;  %v7966_v4 = vsel %vm1344_vm3, 1.0, %v12138_v35  ;;  %6524 = vpow2.f32 %v1635_v54  ;;  %v7968_v5 = vmul.f32 0.5, %v1255_v22 }
 0x296   : > { %v1393_v6 = vmul.f32 0.3275911, %v1377_v55  ;;  %v1410_v7 = vadd.f32 1.0, %v1394_v57  ;;  %v1617_v8 = vmul.f32 %v1601_v61, %v1377_v55  ;;  %v1379_v10 = vand.u32 2147483647, %v7962_v2 }
 0x297   : > { %v1604_v9 = vsub.f32 0.0, %v1380_v0  ;;  %6526 = vrcp.f32 %v1407_v59  ;;  %v7973_v11 = vsel %vm1346_vm4, 1.0, %v12138_v35  ;;  %v1396_v12 = vmul.f32 0.3275911, %v1380_v0  ;;  %v1279_v14 = vpop.f32.mrf.mxu1 }
 0x298   : > { %v1334_v13 = vmul.f32 0.70710677, %v1275_v3  ;;  %6528 = vpow2.f32 %v1633_v60  ;;  %v1639_v16 = vmul.f32 1.442695, %v1618_v63  ;;  %v7975_v17 = vmul.f32 0.5, %v1250_v39 }
 0x299   : > { %v1603_v18 = vsub.f32 0.0, %v1379_v10  ;;  %v1409_v19 = vadd.f32 1.0, %v1393_v6  ;;  %v1620_v20 = vmul.f32 %v1604_v9, %v1380_v0  ;;  %v7978_v23 = vadd.f32 %v7926_v1, %v1269_v50  ;;  %v6291_v32 = vpop.f32.mrf.mxu1 }
 0x29a   : > { %v1382_v22 = vand.u32 2147483647, %v1334_v13  ;;  %6530 = vrcp.f32 %v1410_v7  ;;  %v1637_v24 = vmul.f32 1.442695, %v1617_v8  ;;  %v7980_v25 = vmul.f32 0.5, %v1265_v52 }
 0x29b   : > { %vm1348_vm5 = vcmp.ge.f32.partialorder %v1332_v58, 0.0  ;;  %v7982_v26 = vpop.eup %6514  ;;  %v1412_v27 = vadd.f32 1.0, %v1396_v12  ;;  %v1395_v28 = vmul.f32 0.3275911, %v1379_v10  ;;  %v1619_v29 = vmul.f32 %v1603_v18, %v1379_v10  ;;  %v1289_v54 = vpop.f32.mrf.mxu1 }
 0x29c   : > { %v1606_v30 = vsub.f32 0.0, %v1382_v22  ;;  %v7984_v33 = vpop.eup %6516  ;;  %6532 = vpow2.f32 %v1639_v16  ;;  %v7986_v34 = vmul.f32 0.5, %v1260_v53  ;;  %v7989_v37 = vmul.f32 0.70710677, %v7978_v23 }
 0x29d   : > { %v7992_v38 = vadd.f32 %v6288_v62, %v7926_v1  ;;  %v7994_v39 = vpop.eup %6518  ;;  %6534 = vrcp.f32 %v1409_v19  ;;  %v7997_v40 = vsel %vm1348_vm5, 1.0, %v12138_v35  ;;  %v1643_v41 = vmul.f32 1.442695, %v1620_v20  ;;  %v6294_v12 = vpop.f32.mrf.mxu1 }
 0x29e   : > { %v8000_v42 = vadd.f32 %v7926_v1, %v1279_v14  ;;  %v8002_v45 = vpop.eup %6520  ;;  %6536 = vpow2.f32 %v1637_v24  ;;  %v1398_v46 = vmul.f32 0.3275911, %v1382_v22  ;;  %v1622_v47 = vmul.f32 %v1606_v30, %v1382_v22 }
 0x29f   : > { %v1381_v48 = vand.u32 2147483647, %v7989_v37  ;;  %v8005_v50 = vpop.eup %6522  ;;  %6538 = vrcp.f32 %v1412_v27  ;;  %v1411_v51 = vadd.f32 1.0, %v1395_v28  ;;  %v1641_v52 = vmul.f32 1.442695, %v1619_v29 }
 0x2a0   : > { %v8008_v53 = vmul.f32 0.70710677, %v7992_v38  ;;  %v8011_v58 = vmul.f32 0.70710677, %v8000_v42  ;;  %v8014_v59 = vadd.f32 %v6291_v32, %v7926_v1  ;;  %6540 = vpow2.f32 %v1643_v41 }
 0x2a1   : > { %v1397_v55 = vmul.f32 0.3275911, %v1381_v48  ;;  %v1605_v57 = vsub.f32 0.0, %v1381_v48  ;;  %v8016_v60 = vmul.f32 0.5, %v1275_v3  ;;  %vm1350_vm6 = vcmp.ge.f32.partialorder %v1334_v13, 0.0 }
 0x2a2   : > { %12267 = vst [vmem:[#allocation41_spill] sm:$0xff] %v8014_v59  ;;  %v1384_v61 = vand.u32 2147483647, %v8008_v53  ;;  %v8019_v62 = vpop.eup %6524  ;;  %v1414_v63 = vadd.f32 1.0, %v1398_v46  ;;  %v1647_v0 = vmul.f32 1.442695, %v1622_v47  ;;  %v8022_v7 = vadd.f32 %v7926_v1, %v1289_v54  ;;  %v1299_v47 = vpop.f32.mrf.mxu1 }
 0x2a3   : > { %12268 = vst [vmem:[#allocation42_spill] sm:$0xff] %v8016_v60  ;;  %v1621_v6 = vmul.f32 %v1605_v57, %v1381_v48  ;;  %6542 = vrcp.f32 %v1411_v51  ;;  %v1383_v10 = vand.u32 2147483647, %v8011_v58  ;;  %v8028_v3 = vsel %vm1350_vm6, 1.0, %v12138_v35 }
 0x2a4   : > { %12269 = vst [vmem:[#allocation43_spill] sm:$0xff] %v8022_v7  ;;  %v1400_v8 = vmul.f32 0.3275911, %v1384_v61  ;;  %v1608_v9 = vsub.f32 0.0, %v1384_v61  ;;  %v8025_v14 = vpop.eup %6526  ;;  %6544 = vpow2.f32 %v1641_v52  ;;  %12270 = vst [vmem:[#allocation44_spill] sm:$0xff] %v8028_v3  ;;  %v1413_v13 = vadd.f32 1.0, %v1397_v55 }
 0x2a5   : > { %v1338_v16 = vmul.f32 0.70710677, %v8014_v59  ;;  %v8031_v18 = vpop.eup %6528  ;;  %v1645_v19 = vmul.f32 1.442695, %v1621_v6  ;;  %v1399_v22 = vmul.f32 0.3275911, %v1383_v10  ;;  %6546 = vrcp.f32 %v1414_v63 }
 0x2a6   : > { %v1624_v20 = vmul.f32 %v1608_v9, %v1384_v61  ;;  %v1607_v24 = vsub.f32 0.0, %v1383_v10  ;;  %v1416_v27 = vadd.f32 1.0, %v1400_v8  ;;  %v8034_v29 = vmul.f32 0.70710677, %v8022_v7 }
 0x2a7   : > { %v1386_v28 = vand.u32 2147483647, %v1338_v16  ;;  %v8036_v30 = vpop.eup %6530  ;;  %6548 = vpow2.f32 %v1647_v0  ;;  %v8039_v32 = vmul.f32 0.5, %v7978_v23  ;;  %v1415_v48 = vadd.f32 1.0, %v1399_v22 }
 0x2a8   : > { %v1651_v41 = vmul.f32 1.442695, %v1624_v20  ;;  %v1623_v46 = vmul.f32 %v1607_v24, %v1383_v10  ;;  %6550 = vrcp.f32 %v1413_v13  ;;  %vm1352_vm7 = vcmp.ge.f32.partialorder %v8008_v53, 0.0 }
 0x2a9   : > { %12271 = vst [vmem:[#allocation45_spill] sm:$0xff] %v8039_v32  ;;  %v1402_v51 = vmul.f32 0.3275911, %v1386_v28  ;;  %v1610_v52 = vsub.f32 0.0, %v1386_v28  ;;  %v8041_v54 = vpop.eup %6532  ;;  %6552 = vpow2.f32 %v1645_v19  ;;  %v1385_v55 = vand.u32 2147483647, %v8034_v29 }
 0x2aa   : > { %v8046_v57 = vadd.f32 %v6294_v12, %v7926_v1  ;;  %v8048_v61 = vpop.eup %6534  ;;  %6554 = vrcp.f32 %v1416_v27  ;;  %v1649_v23 = vmul.f32 1.442695, %v1623_v46  ;;  %v8051_v0 = vadd.f32 %v7926_v1, %v1299_v47 }
 0x2ab   : > { %v1626_v63 = vmul.f32 %v1610_v52, %v1386_v28  ;;  %v8053_v6 = vpop.eup %6536  ;;  %vm1343_vm8 = vcmp.ge.f32.partialorder %v7938_v21, 0.0  ;;  %6556 = vpow2.f32 %v1651_v41  ;;  %v1418_v8 = vadd.f32 1.0, %v1402_v51 }
 0x2ac   : > { %12272 = vst [vmem:[#allocation46_spill] sm:$0xff] %v8046_v57  ;;  %12273 = vst [vmem:[#allocation47_spill] sm:$0xff] %v8051_v0  ;;  %v1401_v9 = vmul.f32 0.3275911, %v1385_v55  ;;  %v1609_v10 = vsub.f32 0.0, %v1385_v55  ;;  %v8056_v13 = vpop.eup %6538  ;;  %6558 = vrcp.f32 %v1415_v48  ;;  %vm1354_vm9 = vcmp.ge.f32.partialorder %v1338_v16, 0.0 }
 0x2ad   : > { %v1655_v12 = vmul.f32 1.442695, %v1626_v63  ;;  %v8059_v19 = vmul.f32 0.70710677, %v8046_v57  ;;  %vm1345_vm10 = vcmp.ge.f32.partialorder %v7952_v49, 0.0  ;;  %v8066_v27 = vpop.eup %6540  ;;  %v8069_v28 = vmul.f32 0.5, %v7992_v38 }
 0x2ae   : > { %v1417_v1 = vadd.f32 1.0, %v1401_v9  ;;  %v1625_v20 = vmul.f32 %v1609_v10, %v1385_v55  ;;  %v8063_v22 = vmul.f32 0.70710677, %v8051_v0  ;;  %v1453_v24 = vmul.f32 1.0614054, %v7994_v39 }
 0x2af   : > { %12274 = vst [vmem:[#allocation48_spill] sm:$0xff] %v8059_v19  ;;  %12276 = vst [vmem:[#allocation50_spill] sm:$0xff] %v8069_v28  ;;  %v8072_v16 = vmul.f32 0.5, %v8000_v42  ;;  %6560 = vpow2.f32 %v1649_v23  ;;  %v1388_v41 = vand.u32 2147483647, %v8059_v19  ;;  %v8078_v46 = vsel %vm1352_vm7, 1.0, %v12138_v35 }
 0x2b0   : > { %12275 = vst [vmem:[#allocation49_spill] sm:$0xff] %v8063_v22  ;;  %12278 = vst [vmem:[#allocation52_spill] sm:$0xff] %v8078_v46  ;;  %v8081_v47 = vsel %vm1354_vm9, 1.0, %v12138_v35  ;;  %6562 = vrcp.f32 %v1418_v8  ;;  %v1653_v48 = vmul.f32 1.442695, %v1625_v20  ;;  %v8083_v51 = vpop.eup %6542  ;;  %v8097_v59 = vmul.f32 0.5, %v7934_v15 }
 0x2b1   : > { %12277 = vst [vmem:[#allocation51_spill] sm:$0xff] %v8072_v16  ;;  %12279 = vst [vmem:[#allocation53_spill] sm:$0xff] %v8081_v47  ;;  %6564 = vpow2.f32 %v1655_v12  ;;  %v1404_v38 = vmul.f32 0.3275911, %v1388_v41  ;;  %v1612_v52 = vsub.f32 0.0, %v1388_v41  ;;  %v8086_v55 = vpop.eup %6544  ;;  %v12282_v47 = vmov -1.0  }
 0x2b2   : > { %v1387_v42 = vand.u32 2147483647, %v8063_v22  ;;  %6566 = vrcp.f32 %v1417_v1  ;;  %v1469_v23 = vadd.f32 -1.4531521, %v1453_v24  ;;  %v1455_v53 = vmul.f32 1.0614054, %v8025_v14  ;;  %v8090_v20 = vpop.eup %6546 }
 0x2b3   : > { %v1454_v63 = vmul.f32 1.0614054, %v7982_v26  ;;  %v1420_v9 = vadd.f32 1.0, %v1404_v38  ;;  %v1628_v10 = vmul.f32 %v1612_v52, %v1388_v41  ;;  %v1456_v19 = vmul.f32 1.0614054, %v8005_v50 }
 0x2b4   : > { %v1403_v35 = vmul.f32 0.3275911, %v1387_v42  ;;  %v1611_v8 = vsub.f32 0.0, %v1387_v42  ;;  %v1485_v12 = vmul.f32 %v7994_v39, %v1469_v23  ;;  %v1471_v57 = vadd.f32 -1.4531521, %v1455_v53  ;;  %v8094_v7 = vpop.eup %6548 }
 0x2b5   : > { %v1470_v0 = vadd.f32 -1.4531521, %v1454_v63  ;;  %12280 = vst [vmem:[#allocation54_spill] sm:$0xff] %v8094_v7  ;;  %6568 = vpow2.f32 %v1653_v48  ;;  %v8099_v38 = vpop.eup %6550  ;;  %v1472_v23 = vadd.f32 -1.4531521, %v1456_v19  ;;  %v8124_v21 = vsel %vm1345_vm10, 1.0, %v12282_v47 }
 0x2b6   : > { %v1419_v1 = vadd.f32 1.0, %v1403_v35  ;;  %v1627_v24 = vmul.f32 %v1611_v8, %v1387_v42  ;;  %v1501_v41 = vadd.f32 1.4214138, %v1485_v12  ;;  %v1487_v52 = vmul.f32 %v8025_v14, %v1471_v57  ;;  %v8103_v53 = vpop.eup %6552 }
 0x2b7   : > { %v1486_v22 = vmul.f32 %v7982_v26, %v1470_v0  ;;  %12281 = vst [vmem:[#allocation55_spill] sm:$0xff] %v8103_v53  ;;  %6570 = vrcp.f32 %v1420_v9  ;;  %v8105_v63 = vmul.f32 1.442695, %v1628_v10  ;;  %v8110_v35 = vsel %vm1343_vm8, 1.0, %v12282_v47  ;;  %v8113_v48 = vpop.eup %6554 }
 0x2b8   : > { %v1457_v15 = vmul.f32 1.0614054, %v8048_v61  ;;  %v8115_v42 = vmul.f32 1.442695, %v1627_v24  ;;  %v1517_v57 = vmul.f32 %v7994_v39, %v1501_v41  ;;  %v1503_v0 = vadd.f32 1.4214138, %v1487_v52  ;;  %v8118_v8 = vpop.eup %6556 }
 0x2b9   : > { %v1502_v19 = vadd.f32 1.4214138, %v1486_v22  ;;  %12284 = vst [vmem:[#allocation57_spill] sm:$0xff] %v8118_v8  ;;  %v1488_v9 = vmul.f32 %v8005_v50, %v1472_v23  ;;  %v1458_v12 = vmul.f32 1.0614054, %v8036_v30  ;;  %v8127_v28 = vpop.eup %6558  ;;  %6572 = vrcp.f32 %v1419_v1 }
 0x2ba   : > { %12283 = vst [vmem:[#allocation56_spill] sm:$0xff] %v8115_v42  ;;  %v1473_v10 = vadd.f32 -1.4531521, %v1457_v15  ;;  %v1533_v24 = vadd.f32 -0.28449672, %v1517_v57  ;;  %v1519_v41 = vmul.f32 %v8025_v14, %v1503_v0  ;;  %vm1347_vm11 = vcmp.ge.f32.partialorder %v7962_v2, 0.0 }
 0x2bb   : > { %v1518_v22 = vmul.f32 %v7982_v26, %v1502_v19  ;;  %v1504_v52 = vadd.f32 1.4214138, %v1488_v9  ;;  %v1474_v23 = vadd.f32 -1.4531521, %v1458_v12  ;;  %v1459_v60 = vmul.f32 1.0614054, %v8083_v51 }
 0x2bc   : > { %v1489_v16 = vmul.f32 %v8048_v61, %v1473_v10  ;;  %v8133_v49 = vpop.eup %6560  ;;  %v1549_v15 = vmul.f32 %v7994_v39, %v1533_v24  ;;  %v1535_v32 = vadd.f32 -0.28449672, %v1519_v41  ;;  %v1460_v3 = vmul.f32 1.0614054, %v8056_v13 }
 0x2bd   : > { %12285 = vst [vmem:[#allocation58_spill] sm:$0xff] %v8133_v49  ;;  %v1534_v46 = vadd.f32 -0.28449672, %v1518_v22  ;;  %v8137_v1 = vpop.eup %6562  ;;  %v1520_v57 = vmul.f32 %v8005_v50, %v1504_v52  ;;  %v1490_v19 = vmul.f32 %v8036_v30, %v1474_v23  ;;  %v1475_v9 = vadd.f32 -1.4531521, %v1459_v60 }
 0x2be   : > { %v1505_v0 = vadd.f32 1.4214138, %v1489_v16  ;;  %v8141_v10 = vpop.eup %6564  ;;  %v1565_v12 = vadd.f32 0.2548296, %v1549_v15  ;;  %v1551_v8 = vmul.f32 %v8025_v14, %v1535_v32  ;;  %v1476_v24 = vadd.f32 -1.4531521, %v1460_v3 }
 0x2bf   : > { %12286 = vst [vmem:[#allocation59_spill] sm:$0xff] %v8141_v10  ;;  %v1550_v49 = vmul.f32 %v7982_v26, %v1534_v46  ;;  %v8145_v41 = vpop.eup %6566  ;;  %v1536_v22 = vadd.f32 -0.28449672, %v1520_v57  ;;  %v1506_v53 = vadd.f32 1.4214138, %v1490_v19  ;;  %v1491_v52 = vmul.f32 %v8083_v51, %v1475_v9 }
 0x2c0   : > { %v1521_v7 = vmul.f32 %v8048_v61, %v1505_v0  ;;  %v1581_v16 = vmul.f32 %v7994_v39, %v1565_v12  ;;  %v1567_v23 = vadd.f32 0.2548296, %v1551_v8  ;;  %v1492_v10 = vmul.f32 %v8056_v13, %v1476_v24 }
 0x2c1   : > { %v1566_v60 = vadd.f32 0.2548296, %v1550_v49  ;;  %v1552_v15 = vmul.f32 %v8005_v50, %v1536_v22  ;;  %v1522_v46 = vmul.f32 %v8036_v30, %v1506_v53  ;;  %v1507_v3 = vadd.f32 1.4214138, %v1491_v52 }
 0x2c2   : > { %v1537_v32 = vadd.f32 -0.28449672, %v1521_v7  ;;  %v8153_v42 = vpop.eup %6568  ;;  %v1661_v57 = vmul.f32 %v8002_v45, %v1581_v16  ;;  %v1583_v0 = vmul.f32 %v8025_v14, %v1567_v23  ;;  %v1508_v9 = vadd.f32 1.4214138, %v1492_v10 }
 0x2c3   : > { %v1582_v19 = vmul.f32 %v7982_v26, %v1566_v60  ;;  %v1568_v39 = vadd.f32 0.2548296, %v1552_v15  ;;  %v1538_v49 = vadd.f32 -0.28449672, %v1522_v46  ;;  %v1523_v7 = vmul.f32 %v8083_v51, %v1507_v3 }
 0x2c4   : > { %v1553_v8 = vmul.f32 %v8048_v61, %v1537_v32  ;;  %v8161_v53 = vpop.eup %6570  ;;  %v1677_v12 = vsub.f32 1.0, %v1661_v57  ;;  %v1663_v24 = vmul.f32 %v8031_v18, %v1583_v0  ;;  %v1524_v14 = vmul.f32 %v8056_v13, %v1508_v9 }
 0x2c5   : > { %v1662_v45 = vmul.f32 %v7984_v33, %v1582_v19  ;;  %vm1349_vm13 = vcmp.ge.f32.partialorder %v7989_v37, 0.0  ;;  %v1584_v26 = vmul.f32 %v8005_v50, %v1568_v39  ;;  %v1554_v22 = vmul.f32 %v8036_v30, %v1538_v49 }
 0x2c6   : > { %v1569_v10 = vadd.f32 0.2548296, %v1553_v8  ;;  %v1539_v52 = vadd.f32 -0.28449672, %v1523_v7  ;;  %v1693_v16 = vmul.f32 %v1677_v12, %v7959_v56  ;;  %v1679_v23 = vsub.f32 1.0, %v1663_v24  ;;  %v8170_v32 = vpop.eup %6572 }
 0x2c7   : > { %v1678_v60 = vsub.f32 1.0, %v1662_v45  ;;  %v1540_v15 = vadd.f32 -0.28449672, %v1524_v14  ;;  %v1664_v18 = vmul.f32 %v8019_v62, %v1584_v26  ;;  %v1570_v46 = vadd.f32 0.2548296, %v1554_v22 }
 0x2c8   : > { %v1585_v33 = vmul.f32 %v8048_v61, %v1569_v10  ;;  %v1555_v3 = vmul.f32 %v8083_v51, %v1539_v52  ;;  %v1709_v57 = vadd.f32 1.0, %v1693_v16  ;;  %v1695_v50 = vmul.f32 %v1679_v23, %v8110_v35 }
 0x2c9   : > { %v1694_v0 = vmul.f32 %v1678_v60, %v7945_v36  ;;  %v1556_v19 = vmul.f32 %v8056_v13, %v1540_v15  ;;  %v1680_v56 = vsub.f32 1.0, %v1664_v18  ;;  %v1586_v39 = vmul.f32 %v8036_v30, %v1570_v46 }
 0x2ca   : > { %v1665_v9 = vmul.f32 %v8053_v6, %v1585_v33  ;;  %v1571_v8 = vadd.f32 0.2548296, %v1555_v3  ;;  %vm1351_vm14 = vcmp.ge.f32.partialorder %v8011_v58, 0.0  ;;  %v8182_v62 = vmul.f32 %v1709_v57, %v7948_v43 }
 0x2cb   : > { %v1711_v61 = vadd.f32 1.0, %v1695_v50  ;;  %v1710_v49 = vadd.f32 1.0, %v1694_v0  ;;  %v1572_v7 = vadd.f32 0.2548296, %v1556_v19  ;;  %v1696_v35 = vmul.f32 %v1680_v56, %v7966_v4 }
 0x2cc   : > { %v1681_v12 = vsub.f32 1.0, %v1665_v9  ;;  %v1666_v36 = vmul.f32 %v8041_v54, %v1586_v39  ;;  %v1587_v24 = vmul.f32 %v8083_v51, %v1571_v8  ;;  %v1744_v6 = vsel %vm1743_vm12, %v8182_v62, 0.0 }
 0x2cd   : > { %v8190_v30 = vmul.f32 %v1711_v61, %v8097_v59  ;;  %v8193_v45 = vmul.f32 %v1710_v49, %v7942_v31  ;;  %v1588_v43 = vmul.f32 %v8056_v13, %v1572_v7  ;;  %vm1353_vm15 = vcmp.ge.f32.partialorder %v8034_v29, 0.0  ;;  %1745 = vadd.xlane.f32.xlu0 %v1744_v6 }
 0x2ce   : > { %v1712_v4 = vadd.f32 1.0, %v1696_v35  ;;  %v1697_v14 = vmul.f32 %v1681_v12, %v8124_v21  ;;  %v1682_v54 = vsub.f32 1.0, %v1666_v36  ;;  %v1667_v51 = vmul.f32 %v8086_v55, %v1587_v24 }
 0x2cf   : > { %v1750_v26 = vsel %vm1743_vm12, %v8190_v30, 0.0  ;;  %v1747_v59 = vsel %vm1743_vm12, %v8193_v45, 0.0  ;;  %v1363_v31 = vsel %vm1347_vm11, 1.0, %v12282_v47  ;;  %v1668_v13 = vmul.f32 %v8066_v27, %v1588_v43 }
 0x2d0   : > { %1751 = vadd.xlane.f32.xlu1 %v1750_v26  ;;  %v8208_v10 = vmul.f32 %v1712_v4, %v7950_v44  ;;  %v1713_v21 = vadd.f32 1.0, %v1697_v14  ;;  %v1698_v22 = vmul.f32 %v1682_v54, %v7973_v11  ;;  %v1683_v55 = vsub.f32 1.0, %v1667_v51 }
 0x2d1   : > { %v1684_v52 = vsub.f32 1.0, %v1668_v13  ;;  %v8214_v16 = vsel %vm1349_vm13, 1.0, %v12282_v47  ;;  %v1461_v23 = vmul.f32 1.0614054, %v8099_v38  ;;  %v1462_v2 = vmul.f32 1.0614054, %v8090_v20  ;;  %1748 = vadd.xlane.f32.xlu0 %v1747_v59 }
 0x2d2   : > { %v1753_v27 = vsel %vm1743_vm12, %v8208_v10, 0.0  ;;  %v8221_v44 = vmul.f32 %v1713_v21, %v7975_v17  ;;  %v1714_v60 = vadd.f32 1.0, %v1698_v22  ;;  %v1699_v11 = vmul.f32 %v1683_v55, %v1363_v31 }
 0x2d3   : > { %v1700_v15 = vmul.f32 %v1684_v52, %v7997_v40  ;;  %v1477_v18 = vadd.f32 -1.4531521, %v1461_v23  ;;  %v1478_v33 = vadd.f32 -1.4531521, %v1462_v2  ;;  %v1463_v37 = vmul.f32 1.0614054, %v8127_v28 }
 0x2d4   : > { %1754 = vadd.xlane.f32.xlu1 %v1753_v27  ;;  %v1756_v46 = vsel %vm1743_vm12, %v8221_v44, 0.0  ;;  %v8228_v3 = vmul.f32 %v1714_v60, %v7968_v5  ;;  %v1715_v57 = vadd.f32 1.0, %v1699_v11  ;;  %v1464_v50 = vmul.f32 1.0614054, %v8113_v48  ;;  %v12287_v23 = vld [vmem:[#allocation56_spill] sm:$0xff] }
 0x2d5   : > { %v1716_v17 = vadd.f32 1.0, %v1700_v15  ;;  %v1493_v0 = vmul.f32 %v8099_v38, %v1477_v18  ;;  %v1494_v19 = vmul.f32 %v8090_v20, %v1478_v33  ;;  %v1479_v40 = vadd.f32 -1.4531521, %v1463_v37  ;;  %1757 = vadd.xlane.f32.xlu0 %v1756_v46 }
 0x2d6   : > { %v1759_v56 = vsel %vm1743_vm12, %v8228_v3, 0.0  ;;  %v8236_v9 = vmul.f32 %v1715_v57, %v7986_v34  ;;  %v8241_v5 = vsel %vm1351_vm14, 1.0, %v12282_v47  ;;  %v1480_v39 = vadd.f32 -1.4531521, %v1464_v50 }
 0x2d7   : > { %v8244_v8 = vmul.f32 %v1716_v17, %v7980_v25  ;;  %v1509_v61 = vadd.f32 1.4214138, %v1493_v0  ;;  %v1510_v49 = vadd.f32 1.4214138, %v1494_v19  ;;  %v1495_v7 = vmul.f32 %v8127_v28, %v1479_v40 }
 0x2d8   : > { %1760 = vadd.xlane.f32.xlu1 %v1759_v56  ;;  %v1762_v35 = vsel %vm1743_vm12, %v8236_v9, 0.0  ;;  %v1496_v34 = vmul.f32 %v8113_v48, %v1480_v39  ;;  %v1465_v12 = vmul.f32 1.0614054, %v8145_v41  ;;  %v1466_v58 = vmul.f32 1.0614054, %v8137_v1 }
 0x2d9   : > { %v1525_v36 = vmul.f32 %v8099_v38, %v1509_v61  ;;  %v1526_v24 = vmul.f32 %v8090_v20, %v1510_v49  ;;  %v1511_v25 = vadd.f32 1.4214138, %v1495_v7  ;;  %v8257_v6 = vsel %vm1353_vm15, 1.0, %v12282_v47  ;;  %1763 = vadd.xlane.f32.xlu0 %v1762_v35  ;;  %v12288_v7 = vld [vmem:[#allocation55_spill] sm:$0xff] }
 0x2da   : > { %6574 = vpow2.f32 %v8105_v63  ;;  %v1512_v43 = vadd.f32 1.4214138, %v1496_v34  ;;  %v1481_v4 = vadd.f32 -1.4531521, %v1465_v12  ;;  %v1482_v14 = vadd.f32 -1.4531521, %v1466_v58 }
 0x2db   : > { %v1765_v54 = vsel %vm1743_vm12, %v8244_v8, 0.0  ;;  %v1541_v51 = vadd.f32 -0.28449672, %v1525_v36  ;;  %v1542_v26 = vadd.f32 -0.28449672, %v1526_v24  ;;  %v1527_v59 = vmul.f32 %v8127_v28, %v1511_v25  ;;  %v12289_v34 = vld [vmem:[#allocation54_spill] sm:$0xff] }
 0x2dc   : > { %1766 = vadd.xlane.f32.xlu1 %v1765_v54  ;;  %v1528_v31 = vmul.f32 %v8113_v48, %v1512_v43  ;;  %v1497_v29 = vmul.f32 %v8145_v41, %v1481_v4  ;;  %v1498_v13 = vmul.f32 %v8137_v1, %v1482_v14  ;;  %v1467_v63 = vmul.f32 1.0614054, %v8170_v32  ;;  %v12290_v14 = vld [vmem:[#allocation58_spill] sm:$0xff] }
 0x2dd   : > { %v1557_v21 = vmul.f32 %v8099_v38, %v1541_v51  ;;  %v1558_v22 = vmul.f32 %v8090_v20, %v1542_v26  ;;  %v1543_v55 = vadd.f32 -0.28449672, %v1527_v59  ;;  %v1468_v52 = vmul.f32 1.0614054, %v8161_v53  ;;  %v12291_v26 = vld [vmem:[#allocation57_spill] sm:$0xff] }
 0x2de   : > { %6576 = vpow2.f32 %v12287_v23  ;;  %v1544_v2 = vadd.f32 -0.28449672, %v1528_v31  ;;  %v1513_v27 = vadd.f32 1.4214138, %v1497_v29  ;;  %v1514_v60 = vadd.f32 1.4214138, %v1498_v13 }
 0x2df   : > { %v1573_v11 = vadd.f32 0.2548296, %v1557_v21  ;;  %v1574_v15 = vadd.f32 0.2548296, %v1558_v22  ;;  %v1559_v18 = vmul.f32 %v8127_v28, %v1543_v55  ;;  %v1483_v33 = vadd.f32 -1.4531521, %v1467_v63 }
 0x2e0   : > { %v1560_v37 = vmul.f32 %v8113_v48, %v1544_v2  ;;  %v1529_v46 = vmul.f32 %v8145_v41, %v1513_v27  ;;  %v1530_v57 = vmul.f32 %v8137_v1, %v1514_v60  ;;  %v1484_v50 = vadd.f32 -1.4531521, %v1468_v52  ;;  %v12292_v63 = vld [vmem:[#allocation44_spill] sm:$0xff] }
 0x2e1   : > { %v1589_v17 = vmul.f32 %v8099_v38, %v1573_v11  ;;  %v1590_v0 = vmul.f32 %v8090_v20, %v1574_v15  ;;  %v1575_v19 = vadd.f32 0.2548296, %v1559_v18  ;;  %v1499_v40 = vmul.f32 %v8170_v32, %v1483_v33  ;;  %v12293_v33 = vld [vmem:[#allocation52_spill] sm:$0xff] }
 0x2e2   : > { %v1576_v56 = vadd.f32 0.2548296, %v1560_v37  ;;  %v1545_v39 = vadd.f32 -0.28449672, %v1529_v46  ;;  %v1546_v61 = vadd.f32 -0.28449672, %v1530_v57  ;;  %v1500_v49 = vmul.f32 %v8161_v53, %v1484_v50 }
 0x2e3   : > { %v1669_v35 = vmul.f32 %v12288_v7, %v1589_v17  ;;  %v1670_v12 = vmul.f32 %v12289_v34, %v1590_v0  ;;  %v1591_v58 = vmul.f32 %v8127_v28, %v1575_v19  ;;  %v1515_v36 = vadd.f32 1.4214138, %v1499_v40  ;;  %v12294_v46 = vld [vmem:[#allocation59_spill] sm:$0xff]  ;;  %v12295_v0 = vld [vmem:[#allocation45_spill] sm:$0xff] }
 0x2e4   : > { %v1592_v24 = vmul.f32 %v8113_v48, %v1576_v56  ;;  %v1561_v38 = vmul.f32 %v8145_v41, %v1545_v39  ;;  %v1562_v20 = vmul.f32 %v8137_v1, %v1546_v61  ;;  %v1516_v25 = vadd.f32 1.4214138, %v1500_v49 }
 0x2e5   : > { %v1685_v43 = vsub.f32 1.0, %v1669_v35  ;;  %v1686_v4 = vsub.f32 1.0, %v1670_v12  ;;  %v1671_v54 = vmul.f32 %v12290_v14, %v1591_v58  ;;  %v1531_v51 = vmul.f32 %v8170_v32, %v1515_v36  ;;  %v12297_v35 = vld [vmem:[#allocation51_spill] sm:$0xff]  ;;  %v12298_v58 = vld [vmem:[#allocation50_spill] sm:$0xff] }
 0x2e6   : > { %v1672_v59 = vmul.f32 %v12291_v26, %v1592_v24  ;;  %v1577_v31 = vadd.f32 0.2548296, %v1561_v38  ;;  %v1578_v29 = vadd.f32 0.2548296, %v1562_v20  ;;  %v1532_v28 = vmul.f32 %v8161_v53, %v1516_v25  ;;  %v12299_v38 = vld [vmem:[#allocation53_spill] sm:$0xff] }
 0x2e7   : > { %v6575_v13 = vpop.eup %6574  ;;  %v1701_v48 = vmul.f32 %v1685_v43, %v8214_v16  ;;  %v1702_v21 = vmul.f32 %v1686_v4, %v12292_v63  ;;  %v1687_v22 = vsub.f32 1.0, %v1671_v54  ;;  %v1547_v55 = vadd.f32 -0.28449672, %v1531_v51  ;;  %v12300_v25 = vld [vmem:[#allocation49_spill] sm:$0xff] }
 0x2e8   : > { %v1688_v52 = vsub.f32 1.0, %v1672_v59  ;;  %v1593_v23 = vmul.f32 %v8145_v41, %v1577_v31  ;;  %v1594_v2 = vmul.f32 %v8137_v1, %v1578_v29  ;;  %v1548_v27 = vadd.f32 -0.28449672, %v1532_v28  ;;  %v12296_v1 = vld [vmem:[#allocation42_spill] sm:$0xff]  ;;  %v12301_v54 = vld [vmem:[#allocation41_spill] sm:$0xff]  ;;  %v12303_v29 = vld [vmem:[#allocation48_spill] sm:$0xff] }
 0x2e9   : > { %v1717_v60 = vadd.f32 1.0, %v1701_v48  ;;  %v1718_v11 = vadd.f32 1.0, %v1702_v21  ;;  %v1703_v15 = vmul.f32 %v1687_v22, %v8241_v5  ;;  %v1563_v18 = vmul.f32 %v8170_v32, %v1547_v55 }
 0x2ea   : > { %v1704_v37 = vmul.f32 %v1688_v52, %v12293_v33  ;;  %v1673_v16 = vmul.f32 %v8153_v42, %v1593_v23  ;;  %v1674_v57 = vmul.f32 %v12294_v46, %v1594_v2  ;;  %v1564_v50 = vmul.f32 %v8161_v53, %v1548_v27  ;;  %v12304_v2 = vld [vmem:[#allocation47_spill] sm:$0xff] }
 0x2eb   : > { %v6577_v17 = vpop.eup %6576  ;;  %v8300_v41 = vmul.f32 %v1717_v60, %v12295_v0  ;;  %v8303_v19 = vmul.f32 %v1718_v11, %v12296_v1  ;;  %v1719_v40 = vadd.f32 1.0, %v1703_v15  ;;  %v1579_v56 = vadd.f32 0.2548296, %v1563_v18  ;;  %v12305_v15 = vld [vmem:[#allocation46_spill] sm:$0xff] }
 0x2ec   : > { %v1720_v5 = vadd.f32 1.0, %v1704_v37  ;;  %v1689_v39 = vsub.f32 1.0, %v1673_v16  ;;  %v1690_v61 = vsub.f32 1.0, %v1674_v57  ;;  %v1580_v49 = vadd.f32 0.2548296, %v1564_v50  ;;  %v2000_v50 = vld [vmem:[#allocation11 + $0x18] sm:$0xff] }
 0x2ed   : > { %v1768_v42 = vsel %vm1743_vm12, %v8300_v41, 0.0  ;;  %v1771_v7 = vsel %vm1743_vm12, %v8303_v19, 0.0  ;;  %v8310_v34 = vmul.f32 %v1719_v40, %v12297_v35  ;;  %v1595_v12 = vmul.f32 %v8170_v32, %v1579_v56  ;;  %v12302_v32 = vld [vmem:[#allocation43_spill] sm:$0xff]  ;;  %6295 = vmatprep.subr.mxu0 %v2000_v50 }
 0x2ee   : > { %1769 = vadd.xlane.f32.xlu0 %v1768_v42  ;;  %1772 = vadd.xlane.f32.xlu1 %v1771_v7  ;;  %v8314_v36 = vmul.f32 %v1720_v5, %v12298_v58  ;;  %v1705_v24 = vmul.f32 %v1689_v39, %v8257_v6  ;;  %v1706_v20 = vmul.f32 %v1690_v61, %v12299_v38  ;;  %vm1355_vm1 = vcmp.ge.f32.partialorder %v12300_v25, 0.0 }
 0x2ef   : > { %v1774_v43 = vsel %vm1743_vm12, %v8310_v34, 0.0  ;;  %v1675_v4 = vmul.f32 %v6577_v17, %v1595_v12  ;;  %v1596_v14 = vmul.f32 %v8161_v53, %v1580_v49  ;;  %v1321_v51 = vmul.f32 0.5, %v12301_v54  ;;  %6296 = vmatpush3.msra.mxu0 %v2000_v50 }
 0x2f0   : > { %v1320_v26 = vmul.f32 0.5, %v12302_v32  ;;  %v1721_v59 = vadd.f32 1.0, %v1705_v24  ;;  %v1722_v31 = vadd.f32 1.0, %v1706_v20  ;;  %vm1356_vm2 = vcmp.ge.f32.partialorder %v12303_v29, 0.0 }
 0x2f1   : > { %v1777_v6 = vsel %vm1743_vm12, %v8314_v36, 0.0  ;;  %v1691_v28 = vsub.f32 1.0, %v1675_v4  ;;  %v1676_v48 = vmul.f32 %v6575_v13, %v1596_v14  ;;  %v1371_v53 = vsel %vm1355_vm1, 1.0, %v12282_v47 }
 0x2f2   : > { %1775 = vadd.xlane.f32.xlu0 %v1774_v43  ;;  %1778 = vadd.xlane.f32.xlu1 %v1777_v6  ;;  %v8327_v63 = vmul.f32 %v1721_v59, %v1320_v26  ;;  %v8329_v21 = vmul.f32 %v1722_v31, %v1321_v51  ;;  %v1372_v52 = vsel %vm1356_vm2, 1.0, %v12282_v47  ;;  %v1322_v27 = vmul.f32 0.5, %v12304_v2  ;;  %v9050_v47 = vld [vmem:[%s12115_s9 + $0x100] sm:$0xff] }
 0x2f3   : > { %v1707_v22 = vmul.f32 %v1691_v28, %v1371_v53  ;;  %v1692_v55 = vsub.f32 1.0, %v1676_v48  ;;  %v1323_v18 = vmul.f32 0.5, %v12305_v15  ;;  %12336 = vst [vmem:[#allocation71_spill] sm:$0xff] %v9050_v47 }
 0x2f4   : > { %v1780_v23 = vsel %vm1743_vm12, %v8327_v63, 0.0  ;;  %v1783_v13 = vsel %vm1743_vm12, %v8329_v21, 0.0 }
 0x2f5   : > { %v1723_v60 = vadd.f32 1.0, %v1707_v22  ;;  %v1708_v11 = vmul.f32 %v1692_v55, %v1372_v52  ;;  %v1999_v55 = vld [vmem:[#allocation11 + $0x10] sm:$0xff] }
 0x2f6   : > { %1781 = vadd.xlane.f32.xlu0 %v1780_v23  ;;  %1784 = vadd.xlane.f32.xlu1 %v1783_v13 }
 0x2f7   : > { %v8341_v33 = vmul.f32 %v1723_v60, %v1322_v27  ;;  %v1724_v37 = vadd.f32 1.0, %v1708_v11  ;;  %6297 = vmatprep.subr.mxu0 %v1999_v55 }
 0x2f8   : > { %6298 = vmatpush3.msra.mxu0 %v1999_v55  ;;  %v2204_v55 = vld [vmem:[%s12116_s10 + $0x18] sm:$0xff] }
 0x2f9   : > { %v1786_v16 = vsel %vm1743_vm12, %v8341_v33, 0.0  ;;  %v8345_v46 = vmul.f32 %v1724_v37, %v1323_v18 }
 0x2fa   : > { %1787 = vadd.xlane.f32.xlu0 %v1786_v16 }
 0x2fb   : > { %v1789_v57 = vsel %vm1743_vm12, %v8345_v46, 0.0 }
 0x2fc   : > { %1790 = vadd.xlane.f32.xlu1 %v1789_v57 }
 0x356   : > { %v1746_v17 = vpop.xlane.xlu0 %1745 }
 0x357   : > { %v1793_v0 = vmul.f32 0.03125, %v1746_v17 }
 0x359   : > { %v1752_v1 = vpop.xlane.xlu1 %1751  ;;  %v8350_v40 = vsub.f32 %v8182_v62, %v1793_v0 }
 0x35a   : > { %v1795_v56 = vmul.f32 0.03125, %v1752_v1  ;;  %v1749_v5 = vpop.xlane.xlu0 %1748 }
 0x35b   : > { %v1794_v61 = vmul.f32 0.03125, %v1749_v5  ;;  %v1825_v49 = vmul.f32 %v8350_v40, %v8350_v40 }
 0x35c   : > { %v8353_v39 = vsub.f32 %v8190_v30, %v1795_v56 }
 0x35d   : > { %v1755_v42 = vpop.xlane.xlu1 %1754  ;;  %v8358_v7 = vsub.f32 %v8193_v45, %v1794_v61  ;;  %v1841_v12 = vsel %vm1743_vm12, %v1825_v49, 0.0  ;;  %v1998_v61 = vld [vmem:[#allocation11 + $0x8] sm:$0xff] }
 0x35e   : > { %v1796_v35 = vmul.f32 0.03125, %v1755_v42  ;;  %v1827_v62 = vmul.f32 %v8353_v39, %v8353_v39  ;;  %1842 = vadd.xlane.f32.xlu0 %v1841_v12  ;;  %v1758_v58 = vpop.xlane.xlu0 %1757  ;;  %6299 = vmatprep.subr.mxu0 %v1998_v61 }
 0x35f   : > { %v1797_v30 = vmul.f32 0.03125, %v1758_v58  ;;  %v1826_v20 = vmul.f32 %v8358_v7, %v8358_v7  ;;  %6300 = vmatpush3.msra.mxu0 %v1998_v61 }
 0x360   : > { %v8364_v24 = vsub.f32 %v8208_v10, %v1796_v35  ;;  %v1847_v38 = vsel %vm1743_vm12, %v1827_v62, 0.0 }
 0x361   : > { %v1761_v25 = vpop.xlane.xlu1 %1760  ;;  %v8370_v45 = vsub.f32 %v8221_v44, %v1797_v30  ;;  %v1844_v4 = vsel %vm1743_vm12, %v1826_v20, 0.0 }
 0x362   : > { %v1798_v43 = vmul.f32 0.03125, %v1761_v25  ;;  %v1828_v14 = vmul.f32 %v8364_v24, %v8364_v24  ;;  %1848 = vadd.xlane.f32.xlu0 %v1847_v38  ;;  %1845 = vadd.xlane.f32.xlu1 %v1844_v4  ;;  %v1764_v10 = vpop.xlane.xlu0 %1763 }
 0x363   : > { %v1799_v51 = vmul.f32 0.03125, %v1764_v10  ;;  %v1829_v26 = vmul.f32 %v8370_v45, %v8370_v45 }
 0x364   : > { %v8376_v54 = vsub.f32 %v8228_v3, %v1798_v43  ;;  %v1850_v32 = vsel %vm1743_vm12, %v1828_v14, 0.0 }
 0x365   : > { %v1767_v44 = vpop.xlane.xlu1 %1766  ;;  %v8382_v59 = vsub.f32 %v8236_v9, %v1799_v51  ;;  %v1853_v29 = vsel %vm1743_vm12, %v1829_v26, 0.0  ;;  %v1997_v51 = vld [vmem:[#allocation11] sm:$0xff] }
 0x366   : > { %v1800_v31 = vmul.f32 0.03125, %v1767_v44  ;;  %v1830_v6 = vmul.f32 %v8376_v54, %v8376_v54  ;;  %1851 = vadd.xlane.f32.xlu1 %v1850_v32  ;;  %1854 = vadd.xlane.f32.xlu0 %v1853_v29  ;;  %v2215_v32 = vld [vmem:[%s12116_s10 + $0x70] sm:$0xff]  ;;  %v2214_v26 = vld [vmem:[%s12116_s10 + $0x68] sm:$0xff]  ;;  %v2213_v44 = vld [vmem:[%s12116_s10 + $0x60] sm:$0xff] }
 0x367   : > { %v1831_v48 = vmul.f32 %v8382_v59, %v8382_v59  ;;  %6301 = vmatprep.subr.mxu0 %v1997_v51  ;;  %v2211_v29 = vld [vmem:[%s12116_s10 + $0x50] sm:$0xff] }
 0x368   : > { %v8388_v3 = vsub.f32 %v8244_v8, %v1800_v31  ;;  %v1856_v28 = vsel %vm1743_vm12, %v1830_v6, 0.0  ;;  %6302 = vmatpush3.msra.mxu0 %v1997_v51  ;;  %v2212_v31 = vld [vmem:[%s12116_s10 + $0x58] sm:$0xff]  ;;  %v2210_v6 = vld [vmem:[%s12116_s10 + $0x48] sm:$0xff] }
 0x369   : > { %v1859_v53 = vsel %vm1743_vm12, %v1831_v48, 0.0  ;;  %v2208_v48 = vld [vmem:[%s12116_s10 + $0x38] sm:$0xff] }
 0x36a   : > { %v1832_v9 = vmul.f32 %v8388_v3, %v8388_v3  ;;  %1857 = vadd.xlane.f32.xlu1 %v1856_v28  ;;  %1860 = vadd.xlane.f32.xlu0 %v1859_v53  ;;  %v2209_v28 = vld [vmem:[%s12116_s10 + $0x40] sm:$0xff]  ;;  %v2207_v53 = vld [vmem:[%s12116_s10 + $0x30] sm:$0xff] }
 0x36c   : > { %v1862_v22 = vsel %vm1743_vm12, %v1832_v9, 0.0  ;;  %v2206_v9 = vld [vmem:[%s12116_s10 + $0x28] sm:$0xff] }
 0x36e   : > { %1863 = vadd.xlane.f32.xlu1 %v1862_v22  ;;  %v2205_v22 = vld [vmem:[%s12116_s10 + $0x20] sm:$0xff] }
 0x377   : > { %v1770_v8 = vpop.xlane.xlu0 %1769  ;;  %v1773_v52 = vpop.xlane.xlu1 %1772 }
 0x378   : > { %v1801_v23 = vmul.f32 0.03125, %v1770_v8  ;;  %v1802_v2 = vmul.f32 0.03125, %v1773_v52  ;;  %v2203_v8 = vld [vmem:[%s12116_s10 + $0x10] sm:$0xff] }
 0x37a   : > { %v8398_v27 = vsub.f32 %v8300_v41, %v1801_v23  ;;  %v8401_v13 = vsub.f32 %v8303_v19, %v1802_v2 }
 0x37b   : > { %v1776_v60 = vpop.xlane.xlu0 %1775  ;;  %v1779_v11 = vpop.xlane.xlu1 %1778 }
 0x37c   : > { %v1803_v15 = vmul.f32 0.03125, %v1776_v60  ;;  %v1804_v18 = vmul.f32 0.03125, %v1779_v11  ;;  %v1833_v37 = vmul.f32 %v8398_v27, %v8398_v27  ;;  %v1834_v16 = vmul.f32 %v8401_v13, %v8401_v13 }
 0x37e   : > { %v8408_v57 = vsub.f32 %v8310_v34, %v1803_v15  ;;  %v8411_v50 = vsub.f32 %v8314_v36, %v1804_v18  ;;  %v1865_v41 = vsel %vm1743_vm12, %v1833_v37, 0.0  ;;  %v1868_v19 = vsel %vm1743_vm12, %v1834_v16, 0.0 }
 0x37f   : > { %1866 = vadd.xlane.f32.xlu0 %v1865_v41  ;;  %v1782_v17 = vpop.xlane.xlu0 %1781  ;;  %v1785_v0 = vpop.xlane.xlu1 %1784  ;;  %1869 = vadd.xlane.f32.xlu1 %v1868_v19 }
 0x380   : > { %v1805_v1 = vmul.f32 0.03125, %v1782_v17  ;;  %v1806_v56 = vmul.f32 0.03125, %v1785_v0  ;;  %v1835_v5 = vmul.f32 %v8408_v57, %v8408_v57  ;;  %v1836_v34 = vmul.f32 %v8411_v50, %v8411_v50 }
 0x382   : > { %v8420_v36 = vsub.f32 %v8327_v63, %v1805_v1  ;;  %v8423_v49 = vsub.f32 %v8329_v21, %v1806_v56  ;;  %v1871_v42 = vsel %vm1743_vm12, %v1835_v5, 0.0  ;;  %v1874_v35 = vsel %vm1743_vm12, %v1836_v34, 0.0 }
 0x383   : > { %1872 = vadd.xlane.f32.xlu0 %v1871_v42  ;;  %v1788_v12 = vpop.xlane.xlu0 %1787  ;;  %1875 = vadd.xlane.f32.xlu1 %v1874_v35 }
 0x384   : > { %v1807_v62 = vmul.f32 0.03125, %v1788_v12  ;;  %v1837_v58 = vmul.f32 %v8420_v36, %v8420_v36  ;;  %v1838_v30 = vmul.f32 %v8423_v49, %v8423_v49 }
 0x385   : > { %v1791_v63 = vpop.xlane.xlu1 %1790 }
 0x386   : > { %v8432_v21 = vsub.f32 %v8341_v33, %v1807_v62  ;;  %v1808_v38 = vmul.f32 0.03125, %v1791_v63  ;;  %v1877_v20 = vsel %vm1743_vm12, %v1837_v58, 0.0  ;;  %v1880_v25 = vsel %vm1743_vm12, %v1838_v30, 0.0  ;;  %v8487_v63 = vld [vmem:[#allocation8] ss:$0 sm:$0xff] }
 0x387   : > { %1878 = vadd.xlane.f32.xlu0 %v1877_v20  ;;  %1881 = vadd.xlane.f32.xlu1 %v1880_v25  ;;  %v8490_v25 = vld [vmem:[#allocation10] ss:$0 sm:$0xff] }
 0x388   : > { %v8437_v43 = vsub.f32 %v8345_v46, %v1808_v38  ;;  %v1839_v4 = vmul.f32 %v8432_v21, %v8432_v21  ;;  %v2216_v46 = vld [vmem:[%s12116_s10 + $0x78] sm:$0xff] }
 0x389   : > { %2295 = vmatprep.subr.mxu1 %v2216_v46 }
 0x38a   : > { %v1883_v14 = vsel %vm1743_vm12, %v1839_v4, 0.0  ;;  %v1840_v10 = vmul.f32 %v8437_v43, %v8437_v43  ;;  %2296 = vmatpush1.msra.mxu1 %v2215_v32 }
 0x38b   : > { %1884 = vadd.xlane.f32.xlu0 %v1883_v14  ;;  %2297 = vmatprep.subr.mxu1 %v2214_v26 }
 0x38c   : > { %v1886_v33 = vsel %vm1743_vm12, %v1840_v10, 0.0  ;;  %2298 = vmatpush1.msra.mxu1 %v2213_v44 }
 0x38d   : > { %1887 = vadd.xlane.f32.xlu1 %v1886_v33  ;;  %2299 = vmatprep.subr.mxu1 %v2212_v31 }
 0x38e   : > { %2300 = vmatpush1.msra.mxu1 %v2211_v29 }
 0x38f   : > { %2301 = vmatprep.subr.mxu1 %v2210_v6 }
 0x390   : > { %2302 = vmatpush1.msra.mxu1 %v2209_v28 }
 0x391   : > { %2303 = vmatprep.subr.mxu1 %v2208_v48 }
 0x392   : > { %2304 = vmatpush1.msra.mxu1 %v2207_v53 }
 0x393   : > { %2305 = vmatprep.subr.mxu1 %v2206_v9 }
 0x394   : > { %2306 = vmatpush1.msra.mxu1 %v2205_v22 }
 0x395   : > { %2307 = vmatprep.subr.mxu1 %v2204_v55 }
 0x396   : > { %2308 = vmatpush1.msra.mxu1 %v2203_v8 }
 0x3e7   : > { %v1843_v52 = vpop.xlane.xlu0 %1842 }
 0x3e8   : > { %v1889_v23 = vmul.f32 0.03125, %v1843_v52 }
 0x3ea   : > { %v1905_v2 = vadd.f32 1e-05, %v1889_v23 }
 0x3eb   : > { %v1846_v60 = vpop.xlane.xlu1 %1845  ;;  %v1849_v11 = vpop.xlane.xlu0 %1848 }
 0x3ec   : > { %6578 = vrsqrt.f32 %v1905_v2  ;;  %v1890_v15 = vmul.f32 0.03125, %v1846_v60  ;;  %v1891_v18 = vmul.f32 0.03125, %v1849_v11 }
 0x3ee   : > { %v1906_v37 = vadd.f32 1e-05, %v1890_v15  ;;  %v1907_v16 = vadd.f32 1e-05, %v1891_v18 }
 0x3ef   : > { %v1852_v41 = vpop.xlane.xlu1 %1851  ;;  %v1855_v19 = vpop.xlane.xlu0 %1854 }
 0x3f0   : > { %6580 = vrsqrt.f32 %v1906_v37  ;;  %v1892_v17 = vmul.f32 0.03125, %v1852_v41  ;;  %v1893_v0 = vmul.f32 0.03125, %v1855_v19 }
 0x3f1   : > { %6582 = vrsqrt.f32 %v1907_v16 }
 0x3f2   : > { %v1908_v1 = vadd.f32 1e-05, %v1892_v17  ;;  %v1909_v56 = vadd.f32 1e-05, %v1893_v0 }
 0x3f3   : > { %v1858_v5 = vpop.xlane.xlu1 %1857  ;;  %v1861_v34 = vpop.xlane.xlu0 %1860 }
 0x3f4   : > { %6584 = vrsqrt.f32 %v1908_v1  ;;  %v1894_v61 = vmul.f32 0.03125, %v1858_v5  ;;  %v1895_v42 = vmul.f32 0.03125, %v1861_v34 }
 0x3f5   : > { %6586 = vrsqrt.f32 %v1909_v56 }
 0x3f6   : > { %v1910_v35 = vadd.f32 1e-05, %v1894_v61  ;;  %v1911_v12 = vadd.f32 1e-05, %v1895_v42 }
 0x3f7   : > { %v1864_v62 = vpop.xlane.xlu1 %1863 }
 0x3f8   : > { %6588 = vrsqrt.f32 %v1910_v35  ;;  %v1896_v58 = vmul.f32 0.03125, %v1864_v62 }
 0x3f9   : > { %v6579_v30 = vpop.eup %6578  ;;  %6590 = vrsqrt.f32 %v1911_v12 }
 0x3fa   : > { %v1912_v38 = vadd.f32 1e-05, %v1896_v58  ;;  %v1937_v20 = vmul.f32 %v6579_v30, %v8350_v40 }
 0x3fc   : > { %6592 = vrsqrt.f32 %v1912_v38  ;;  %v1959_v4 = vmul.f32 %v8487_v63, %v1937_v20 }
 0x3fd   : > { %v6581_v14 = vpop.eup %6580 }
 0x3fe   : > { %v6583_v10 = vpop.eup %6582  ;;  %v1938_v33 = vmul.f32 %v6581_v14, %v8358_v7  ;;  %v1981_v51 = vadd.f32 %v8490_v25, %v1959_v4 }
 0x3ff   : > { %v1939_v46 = vmul.f32 %v6583_v10, %v8353_v39 }
 0x400   : > { %v1960_v32 = vmul.f32 %v8487_v63, %v1938_v33  ;;  %6303 = vmatprep.mubr.msk.f32.mxu0 %vm1743_vm12, %v1981_v51 }
 0x401   : > { %v6585_v26 = vpop.eup %6584  ;;  %v1961_v40 = vmul.f32 %v8487_v63, %v1939_v46 }
 0x402   : > { %v6587_v44 = vpop.eup %6586  ;;  %v1982_v31 = vadd.f32 %v8490_v25, %v1960_v32  ;;  %v1940_v29 = vmul.f32 %v6585_v26, %v8364_v24 }
 0x403   : > { %v1983_v6 = vadd.f32 %v8490_v25, %v1961_v40  ;;  %v1941_v7 = vmul.f32 %v6587_v44, %v8370_v45 }
 0x404   : > { %6304 = vmatmul.mubr.msk.f32.vlgmr.msra.gmra.mxu0 %vm1743_vm12, %v1982_v31  ;;  %v1962_v39 = vmul.f32 %v8487_v63, %v1940_v29 }
 0x405   : > { %v6589_v28 = vpop.eup %6588  ;;  %6306 = vmatprep.mubr.msk.f32.mxu0 %vm1743_vm12, %v1983_v6  ;;  %v1963_v48 = vmul.f32 %v8487_v63, %v1941_v7 }
 0x406   : > { %v6591_v53 = vpop.eup %6590  ;;  %v1984_v9 = vadd.f32 %v8490_v25, %v1962_v39  ;;  %v1942_v22 = vmul.f32 %v6589_v28, %v8376_v54 }
 0x407   : > { %v1985_v8 = vadd.f32 %v8490_v25, %v1963_v48  ;;  %v1943_v45 = vmul.f32 %v6591_v53, %v8382_v59 }
 0x408   : > { %v1867_v55 = vpop.xlane.xlu0 %1866  ;;  %v1870_v24 = vpop.xlane.xlu1 %1869  ;;  %6307 = vmatmul.mubr.msk.f32.gmra.mxu0 %vm1743_vm12, %v1984_v9  ;;  %v1964_v2 = vmul.f32 %v8487_v63, %v1942_v22 }
 0x409   : > { %v1897_v52 = vmul.f32 0.03125, %v1867_v55  ;;  %v1898_v23 = vmul.f32 0.03125, %v1870_v24  ;;  %v6593_v60 = vpop.eup %6592  ;;  %6309 = vmatprep.mubr.msk.f32.mxu0 %vm1743_vm12, %v1985_v8  ;;  %v1965_v11 = vmul.f32 %v8487_v63, %v1943_v45 }
 0x40a   : > { %v1986_v54 = vadd.f32 %v8490_v25, %v1964_v2  ;;  %v1944_v37 = vmul.f32 %v6593_v60, %v8388_v3  ;;  %v7533_v60 = vmov 0.0  }
 0x40b   : > { %v1913_v15 = vadd.f32 1e-05, %v1897_v52  ;;  %v1914_v18 = vadd.f32 1e-05, %v1898_v23  ;;  %v1987_v59 = vadd.f32 %v8490_v25, %v1965_v11  ;;  %2343 = vmatprep.mubr.f32.mxu1 %v7533_v60 }
 0x40c   : > { %v1873_v16 = vpop.xlane.xlu0 %1872  ;;  %v1876_v41 = vpop.xlane.xlu1 %1875  ;;  %6310 = vmatmul.mubr.msk.f32.gmra.mxu0 %vm1743_vm12, %v1986_v54  ;;  %v1966_v0 = vmul.f32 %v8487_v63, %v1944_v37 }
 0x40d   : > { %6594 = vrsqrt.f32 %v1913_v15  ;;  %v1899_v19 = vmul.f32 0.03125, %v1873_v16  ;;  %v1900_v17 = vmul.f32 0.03125, %v1876_v41  ;;  %6312 = vmatprep.mubr.msk.f32.mxu0 %vm1743_vm12, %v1987_v59 }
 0x40e   : > { %6596 = vrsqrt.f32 %v1914_v18  ;;  %v1988_v5 = vadd.f32 %v8490_v25, %v1966_v0 }
 0x40f   : > { %v1915_v1 = vadd.f32 1e-05, %v1899_v19  ;;  %v1916_v56 = vadd.f32 1e-05, %v1900_v17 }
 0x410   : > { %v1879_v34 = vpop.xlane.xlu0 %1878  ;;  %v1882_v3 = vpop.xlane.xlu1 %1881  ;;  %6313 = vmatmul.mubr.msk.f32.gmra.mxu0 %vm1743_vm12, %v1988_v5 }
 0x411   : > { %6598 = vrsqrt.f32 %v1915_v1  ;;  %v1901_v61 = vmul.f32 0.03125, %v1879_v34  ;;  %v1902_v42 = vmul.f32 0.03125, %v1882_v3  ;;  %v8593_v3 = vld [vmem:[%s12115_s9 + $0xf8] sm:$0xff] }
 0x412   : > { %6600 = vrsqrt.f32 %v1916_v56  ;;  %2440 = vmatprep.subr.mxu0 %v8593_v3 }
 0x413   : > { %v1917_v35 = vadd.f32 1e-05, %v1901_v61  ;;  %v1918_v12 = vadd.f32 1e-05, %v1902_v42  ;;  %v8598_v61 = vld [vmem:[%s12115_s9 + $0xf0] sm:$0xff]  ;;  %v8603_v42 = vld [vmem:[%s12115_s9 + $0xe8] sm:$0xff] }
 0x414   : > { %v1885_v62 = vpop.xlane.xlu0 %1884  ;;  %2441 = vmatpush1.msra.mxu0 %v8598_v61 }
 0x415   : > { %6602 = vrsqrt.f32 %v1917_v35  ;;  %v1903_v58 = vmul.f32 0.03125, %v1885_v62  ;;  %v8610_v35 = vld [vmem:[%s12115_s9 + $0xe0] sm:$0xff]  ;;  %2442 = vmatprep.subr.mxu0 %v8603_v42  ;;  %v8625_v62 = vld [vmem:[%s12115_s9 + $0xd0] sm:$0xff] }
 0x416   : > { %6604 = vrsqrt.f32 %v1918_v12  ;;  %v1888_v30 = vpop.xlane.xlu1 %1887  ;;  %2443 = vmatpush1.msra.mxu0 %v8610_v35  ;;  %v8620_v12 = vld [vmem:[%s12115_s9 + $0xd8] sm:$0xff] }
 0x417   : > { %v1919_v38 = vadd.f32 1e-05, %v1903_v58  ;;  %v1904_v20 = vmul.f32 0.03125, %v1888_v30  ;;  %v8630_v58 = vld [vmem:[%s12115_s9 + $0xc8] sm:$0xff]  ;;  %2444 = vmatprep.subr.mxu0 %v8620_v12 }
 0x418   : > { %2445 = vmatpush1.msra.mxu0 %v8625_v62 }
 0x419   : > { %6606 = vrsqrt.f32 %v1919_v38  ;;  %v1920_v4 = vadd.f32 1e-05, %v1904_v20  ;;  %v8638_v38 = vld [vmem:[%s12115_s9 + $0xc0] sm:$0xff]  ;;  %2446 = vmatprep.subr.mxu0 %v8630_v58 }
 0x41a   : > { %v6595_v14 = vpop.eup %6594  ;;  %2447 = vmatpush1.msra.mxu0 %v8638_v38 }
 0x41b   : > { %v6597_v10 = vpop.eup %6596  ;;  %6608 = vrsqrt.f32 %v1920_v4  ;;  %v1945_v33 = vmul.f32 %v6595_v14, %v8398_v27 }
 0x41c   : > { %v1946_v51 = vmul.f32 %v6597_v10, %v8401_v13 }
 0x41d   : > { %v1967_v46 = vmul.f32 %v8487_v63, %v1945_v33  ;;  %v8652_v33 = vld [vmem:[%s12115_s9 + $0xb8] sm:$0xff] }
 0x41e   : > { %v6599_v32 = vpop.eup %6598  ;;  %v1968_v26 = vmul.f32 %v8487_v63, %v1946_v51  ;;  %v8657_v51 = vld [vmem:[%s12115_s9 + $0xb0] sm:$0xff]  ;;  %2448 = vmatprep.subr.mxu0 %v8652_v33 }
 0x41f   : > { %v6601_v40 = vpop.eup %6600  ;;  %v1989_v44 = vadd.f32 %v8490_v25, %v1967_v46  ;;  %v1947_v31 = vmul.f32 %v6599_v32, %v8408_v57  ;;  %v8665_v32 = vld [vmem:[%s12115_s9 + $0xa8] sm:$0xff]  ;;  %2449 = vmatpush1.msra.mxu0 %v8657_v51 }
 0x420   : > { %v1990_v29 = vadd.f32 %v8490_v25, %v1968_v26  ;;  %v1948_v6 = vmul.f32 %v6601_v40, %v8411_v50  ;;  %2450 = vmatprep.subr.mxu0 %v8665_v32 }
 0x421   : > { %6315 = vmatprep.mubr.msk.f32.mxu0 %vm1743_vm12, %v1989_v44  ;;  %v1969_v27 = vmul.f32 %v8487_v63, %v1947_v31  ;;  %v8675_v44 = vld [vmem:[%s12115_s9 + $0xa0] sm:$0xff] }
 0x422   : > { %v6603_v7 = vpop.eup %6602  ;;  %6316 = vmatmul.mubr.msk.f32.gmra.mxu0 %vm1743_vm12, %v1990_v29  ;;  %v1970_v13 = vmul.f32 %v8487_v63, %v1948_v6  ;;  %v8682_v29 = vld [vmem:[%s12115_s9 + $0x98] sm:$0xff] }
 0x423   : > { %v6605_v39 = vpop.eup %6604  ;;  %v1991_v28 = vadd.f32 %v8490_v25, %v1969_v27  ;;  %v1949_v48 = vmul.f32 %v6603_v7, %v8420_v36  ;;  %v8690_v27 = vld [vmem:[%s12115_s9 + $0x90] sm:$0xff]  ;;  %2451 = vmatpush1.msra.mxu0 %v8675_v44 }
 0x424   : > { %v1992_v57 = vadd.f32 %v8490_v25, %v1970_v13  ;;  %v1950_v53 = vmul.f32 %v6605_v39, %v8423_v49  ;;  %2452 = vmatprep.subr.mxu0 %v8682_v29  ;;  %v8700_v39 = vld [vmem:[%s12115_s9 + $0x88] sm:$0xff] }
 0x425   : > { %6318 = vmatprep.mubr.msk.f32.mxu0 %vm1743_vm12, %v1991_v28  ;;  %v1971_v50 = vmul.f32 %v8487_v63, %v1949_v48  ;;  %2453 = vmatpush1.msra.mxu0 %v8690_v27  ;;  %v8707_v28 = vld [vmem:[%s12115_s9 + $0x80] sm:$0xff] }
 0x426   : > { %v6607_v9 = vpop.eup %6606  ;;  %6319 = vmatmul.mubr.msk.f32.gmra.mxu0 %vm1743_vm12, %v1992_v57  ;;  %v1972_v22 = vmul.f32 %v8487_v63, %v1950_v53  ;;  %2454 = vmatprep.subr.mxu0 %v8700_v39  ;;  %v8718_v53 = vld [vmem:[%s12115_s9 + $0x78] sm:$0xff] }
 0x427   : > { %v1993_v55 = vadd.f32 %v8490_v25, %v1971_v50  ;;  %v1951_v24 = vmul.f32 %v6607_v9, %v8432_v21  ;;  %v2202_v21 = vld [vmem:[%s12116_s10 + $0x8] sm:$0xff]  ;;  %2455 = vmatpush1.msra.mxu0 %v8707_v28  ;;  %v8725_v9 = vld [vmem:[%s12115_s9 + $0x70] sm:$0xff] }
 0x428   : > { %v6609_v8 = vpop.eup %6608  ;;  %v1994_v36 = vadd.f32 %v8490_v25, %v1972_v22  ;;  %2309 = vmatprep.subr.mxu1 %v2202_v21  ;;  %2456 = vmatprep.subr.mxu0 %v8718_v53  ;;  %v8798_v21 = vld [vmem:[%s12115_s9 + $0x20] sm:$0xff] }
 0x429   : > { %6321 = vmatprep.mubr.msk.f32.mxu0 %vm1743_vm12, %v1993_v55  ;;  %v1973_v49 = vmul.f32 %v8487_v63, %v1951_v24  ;;  %v1952_v45 = vmul.f32 %v6609_v8, %v8437_v43  ;;  %v2201_v43 = vld [vmem:[%s12116_s10] sm:$0xff]  ;;  %v8735_v55 = vld [vmem:[%s12115_s9 + $0x68] sm:$0xff]  ;;  %2457 = vmatpush1.msra.mxu0 %v8725_v9  ;;  %v8749_v8 = vld [vmem:[%s12115_s9 + $0x58] sm:$0xff] }
 0x42a   : > { %6322 = vmatmul.mubr.msk.f32.gmra.mxu0 %vm1743_vm12, %v1994_v36  ;;  %2310 = vmatpush1.msra.mxu1 %v2201_v43  ;;  %v8742_v24 = vld [vmem:[%s12115_s9 + $0x60] sm:$0xff]  ;;  %v8755_v36 = vld [vmem:[%s12115_s9 + $0x50] sm:$0xff]  ;;  %v8804_v43 = vld [vmem:[%s12115_s9 + $0x18] sm:$0xff] }
 0x42b   : > { %v1995_v52 = vadd.f32 %v8490_v25, %v1973_v49  ;;  %v1974_v23 = vmul.f32 %v8487_v63, %v1952_v45  ;;  %v8562_v63 = vld [vmem:[#allocation13] ss:$0 sm:$0xff]  ;;  %2665 = vmatprep.subr.mxu1 %v8593_v3  ;;  %2458 = vmatprep.subr.mxu0 %v8735_v55  ;;  %v8770_v45 = vld [vmem:[%s12115_s9 + $0x40] sm:$0xff] }
 0x42c   : > { %2459 = vmatpush1.msra.mxu0 %v8742_v24  ;;  %v8763_v49 = vld [vmem:[%s12115_s9 + $0x48] sm:$0xff] }
 0x42d   : > { %6324 = vmatprep.mubr.msk.f32.mxu0 %vm1743_vm12, %v1995_v52  ;;  %v1996_v2 = vadd.f32 %v8490_v25, %v1974_v23  ;;  %2460 = vmatprep.subr.mxu0 %v8749_v8  ;;  %v8776_v52 = vld [vmem:[%s12115_s9 + $0x38] sm:$0xff]  ;;  %v8783_v23 = vld [vmem:[%s12115_s9 + $0x30] sm:$0xff] }
 0x42e   : > { %2461 = vmatpush1.msra.mxu0 %v8755_v36 }
 0x42f   : > { %6325 = vmatmul.mubr.msk.f32.gmra.mxu0 %vm1743_vm12, %v1996_v2  ;;  %2462 = vmatprep.subr.mxu0 %v8763_v49  ;;  %v8791_v2 = vld [vmem:[%s12115_s9 + $0x28] sm:$0xff] }
 0x430   : > { %2463 = vmatpush1.msra.mxu0 %v8770_v45 }
 0x431   : > { %2464 = vmatprep.subr.mxu0 %v8776_v52 }
 0x432   : > { %2465 = vmatpush1.msra.mxu0 %v8783_v23 }
 0x433   : > { %2466 = vmatprep.subr.mxu0 %v8791_v2 }
 0x434   : > { %2467 = vmatpush1.msra.mxu0 %v8798_v21 }
 0x435   : > { %2468 = vmatprep.subr.mxu0 %v8804_v43 }
 0x4c4   : > { %v6305_v11 = vpop.f32.mrf.mxu0 }
 0x4c5   : > { %v2128_v25 = vadd.f32 %v6305_v11, %v8562_v63  ;;  %v8819_v11 = vld [vmem:[%s12115_s9 + $0x8] sm:$0xff] }
 0x4c6   : > { %v2122_v15 = vpop.f32.mrf.mxu0 }
 0x4c7   : > { %v2123_v18 = vadd.f32 %v8562_v63, %v2122_v15  ;;  %5681 = vrot.lane.b32.xlu1 %v2128_v25, %s7534_s26  ;;  %v8832_v15 = vld [vmem:[%s12115_s9 + $0x1f8] sm:$0xff] }
 0x4c8   : > { %v6308_v54 = vpop.f32.mrf.mxu0 }
 0x4c9   : > { %v2138_v37 = vadd.f32 %v6308_v54, %v8562_v63  ;;  %5679 = vrot.lane.b32.xlu0 %v2123_v18, %s7534_s26  ;;  %6044 = vmatmul.mubr.msk.f32.vlgmr.msra.gmra.mxu1 %vm906_vm0, %v2123_v18  ;;  %v8839_v18 = vld [vmem:[%s12115_s9 + $0x1f0] sm:$0xff]  ;;  %v8847_v54 = vld [vmem:[%s12115_s9 + $0x1e8] sm:$0xff] }
 0x4ca   : > { %v2132_v16 = vpop.f32.mrf.mxu0  ;;  %2349 = vmatprep.mubr.f32.mxu1 %v7533_v60  ;;  %2666 = vmatpush1.msra.mxu1 %v8598_v61  ;;  %12306 = vst [vmem:[#allocation56_spill] sm:$0xff] %v8839_v18  ;;  %12307 = vst [vmem:[#allocation55_spill] sm:$0xff] %v8847_v54 }
 0x4cb   : > { %5685 = vrot.lane.b32.xlu1 %v2138_v37, %s7534_s26  ;;  %v2133_v59 = vadd.f32 %v8562_v63, %v2132_v16  ;;  %2667 = vmatprep.subr.mxu1 %v8603_v42  ;;  %v8860_v16 = vld [vmem:[%s12115_s9 + $0x1d8] sm:$0xff] }
 0x4cc   : > { %v6311_v41 = vpop.f32.mrf.mxu0  ;;  %2668 = vmatpush1.msra.mxu1 %v8610_v35  ;;  %12309 = vst [vmem:[#allocation58_spill] sm:$0xff] %v8860_v16 }
 0x4cd   : > { %6045 = vmatmul.mubr.msk.f32.gmra.mxu1 %vm906_vm0, %v2128_v25  ;;  %v2148_v1 = vadd.f32 %v6311_v41, %v8562_v63  ;;  %2669 = vmatprep.subr.mxu1 %v8620_v12  ;;  %v8826_v25 = vld [vmem:[%s12115_s9] sm:$0xff]  ;;  %v8876_v41 = vld [vmem:[%s12115_s9 + $0x1c8] sm:$0xff] }
 0x4ce   : > { %v2142_v19 = vpop.f32.mrf.mxu0  ;;  %2355 = vmatprep.mubr.f32.mxu1 %v7533_v60  ;;  %2670 = vmatpush1.msra.mxu1 %v8625_v62  ;;  %12311 = vst [vmem:[#allocation44_spill] sm:$0xff] %v8876_v41 }
 0x4cf   : > { %v2143_v17 = vadd.f32 %v8562_v63, %v2142_v19  ;;  %5683 = vrot.lane.b32.xlu1 %v2133_v59, %s7534_s26  ;;  %2671 = vmatprep.subr.mxu1 %v8630_v58  ;;  %v8889_v19 = vld [vmem:[%s12115_s9 + $0x1b8] sm:$0xff] }
 0x4d0   : > { %v6314_v0 = vpop.f32.mrf.mxu0  ;;  %2672 = vmatpush1.msra.mxu1 %v8638_v38  ;;  %12313 = vst [vmem:[#allocation59_spill] sm:$0xff] %v8889_v19 }
 0x4d1   : > { %6046 = vmatmul.mubr.msk.f32.gmra.mxu1 %vm906_vm0, %v2133_v59  ;;  %5687 = vrot.lane.b32.xlu0 %v2143_v17, %s7534_s26  ;;  %v2158_v34 = vadd.f32 %v6314_v0, %v8562_v63  ;;  %v8882_v59 = vld [vmem:[%s12115_s9 + $0x1c0] sm:$0xff]  ;;  %v8903_v0 = vld [vmem:[%s12115_s9 + $0x1a8] sm:$0xff] }
 0x4d2   : > { %v2152_v56 = vpop.f32.mrf.mxu0  ;;  %2361 = vmatprep.mubr.f32.mxu1 %v7533_v60  ;;  %2673 = vmatprep.subr.mxu1 %v8652_v33  ;;  %12312 = vst [vmem:[#allocation52_spill] sm:$0xff] %v8882_v59  ;;  %12315 = vst [vmem:[#allocation42_spill] sm:$0xff] %v8903_v0 }
 0x4d3   : > { %v2153_v5 = vadd.f32 %v8562_v63, %v2152_v56  ;;  %5689 = vrot.lane.b32.xlu1 %v2148_v1, %s7534_s26  ;;  %2674 = vmatpush1.msra.mxu1 %v8657_v51  ;;  %v8917_v56 = vld [vmem:[%s12115_s9 + $0x198] sm:$0xff] }
 0x4d4   : > { %2675 = vmatprep.subr.mxu1 %v8665_v32  ;;  %12317 = vst [vmem:[#allocation50_spill] sm:$0xff] %v8917_v56 }
 0x4d5   : > { %6047 = vmatmul.mubr.msk.f32.gmra.mxu1 %vm906_vm0, %v2138_v37  ;;  %5691 = vrot.lane.b32.xlu0 %v2153_v5, %s7534_s26  ;;  %v8854_v37 = vld [vmem:[%s12115_s9 + $0x1e0] sm:$0xff] }
 0x4d6   : > { %2367 = vmatprep.mubr.f32.mxu1 %v7533_v60  ;;  %2676 = vmatpush1.msra.mxu1 %v8675_v44  ;;  %12308 = vst [vmem:[#allocation54_spill] sm:$0xff] %v8854_v37 }
 0x4d7   : > { %5693 = vrot.lane.b32.xlu1 %v2158_v34, %s7534_s26  ;;  %2677 = vmatprep.subr.mxu1 %v8682_v29 }
 0x4d8   : > { %2678 = vmatpush1.msra.mxu1 %v8690_v27 }
 0x4d9   : > { %6048 = vmatmul.mubr.msk.f32.gmra.mxu1 %vm906_vm0, %v2143_v17  ;;  %2679 = vmatprep.subr.mxu1 %v8700_v39  ;;  %v8896_v17 = vld [vmem:[%s12115_s9 + $0x1b0] sm:$0xff] }
 0x4da   : > { %2373 = vmatprep.mubr.f32.mxu1 %v7533_v60  ;;  %2680 = vmatpush1.msra.mxu1 %v8707_v28  ;;  %12314 = vst [vmem:[#allocation45_spill] sm:$0xff] %v8896_v17 }
 0x4db   : > { %2681 = vmatprep.subr.mxu1 %v8718_v53 }
 0x4dc   : > { %2682 = vmatpush1.msra.mxu1 %v8725_v9 }
 0x4dd   : > { %6049 = vmatmul.mubr.msk.f32.gmra.mxu1 %vm906_vm0, %v2148_v1  ;;  %2683 = vmatprep.subr.mxu1 %v8735_v55  ;;  %v8910_v1 = vld [vmem:[%s12115_s9 + $0x1a0] sm:$0xff] }
 0x4de   : > { %2379 = vmatprep.mubr.f32.mxu1 %v7533_v60  ;;  %2684 = vmatpush1.msra.mxu1 %v8742_v24  ;;  %12316 = vst [vmem:[#allocation51_spill] sm:$0xff] %v8910_v1 }
 0x4df   : > { %2685 = vmatprep.subr.mxu1 %v8749_v8 }
 0x4e0   : > { %2686 = vmatpush1.msra.mxu1 %v8755_v36 }
 0x4e1   : > { %6050 = vmatmul.mubr.msk.f32.gmra.mxu1 %vm906_vm0, %v2153_v5  ;;  %v8924_v5 = vld [vmem:[%s12115_s9 + $0x190] sm:$0xff]  ;;  %2687 = vmatprep.subr.mxu1 %v8763_v49 }
 0x4e2   : > { %v6317_v30 = vpop.f32.mrf.mxu0  ;;  %2385 = vmatprep.mubr.f32.mxu1 %v7533_v60  ;;  %12318 = vst [vmem:[#allocation53_spill] sm:$0xff] %v8924_v5  ;;  %2688 = vmatpush1.msra.mxu1 %v8770_v45 }
 0x4e3   : > { %v2168_v20 = vadd.f32 %v6317_v30, %v8562_v63  ;;  %v8938_v30 = vld [vmem:[%s12115_s9 + $0x180] sm:$0xff]  ;;  %2689 = vmatprep.subr.mxu1 %v8776_v52 }
 0x4e4   : > { %v2162_v4 = vpop.f32.mrf.mxu0  ;;  %12320 = vst [vmem:[#allocation41_spill] sm:$0xff] %v8938_v30  ;;  %2690 = vmatpush1.msra.mxu1 %v8783_v23 }
 0x4e5   : > { %v2163_v14 = vadd.f32 %v8562_v63, %v2162_v4  ;;  %5697 = vrot.lane.b32.xlu1 %v2168_v20, %s7534_s26  ;;  %6051 = vmatmul.mubr.msk.f32.gmra.mxu1 %vm906_vm0, %v2158_v34  ;;  %v8931_v34 = vld [vmem:[%s12115_s9 + $0x188] sm:$0xff]  ;;  %v8952_v4 = vld [vmem:[%s12115_s9 + $0x170] sm:$0xff] }
 0x4e6   : > { %v6320_v10 = vpop.f32.mrf.mxu0  ;;  %2391 = vmatprep.mubr.f32.mxu1 %v7533_v60  ;;  %12319 = vst [vmem:[#allocation49_spill] sm:$0xff] %v8931_v34  ;;  %12322 = vst [vmem:[#allocation48_spill] sm:$0xff] %v8952_v4  ;;  %2691 = vmatprep.subr.mxu1 %v8791_v2 }
 0x4e7   : > { %v2178_v46 = vadd.f32 %v6320_v10, %v8562_v63  ;;  %5695 = vrot.lane.b32.xlu0 %v2163_v14, %s7534_s26  ;;  %2692 = vmatpush1.msra.mxu1 %v8798_v21  ;;  %v8966_v10 = vld [vmem:[%s12115_s9 + $0x160] sm:$0xff] }
 0x4e8   : > { %v2172_v26 = vpop.f32.mrf.mxu0  ;;  %12324 = vst [vmem:[#allocation46_spill] sm:$0xff] %v8966_v10  ;;  %2693 = vmatprep.subr.mxu1 %v8804_v43 }
 0x4e9   : > { %v2173_v40 = vadd.f32 %v8562_v63, %v2172_v26  ;;  %5701 = vrot.lane.b32.xlu1 %v2178_v46, %s7534_s26  ;;  %6052 = vmatmul.mubr.msk.f32.gmra.mxu1 %vm906_vm0, %v2163_v14  ;;  %v8959_v14 = vld [vmem:[%s12115_s9 + $0x168] sm:$0xff]  ;;  %v8980_v26 = vld [vmem:[%s12115_s9 + $0x150] sm:$0xff] }
 0x4ea   : > { %v6323_v31 = vpop.f32.mrf.mxu0  ;;  %2397 = vmatprep.mubr.f32.mxu1 %v7533_v60  ;;  %12323 = vst [vmem:[#allocation47_spill] sm:$0xff] %v8959_v14  ;;  %12326 = vst [vmem:[#allocation61_spill] sm:$0xff] %v8980_v26 }
 0x4eb   : > { %v2188_v6 = vadd.f32 %v6323_v31, %v8562_v63  ;;  %5699 = vrot.lane.b32.xlu0 %v2173_v40, %s7534_s26  ;;  %v8994_v31 = vld [vmem:[%s12115_s9 + $0x140] sm:$0xff] }
 0x4ec   : > { %v2182_v7 = vpop.f32.mrf.mxu0  ;;  %12328 = vst [vmem:[#allocation63_spill] sm:$0xff] %v8994_v31 }
 0x4ed   : > { %v2183_v13 = vadd.f32 %v8562_v63, %v2182_v7  ;;  %5705 = vrot.lane.b32.xlu1 %v2188_v6, %s7534_s26  ;;  %6053 = vmatmul.mubr.msk.f32.gmra.mxu1 %vm906_vm0, %v2168_v20  ;;  %v8945_v20 = vld [vmem:[%s12115_s9 + $0x178] sm:$0xff]  ;;  %v9008_v7 = vld [vmem:[%s12115_s9 + $0x130] sm:$0xff] }
 0x4ee   : > { %2403 = vmatprep.mubr.f32.mxu1 %v7533_v60  ;;  %12321 = vst [vmem:[#allocation43_spill] sm:$0xff] %v8945_v20  ;;  %12330 = vst [vmem:[#allocation65_spill] sm:$0xff] %v9008_v7 }
 0x4ef   : > { %v6326_v48 = vpop.f32.mrf.mxu0  ;;  %5703 = vrot.lane.b32.xlu0 %v2183_v13, %s7534_s26 }
 0x4f0   : > { %v8712_v57 = vadd.f32 %v6326_v48, %v8562_v63  ;;  %v9022_v48 = vld [vmem:[%s12115_s9 + $0x120] sm:$0xff] }
 0x4f1   : > { %v2192_v50 = vpop.f32.mrf.mxu0  ;;  %6054 = vmatmul.mubr.msk.f32.gmra.mxu1 %vm906_vm0, %v2173_v40  ;;  %v8987_v40 = vld [vmem:[%s12115_s9 + $0x148] sm:$0xff]  ;;  %12332 = vst [vmem:[#allocation67_spill] sm:$0xff] %v9022_v48 }
 0x4f2   : > { %v2193_v22 = vadd.f32 %v8562_v63, %v2192_v50  ;;  %5709 = vrot.lane.b32.xlu1 %v8712_v57, %s7534_s26  ;;  %2409 = vmatprep.mubr.f32.mxu1 %v7533_v60  ;;  %v8811_v63 = vld [vmem:[%s12115_s9 + $0x10] sm:$0xff]  ;;  %12327 = vst [vmem:[#allocation62_spill] sm:$0xff] %v8987_v40 }
 0x4f3   : > { %2469 = vmatpush1.msra.mxu0 %v8811_v63  ;;  %2694 = vmatpush1.msra.mxu1 %v8811_v63  ;;  %v9036_v50 = vld [vmem:[%s12115_s9 + $0x110] sm:$0xff] }
 0x4f4   : > { %5707 = vrot.lane.b32.xlu0 %v2193_v22, %s7534_s26  ;;  %2470 = vmatprep.subr.mxu0 %v8819_v11  ;;  %12334 = vst [vmem:[#allocation69_spill] sm:$0xff] %v9036_v50  ;;  %s11965_s26 = scalar_lea.vmem [#allocation25], %s5988_s20 }
 0x4f5   : > { %6055 = vmatmul.mubr.msk.f32.gmra.mxu1 %vm906_vm0, %v2178_v46  ;;  %2471 = vmatpush1.msra.mxu0 %v8826_v25  ;;  %v8973_v46 = vld [vmem:[%s12115_s9 + $0x158] sm:$0xff]  ;;  %s5758_s21 = sshll.u32 %s11965_s26, 4  ;;  %s12058_s21 = int_to_ptr.vmem [resolvable:$true] %s5758_s21 }
 0x4f6   : > { %2415 = vmatprep.mubr.f32.mxu1 %v7533_v60  ;;  %2472 = vmatprep.subr.mxu0 %v8832_v15  ;;  %12325 = vst [vmem:[#allocation60_spill] sm:$0xff] %v8973_v46  ;;  %s7422_s29 = scalar_lea.vmem %s12058_s21, 2048  ;;  %p7429_p11 = scmp.lt.s32.totalorder %s12058_s21, %s7427_s30 }
 0x4f7   : > { %2473 = vmatpush2.msra.mxu0 %v8839_v18  ;;  %2695 = vmatprep.subr.mxu1 %v8819_v11  ;;  %p7423_p9 = scmp.ne.s32.totalorder %s12058_s21, %s7422_s29  ;;  %p7430_p5 = scmp.lt.s32.totalorder %s7428_s27, %s7422_s29 }
 0x4f8   : > { %2474 = vmatprep.subr.mxu0 %v8847_v54  ;;  %2696 = vmatpush1.msra.mxu1 %v8826_v25 }
 0x4f9   : > { %6056 = vmatmul.mubr.msk.f32.gmra.mxu1 %vm906_vm0, %v2183_v13  ;;  %2475 = vmatpush2.msra.mxu0 %v8854_v37  ;;  %v9015_v13 = vld [vmem:[%s12115_s9 + $0x128] sm:$0xff]  ;;  %p7424_p12 = pnand %p7423_p9, %p12467_p7  ;;  %p7431_p6 = por %p7430_p5, %p7429_p11 }
 0x4fa   : > { %2421 = vmatprep.mubr.f32.mxu1 %v7533_v60  ;;  %2476 = vmatprep.subr.mxu0 %v8860_v16  ;;  %12331 = vst [vmem:[#allocation66_spill] sm:$0xff] %v9015_v13 }
 0x4fb   : > { %2697 = vmatprep.subr.mxu1 %v8832_v15  ;;  %p7425_p8 = pneg %p7424_p12 }
 0x4fc   : > { %2698 = vmatpush2.msra.mxu1 %v8839_v18 }
 0x4fd   : > { %6057 = vmatmul.mubr.msk.f32.gmra.mxu1 %vm906_vm0, %v2188_v6  ;;  %v9001_v6 = vld [vmem:[%s12115_s9 + $0x138] sm:$0xff]  ;;  %2699 = vmatprep.subr.mxu1 %v8847_v54  ;;  %p7432_p10 = pnand %p7431_p6, %p7425_p8 }
 0x4fe   : > { %2427 = vmatprep.mubr.f32.mxu1 %v7533_v60  ;;  %12329 = vst [vmem:[#allocation64_spill] sm:$0xff] %v9001_v6  ;;  %2700 = vmatpush2.msra.mxu1 %v8854_v37 }
 0x4ff   : > { %2701 = vmatprep.subr.mxu1 %v8860_v16 }
 0x501   : > { %6058 = vmatmul.mubr.msk.f32.gmra.mxu1 %vm906_vm0, %v2193_v22  ;;  %v9043_v22 = vld [vmem:[%s12115_s9 + $0x108] sm:$0xff] }
 0x502   : > { %2433 = vmatprep.mubr.f32.mxu1 %v7533_v60  ;;  %v8867_v60 = vld [vmem:[%s12115_s9 + $0x1d0] sm:$0xff]  ;;  %12335 = vst [vmem:[#allocation70_spill] sm:$0xff] %v9043_v22 }
 0x503   : > { %12310 = vst [vmem:[#allocation57_spill] sm:$0xff] %v8867_v60  ;;  %2477 = vmatpush2.msra.mxu0 %v8867_v60  ;;  %2702 = vmatpush2.msra.mxu1 %v8867_v60 }
 0x504   : > { %2478 = vmatprep.subr.mxu0 %v8876_v41  ;;  %2703 = vmatprep.subr.mxu1 %v8876_v41 }
 0x505   : > { %6059 = vmatmul.mubr.msk.f32.gmra.mxu1 %vm906_vm0, %v8712_v57  ;;  %2479 = vmatpush2.msra.mxu0 %v8882_v59  ;;  %v9029_v57 = vld [vmem:[%s12115_s9 + $0x118] sm:$0xff] }
 0x506   : > { %2480 = vmatprep.subr.mxu0 %v8889_v19  ;;  %12333 = vst [vmem:[#allocation68_spill] sm:$0xff] %v9029_v57  ;;  %2704 = vmatpush2.msra.mxu1 %v8882_v59 }
 0x507   : > { %2481 = vmatpush2.msra.mxu0 %v8896_v17  ;;  %2705 = vmatprep.subr.mxu1 %v8889_v19 }
 0x508   : > { %2482 = vmatprep.subr.mxu0 %v8903_v0  ;;  %2706 = vmatpush2.msra.mxu1 %v8896_v17 }
 0x509   : > { %2483 = vmatpush2.msra.mxu0 %v8910_v1  ;;  %2707 = vmatprep.subr.mxu1 %v8903_v0 }
 0x50a   : > { %2484 = vmatprep.subr.mxu0 %v8917_v56  ;;  %2708 = vmatpush2.msra.mxu1 %v8910_v1 }
 0x50b   : > { %2485 = vmatpush2.msra.mxu0 %v8924_v5  ;;  %2709 = vmatprep.subr.mxu1 %v8917_v56 }
 0x50c   : > { %2486 = vmatprep.subr.mxu0 %v8931_v34  ;;  %2710 = vmatpush2.msra.mxu1 %v8924_v5 }
 0x50d   : > { %2487 = vmatpush2.msra.mxu0 %v8938_v30  ;;  %2711 = vmatprep.subr.mxu1 %v8931_v34 }
 0x50e   : > { %2488 = vmatprep.subr.mxu0 %v8945_v20  ;;  %2712 = vmatpush2.msra.mxu1 %v8938_v30 }
 0x50f   : > { %2489 = vmatpush2.msra.mxu0 %v8952_v4  ;;  %2713 = vmatprep.subr.mxu1 %v8945_v20 }
 0x510   : > { %2490 = vmatprep.subr.mxu0 %v8959_v14  ;;  %2714 = vmatpush2.msra.mxu1 %v8952_v4 }
 0x511   : > { %2491 = vmatpush2.msra.mxu0 %v8966_v10  ;;  %2715 = vmatprep.subr.mxu1 %v8959_v14 }
 0x512   : > { %2492 = vmatprep.subr.mxu0 %v8973_v46  ;;  %2716 = vmatpush2.msra.mxu1 %v8966_v10 }
 0x513   : > { %2493 = vmatpush2.msra.mxu0 %v8980_v26  ;;  %2717 = vmatprep.subr.mxu1 %v8973_v46 }
 0x514   : > { %2494 = vmatprep.subr.mxu0 %v8987_v40  ;;  %2718 = vmatpush2.msra.mxu1 %v8980_v26 }
 0x515   : > { %2495 = vmatpush2.msra.mxu0 %v8994_v31  ;;  %2719 = vmatprep.subr.mxu1 %v8987_v40  ;;  %v2221_v40 = vlaneseq }
 0x516   : > { %2496 = vmatprep.subr.mxu0 %v9001_v6  ;;  %2720 = vmatpush2.msra.mxu1 %v8994_v31 }
 0x517   : > { %2497 = vmatpush2.msra.mxu0 %v9008_v7  ;;  %2721 = vmatprep.subr.mxu1 %v9001_v6  ;;  %v2222_v31 = vshrl.u32 %v2221_v40, 7 }
 0x518   : > { %2498 = vmatprep.subr.mxu0 %v9015_v13  ;;  %2722 = vmatpush2.msra.mxu1 %v9008_v7  ;;  %v2217_v7 = vld [vmem:[#allocation14] sm:$0x3] }
 0x519   : > { %2499 = vmatpush2.msra.mxu0 %v9022_v48  ;;  %2723 = vmatprep.subr.mxu1 %v9015_v13  ;;  %v9080_v26 = vsub.s32 1, %v2222_v31  ;;  %v9082_v6 = vsub.s32 0, %v2222_v31 }
 0x51a   : > { %2500 = vmatprep.subr.mxu0 %v9029_v57  ;;  %2724 = vmatpush2.msra.mxu1 %v9022_v48 }
 0x51b   : > { %2501 = vmatpush2.msra.mxu0 %v9036_v50  ;;  %2725 = vmatprep.subr.mxu1 %v9029_v57  ;;  %12337 = vst [vmem:[#allocation72_spill] sm:$0xff] %v9080_v26  ;;  %12338 = vst [vmem:[#allocation73_spill] sm:$0xff] %v9082_v6  ;;  %v9085_v13 = vrot.slane %v2217_v7, %v9080_v26  ;;  %v9088_v57 = vrot.slane %v2217_v7, %v9082_v6 }
 0x51c   : > { %2502 = vmatprep.subr.mxu0 %v9043_v22  ;;  %2726 = vmatpush2.msra.mxu1 %v9036_v50 }
 0x51d   : > { %2503 = vmatpush2.msra.mxu0 %v9050_v47  ;;  %2727 = vmatprep.subr.mxu1 %v9043_v22 }
 0x51e   : > { %2728 = vmatpush2.msra.mxu1 %v9050_v47 }
 0x51f   : > { %4079 = vmatprep.subr.mxu1 %v8593_v3 }
 0x589   : > { %v2345_v50 = vpop.f32.mrf.mxu1 }
 0x58a   : > { %v9094_v3 = vadd.f32 %v2345_v50, %v9088_v57 }
 0x58b   : > { %v2347_v48 = vpop.f32.mrf.mxu1 }
 0x58c   : > { %v9091_v22 = vadd.f32 %v2347_v48, %v9085_v13 }
 0x58d   : > { %v2351_v40 = vpop.f32.mrf.mxu1 }
 0x58e   : > { %2504 = vmatprep.mubr.f32.mxu0 %v9091_v22  ;;  %v9102_v7 = vadd.f32 %v2351_v40, %v9088_v57 }
 0x58f   : > { %v2353_v31 = vpop.f32.mrf.mxu1  ;;  %2505 = vmatmul.mubr.f32.vlgmr.msra.gmra.mxu0 %v9094_v3 }
 0x590   : > { %v9099_v26 = vadd.f32 %v2353_v31, %v9085_v13 }
 0x591   : > { %v2357_v6 = vpop.f32.mrf.mxu1 }
 0x592   : > { %2510 = vmatprep.mubr.f32.mxu0 %v9099_v26  ;;  %v9110_v47 = vadd.f32 %v2357_v6, %v9088_v57 }
 0x593   : > { %v2359_v48 = vpop.f32.mrf.mxu1  ;;  %2511 = vmatmul.mubr.f32.gmra.mxu0 %v9102_v7 }
 0x594   : > { %v9107_v50 = vadd.f32 %v2359_v48, %v9085_v13 }
 0x595   : > { %v2363_v46 = vpop.f32.mrf.mxu1 }
 0x596   : > { %2516 = vmatprep.mubr.f32.mxu0 %v9107_v50  ;;  %v9118_v10 = vadd.f32 %v2363_v46, %v9088_v57 }
 0x597   : > { %v2365_v31 = vpop.f32.mrf.mxu1  ;;  %2517 = vmatmul.mubr.f32.gmra.mxu0 %v9110_v47 }
 0x598   : > { %v9115_v40 = vadd.f32 %v2365_v31, %v9085_v13 }
 0x599   : > { %v2369_v14 = vpop.f32.mrf.mxu1 }
 0x59a   : > { %2522 = vmatprep.mubr.f32.mxu0 %v9115_v40  ;;  %v9126_v4 = vadd.f32 %v2369_v14, %v9088_v57 }
 0x59b   : > { %v2371_v48 = vpop.f32.mrf.mxu1  ;;  %2523 = vmatmul.mubr.f32.gmra.mxu0 %v9118_v10 }
 0x59c   : > { %v9123_v6 = vadd.f32 %v2371_v48, %v9085_v13 }
 0x59d   : > { %v2375_v20 = vpop.f32.mrf.mxu1 }
 0x59e   : > { %2528 = vmatprep.mubr.f32.mxu0 %v9123_v6  ;;  %v9134_v30 = vadd.f32 %v2375_v20, %v9088_v57 }
 0x59f   : > { %v2377_v31 = vpop.f32.mrf.mxu1  ;;  %2529 = vmatmul.mubr.f32.gmra.mxu0 %v9126_v4 }
 0x5a0   : > { %v9131_v46 = vadd.f32 %v2377_v31, %v9085_v13 }
 0x5a1   : > { %v2381_v34 = vpop.f32.mrf.mxu1 }
 0x5a2   : > { %2534 = vmatprep.mubr.f32.mxu0 %v9131_v46  ;;  %v9142_v5 = vadd.f32 %v2381_v34, %v9088_v57 }
 0x5a3   : > { %v2383_v48 = vpop.f32.mrf.mxu1  ;;  %2535 = vmatmul.mubr.f32.gmra.mxu0 %v9134_v30 }
 0x5a4   : > { %v9139_v14 = vadd.f32 %v2383_v48, %v9085_v13 }
 0x5a5   : > { %v2387_v56 = vpop.f32.mrf.mxu1 }
 0x5a6   : > { %2540 = vmatprep.mubr.f32.mxu0 %v9139_v14  ;;  %v9150_v1 = vadd.f32 %v2387_v56, %v9088_v57 }
 0x5a7   : > { %v2389_v31 = vpop.f32.mrf.mxu1  ;;  %2541 = vmatmul.mubr.f32.gmra.mxu0 %v9142_v5 }
 0x5a8   : > { %v9147_v20 = vadd.f32 %v2389_v31, %v9085_v13 }
 0x5a9   : > { %v2393_v0 = vpop.f32.mrf.mxu1 }
 0x5aa   : > { %2546 = vmatprep.mubr.f32.mxu0 %v9147_v20  ;;  %v9158_v17 = vadd.f32 %v2393_v0, %v9088_v57 }
 0x5ab   : > { %v2395_v48 = vpop.f32.mrf.mxu1  ;;  %2547 = vmatmul.mubr.f32.gmra.mxu0 %v9150_v1 }
 0x5ac   : > { %v9155_v34 = vadd.f32 %v2395_v48, %v9085_v13 }
 0x5ad   : > { %v2399_v19 = vpop.f32.mrf.mxu1 }
 0x5ae   : > { %2552 = vmatprep.mubr.f32.mxu0 %v9155_v34  ;;  %v9166_v59 = vadd.f32 %v2399_v19, %v9088_v57 }
 0x5af   : > { %v2401_v31 = vpop.f32.mrf.mxu1  ;;  %2553 = vmatmul.mubr.f32.gmra.mxu0 %v9158_v17 }
 0x5b0   : > { %v9163_v56 = vadd.f32 %v2401_v31, %v9085_v13 }
 0x5b1   : > { %v2405_v41 = vpop.f32.mrf.mxu1 }
 0x5b2   : > { %2558 = vmatprep.mubr.f32.mxu0 %v9163_v56  ;;  %v9174_v60 = vadd.f32 %v2405_v41, %v9088_v57 }
 0x5b3   : > { %v2407_v48 = vpop.f32.mrf.mxu1  ;;  %2559 = vmatmul.mubr.f32.gmra.mxu0 %v9166_v59 }
 0x5b4   : > { %v9171_v0 = vadd.f32 %v2407_v48, %v9085_v13  ;;  %12340 = vst [vmem:[#allocation75_spill] sm:$0xff] %v9174_v60 }
 0x5b5   : > { %v2411_v16 = vpop.f32.mrf.mxu1 }
 0x5b6   : > { %12339 = vst [vmem:[#allocation74_spill] sm:$0xff] %v9171_v0  ;;  %2564 = vmatprep.mubr.f32.mxu0 %v9171_v0  ;;  %v9182_v37 = vadd.f32 %v2411_v16, %v9088_v57 }
 0x5b7   : > { %v2413_v31 = vpop.f32.mrf.mxu1  ;;  %2565 = vmatmul.mubr.f32.gmra.mxu0 %v9174_v60 }
 0x5b8   : > { %v9179_v19 = vadd.f32 %v2413_v31, %v9085_v13  ;;  %12342 = vst [vmem:[#allocation77_spill] sm:$0xff] %v9182_v37 }
 0x5b9   : > { %v2417_v54 = vpop.f32.mrf.mxu1 }
 0x5ba   : > { %12341 = vst [vmem:[#allocation76_spill] sm:$0xff] %v9179_v19  ;;  %2570 = vmatprep.mubr.f32.mxu0 %v9179_v19  ;;  %v9190_v0 = vadd.f32 %v2417_v54, %v9088_v57 }
 0x5bb   : > { %v2419_v48 = vpop.f32.mrf.mxu1  ;;  %2571 = vmatmul.mubr.f32.gmra.mxu0 %v9182_v37 }
 0x5bc   : > { %v9187_v41 = vadd.f32 %v2419_v48, %v9085_v13  ;;  %12344 = vst [vmem:[#allocation79_spill] sm:$0xff] %v9190_v0 }
 0x5bd   : > { %v2423_v18 = vpop.f32.mrf.mxu1 }
 0x5be   : > { %12343 = vst [vmem:[#allocation78_spill] sm:$0xff] %v9187_v41  ;;  %2576 = vmatprep.mubr.f32.mxu0 %v9187_v41  ;;  %v9198_v19 = vadd.f32 %v2423_v18, %v9088_v57 }
 0x5bf   : > { %v2425_v31 = vpop.f32.mrf.mxu1  ;;  %2577 = vmatmul.mubr.f32.gmra.mxu0 %v9190_v0 }
 0x5c0   : > { %v9195_v16 = vadd.f32 %v2425_v31, %v9085_v13  ;;  %12346 = vst [vmem:[#allocation81_spill] sm:$0xff] %v9198_v19 }
 0x5c1   : > { %v2429_v60 = vpop.f32.mrf.mxu1 }
 0x5c2   : > { %12345 = vst [vmem:[#allocation80_spill] sm:$0xff] %v9195_v16  ;;  %2582 = vmatprep.mubr.f32.mxu0 %v9195_v16  ;;  %v9206_v41 = vadd.f32 %v2429_v60, %v9088_v57 }
 0x5c3   : > { %v2431_v48 = vpop.f32.mrf.mxu1  ;;  %2583 = vmatmul.mubr.f32.gmra.mxu0 %v9198_v19 }
 0x5c4   : > { %v9203_v54 = vadd.f32 %v2431_v48, %v9085_v13 }
 0x5c5   : > { %v2435_v37 = vpop.f32.mrf.mxu1 }
 0x5c6   : > { %12347 = vst [vmem:[#allocation82_spill] sm:$0xff] %v9203_v54  ;;  %2588 = vmatprep.mubr.f32.mxu0 %v9203_v54  ;;  %v9214_v16 = vadd.f32 %v2435_v37, %v9088_v57 }
 0x5c7   : > { %v2437_v31 = vpop.f32.mrf.mxu1  ;;  %2589 = vmatmul.mubr.f32.gmra.mxu0 %v9206_v41 }
 0x5c8   : > { %v9211_v18 = vadd.f32 %v2437_v31, %v9085_v13 }
 0x5ca   : > { %12348 = vst [vmem:[#allocation83_spill] sm:$0xff] %v9211_v18  ;;  %2594 = vmatprep.mubr.f32.mxu0 %v9211_v18 }
 0x5cb   : > { %2595 = vmatmul.mubr.f32.gmra.mxu0 %v9214_v16 }
 0x64f   : > { %v2506_v48 = vpop.f32.mrf.mxu0 }
 0x650   : > { %v9219_v60 = vsub.f32 %v9094_v3, %v2506_v48 }
 0x651   : > { %v2508_v19 = vpop.f32.mrf.mxu0 }
 0x652   : > { %v9222_v54 = vsub.f32 %v9091_v22, %v2508_v19  ;;  %v2633_v37 = vmul.f32 %v9219_v60, %v9219_v60 }
 0x653   : > { %v2512_v0 = vpop.f32.mrf.mxu0 }
 0x654   : > { %v2634_v13 = vmul.f32 %v9222_v54, %v9222_v54  ;;  %v9229_v57 = vsub.f32 %v9102_v7, %v2512_v0 }
 0x655   : > { %v2514_v31 = vpop.f32.mrf.mxu0 }
 0x656   : > { %v9232_v18 = vsub.f32 %v9099_v26, %v2514_v31  ;;  %2729 = vmatprep.mubr.f32.mxu1 %v2634_v13  ;;  %v2635_v19 = vmul.f32 %v9229_v57, %v9229_v57  ;;  %v12354_v13 = vld [vmem:[#allocation56_spill] sm:$0xff]  ;;  %v12357_v31 = vld [vmem:[#allocation55_spill] sm:$0xff] }
 0x657   : > { %v2518_v3 = vpop.f32.mrf.mxu0  ;;  %2730 = vmatmul.mubr.f32.vlgmr.msra.gmra.mxu1 %v2633_v37  ;;  %v12355_v37 = vld [vmem:[#allocation75_spill] sm:$0xff] }
 0x658   : > { %v2636_v22 = vmul.f32 %v9232_v18, %v9232_v18  ;;  %4080 = vmatpush1.msra.mxu1 %v8598_v61  ;;  %v9240_v48 = vsub.f32 %v9110_v47, %v2518_v3  ;;  %v12358_v3 = vld [vmem:[#allocation74_spill] sm:$0xff] }
 0x659   : > { %v2520_v7 = vpop.f32.mrf.mxu0  ;;  %4081 = vmatprep.subr.mxu1 %v8603_v42 }
 0x65a   : > { %v9244_v26 = vsub.f32 %v9107_v50, %v2520_v7  ;;  %2735 = vmatprep.mubr.f32.mxu1 %v2636_v22  ;;  %4082 = vmatpush1.msra.mxu1 %v8610_v35  ;;  %v2637_v47 = vmul.f32 %v9240_v48, %v9240_v48  ;;  %v12360_v22 = vld [vmem:[#allocation54_spill] sm:$0xff] }
 0x65b   : > { %v2524_v0 = vpop.f32.mrf.mxu0  ;;  %2736 = vmatmul.mubr.f32.gmra.mxu1 %v2635_v19  ;;  %4083 = vmatprep.subr.mxu1 %v8620_v12  ;;  %v12361_v19 = vld [vmem:[#allocation58_spill] sm:$0xff] }
 0x65c   : > { %v2638_v61 = vmul.f32 %v9244_v26, %v9244_v26  ;;  %4084 = vmatpush1.msra.mxu1 %v8625_v62  ;;  %v9254_v42 = vsub.f32 %v9118_v10, %v2524_v0  ;;  %v12362_v0 = vld [vmem:[#allocation57_spill] sm:$0xff] }
 0x65d   : > { %v2526_v50 = vpop.f32.mrf.mxu0  ;;  %4085 = vmatprep.subr.mxu1 %v8630_v58 }
 0x65e   : > { %v9258_v35 = vsub.f32 %v9115_v40, %v2526_v50  ;;  %2741 = vmatprep.mubr.f32.mxu1 %v2638_v61  ;;  %4086 = vmatpush1.msra.mxu1 %v8638_v38  ;;  %v2639_v10 = vmul.f32 %v9254_v42, %v9254_v42 }
 0x65f   : > { %v2530_v12 = vpop.f32.mrf.mxu0  ;;  %2742 = vmatmul.mubr.f32.gmra.mxu1 %v2637_v47  ;;  %4087 = vmatprep.subr.mxu1 %v8652_v33  ;;  %v12363_v47 = vld [vmem:[#allocation77_spill] sm:$0xff] }
 0x660   : > { %v2640_v62 = vmul.f32 %v9258_v35, %v9258_v35  ;;  %4088 = vmatpush1.msra.mxu1 %v8657_v51  ;;  %v9268_v58 = vsub.f32 %v9126_v4, %v2530_v12 }
 0x661   : > { %v2532_v40 = vpop.f32.mrf.mxu0  ;;  %4089 = vmatprep.subr.mxu1 %v8665_v32 }
 0x662   : > { %v9272_v38 = vsub.f32 %v9123_v6, %v2532_v40  ;;  %2747 = vmatprep.mubr.f32.mxu1 %v2640_v62  ;;  %4090 = vmatpush1.msra.mxu1 %v8675_v44  ;;  %v2641_v4 = vmul.f32 %v9268_v58, %v9268_v58  ;;  %v12365_v62 = vld [vmem:[#allocation44_spill] sm:$0xff] }
 0x663   : > { %v2536_v33 = vpop.f32.mrf.mxu0  ;;  %2748 = vmatmul.mubr.f32.gmra.mxu1 %v2639_v10  ;;  %4091 = vmatprep.subr.mxu1 %v8682_v29  ;;  %v12366_v10 = vld [vmem:[#allocation76_spill] sm:$0xff] }
 0x664   : > { %v2642_v51 = vmul.f32 %v9272_v38, %v9272_v38  ;;  %4092 = vmatpush1.msra.mxu1 %v8690_v27  ;;  %v9282_v32 = vsub.f32 %v9134_v30, %v2536_v33  ;;  %v12368_v33 = vld [vmem:[#allocation52_spill] sm:$0xff] }
 0x665   : > { %v2538_v6 = vpop.f32.mrf.mxu0  ;;  %4093 = vmatprep.subr.mxu1 %v8700_v39 }
 0x666   : > { %v9286_v44 = vsub.f32 %v9131_v46, %v2538_v6  ;;  %2753 = vmatprep.mubr.f32.mxu1 %v2642_v51  ;;  %4094 = vmatpush1.msra.mxu1 %v8707_v28  ;;  %v2643_v30 = vmul.f32 %v9282_v32, %v9282_v32 }
 0x667   : > { %v2542_v29 = vpop.f32.mrf.mxu0  ;;  %2754 = vmatmul.mubr.f32.gmra.mxu1 %v2641_v4  ;;  %4095 = vmatprep.subr.mxu1 %v8718_v53  ;;  %v12369_v4 = vld [vmem:[#allocation59_spill] sm:$0xff] }
 0x668   : > { %v2644_v27 = vmul.f32 %v9286_v44, %v9286_v44  ;;  %4096 = vmatpush1.msra.mxu1 %v8725_v9  ;;  %v9296_v39 = vsub.f32 %v9142_v5, %v2542_v29  ;;  %v12370_v29 = vld [vmem:[#allocation45_spill] sm:$0xff] }
 0x669   : > { %v2544_v46 = vpop.f32.mrf.mxu0  ;;  %4097 = vmatprep.subr.mxu1 %v8735_v55 }
 0x66a   : > { %v9300_v28 = vsub.f32 %v9139_v14, %v2544_v46  ;;  %2759 = vmatprep.mubr.f32.mxu1 %v2644_v27  ;;  %4098 = vmatpush1.msra.mxu1 %v8742_v24  ;;  %v2645_v5 = vmul.f32 %v9296_v39, %v9296_v39 }
 0x66b   : > { %v2548_v53 = vpop.f32.mrf.mxu0  ;;  %2760 = vmatmul.mubr.f32.gmra.mxu1 %v2643_v30  ;;  %4099 = vmatprep.subr.mxu1 %v8749_v8  ;;  %v12371_v30 = vld [vmem:[#allocation79_spill] sm:$0xff] }
 0x66c   : > { %v2646_v9 = vmul.f32 %v9300_v28, %v9300_v28  ;;  %4100 = vmatpush1.msra.mxu1 %v8755_v36  ;;  %v9310_v55 = vsub.f32 %v9150_v1, %v2548_v53 }
 0x66d   : > { %v2550_v14 = vpop.f32.mrf.mxu0  ;;  %4101 = vmatprep.subr.mxu1 %v8763_v49 }
 0x66e   : > { %12349 = vst [vmem:[#allocation84_spill] sm:$0xff] %v9310_v55  ;;  %v9314_v24 = vsub.f32 %v9147_v20, %v2550_v14  ;;  %2765 = vmatprep.mubr.f32.mxu1 %v2646_v9  ;;  %4102 = vmatpush1.msra.mxu1 %v8770_v45  ;;  %v2647_v1 = vmul.f32 %v9310_v55, %v9310_v55  ;;  %v12373_v9 = vld [vmem:[#allocation42_spill] sm:$0xff] }
 0x66f   : > { %v2554_v8 = vpop.f32.mrf.mxu0  ;;  %2766 = vmatmul.mubr.f32.gmra.mxu1 %v2645_v5  ;;  %4103 = vmatprep.subr.mxu1 %v8776_v52  ;;  %v12374_v5 = vld [vmem:[#allocation78_spill] sm:$0xff] }
 0x670   : > { %v2648_v36 = vmul.f32 %v9314_v24, %v9314_v24  ;;  %4104 = vmatpush1.msra.mxu1 %v8783_v23  ;;  %v9324_v49 = vsub.f32 %v9158_v17, %v2554_v8  ;;  %v12376_v8 = vld [vmem:[#allocation51_spill] sm:$0xff] }
 0x671   : > { %v2556_v20 = vpop.f32.mrf.mxu0  ;;  %4105 = vmatprep.subr.mxu1 %v8791_v2 }
 0x672   : > { %12350 = vst [vmem:[#allocation85_spill] sm:$0xff] %v9324_v49  ;;  %v9328_v45 = vsub.f32 %v9155_v34, %v2556_v20  ;;  %2771 = vmatprep.mubr.f32.mxu1 %v2648_v36  ;;  %4106 = vmatpush1.msra.mxu1 %v8798_v21  ;;  %v2649_v17 = vmul.f32 %v9324_v49, %v9324_v49 }
 0x673   : > { %v2560_v52 = vpop.f32.mrf.mxu0  ;;  %2772 = vmatmul.mubr.f32.gmra.mxu1 %v2647_v1  ;;  %4107 = vmatprep.subr.mxu1 %v8804_v43  ;;  %v12377_v1 = vld [vmem:[#allocation50_spill] sm:$0xff] }
 0x674   : > { %12351 = vst [vmem:[#allocation86_spill] sm:$0xff] %v9328_v45  ;;  %v2650_v23 = vmul.f32 %v9328_v45, %v9328_v45  ;;  %4108 = vmatpush1.msra.mxu1 %v8811_v63  ;;  %v9338_v2 = vsub.f32 %v9166_v59, %v2560_v52  ;;  %v12378_v52 = vld [vmem:[#allocation53_spill] sm:$0xff] }
 0x675   : > { %v2562_v34 = vpop.f32.mrf.mxu0  ;;  %4109 = vmatprep.subr.mxu1 %v8819_v11 }
 0x676   : > { %12352 = vst [vmem:[#allocation87_spill] sm:$0xff] %v9338_v2  ;;  %v9342_v21 = vsub.f32 %v9163_v56, %v2562_v34  ;;  %2777 = vmatprep.mubr.f32.mxu1 %v2650_v23  ;;  %4110 = vmatpush1.msra.mxu1 %v8826_v25  ;;  %v2651_v59 = vmul.f32 %v9338_v2, %v9338_v2 }
 0x677   : > { %v2566_v43 = vpop.f32.mrf.mxu0  ;;  %2778 = vmatmul.mubr.f32.gmra.mxu1 %v2649_v17  ;;  %4111 = vmatprep.subr.mxu1 %v8832_v15  ;;  %v12379_v17 = vld [vmem:[#allocation81_spill] sm:$0xff] }
 0x678   : > { %12353 = vst [vmem:[#allocation88_spill] sm:$0xff] %v9342_v21  ;;  %v2652_v63 = vmul.f32 %v9342_v21, %v9342_v21  ;;  %4112 = vmatpush2.msra.mxu1 %v12354_v13  ;;  %v9352_v11 = vsub.f32 %v12355_v37, %v2566_v43  ;;  %v12382_v13 = vld [vmem:[#allocation80_spill] sm:$0xff]  ;;  %v12384_v37 = vld [vmem:[#allocation41_spill] sm:$0xff] }
 0x679   : > { %v2568_v56 = vpop.f32.mrf.mxu0  ;;  %4113 = vmatprep.subr.mxu1 %v12357_v31  ;;  %v12385_v31 = vld [vmem:[#allocation43_spill] sm:$0xff] }
 0x67a   : > { %12356 = vst [vmem:[#allocation56_spill] sm:$0xff] %v9352_v11  ;;  %v9356_v25 = vsub.f32 %v12358_v3, %v2568_v56  ;;  %2783 = vmatprep.mubr.f32.mxu1 %v2652_v63  ;;  %4114 = vmatpush2.msra.mxu1 %v12360_v22  ;;  %v2653_v61 = vmul.f32 %v9352_v11, %v9352_v11  ;;  %v12381_v63 = vld [vmem:[#allocation49_spill] sm:$0xff]  ;;  %v12386_v22 = vld [vmem:[#allocation48_spill] sm:$0xff] }
 0x67b   : > { %v2572_v15 = vpop.f32.mrf.mxu0  ;;  %2784 = vmatmul.mubr.f32.gmra.mxu1 %v2651_v59  ;;  %4115 = vmatprep.subr.mxu1 %v12361_v19 }
 0x67c   : > { %12359 = vst [vmem:[#allocation75_spill] sm:$0xff] %v9356_v25  ;;  %v2654_v7 = vmul.f32 %v9356_v25, %v9356_v25  ;;  %4116 = vmatpush2.msra.mxu1 %v12362_v0  ;;  %v9366_v50 = vsub.f32 %v12363_v47, %v2572_v15  ;;  %v12388_v0 = vld [vmem:[#allocation47_spill] sm:$0xff] }
 0x67d   : > { %v2574_v12 = vpop.f32.mrf.mxu0  ;;  %4117 = vmatprep.subr.mxu1 %v12365_v62 }
 0x67e   : > { %12364 = vst [vmem:[#allocation55_spill] sm:$0xff] %v9366_v50  ;;  %v9370_v40 = vsub.f32 %v12366_v10, %v2574_v12  ;;  %2789 = vmatprep.mubr.f32.mxu1 %v2654_v7  ;;  %4118 = vmatpush2.msra.mxu1 %v12368_v33  ;;  %v2655_v27 = vmul.f32 %v9366_v50, %v9366_v50  ;;  %v12391_v12 = vld [vmem:[#allocation46_spill] sm:$0xff]  ;;  %v12392_v10 = vld [vmem:[#allocation60_spill] sm:$0xff] }
 0x67f   : > { %v2578_v51 = vpop.f32.mrf.mxu0  ;;  %2790 = vmatmul.mubr.f32.gmra.mxu1 %v2653_v61  ;;  %4119 = vmatprep.subr.mxu1 %v12369_v4  ;;  %v12389_v61 = vld [vmem:[#allocation82_spill] sm:$0xff] }
 0x680   : > { %12367 = vst [vmem:[#allocation74_spill] sm:$0xff] %v9370_v40  ;;  %v2656_v6 = vmul.f32 %v9370_v40, %v9370_v40  ;;  %4120 = vmatpush2.msra.mxu1 %v12370_v29  ;;  %v9380_v46 = vsub.f32 %v12371_v30, %v2578_v51  ;;  %v12393_v51 = vld [vmem:[#allocation61_spill] sm:$0xff]  ;;  %v12395_v29 = vld [vmem:[#allocation62_spill] sm:$0xff] }
 0x681   : > { %v2580_v53 = vpop.f32.mrf.mxu0  ;;  %4121 = vmatprep.subr.mxu1 %v12373_v9  ;;  %v12399_v9 = vld [vmem:[#allocation64_spill] sm:$0xff] }
 0x682   : > { %12372 = vst [vmem:[#allocation54_spill] sm:$0xff] %v9380_v46  ;;  %v9384_v14 = vsub.f32 %v12374_v5, %v2580_v53  ;;  %2795 = vmatprep.mubr.f32.mxu1 %v2656_v6  ;;  %4122 = vmatpush2.msra.mxu1 %v12376_v8  ;;  %v2657_v23 = vmul.f32 %v9380_v46, %v9380_v46  ;;  %v12398_v53 = vld [vmem:[#allocation63_spill] sm:$0xff]  ;;  %v12400_v8 = vld [vmem:[#allocation65_spill] sm:$0xff] }
 0x683   : > { %v2584_v36 = vpop.f32.mrf.mxu0  ;;  %2796 = vmatmul.mubr.f32.gmra.mxu1 %v2655_v27  ;;  %4123 = vmatprep.subr.mxu1 %v12377_v1  ;;  %v12396_v27 = vld [vmem:[#allocation83_spill] sm:$0xff] }
 0x684   : > { %12375 = vst [vmem:[#allocation58_spill] sm:$0xff] %v9384_v14  ;;  %v2658_v20 = vmul.f32 %v9384_v14, %v9384_v14  ;;  %4124 = vmatpush2.msra.mxu1 %v12378_v52  ;;  %v9394_v34 = vsub.f32 %v12379_v17, %v2584_v36  ;;  %v12401_v36 = vld [vmem:[#allocation66_spill] sm:$0xff]  ;;  %v12402_v1 = vld [vmem:[#allocation67_spill] sm:$0xff]  ;;  %v12404_v52 = vld [vmem:[#allocation69_spill] sm:$0xff] }
 0x685   : > { %v2586_v43 = vpop.f32.mrf.mxu0  ;;  %4125 = vmatprep.subr.mxu1 %v12381_v63  ;;  %v12406_v17 = vld [vmem:[#allocation71_spill] sm:$0xff]  ;;  %v3870_v63 = vld [vmem:[%s12120_s14 + $0xf0] sm:$0xff] }
 0x686   : > { %12380 = vst [vmem:[#allocation57_spill] sm:$0xff] %v9394_v34  ;;  %v9398_v59 = vsub.f32 %v12382_v13, %v2586_v43  ;;  %2801 = vmatprep.mubr.f32.mxu1 %v2658_v20  ;;  %4126 = vmatpush2.msra.mxu1 %v12384_v37  ;;  %v2659_v15 = vmul.f32 %v9394_v34, %v9394_v34  ;;  %v12403_v20 = vld [vmem:[#allocation68_spill] sm:$0xff]  ;;  %v3871_v43 = vld [vmem:[%s12120_s14 + $0xf8] sm:$0xff]  ;;  %v3869_v13 = vld [vmem:[%s12120_s14 + $0xe8] sm:$0xff] }
 0x687   : > { %v2590_v56 = vpop.f32.mrf.mxu0  ;;  %2802 = vmatmul.mubr.f32.gmra.mxu1 %v2657_v23  ;;  %4127 = vmatprep.subr.mxu1 %v12385_v31  ;;  %v12405_v23 = vld [vmem:[#allocation70_spill] sm:$0xff]  ;;  %v3866_v31 = vld [vmem:[%s12120_s14 + $0xd0] sm:$0xff] }
 0x688   : > { %12383 = vst [vmem:[#allocation77_spill] sm:$0xff] %v9398_v59  ;;  %v2660_v3 = vmul.f32 %v9398_v59, %v9398_v59  ;;  %4128 = vmatpush2.msra.mxu1 %v12386_v22  ;;  %v9408_v19 = vsub.f32 %v9206_v41, %v2590_v56  ;;  %3918 = vmatprep.subr.mxu0 %v3871_v43  ;;  %v3868_v37 = vld [vmem:[%s12120_s14 + $0xe0] sm:$0xff]  ;;  %v3867_v56 = vld [vmem:[%s12120_s14 + $0xd8] sm:$0xff] }
 0x689   : > { %v2592_v7 = vpop.f32.mrf.mxu0  ;;  %4129 = vmatprep.subr.mxu1 %v12388_v0  ;;  %3919 = vmatpush1.msra.mxu0 %v3870_v63  ;;  %v3864_v22 = vld [vmem:[%s12120_s14 + $0xc0] sm:$0xff]  ;;  %v3861_v0 = vld [vmem:[%s12120_s14 + $0xa8] sm:$0xff]  ;;  %v3903_v43 = vld [vmem:[%s12120_s14 + $0x1f8] sm:$0xff] }
 0x68a   : > { %12387 = vst [vmem:[#allocation44_spill] sm:$0xff] %v9408_v19  ;;  %v9412_v47 = vsub.f32 %v12389_v61, %v2592_v7  ;;  %2807 = vmatprep.mubr.f32.mxu1 %v2660_v3  ;;  %4130 = vmatpush2.msra.mxu1 %v12391_v12  ;;  %v2661_v41 = vmul.f32 %v9408_v19, %v9408_v19  ;;  %v3865_v3 = vld [vmem:[%s12120_s14 + $0xc8] sm:$0xff]  ;;  %v3862_v7 = vld [vmem:[%s12120_s14 + $0xb0] sm:$0xff]  ;;  %v3860_v61 = vld [vmem:[%s12120_s14 + $0xa0] sm:$0xff] }
 0x68b   : > { %v2596_v62 = vpop.f32.mrf.mxu0  ;;  %2808 = vmatmul.mubr.f32.gmra.mxu1 %v2659_v15  ;;  %4131 = vmatprep.subr.mxu1 %v12392_v10  ;;  %v3863_v15 = vld [vmem:[%s12120_s14 + $0xb8] sm:$0xff]  ;;  %v3857_v10 = vld [vmem:[%s12120_s14 + $0x88] sm:$0xff]  ;;  %v3902_v63 = vld [vmem:[%s12120_s14 + $0x1f0] sm:$0xff] }
 0x68c   : > { %12390 = vst [vmem:[#allocation76_spill] sm:$0xff] %v9412_v47  ;;  %v2662_v33 = vmul.f32 %v9412_v47, %v9412_v47  ;;  %4132 = vmatpush2.msra.mxu1 %v12393_v51  ;;  %v9422_v4 = vsub.f32 %v9214_v16, %v2596_v62  ;;  %3920 = vmatprep.subr.mxu0 %v3869_v13  ;;  %v3859_v12 = vld [vmem:[%s12120_s14 + $0x98] sm:$0xff]  ;;  %v3858_v62 = vld [vmem:[%s12120_s14 + $0x90] sm:$0xff]  ;;  %v3901_v13 = vld [vmem:[%s12120_s14 + $0x1e8] sm:$0xff] }
 0x68d   : > { %v2598_v6 = vpop.f32.mrf.mxu0  ;;  %4133 = vmatprep.subr.mxu1 %v12395_v29  ;;  %3921 = vmatpush1.msra.mxu0 %v3868_v37  ;;  %v3855_v51 = vld [vmem:[%s12120_s14 + $0x78] sm:$0xff]  ;;  %v3852_v29 = vld [vmem:[%s12120_s14 + $0x60] sm:$0xff] }
 0x68e   : > { %12394 = vst [vmem:[#allocation52_spill] sm:$0xff] %v9422_v4  ;;  %v9426_v30 = vsub.f32 %v12396_v27, %v2598_v6  ;;  %2813 = vmatprep.mubr.f32.mxu1 %v2662_v33  ;;  %4134 = vmatpush2.msra.mxu1 %v12398_v53  ;;  %v2663_v16 = vmul.f32 %v9422_v4, %v9422_v4  ;;  %v3856_v33 = vld [vmem:[%s12120_s14 + $0x80] sm:$0xff]  ;;  %v3853_v6 = vld [vmem:[%s12120_s14 + $0x68] sm:$0xff]  ;;  %v3851_v27 = vld [vmem:[%s12120_s14 + $0x58] sm:$0xff] }
 0x68f   : > { %2814 = vmatmul.mubr.f32.gmra.mxu1 %v2661_v41  ;;  %4135 = vmatprep.subr.mxu1 %v12399_v9  ;;  %v3854_v41 = vld [vmem:[%s12120_s14 + $0x70] sm:$0xff]  ;;  %v3849_v9 = vld [vmem:[%s12120_s14 + $0x48] sm:$0xff]  ;;  %v3900_v37 = vld [vmem:[%s12120_s14 + $0x1e0] sm:$0xff] }
 0x690   : > { %12397 = vst [vmem:[#allocation59_spill] sm:$0xff] %v9426_v30  ;;  %v2664_v5 = vmul.f32 %v9426_v30, %v9426_v30  ;;  %4136 = vmatpush2.msra.mxu1 %v12400_v8  ;;  %3922 = vmatprep.subr.mxu0 %v3867_v56  ;;  %v3850_v53 = vld [vmem:[%s12120_s14 + $0x50] sm:$0xff]  ;;  %v3847_v8 = vld [vmem:[%s12120_s14 + $0x38] sm:$0xff] }
 0x691   : > { %4137 = vmatprep.subr.mxu1 %v12401_v36  ;;  %3923 = vmatpush1.msra.mxu0 %v3866_v31  ;;  %v3845_v36 = vld [vmem:[%s12120_s14 + $0x28] sm:$0xff]  ;;  %v3899_v56 = vld [vmem:[%s12120_s14 + $0x1d8] sm:$0xff]  ;;  %v3898_v31 = vld [vmem:[%s12120_s14 + $0x1d0] sm:$0xff] }
 0x692   : > { %2819 = vmatprep.mubr.f32.mxu1 %v2664_v5  ;;  %4138 = vmatpush2.msra.mxu1 %v12402_v1  ;;  %v3848_v5 = vld [vmem:[%s12120_s14 + $0x40] sm:$0xff] }
 0x693   : > { %2820 = vmatmul.mubr.f32.gmra.mxu1 %v2663_v16  ;;  %4139 = vmatprep.subr.mxu1 %v12403_v20  ;;  %v3846_v16 = vld [vmem:[%s12120_s14 + $0x30] sm:$0xff]  ;;  %v3844_v1 = vld [vmem:[%s12120_s14 + $0x20] sm:$0xff]  ;;  %v3843_v20 = vld [vmem:[%s12120_s14 + $0x18] sm:$0xff] }
 0x694   : > { %4140 = vmatpush2.msra.mxu1 %v12404_v52  ;;  %3924 = vmatprep.subr.mxu0 %v3865_v3  ;;  %v3842_v52 = vld [vmem:[%s12120_s14 + $0x10] sm:$0xff]  ;;  %v3897_v3 = vld [vmem:[%s12120_s14 + $0x1c8] sm:$0xff] }
 0x695   : > { %4141 = vmatprep.subr.mxu1 %v12405_v23  ;;  %3925 = vmatpush1.msra.mxu0 %v3864_v22  ;;  %v3841_v23 = vld [vmem:[%s12120_s14 + $0x8] sm:$0xff]  ;;  %v3896_v22 = vld [vmem:[%s12120_s14 + $0x1c0] sm:$0xff] }
 0x696   : > { %4142 = vmatpush2.msra.mxu1 %v12406_v17  ;;  %3926 = vmatprep.subr.mxu0 %v3863_v15  ;;  %v3840_v17 = vld [vmem:[%s12120_s14] sm:$0xff]  ;;  %v3895_v15 = vld [vmem:[%s12120_s14 + $0x1b8] sm:$0xff] }
 0x697   : > { %3927 = vmatpush1.msra.mxu0 %v3862_v7  ;;  %v3894_v7 = vld [vmem:[%s12120_s14 + $0x1b0] sm:$0xff] }
 0x698   : > { %3928 = vmatprep.subr.mxu0 %v3861_v0  ;;  %v3893_v0 = vld [vmem:[%s12120_s14 + $0x1a8] sm:$0xff] }
 0x699   : > { %3929 = vmatpush1.msra.mxu0 %v3860_v61  ;;  %v3892_v61 = vld [vmem:[%s12120_s14 + $0x1a0] sm:$0xff] }
 0x69a   : > { %3930 = vmatprep.subr.mxu0 %v3859_v12  ;;  %v3891_v12 = vld [vmem:[%s12120_s14 + $0x198] sm:$0xff] }
 0x69b   : > { %3931 = vmatpush1.msra.mxu0 %v3858_v62  ;;  %v3890_v62 = vld [vmem:[%s12120_s14 + $0x190] sm:$0xff] }
 0x69c   : > { %3932 = vmatprep.subr.mxu0 %v3857_v10  ;;  %v3889_v10 = vld [vmem:[%s12120_s14 + $0x188] sm:$0xff] }
 0x69d   : > { %3933 = vmatpush1.msra.mxu0 %v3856_v33  ;;  %v3888_v33 = vld [vmem:[%s12120_s14 + $0x180] sm:$0xff] }
 0x69e   : > { %3934 = vmatprep.subr.mxu0 %v3855_v51  ;;  %v3887_v51 = vld [vmem:[%s12120_s14 + $0x178] sm:$0xff] }
 0x69f   : > { %3935 = vmatpush1.msra.mxu0 %v3854_v41  ;;  %v3886_v41 = vld [vmem:[%s12120_s14 + $0x170] sm:$0xff] }
 0x6a0   : > { %3936 = vmatprep.subr.mxu0 %v3853_v6  ;;  %v3885_v6 = vld [vmem:[%s12120_s14 + $0x168] sm:$0xff] }
 0x6a1   : > { %3937 = vmatpush1.msra.mxu0 %v3852_v29  ;;  %v3884_v29 = vld [vmem:[%s12120_s14 + $0x160] sm:$0xff] }
 0x6a2   : > { %3938 = vmatprep.subr.mxu0 %v3851_v27  ;;  %v3883_v27 = vld [vmem:[%s12120_s14 + $0x158] sm:$0xff] }
 0x6a3   : > { %3939 = vmatpush1.msra.mxu0 %v3850_v53  ;;  %v3882_v53 = vld [vmem:[%s12120_s14 + $0x150] sm:$0xff] }
 0x6a4   : > { %3940 = vmatprep.subr.mxu0 %v3849_v9  ;;  %v3881_v9 = vld [vmem:[%s12120_s14 + $0x148] sm:$0xff] }
 0x6a5   : > { %3941 = vmatpush1.msra.mxu0 %v3848_v5  ;;  %v3880_v5 = vld [vmem:[%s12120_s14 + $0x140] sm:$0xff] }
 0x6a6   : > { %3942 = vmatprep.subr.mxu0 %v3847_v8  ;;  %v3879_v8 = vld [vmem:[%s12120_s14 + $0x138] sm:$0xff] }
 0x6a7   : > { %3943 = vmatpush1.msra.mxu0 %v3846_v16  ;;  %v3878_v16 = vld [vmem:[%s12120_s14 + $0x130] sm:$0xff] }
 0x6a8   : > { %3944 = vmatprep.subr.mxu0 %v3845_v36  ;;  %v3877_v36 = vld [vmem:[%s12120_s14 + $0x128] sm:$0xff] }
 0x6a9   : > { %3945 = vmatpush1.msra.mxu0 %v3844_v1  ;;  %v3876_v1 = vld [vmem:[%s12120_s14 + $0x120] sm:$0xff] }
 0x6aa   : > { %3946 = vmatprep.subr.mxu0 %v3843_v20  ;;  %v3875_v20 = vld [vmem:[%s12120_s14 + $0x118] sm:$0xff] }
 0x6ab   : > { %3947 = vmatpush1.msra.mxu0 %v3842_v52  ;;  %v3874_v52 = vld [vmem:[%s12120_s14 + $0x110] sm:$0xff] }
 0x6ac   : > { %3948 = vmatprep.subr.mxu0 %v3841_v23  ;;  %v3873_v23 = vld [vmem:[%s12120_s14 + $0x108] sm:$0xff] }
 0x6ad   : > { %3949 = vmatpush1.msra.mxu0 %v3840_v17  ;;  %v3872_v17 = vld [vmem:[%s12120_s14 + $0x100] sm:$0xff] }
 0x6ae   : > { %3950 = vmatprep.subr.mxu0 %v3903_v43  ;;  %v6994_v43 = vld [vmem:[%s12115_s9 + $0xf8] sm:$0xff] }
 0x6af   : > { %3951 = vmatpush2.msra.mxu0 %v3902_v63 }
 0x6b0   : > { %3952 = vmatprep.subr.mxu0 %v3901_v13 }
 0x6b1   : > { %3953 = vmatpush2.msra.mxu0 %v3900_v37 }
 0x6b2   : > { %3954 = vmatprep.subr.mxu0 %v3899_v56 }
 0x6b3   : > { %3955 = vmatpush2.msra.mxu0 %v3898_v31 }
 0x6b4   : > { %3956 = vmatprep.subr.mxu0 %v3897_v3 }
 0x6b5   : > { %3957 = vmatpush2.msra.mxu0 %v3896_v22 }
 0x6b6   : > { %3958 = vmatprep.subr.mxu0 %v3895_v15 }
 0x6b7   : > { %3959 = vmatpush2.msra.mxu0 %v3894_v7 }
 0x6b8   : > { %3960 = vmatprep.subr.mxu0 %v3893_v0 }
 0x6b9   : > { %3961 = vmatpush2.msra.mxu0 %v3892_v61  ;;  %v2218_v61 = vld [vmem:[#allocation16] sm:$0x3] }
 0x6ba   : > { %3962 = vmatprep.subr.mxu0 %v3891_v12 }
 0x6bb   : > { %3963 = vmatpush2.msra.mxu0 %v3890_v62 }
 0x6bc   : > { %3964 = vmatprep.subr.mxu0 %v3889_v10 }
 0x6bd   : > { %3965 = vmatpush2.msra.mxu0 %v3888_v33  ;;  %v2219_v33 = vld [vmem:[#allocation17] sm:$0x3] }
 0x6be   : > { %3966 = vmatprep.subr.mxu0 %v3887_v51  ;;  %v12407_v51 = vld [vmem:[#allocation73_spill] sm:$0xff] }
 0x6bf   : > { %3967 = vmatpush2.msra.mxu0 %v3886_v41  ;;  %v9637_v41 = vrot.slane %v2218_v61, %v12407_v51 }
 0x6c0   : > { %3968 = vmatprep.subr.mxu0 %v3885_v6 }
 0x6c1   : > { %3969 = vmatpush2.msra.mxu0 %v3884_v29 }
 0x6c2   : > { %3970 = vmatprep.subr.mxu0 %v3883_v27 }
 0x6c3   : > { %3971 = vmatpush2.msra.mxu0 %v3882_v53  ;;  %v12408_v53 = vld [vmem:[#allocation72_spill] sm:$0xff] }
 0x6c4   : > { %3972 = vmatprep.subr.mxu0 %v3881_v9  ;;  %v9641_v9 = vrot.slane %v2218_v61, %v12408_v53 }
 0x6c5   : > { %3973 = vmatpush2.msra.mxu0 %v3880_v5  ;;  %v9644_v5 = vrot.slane %v2219_v33, %v12407_v51 }
 0x6c6   : > { %3974 = vmatprep.subr.mxu0 %v3879_v8 }
 0x6c7   : > { %3975 = vmatpush2.msra.mxu0 %v3878_v16 }
 0x6c8   : > { %3976 = vmatprep.subr.mxu0 %v3877_v36 }
 0x6c9   : > { %3977 = vmatpush2.msra.mxu0 %v3876_v1 }
 0x6ca   : > { %3978 = vmatprep.subr.mxu0 %v3875_v20 }
 0x6cb   : > { %3979 = vmatpush2.msra.mxu0 %v3874_v52  ;;  %v9649_v52 = vrot.slane %v2219_v33, %v12408_v53 }
 0x6cc   : > { %3980 = vmatprep.subr.mxu0 %v3873_v23 }
 0x6cd   : > { %3981 = vmatpush2.msra.mxu0 %v3872_v17 }
 0x6ce   : > { %4304 = vmatprep.subr.mxu0 %v6994_v43 }
 0x717   : > { %v2731_v63 = vpop.f32.mrf.mxu1 }
 0x718   : > { %v2732_v13 = vadd.f32 1e-05, %v2731_v63 }
 0x719   : > { %v2733_v37 = vpop.f32.mrf.mxu1 }
 0x71a   : > { %6610 = vrsqrt.f32 %v2732_v13  ;;  %v2734_v56 = vadd.f32 1e-05, %v2733_v37 }
 0x71b   : > { %v2737_v31 = vpop.f32.mrf.mxu1 }
 0x71c   : > { %6612 = vrsqrt.f32 %v2734_v56  ;;  %v2738_v3 = vadd.f32 1e-05, %v2737_v31 }
 0x71d   : > { %v2739_v22 = vpop.f32.mrf.mxu1 }
 0x71e   : > { %6614 = vrsqrt.f32 %v2738_v3  ;;  %v2740_v15 = vadd.f32 1e-05, %v2739_v22 }
 0x71f   : > { %v2743_v7 = vpop.f32.mrf.mxu1 }
 0x720   : > { %6616 = vrsqrt.f32 %v2740_v15  ;;  %v2744_v16 = vadd.f32 1e-05, %v2743_v7 }
 0x721   : > { %v2745_v0 = vpop.f32.mrf.mxu1 }
 0x722   : > { %v2746_v62 = vadd.f32 1e-05, %v2745_v0 }
 0x723   : > { %v2749_v12 = vpop.f32.mrf.mxu1 }
 0x724   : > { %6618 = vrsqrt.f32 %v2746_v62  ;;  %v2750_v31 = vadd.f32 1e-05, %v2749_v12 }
 0x725   : > { %v2751_v10 = vpop.f32.mrf.mxu1  ;;  %6620 = vrsqrt.f32 %v2744_v16 }
 0x726   : > { %v2752_v15 = vadd.f32 1e-05, %v2751_v10  ;;  %6622 = vrsqrt.f32 %v2750_v31 }
 0x727   : > { %v6611_v6 = vpop.eup %6610  ;;  %v2755_v29 = vpop.f32.mrf.mxu1 }
 0x728   : > { %v2858_v27 = vmul.f32 %v6611_v6, %v9219_v60  ;;  %v2756_v61 = vadd.f32 1e-05, %v2755_v29  ;;  %6624 = vrsqrt.f32 %v2752_v15 }
 0x729   : > { %v6613_v8 = vpop.eup %6612  ;;  %v2757_v36 = vpop.f32.mrf.mxu1 }
 0x72a   : > { %v2901_v1 = vmul.f32 %v9637_v41, %v2858_v27  ;;  %v2859_v20 = vmul.f32 %v6613_v8, %v9222_v54  ;;  %6626 = vrsqrt.f32 %v2756_v61 }
 0x72b   : > { %v6615_v23 = vpop.eup %6614  ;;  %v2761_v17 = vpop.f32.mrf.mxu1 }
 0x72c   : > { %v2902_v60 = vmul.f32 %v9641_v9, %v2859_v20  ;;  %v2944_v43 = vadd.f32 %v9644_v5, %v2901_v1  ;;  %v2860_v37 = vmul.f32 %v6615_v23, %v9229_v57  ;;  %v2758_v57 = vadd.f32 1e-05, %v2757_v36 }
 0x72d   : > { %v6617_v63 = vpop.eup %6616  ;;  %v2763_v13 = vpop.f32.mrf.mxu1  ;;  %v2762_v16 = vadd.f32 1e-05, %v2761_v17 }
 0x72e   : > { %v2945_v56 = vadd.f32 %v9649_v52, %v2902_v60  ;;  %v9655_v22 = vmul.f32 0.70710677, %v2944_v43  ;;  %v2861_v54 = vmul.f32 %v6617_v63, %v9232_v18  ;;  %v2903_v0 = vmul.f32 %v9637_v41, %v2860_v37 }
 0x72f   : > { %v2767_v3 = vpop.f32.mrf.mxu1  ;;  %6628 = vrsqrt.f32 %v2758_v57  ;;  %v2764_v36 = vadd.f32 1e-05, %v2763_v13 }
 0x730   : > { %v9658_v7 = vmul.f32 0.70710677, %v2945_v56  ;;  %v3104_v33 = vand.u32 2147483647, %v9655_v22  ;;  %v2904_v6 = vmul.f32 %v9641_v9, %v2861_v54  ;;  %v9665_v10 = vadd.f32 %v9644_v5, %v2903_v0 }
 0x731   : > { %v2769_v62 = vpop.f32.mrf.mxu1  ;;  %v6619_v23 = vpop.eup %6618  ;;  %v2768_v37 = vadd.f32 1e-05, %v2767_v3  ;;  %vm3040_vm3 = vcmp.ge.f32.partialorder %v9655_v22, 0.0 }
 0x732   : > { %v3105_v27 = vand.u32 2147483647, %v9658_v7  ;;  %v3136_v8 = vmul.f32 0.3275911, %v3104_v33  ;;  %v9668_v20 = vadd.f32 %v9649_v52, %v2904_v6  ;;  %v2770_v54 = vadd.f32 1e-05, %v2769_v62  ;;  %v6621_v57 = vpop.eup %6620 }
 0x733   : > { %v2773_v12 = vpop.f32.mrf.mxu1  ;;  %v9674_v15 = vmul.f32 0.70710677, %v9665_v10  ;;  %v3552_v61 = vsub.f32 0.0, %v3104_v33  ;;  %v2863_v13 = vmul.f32 %v6619_v23, %v9244_v26  ;;  %vm3041_vm4 = vcmp.ge.f32.partialorder %v9658_v7, 0.0 }
 0x734   : > { %v3137_v18 = vmul.f32 0.3275911, %v3105_v27  ;;  %v3168_v29 = vadd.f32 1.0, %v3136_v8  ;;  %v3553_v63 = vsub.f32 0.0, %v3105_v27  ;;  %v9671_v17 = vmul.f32 0.70710677, %v9668_v20 }
 0x735   : > { %v2775_v1 = vpop.f32.mrf.mxu1  ;;  %v2774_v3 = vadd.f32 1e-05, %v2773_v12  ;;  %v2906_v53 = vmul.f32 %v9641_v9, %v2863_v13  ;;  %v3584_v26 = vmul.f32 %v3552_v61, %v3104_v33  ;;  %v2862_v12 = vmul.f32 %v6621_v57, %v9240_v48 }
 0x736   : > { %v3169_v60 = vadd.f32 1.0, %v3137_v18  ;;  %6630 = vrcp.f32 %v3168_v29  ;;  %v3107_v6 = vand.u32 2147483647, %v9671_v17  ;;  %v3585_v8 = vmul.f32 %v3553_v63, %v3105_v27 }
 0x737   : > { %v2779_v31 = vpop.f32.mrf.mxu1  ;;  %6632 = vrsqrt.f32 %v2762_v16  ;;  %v9678_v29 = vmul.f32 0.5, %v2945_v56  ;;  %v9680_v16 = vmul.f32 0.5, %v2944_v43  ;;  %v2776_v51 = vadd.f32 1e-05, %v2775_v1 }
 0x738   : > { %6634 = vrcp.f32 %v3169_v60  ;;  %v3139_v62 = vmul.f32 0.3275911, %v3107_v6  ;;  %v3106_v60 = vand.u32 2147483647, %v9674_v15  ;;  %v2780_v4 = vadd.f32 1e-05, %v2779_v31 }
 0x739   : > { %v2781_v0 = vpop.f32.mrf.mxu1  ;;  %6636 = vrsqrt.f32 %v2764_v36  ;;  %v3618_v27 = vmul.f32 1.442695, %v3585_v8  ;;  %v3555_v36 = vsub.f32 0.0, %v3107_v6  ;;  %v9687_v43 = vadd.f32 %v9649_v52, %v2906_v53 }
 0x73a   : > { %6638 = vrsqrt.f32 %v2768_v37  ;;  %v3171_v23 = vadd.f32 1.0, %v3139_v62  ;;  %v3138_v56 = vmul.f32 0.3275911, %v3106_v60  ;;  %v2905_v1 = vmul.f32 %v9637_v41, %v2862_v12  ;;  %v9690_v37 = vpop.eup %6622 }
 0x73b   : > { %v2785_v18 = vpop.f32.mrf.mxu1  ;;  %6640 = vrsqrt.f32 %v2770_v54  ;;  %v2782_v33 = vadd.f32 1e-05, %v2781_v0  ;;  %v6625_v31 = vpop.eup %6624  ;;  %v3616_v54 = vmul.f32 1.442695, %v3584_v26  ;;  %v9694_v61 = vmul.f32 0.70710677, %v9687_v43 }
 0x73c   : > { %6642 = vrsqrt.f32 %v2774_v3  ;;  %v3170_v48 = vadd.f32 1.0, %v3138_v56  ;;  %v9697_v13 = vadd.f32 %v9644_v5, %v2905_v1  ;;  %v9699_v53 = vpop.eup %6626  ;;  %v2786_v57 = vadd.f32 1e-05, %v2785_v18 }
 0x73d   : > { %v2787_v30 = vpop.f32.mrf.mxu1  ;;  %6644 = vrcp.f32 %v3171_v23  ;;  %v3587_v3 = vmul.f32 %v3555_v36, %v3107_v6  ;;  %v3554_v8 = vsub.f32 0.0, %v3106_v60  ;;  %v12409_v7 = vmov -1.0  }
 0x73e   : > { %6646 = vrsqrt.f32 %v2776_v51  ;;  %v9701_v51 = vpop.eup %6628  ;;  %v9704_v62 = vsel %vm3041_vm4, 1.0, %v12409_v7  ;;  %v9712_v26 = vand.u32 2147483647, %v9694_v61  ;;  %v2788_v6 = vadd.f32 1e-05, %v2787_v30 }
 0x73f   : > { %v2791_v63 = vpop.f32.mrf.mxu1  ;;  %6648 = vrsqrt.f32 %v2780_v4  ;;  %v9709_v4 = vsel %vm3040_vm3, 1.0, %v12409_v7  ;;  %v9717_v18 = vmul.f32 0.5, %v9665_v10  ;;  %v9720_v12 = vmul.f32 0.70710677, %v9697_v13 }
 0x740   : > { %6650 = vpow2.f32 %v3618_v27  ;;  %vm3043_vm5 = vcmp.ge.f32.partialorder %v9671_v17, 0.0  ;;  %v3141_v36 = vmul.f32 0.3275911, %v9712_v26  ;;  %v3622_v1 = vmul.f32 1.442695, %v3587_v3 }
 0x741   : > { %v2793_v0 = vpop.f32.mrf.mxu1  ;;  %6652 = vrcp.f32 %v3170_v48  ;;  %v3586_v30 = vmul.f32 %v3554_v8, %v3106_v60  ;;  %v9730_v10 = vand.u32 2147483647, %v9720_v12  ;;  %v2792_v46 = vadd.f32 1e-05, %v2791_v63 }
 0x742   : > { %6654 = vrsqrt.f32 %v2782_v33  ;;  %v3173_v34 = vadd.f32 1.0, %v3141_v36  ;;  %vm3042_vm6 = vcmp.ge.f32.partialorder %v9674_v15, 0.0  ;;  %v9761_v17 = vmul.f32 0.5, %v9687_v43 }
 0x743   : > { %v9714_v23 = vpop.eup %6630  ;;  %6656 = vpow2.f32 %v3616_v54  ;;  %v2797_v48 = vpop.f32.mrf.mxu1  ;;  %v2865_v54 = vmul.f32 %v6625_v31, %v9258_v35  ;;  %v3140_v60 = vmul.f32 0.3275911, %v9730_v10  ;;  %v9749_v35 = vsel %vm3043_vm5, 1.0, %v12409_v7 }
 0x744   : > { %v9722_v27 = vpop.eup %6632  ;;  %v3264_v22 = vmul.f32 1.0614054, %v9714_v23  ;;  %6658 = vrsqrt.f32 %v2786_v57  ;;  %v9739_v57 = vmul.f32 0.5, %v9668_v20  ;;  %v9758_v15 = vsel %vm3042_vm6, 1.0, %v12409_v7 }
 0x745   : > { %v9727_v56 = vpop.eup %6634  ;;  %6660 = vrsqrt.f32 %v2788_v6  ;;  %v3172_v63 = vadd.f32 1.0, %v3140_v60  ;;  %v2799_v31 = vpop.f32.mrf.mxu1  ;;  %vm3045_vm7 = vcmp.ge.f32.partialorder %v9694_v61, 0.0  ;;  %v2864_v11 = vmul.f32 %v9690_v37, %v9254_v42 }
 0x746   : > { %v9732_v33 = vpop.eup %6636  ;;  %v3265_v19 = vmul.f32 1.0614054, %v9727_v56  ;;  %v3296_v47 = vadd.f32 -1.4531521, %v3264_v22  ;;  %6662 = vrcp.f32 %v3173_v34  ;;  %v2794_v22 = vadd.f32 1e-05, %v2793_v0 }
 0x747   : > { %v9736_v59 = vpop.eup %6638  ;;  %6664 = vpow2.f32 %v3622_v1  ;;  %v2798_v34 = vadd.f32 1e-05, %v2797_v48  ;;  %vm3044_vm8 = vcmp.ge.f32.partialorder %v9720_v12, 0.0 }
 0x748   : > { %v9742_v3 = vpop.eup %6640  ;;  %v3297_v8 = vadd.f32 -1.4531521, %v3265_v19  ;;  %v3328_v14 = vmul.f32 %v9714_v23, %v3296_v47  ;;  %v3620_v19 = vmul.f32 1.442695, %v3586_v30  ;;  %v2908_v47 = vmul.f32 %v9641_v9, %v2865_v54  ;;  %v2803_v54 = vpop.f32.mrf.mxu1 }
 0x749   : > { %v9751_v20 = vpop.eup %6642  ;;  %6666 = vrsqrt.f32 %v2792_v46  ;;  %v3557_v46 = vsub.f32 0.0, %v9712_v26 }
 0x74a   : > { %12410 = vst [vmem:[#allocation45_spill] sm:$0xff] %v9751_v20  ;;  %v3329_v6 = vmul.f32 %v9727_v56, %v3297_v8  ;;  %v3360_v36 = vadd.f32 1.4214138, %v3328_v14  ;;  %v9755_v50 = vpop.eup %6644  ;;  %6668 = vrcp.f32 %v3172_v63  ;;  %v9772_v48 = vadd.f32 %v9649_v52, %v2908_v47  ;;  %v2805_v42 = vpop.f32.mrf.mxu1 }
 0x74b   : > { %v9763_v0 = vpop.eup %6646  ;;  %v3267_v14 = vmul.f32 1.0614054, %v9755_v50  ;;  %6670 = vrsqrt.f32 %v2794_v22  ;;  %v2800_v63 = vadd.f32 1e-05, %v2799_v31  ;;  %v3556_v31 = vsub.f32 0.0, %v9730_v10 }
 0x74c   : > { %12411 = vst [vmem:[#allocation79_spill] sm:$0xff] %v9763_v0  ;;  %v3361_v1 = vadd.f32 1.4214138, %v3329_v6  ;;  %v3392_v60 = vmul.f32 %v9714_v23, %v3360_v36  ;;  %v9767_v30 = vpop.eup %6648  ;;  %6672 = vpow2.f32 %v3620_v19  ;;  %v9778_v22 = vmul.f32 0.70710677, %v9772_v48 }
 0x74d   : > { %12412 = vst [vmem:[#allocation42_spill] sm:$0xff] %v9767_v30  ;;  %v6651_v43 = vpop.eup %6650  ;;  %v3299_v40 = vadd.f32 -1.4531521, %v3267_v14  ;;  %6674 = vrsqrt.f32 %v2798_v34  ;;  %v2804_v14 = vadd.f32 1e-05, %v2803_v54  ;;  %v3589_v34 = vmul.f32 %v3557_v46, %v9712_v26 }
 0x74e   : > { %v3393_v8 = vmul.f32 %v9727_v56, %v3361_v1  ;;  %v3424_v6 = vadd.f32 -0.28449672, %v3392_v60  ;;  %v9775_v36 = vpop.eup %6652  ;;  %v9790_v21 = vand.u32 2147483647, %v9778_v22  ;;  %6676 = vrsqrt.f32 %v2800_v63 }
 0x74f   : > { %v9782_v25 = vpop.eup %6654  ;;  %v3331_v1 = vmul.f32 %v9755_v50, %v3299_v40  ;;  %v3266_v60 = vmul.f32 1.0614054, %v9775_v36  ;;  %v9796_v40 = vmul.f32 0.5, %v9697_v13  ;;  %v2907_v26 = vmul.f32 %v9637_v41, %v2864_v11 }
 0x750   : > { %12413 = vst [vmem:[#allocation78_spill] sm:$0xff] %v9782_v25  ;;  %v3425_v47 = vadd.f32 -0.28449672, %v3393_v8  ;;  %v3456_v2 = vmul.f32 %v9714_v23, %v3424_v6  ;;  %v6657_v19 = vpop.eup %6656  ;;  %v3143_v54 = vmul.f32 0.3275911, %v9790_v21  ;;  %6678 = vrsqrt.f32 %v2804_v14 }
 0x751   : > { %v9792_v30 = vpop.eup %6658  ;;  %v3363_v6 = vadd.f32 1.4214138, %v3331_v1  ;;  %v3298_v49 = vadd.f32 -1.4531521, %v3266_v60  ;;  %v9810_v13 = vsel %vm3045_vm7, 1.0, %v12409_v7  ;;  %v3588_v11 = vmul.f32 %v3556_v31, %v9730_v10  ;;  %v2809_v60 = vpop.f32.mrf.mxu1 }
 0x752   : > { %12414 = vst [vmem:[#allocation51_spill] sm:$0xff] %v9792_v30  ;;  %v3457_v37 = vmul.f32 %v9727_v56, %v3425_v47  ;;  %v3488_v8 = vadd.f32 0.2548296, %v3456_v2  ;;  %v9800_v46 = vpop.eup %6660  ;;  %v3626_v63 = vmul.f32 1.442695, %v3589_v34  ;;  %v3175_v20 = vadd.f32 1.0, %v3143_v54 }
 0x753   : > { %12415 = vst [vmem:[#allocation50_spill] sm:$0xff] %v9800_v46  ;;  %v3395_v30 = vmul.f32 %v9755_v50, %v3363_v6  ;;  %v3330_v47 = vmul.f32 %v9775_v36, %v3298_v49  ;;  %v9805_v2 = vpop.eup %6662  ;;  %v2806_v46 = vadd.f32 1e-05, %v2805_v42  ;;  %v9816_v14 = vadd.f32 %v9644_v5, %v2907_v26 }
 0x754   : > { %v3489_v25 = vadd.f32 0.2548296, %v3457_v37  ;;  %v3520_v45 = vmul.f32 %v9714_v23, %v3488_v8  ;;  %v6665_v1 = vpop.eup %6664  ;;  %v3269_v49 = vmul.f32 1.0614054, %v9805_v2  ;;  %6680 = vpow2.f32 %v3626_v63 }
 0x755   : > { %v3427_v8 = vadd.f32 -0.28449672, %v3395_v30  ;;  %v3362_v6 = vadd.f32 1.4214138, %v3330_v47  ;;  %6682 = vrcp.f32 %v3175_v20  ;;  %vm3047_vm9 = vcmp.ge.f32.partialorder %v9778_v22, 0.0  ;;  %v7008_v22 = vld [vmem:[%s12115_s9 + $0x88] sm:$0xff] }
 0x756   : > { %v3521_v37 = vmul.f32 %v9727_v56, %v3489_v25  ;;  %v3680_v23 = vmul.f32 %v6657_v19, %v3520_v45  ;;  %v9818_v61 = vpop.eup %6666  ;;  %v9824_v45 = vadd.f32 1e-05, %v2809_v60  ;;  %v3301_v25 = vadd.f32 -1.4531521, %v3269_v49 }
 0x757   : > { %v3459_v10 = vmul.f32 %v9755_v50, %v3427_v8  ;;  %v3394_v31 = vmul.f32 %v9775_v36, %v3362_v6  ;;  %v9822_v0 = vpop.eup %6668  ;;  %v3624_v56 = vmul.f32 1.442695, %v3588_v11  ;;  %v9833_v60 = vmul.f32 0.70710677, %v9816_v14 }
 0x758   : > { %v3681_v55 = vmul.f32 %v6651_v43, %v3521_v37  ;;  %v3712_v34 = vsub.f32 1.0, %v3680_v23  ;;  %v9826_v30 = vpop.eup %6670  ;;  %v3333_v47 = vmul.f32 %v9805_v2, %v3301_v25  ;;  %v3268_v37 = vmul.f32 1.0614054, %v9822_v0 }
 0x759   : > { %v3491_v54 = vadd.f32 0.2548296, %v3459_v10  ;;  %v3426_v26 = vadd.f32 -0.28449672, %v3394_v31  ;;  %v6673_v43 = vpop.eup %6672  ;;  %6684 = vrsqrt.f32 %v2806_v46  ;;  %v3559_v49 = vsub.f32 0.0, %v9790_v21  ;;  %v2811_v31 = vpop.f32.mrf.mxu1 }
 0x75a   : > { %v3713_v19 = vsub.f32 1.0, %v3681_v55  ;;  %v3744_v42 = vmul.f32 %v3712_v34, %v9709_v4  ;;  %v9835_v63 = vpop.eup %6674  ;;  %v3365_v8 = vadd.f32 1.4214138, %v3333_v47  ;;  %v3300_v6 = vadd.f32 -1.4531521, %v3268_v37 }
 0x75b   : > { %12416 = vst [vmem:[#allocation53_spill] sm:$0xff] %v9835_v63  ;;  %v3523_v4 = vmul.f32 %v9755_v50, %v3491_v54  ;;  %v3458_v23 = vmul.f32 %v9775_v36, %v3426_v26  ;;  %6686 = vpow2.f32 %v3624_v56  ;;  %v9845_v50 = vand.u32 2147483647, %v9833_v60 }
 0x75c   : > { %v3745_v11 = vmul.f32 %v3713_v19, %v9704_v62  ;;  %v3776_v55 = vadd.f32 1.0, %v3744_v42  ;;  %v3397_v63 = vmul.f32 %v9805_v2, %v3365_v8  ;;  %v3332_v62 = vmul.f32 %v9822_v0, %v3300_v6  ;;  %v9847_v19 = vpop.eup %6676 }
 0x75d   : > { %v3683_v10 = vmul.f32 %v6665_v1, %v3523_v4  ;;  %v3490_v20 = vadd.f32 0.2548296, %v3458_v23  ;;  %v2867_v1 = vmul.f32 %v9701_v51, %v9272_v38  ;;  %v2866_v47 = vmul.f32 %v9699_v53, %v9268_v58  ;;  %v9856_v37 = vpop.eup %6678  ;;  %v2815_v23 = vpop.f32.mrf.mxu1 }
 0x75e   : > { %v3777_v34 = vadd.f32 1.0, %v3745_v11  ;;  %v3808_v25 = vmul.f32 %v3776_v55, %v9680_v16  ;;  %v3429_v56 = vadd.f32 -0.28449672, %v3397_v63  ;;  %v3364_v26 = vadd.f32 1.4214138, %v3332_v62  ;;  %v6997_v62 = vld [vmem:[%s12115_s9 + $0xe0] sm:$0xff] }
 0x75f   : > { %v3715_v42 = vsub.f32 1.0, %v3683_v10  ;;  %v3522_v54 = vmul.f32 %v9775_v36, %v3490_v20  ;;  %v3142_v16 = vmul.f32 0.3275911, %v9845_v50  ;;  %v2812_v11 = vadd.f32 1e-05, %v2811_v31  ;;  %v6996_v20 = vld [vmem:[%s12115_s9 + $0xe8] sm:$0xff] }
 0x760   : > { %v3809_v46 = vmul.f32 %v3777_v34, %v9678_v29  ;;  %v2910_v4 = vmul.f32 %v9641_v9, %v2867_v1  ;;  %v3461_v36 = vmul.f32 %v9805_v2, %v3429_v56  ;;  %v3396_v38 = vmul.f32 %v9822_v0, %v3364_v26  ;;  %v6999_v56 = vld [vmem:[%s12115_s9 + $0xd0] sm:$0xff]  ;;  %v2817_v26 = vpop.f32.mrf.mxu1 }
 0x761   : > { %v3747_v55 = vmul.f32 %v3715_v42, %v9749_v35  ;;  %v3682_v29 = vmul.f32 %v6673_v43, %v3522_v54  ;;  %v3174_v51 = vadd.f32 1.0, %v3142_v16  ;;  %v2909_v63 = vmul.f32 %v9637_v41, %v2866_v47  ;;  %v6995_v35 = vld [vmem:[%s12115_s9 + $0xf0] sm:$0xff] }
 0x762   : > { %3982 = vmatprep.mubr.f32.mxu0 %v3809_v46  ;;  %v3591_v53 = vmul.f32 %v3559_v49, %v9790_v21  ;;  %v9865_v6 = vadd.f32 %v9649_v52, %v2910_v4  ;;  %v3493_v43 = vadd.f32 0.2548296, %v3461_v36  ;;  %v3428_v34 = vadd.f32 -0.28449672, %v3396_v38  ;;  %v6681_v21 = vpop.eup %6680 }
 0x763   : > { %3983 = vmatmul.mubr.f32.vlgmr.msra.gmra.mxu0 %v3808_v25  ;;  %v3779_v8 = vadd.f32 1.0, %v3747_v55  ;;  %v3714_v58 = vsub.f32 1.0, %v3682_v29  ;;  %6688 = vrcp.f32 %v3174_v51  ;;  %v9871_v10 = vadd.f32 %v9644_v5, %v2909_v63  ;;  %v9895_v12 = vpop.eup %6682  ;;  %v7001_v51 = vld [vmem:[%s12115_s9 + $0xc0] sm:$0xff] }
 0x764   : > { %4305 = vmatpush1.msra.mxu0 %v6995_v35  ;;  %6690 = vrsqrt.f32 %v9824_v45  ;;  %v9882_v25 = vsel %vm3044_vm8, 1.0, %v12409_v7  ;;  %v2816_v46 = vadd.f32 1e-05, %v2815_v23  ;;  %v3525_v42 = vmul.f32 %v9805_v2, %v3493_v43  ;;  %v2821_v43 = vpop.f32.mrf.mxu1 }
 0x765   : > { %4306 = vmatprep.subr.mxu0 %v6996_v20  ;;  %v3811_v49 = vmul.f32 %v3779_v8, %v9739_v57  ;;  %v3746_v31 = vmul.f32 %v3714_v58, %v9758_v15  ;;  %v3460_v54 = vmul.f32 %v9822_v0, %v3428_v34  ;;  %v9890_v45 = vmul.f32 0.70710677, %v9865_v6  ;;  %v6998_v57 = vld [vmem:[%s12115_s9 + $0xd8] sm:$0xff] }
 0x766   : > { %4307 = vmatpush1.msra.mxu0 %v6997_v62  ;;  %6692 = vrsqrt.f32 %v2812_v11  ;;  %v9898_v1 = vmul.f32 0.70710677, %v9871_v10  ;;  %v2869_v2 = vmul.f32 %v9732_v33, %v9286_v44  ;;  %v3685_v16 = vmul.f32 %v6681_v21, %v3525_v42  ;;  %v7000_v11 = vld [vmem:[%s12115_s9 + $0xc8] sm:$0xff]  ;;  %v9909_v4 = vpop.eup %6684  ;;  %v7003_v21 = vld [vmem:[%s12115_s9 + $0xb0] sm:$0xff] }
 0x767   : > { %4308 = vmatprep.subr.mxu0 %v6998_v57  ;;  %3988 = vmatprep.mubr.f32.mxu0 %v3811_v49  ;;  %v3778_v15 = vadd.f32 1.0, %v3746_v31  ;;  %v3492_v47 = vadd.f32 0.2548296, %v3460_v54  ;;  %v3271_v55 = vmul.f32 1.0614054, %v9895_v12  ;;  %v9913_v33 = vmul.f32 0.5, %v9772_v48 }
 0x768   : > { %4309 = vmatpush1.msra.mxu0 %v6999_v56  ;;  %v3630_v29 = vmul.f32 1.442695, %v3591_v53  ;;  %v3558_v36 = vsub.f32 0.0, %v9845_v50  ;;  %v9917_v38 = vand.u32 2147483647, %v9890_v45  ;;  %v6687_v63 = vpop.eup %6686  ;;  %6694 = vrsqrt.f32 %v2816_v46 }
 0x769   : > { %4310 = vmatprep.subr.mxu0 %v7000_v11  ;;  %v3810_v44 = vmul.f32 %v3778_v15, %v9717_v18  ;;  %v3717_v23 = vsub.f32 1.0, %v3685_v16  ;;  %v3524_v8 = vmul.f32 %v9822_v0, %v3492_v47  ;;  %v3303_v58 = vadd.f32 -1.4531521, %v3271_v55  ;;  %v7002_v18 = vld [vmem:[%s12115_s9 + $0xb8] sm:$0xff]  ;;  %v2823_v16 = vpop.f32.mrf.mxu1  ;;  %v7007_v11 = vld [vmem:[%s12115_s9 + $0x90] sm:$0xff] }
 0x76a   : > { %4311 = vmatpush1.msra.mxu0 %v7001_v51  ;;  %v3145_v48 = vmul.f32 0.3275911, %v9917_v38  ;;  %v9929_v53 = vand.u32 2147483647, %v9898_v1  ;;  %v2912_v35 = vmul.f32 %v9641_v9, %v2869_v2  ;;  %6696 = vpow2.f32 %v3630_v29 }
 0x76b   : > { %4312 = vmatprep.subr.mxu0 %v7002_v18  ;;  %3989 = vmatmul.mubr.f32.gmra.mxu0 %v3810_v44  ;;  %v3749_v34 = vmul.f32 %v3717_v23, %v9810_v13  ;;  %v3684_v0 = vmul.f32 %v6687_v63, %v3524_v8  ;;  %v3335_v20 = vmul.f32 %v9895_v12, %v3303_v58  ;;  %v7004_v13 = vld [vmem:[%s12115_s9 + $0xa8] sm:$0xff]  ;;  %v9950_v2 = vadd.f32 1e-05, %v2817_v26  ;;  %v7009_v58 = vld [vmem:[%s12115_s9 + $0x80] sm:$0xff] }
 0x76c   : > { %4313 = vmatpush1.msra.mxu0 %v7003_v21  ;;  %v3590_v49 = vmul.f32 %v3558_v36, %v9845_v50  ;;  %v3177_v31 = vadd.f32 1.0, %v3145_v48  ;;  %v3144_v62 = vmul.f32 0.3275911, %v9929_v53  ;;  %v2868_v46 = vmul.f32 %v9722_v27, %v9282_v32  ;;  %v7005_v50 = vld [vmem:[%s12115_s9 + $0xa0] sm:$0xff]  ;;  %v7006_v27 = vld [vmem:[%s12115_s9 + $0x98] sm:$0xff] }
 0x76d   : > { %4314 = vmatprep.subr.mxu0 %v7004_v13  ;;  %v3781_v42 = vadd.f32 1.0, %v3749_v34  ;;  %v3716_v54 = vsub.f32 1.0, %v3684_v0  ;;  %v3367_v57 = vadd.f32 1.4214138, %v3335_v20  ;;  %v9945_v15 = vadd.f32 %v9649_v52, %v2912_v35  ;;  %v7010_v34 = vld [vmem:[%s12115_s9 + $0x78] sm:$0xff] }
 0x76e   : > { %4315 = vmatpush1.msra.mxu0 %v7005_v50  ;;  %v9952_v56 = vadd.f32 1e-05, %v2821_v43  ;;  %6698 = vrcp.f32 %v3177_v31  ;;  %v3176_v32 = vadd.f32 1.0, %v3144_v62  ;;  %v9962_v29 = vsel %vm3047_vm9, 1.0, %v12409_v7  ;;  %v7011_v62 = vld [vmem:[%s12115_s9 + $0x70] sm:$0xff] }
 0x76f   : > { %4316 = vmatprep.subr.mxu0 %v7006_v27  ;;  %v3813_v47 = vmul.f32 %v3781_v42, %v9761_v17  ;;  %v3748_v55 = vmul.f32 %v3716_v54, %v9882_v25  ;;  %v3399_v26 = vmul.f32 %v9895_v12, %v3367_v57  ;;  %vm3046_vm10 = vcmp.ge.f32.partialorder %v9833_v60, 0.0 }
 0x770   : > { %4317 = vmatpush1.msra.mxu0 %v7007_v11  ;;  %v9968_v44 = vpop.eup %6688  ;;  %v3628_v36 = vmul.f32 1.442695, %v3590_v49  ;;  %v9972_v17 = vmul.f32 0.70710677, %v9945_v15  ;;  %v2911_v25 = vmul.f32 %v9637_v41, %v2868_v46  ;;  %6700 = vrcp.f32 %v3176_v32 }
 0x771   : > { %4318 = vmatprep.subr.mxu0 %v7008_v22  ;;  %v9978_v51 = vpop.eup %6690  ;;  %3994 = vmatprep.mubr.f32.mxu0 %v3813_v47  ;;  %v3780_v63 = vadd.f32 1.0, %v3748_v55  ;;  %v3431_v23 = vadd.f32 -0.28449672, %v3399_v26  ;;  %v3270_v8 = vmul.f32 1.0614054, %v9968_v44  ;;  %v3561_v48 = vsub.f32 0.0, %v9917_v38 }
 0x772   : > { %4319 = vmatpush1.msra.mxu0 %v7009_v58  ;;  %v9984_v18 = vadd.f32 1e-05, %v2823_v16  ;;  %v9988_v35 = vand.u32 2147483647, %v9972_v17  ;;  %v9991_v43 = vadd.f32 %v9644_v5, %v2911_v25  ;;  %v10001_v49 = vmul.f32 0.5, %v9816_v14  ;;  %v7012_v14 = vld [vmem:[%s12115_s9 + $0x68] sm:$0xff] }
 0x773   : > { %4320 = vmatprep.subr.mxu0 %v7010_v34  ;;  %v9996_v0 = vpop.eup %6692  ;;  %v3812_v20 = vmul.f32 %v3780_v63, %v9796_v40  ;;  %v3463_v21 = vmul.f32 %v9895_v12, %v3431_v23  ;;  %v3302_v31 = vadd.f32 -1.4531521, %v3270_v8  ;;  %v10009_v46 = vsel %vm3046_vm10, 1.0, %v12409_v7  ;;  %v7013_v55 = vld [vmem:[%s12115_s9 + $0x60] sm:$0xff] }
 0x774   : > { %4321 = vmatpush1.msra.mxu0 %v7011_v62  ;;  %6702 = vpow2.f32 %v3628_v36  ;;  %v3147_v13 = vmul.f32 0.3275911, %v9988_v35  ;;  %v10013_v40 = vmul.f32 0.70710677, %v9991_v43  ;;  %v2871_v60 = vmul.f32 %v9742_v3, %v9300_v28 }
 0x775   : > { %4322 = vmatprep.subr.mxu0 %v7012_v14  ;;  %3995 = vmatmul.mubr.f32.gmra.mxu0 %v3812_v20  ;;  %v3495_v42 = vadd.f32 0.2548296, %v3463_v21  ;;  %v3334_v54 = vmul.f32 %v9968_v44, %v3302_v31  ;;  %v2870_v57 = vmul.f32 %v9736_v59, %v9296_v39  ;;  %v10023_v50 = vpop.eup %6694  ;;  %v3593_v32 = vmul.f32 %v3561_v48, %v9917_v38  ;;  %v7014_v38 = vld [vmem:[%s12115_s9 + $0x58] sm:$0xff]  ;;  %v7017_v48 = vld [vmem:[%s12115_s9 + $0x40] sm:$0xff] }
 0x776   : > { %v3560_v27 = vsub.f32 0.0, %v9929_v53  ;;  %v3179_v16 = vadd.f32 1.0, %v3147_v13  ;;  %v10028_v47 = vand.u32 2147483647, %v10013_v40  ;;  %4323 = vmatpush1.msra.mxu0 %v7013_v55  ;;  %v10035_v39 = vmul.f32 0.5, %v9865_v6  ;;  %v7015_v6 = vld [vmem:[%s12115_s9 + $0x50] sm:$0xff] }
 0x777   : > { %v3527_v28 = vmul.f32 %v9895_v12, %v3495_v42  ;;  %v3366_v3 = vadd.f32 1.4214138, %v3334_v54  ;;  %v2914_v59 = vmul.f32 %v9641_v9, %v2871_v60  ;;  %4324 = vmatprep.subr.mxu0 %v7014_v38  ;;  %v6697_v26 = vpop.eup %6696  ;;  %vm3049_vm11 = vcmp.ge.f32.partialorder %v9890_v45, 0.0  ;;  %v7018_v13 = vld [vmem:[%s12115_s9 + $0x38] sm:$0xff]  ;;  %v7019_v54 = vld [vmem:[%s12115_s9 + $0x30] sm:$0xff]  ;;  %v12417_v45 = vld [vmem:[#allocation79_spill] sm:$0xff] }
 0x778   : > { %v10043_v11 = vmul.f32 0.5, %v9871_v10  ;;  %6704 = vrcp.f32 %v3179_v16  ;;  %v3146_v12 = vmul.f32 0.3275911, %v10028_v47  ;;  %4325 = vmatpush1.msra.mxu0 %v7015_v6  ;;  %v2913_v63 = vmul.f32 %v9637_v41, %v2870_v57  ;;  %v7016_v10 = vld [vmem:[%s12115_s9 + $0x48] sm:$0xff]  ;;  %v7022_v6 = vld [vmem:[%s12115_s9 + $0x18] sm:$0xff] }
 0x779   : > { %v3687_v36 = vmul.f32 %v6697_v26, %v3527_v28  ;;  %v3398_v25 = vmul.f32 %v9968_v44, %v3366_v3  ;;  %v10051_v22 = vadd.f32 %v9649_v52, %v2914_v59  ;;  %4326 = vmatprep.subr.mxu0 %v7016_v10  ;;  %v3634_v23 = vmul.f32 1.442695, %v3593_v32  ;;  %v7020_v16 = vld [vmem:[%s12115_s9 + $0x28] sm:$0xff]  ;;  %v7021_v59 = vld [vmem:[%s12115_s9 + $0x20] sm:$0xff]  ;;  %v7023_v10 = vld [vmem:[%s12115_s9 + $0x10] sm:$0xff] }
 0x77a   : > { %vm3048_vm12 = vcmp.ge.f32.partialorder %v9898_v1, 0.0  ;;  %v3592_v8 = vmul.f32 %v3560_v27, %v9929_v53  ;;  %v3178_v58 = vadd.f32 1.0, %v3146_v12  ;;  %4327 = vmatpush1.msra.mxu0 %v7017_v48  ;;  %v3563_v31 = vsub.f32 0.0, %v9988_v35 }
 0x77b   : > { %v10062_v34 = vpop.eup %6698  ;;  %v3719_v20 = vsub.f32 1.0, %v3687_v36  ;;  %v3430_v21 = vadd.f32 -0.28449672, %v3398_v25  ;;  %v10066_v62 = vmul.f32 0.70710677, %v10051_v22  ;;  %4328 = vmatprep.subr.mxu0 %v7018_v13  ;;  %v10074_v53 = vsel %vm3049_vm11, 1.0, %v12409_v7 }
 0x77c   : > { %v3273_v14 = vmul.f32 1.0614054, %v10062_v34  ;;  %6706 = vrcp.f32 %v3178_v58  ;;  %v10078_v42 = vadd.f32 %v9644_v5, %v2913_v63  ;;  %4329 = vmatpush1.msra.mxu0 %v7019_v54  ;;  %v2873_v27 = vmul.f32 %v12417_v45, %v9314_v24 }
 0x77d   : > { %v3751_v60 = vmul.f32 %v3719_v20, %v9962_v29  ;;  %v3462_v57 = vmul.f32 %v9968_v44, %v3430_v21  ;;  %v10086_v32 = vand.u32 2147483647, %v10066_v62  ;;  %4330 = vmatprep.subr.mxu0 %v7020_v16  ;;  %v10093_v55 = vpop.eup %6700  ;;  %6708 = vpow2.f32 %v3634_v23  ;;  %v7024_v20 = vld [vmem:[%s12115_s9 + $0x8] sm:$0xff] }
 0x77e   : > { %v3305_v28 = vadd.f32 -1.4531521, %v3273_v14  ;;  %v10098_v29 = vsel %vm3048_vm12, 1.0, %v12409_v7  ;;  %v3632_v3 = vmul.f32 1.442695, %v3592_v8  ;;  %4331 = vmatpush1.msra.mxu0 %v7021_v59  ;;  %v3595_v12 = vmul.f32 %v3563_v31, %v9988_v35 }
 0x77f   : > { %v3783_v24 = vadd.f32 1.0, %v3751_v60  ;;  %v3494_v38 = vadd.f32 0.2548296, %v3462_v57  ;;  %v3272_v26 = vmul.f32 1.0614054, %v10093_v55  ;;  %4332 = vmatprep.subr.mxu0 %v7022_v6  ;;  %v3562_v36 = vsub.f32 0.0, %v10028_v47 }
 0x780   : > { %v3337_v1 = vmul.f32 %v10062_v34, %v3305_v28  ;;  %v3149_v25 = vmul.f32 0.3275911, %v10086_v32  ;;  %v10112_v63 = vmul.f32 0.70710677, %v10078_v42  ;;  %4333 = vmatpush1.msra.mxu0 %v7023_v10  ;;  %v2916_v48 = vmul.f32 %v9641_v9, %v2873_v27  ;;  %v7027_v27 = vld [vmem:[%s12115_s9 + $0x1f0] sm:$0xff] }
 0x781   : > { %v6703_v35 = vpop.eup %6702  ;;  %v3815_v23 = vmul.f32 %v3783_v24, %v9913_v33  ;;  %v3526_v8 = vmul.f32 %v9968_v44, %v3494_v38  ;;  %v3304_v58 = vadd.f32 -1.4531521, %v3272_v26  ;;  %4334 = vmatprep.subr.mxu0 %v7024_v20  ;;  %v10124_v31 = vmul.f32 0.5, %v9945_v15  ;;  %v7025_v33 = vld [vmem:[%s12115_s9] sm:$0xff]  ;;  %v7026_v15 = vld [vmem:[%s12115_s9 + $0x1f8] sm:$0xff] }
 0x782   : > { %v3369_v21 = vadd.f32 1.4214138, %v3337_v1  ;;  %v3181_v13 = vadd.f32 1.0, %v3149_v25  ;;  %v10127_v14 = vand.u32 2147483647, %v10112_v63  ;;  %4335 = vmatpush1.msra.mxu0 %v7025_v33  ;;  %6710 = vpow2.f32 %v3632_v3  ;;  %v7032_v33 = vld [vmem:[%s12115_s9 + $0x1c8] sm:$0xff] }
 0x783   : > { %4000 = vmatprep.mubr.f32.mxu0 %v3815_v23  ;;  %v3686_v44 = vmul.f32 %v6703_v35, %v3526_v8  ;;  %v3336_v54 = vmul.f32 %v10093_v55, %v3304_v58  ;;  %vm3051_vm13 = vcmp.ge.f32.partialorder %v9972_v17, 0.0  ;;  %4336 = vmatprep.subr.mxu0 %v7026_v15  ;;  %v3594_v57 = vmul.f32 %v3562_v36, %v10028_v47  ;;  %v7028_v47 = vld [vmem:[%s12115_s9 + $0x1e8] sm:$0xff]  ;;  %v7029_v36 = vld [vmem:[%s12115_s9 + $0x1e0] sm:$0xff]  ;;  %v7030_v23 = vld [vmem:[%s12115_s9 + $0x1d8] sm:$0xff] }
 0x784   : > { %v3401_v60 = vmul.f32 %v10062_v34, %v3369_v21  ;;  %6712 = vrcp.f32 %v3181_v13  ;;  %v3148_v45 = vmul.f32 0.3275911, %v10127_v14  ;;  %4337 = vmatpush2.msra.mxu0 %v7027_v27  ;;  %v3638_v59 = vmul.f32 1.442695, %v3595_v12 }
 0x785   : > { %v10143_v16 = vpop.eup %6704  ;;  %v3718_v28 = vsub.f32 1.0, %v3686_v44  ;;  %v3368_v3 = vadd.f32 1.4214138, %v3336_v54  ;;  %v10146_v24 = vadd.f32 %v9649_v52, %v2916_v48  ;;  %4338 = vmatprep.subr.mxu0 %v7028_v47  ;;  %v3565_v6 = vsub.f32 0.0, %v10086_v32  ;;  %v7034_v47 = vld [vmem:[%s12115_s9 + $0x1b8] sm:$0xff] }
 0x786   : > { %v3433_v38 = vadd.f32 -0.28449672, %v3401_v60  ;;  %v3275_v26 = vmul.f32 1.0614054, %v10143_v16  ;;  %v3180_v1 = vadd.f32 1.0, %v3148_v45  ;;  %4339 = vmatpush2.msra.mxu0 %v7029_v36  ;;  %v10161_v10 = vsel %vm3051_vm13, 1.0, %v12409_v7 }
 0x787   : > { %v3750_v12 = vmul.f32 %v3718_v28, %v10009_v46  ;;  %v3400_v25 = vmul.f32 %v10093_v55, %v3368_v3  ;;  %v10164_v35 = vmul.f32 0.70710677, %v10146_v24  ;;  %4340 = vmatprep.subr.mxu0 %v7030_v23  ;;  %v3636_v48 = vmul.f32 1.442695, %v3594_v57  ;;  %v7031_v46 = vld [vmem:[%s12115_s9 + $0x1d0] sm:$0xff]  ;;  %v7033_v57 = vld [vmem:[%s12115_s9 + $0x1c0] sm:$0xff] }
 0x788   : > { %v3465_v8 = vmul.f32 %v10062_v34, %v3433_v38  ;;  %v3307_v58 = vadd.f32 -1.4531521, %v3275_v26  ;;  %6714 = vrcp.f32 %v3180_v1  ;;  %4341 = vmatpush2.msra.mxu0 %v7031_v46  ;;  %v3597_v60 = vmul.f32 %v3565_v6, %v10086_v32  ;;  %v12418_v36 = vld [vmem:[#allocation84_spill] sm:$0xff]  ;;  %v12420_v23 = vld [vmem:[#allocation86_spill] sm:$0xff] }
 0x789   : > { %v10173_v17 = vpop.eup %6706  ;;  %v3782_v20 = vadd.f32 1.0, %v3750_v12  ;;  %v3432_v21 = vadd.f32 -0.28449672, %v3400_v25  ;;  %6716 = vpow2.f32 %v3638_v59  ;;  %v10176_v13 = vand.u32 2147483647, %v10164_v35  ;;  %4342 = vmatprep.subr.mxu0 %v7032_v33  ;;  %v12419_v12 = vld [vmem:[#allocation45_spill] sm:$0xff] }
 0x78a   : > { %v3497_v44 = vadd.f32 0.2548296, %v3465_v8  ;;  %v3339_v54 = vmul.f32 %v10143_v16, %v3307_v58  ;;  %v3274_v15 = vmul.f32 1.0614054, %v10173_v17  ;;  %4343 = vmatpush2.msra.mxu0 %v7033_v57  ;;  %v6709_v45 = vpop.eup %6708  ;;  %v3564_v3 = vsub.f32 0.0, %v10127_v14  ;;  %v12421_v8 = vld [vmem:[#allocation78_spill] sm:$0xff] }
 0x78b   : > { %v3814_v27 = vmul.f32 %v3782_v20, %v10001_v49  ;;  %v3464_v28 = vmul.f32 %v10093_v55, %v3432_v21  ;;  %v3151_v59 = vmul.f32 0.3275911, %v10176_v13  ;;  %4344 = vmatprep.subr.mxu0 %v7034_v47  ;;  %6718 = vpow2.f32 %v3636_v48  ;;  %v7035_v49 = vld [vmem:[%s12115_s9 + $0x1b0] sm:$0xff]  ;;  %v7037_v33 = vld [vmem:[%s12115_s9 + $0x1a0] sm:$0xff]  ;;  %v7038_v57 = vld [vmem:[%s12115_s9 + $0x198] sm:$0xff] }
 0x78c   : > { %v3529_v32 = vmul.f32 %v10062_v34, %v3497_v44  ;;  %v3371_v38 = vadd.f32 1.4214138, %v3339_v54  ;;  %v3306_v26 = vadd.f32 -1.4531521, %v3274_v15  ;;  %4345 = vmatpush2.msra.mxu0 %v7035_v49  ;;  %v2872_v25 = vmul.f32 %v12419_v12, %v12418_v36  ;;  %v7036_v34 = vld [vmem:[%s12115_s9 + $0x1a8] sm:$0xff] }
 0x78d   : > { %4001 = vmatmul.mubr.f32.gmra.mxu0 %v3814_v27  ;;  %v3496_v6 = vadd.f32 0.2548296, %v3464_v28  ;;  %v3183_v1 = vadd.f32 1.0, %v3151_v59  ;;  %v2875_v58 = vmul.f32 %v12421_v8, %v12420_v23  ;;  %4346 = vmatprep.subr.mxu0 %v7036_v34  ;;  %v3642_v21 = vmul.f32 1.442695, %v3597_v60 }
 0x78e   : > { %v3689_v48 = vmul.f32 %v6709_v45, %v3529_v32  ;;  %v3403_v46 = vmul.f32 %v10143_v16, %v3371_v38  ;;  %v3338_v20 = vmul.f32 %v10173_v17, %v3306_v26  ;;  %4347 = vmatpush2.msra.mxu0 %v7037_v33  ;;  %v3596_v54 = vmul.f32 %v3564_v3, %v10127_v14 }
 0x78f   : > { %v3528_v44 = vmul.f32 %v10093_v55, %v3496_v6  ;;  %6720 = vrcp.f32 %v3183_v1  ;;  %v2915_v15 = vmul.f32 %v9637_v41, %v2872_v25  ;;  %4348 = vmatprep.subr.mxu0 %v7038_v57  ;;  %v6711_v45 = vpop.eup %6710  ;;  %v10217_v28 = vmul.f32 0.5, %v9991_v43  ;;  %v7039_v55 = vld [vmem:[%s12115_s9 + $0x190] sm:$0xff]  ;;  %v7040_v43 = vld [vmem:[%s12115_s9 + $0x188] sm:$0xff]  ;;  %v7041_v1 = vld [vmem:[%s12115_s9 + $0x180] sm:$0xff] }
 0x790   : > { %v3721_v27 = vsub.f32 1.0, %v3689_v48  ;;  %v3435_v60 = vadd.f32 -0.28449672, %v3403_v46  ;;  %v3370_v59 = vadd.f32 1.4214138, %v3338_v20  ;;  %4349 = vmatpush2.msra.mxu0 %v7039_v55  ;;  %vm3050_vm14 = vcmp.ge.f32.partialorder %v10013_v40, 0.0 }
 0x791   : > { %v10222_v14 = vpop.eup %6712  ;;  %v3688_v3 = vmul.f32 %v6711_v45, %v3528_v44  ;;  %v10226_v47 = vadd.f32 %v9644_v5, %v2915_v15  ;;  %v2918_v32 = vmul.f32 %v9641_v9, %v2875_v58  ;;  %4350 = vmatprep.subr.mxu0 %v7040_v43  ;;  %v3640_v12 = vmul.f32 1.442695, %v3596_v54  ;;  %v7043_v48 = vld [vmem:[%s12115_s9 + $0x170] sm:$0xff]  ;;  %v7048_v40 = vld [vmem:[%s12115_s9 + $0x148] sm:$0xff] }
 0x792   : > { %v3753_v38 = vmul.f32 %v3721_v27, %v10074_v53  ;;  %v3467_v26 = vmul.f32 %v10143_v16, %v3435_v60  ;;  %v3402_v49 = vmul.f32 %v10173_v17, %v3370_v59  ;;  %v3277_v6 = vmul.f32 1.0614054, %v10222_v14  ;;  %4351 = vmatpush2.msra.mxu0 %v7041_v1  ;;  %v7042_v53 = vld [vmem:[%s12115_s9 + $0x178] sm:$0xff]  ;;  %v7045_v60 = vld [vmem:[%s12115_s9 + $0x160] sm:$0xff] }
 0x793   : > { %v3720_v36 = vsub.f32 1.0, %v3688_v3  ;;  %v3567_v25 = vsub.f32 0.0, %v10176_v13  ;;  %v10241_v23 = vmul.f32 0.70710677, %v10226_v47  ;;  %4352 = vmatprep.subr.mxu0 %v7042_v53  ;;  %6722 = vpow2.f32 %v3642_v21  ;;  %v7044_v21 = vld [vmem:[%s12115_s9 + $0x168] sm:$0xff] }
 0x794   : > { %v3785_v8 = vadd.f32 1.0, %v3753_v38  ;;  %v3499_v58 = vadd.f32 0.2548296, %v3467_v26  ;;  %v3434_v34 = vadd.f32 -0.28449672, %v3402_v49  ;;  %4353 = vmatpush2.msra.mxu0 %v7043_v48  ;;  %v10256_v54 = vadd.f32 %v9649_v52, %v2918_v32  ;;  %v7047_v49 = vld [vmem:[%s12115_s9 + $0x150] sm:$0xff] }
 0x795   : > { %v10249_v46 = vpop.eup %6714  ;;  %v3752_v20 = vmul.f32 %v3720_v36, %v10098_v29  ;;  %v3309_v33 = vadd.f32 -1.4531521, %v3277_v6  ;;  %v10253_v44 = vand.u32 2147483647, %v10241_v23  ;;  %4354 = vmatprep.subr.mxu0 %v7044_v21  ;;  %v3599_v3 = vmul.f32 %v3567_v25, %v10176_v13 }
 0x796   : > { %v6717_v15 = vpop.eup %6716  ;;  %v3817_v57 = vmul.f32 %v3785_v8, %v10035_v39  ;;  %v3531_v45 = vmul.f32 %v10143_v16, %v3499_v58  ;;  %v3466_v27 = vmul.f32 %v10173_v17, %v3434_v34  ;;  %v3276_v29 = vmul.f32 1.0614054, %v10249_v46  ;;  %4355 = vmatpush2.msra.mxu0 %v7045_v60  ;;  %v7046_v39 = vld [vmem:[%s12115_s9 + $0x158] sm:$0xff] }
 0x797   : > { %v3784_v59 = vadd.f32 1.0, %v3752_v20  ;;  %v3341_v55 = vmul.f32 %v10222_v14, %v3309_v33  ;;  %v3150_v32 = vmul.f32 0.3275911, %v10253_v44  ;;  %4356 = vmatprep.subr.mxu0 %v7046_v39  ;;  %v3082_v43 = vsel %vm3050_vm14, 1.0, %v12409_v7 }
 0x798   : > { %4006 = vmatprep.mubr.f32.mxu0 %v3817_v57  ;;  %v3691_v16 = vmul.f32 %v6717_v15, %v3531_v45  ;;  %v3498_v38 = vadd.f32 0.2548296, %v3466_v27  ;;  %v3308_v26 = vadd.f32 -1.4531521, %v3276_v29  ;;  %4357 = vmatpush2.msra.mxu0 %v7047_v49  ;;  %v6719_v13 = vpop.eup %6718  ;;  %v10282_v25 = vmul.f32 0.70710677, %v10256_v54 }
 0x799   : > { %v3816_v6 = vmul.f32 %v3784_v59, %v10043_v11  ;;  %v3373_v1 = vadd.f32 1.4214138, %v3341_v55  ;;  %v3182_v36 = vadd.f32 1.0, %v3150_v32  ;;  %4358 = vmatprep.subr.mxu0 %v7048_v40  ;;  %6724 = vpow2.f32 %v3640_v12  ;;  %v7049_v11 = vld [vmem:[%s12115_s9 + $0x140] sm:$0xff]  ;;  %v12422_v57 = vld [vmem:[#allocation85_spill] sm:$0xff]  ;;  %v7051_v29 = vld [vmem:[%s12115_s9 + $0x130] sm:$0xff] }
 0x79a   : > { %v3723_v53 = vsub.f32 1.0, %v3691_v16  ;;  %v3530_v8 = vmul.f32 %v10173_v17, %v3498_v38  ;;  %v3340_v58 = vmul.f32 %v10249_v46, %v3308_v26  ;;  %4359 = vmatpush2.msra.mxu0 %v7049_v11  ;;  %v3646_v48 = vmul.f32 1.442695, %v3599_v3  ;;  %v7050_v17 = vld [vmem:[%s12115_s9 + $0x138] sm:$0xff]  ;;  %v12423_v45 = vld [vmem:[#allocation42_spill] sm:$0xff] }
 0x79b   : > { %4007 = vmatmul.mubr.f32.gmra.mxu0 %v3816_v6  ;;  %v3405_v34 = vmul.f32 %v10222_v14, %v3373_v1  ;;  %6726 = vrcp.f32 %v3182_v36  ;;  %v10294_v20 = vand.u32 2147483647, %v10282_v25  ;;  %4360 = vmatprep.subr.mxu0 %v7050_v17  ;;  %v2874_v27 = vmul.f32 %v12423_v45, %v12422_v57 }
 0x79c   : > { %v10299_v33 = vpop.eup %6720  ;;  %v3755_v12 = vmul.f32 %v3723_v53, %v10161_v10  ;;  %v3690_v21 = vmul.f32 %v6719_v13, %v3530_v8  ;;  %v3372_v15 = vadd.f32 1.4214138, %v3340_v58  ;;  %4361 = vmatpush2.msra.mxu0 %v7051_v29  ;;  %v10308_v60 = vmul.f32 0.5, %v10051_v22  ;;  %v7052_v10 = vld [vmem:[%s12115_s9 + $0x128] sm:$0xff]  ;;  %v7053_v22 = vld [vmem:[%s12115_s9 + $0x120] sm:$0xff]  ;;  %v7054_v13 = vld [vmem:[%s12115_s9 + $0x118] sm:$0xff] }
 0x79d   : > { %v3437_v59 = vadd.f32 -0.28449672, %v3405_v34  ;;  %v3279_v55 = vmul.f32 1.0614054, %v10299_v33  ;;  %v3566_v3 = vsub.f32 0.0, %v10253_v44  ;;  %4362 = vmatprep.subr.mxu0 %v7052_v10  ;;  %vm3053_vm15 = vcmp.ge.f32.partialorder %v10066_v62, 0.0 }
 0x79e   : > { %v3787_v32 = vadd.f32 1.0, %v3755_v12  ;;  %v3722_v39 = vsub.f32 1.0, %v3690_v21  ;;  %v3404_v16 = vmul.f32 %v10249_v46, %v3372_v15  ;;  %4363 = vmatpush2.msra.mxu0 %v7053_v22  ;;  %6728 = vpow2.f32 %v3646_v48  ;;  %v7055_v53 = vld [vmem:[%s12115_s9 + $0x110] sm:$0xff]  ;;  %v12425_v15 = vld [vmem:[#allocation50_spill] sm:$0xff]  ;;  %v12427_v10 = vld [vmem:[#allocation51_spill] sm:$0xff] }
 0x79f   : > { %v3469_v38 = vmul.f32 %v10222_v14, %v3437_v59  ;;  %v3311_v26 = vadd.f32 -1.4531521, %v3279_v55  ;;  %v3153_v49 = vmul.f32 0.3275911, %v10294_v20  ;;  %4364 = vmatprep.subr.mxu0 %v7054_v13  ;;  %v2917_v40 = vmul.f32 %v9637_v41, %v2874_v27  ;;  %v12424_v21 = vld [vmem:[#allocation88_spill] sm:$0xff] }
 0x7a0   : > { %v3819_v6 = vmul.f32 %v3787_v32, %v10124_v31  ;;  %v3754_v1 = vmul.f32 %v3722_v39, %v3082_v43  ;;  %v3436_v36 = vadd.f32 -0.28449672, %v3404_v16  ;;  %4365 = vmatpush2.msra.mxu0 %v7055_v53  ;;  %v6723_v8 = vpop.eup %6722  ;;  %v3598_v34 = vmul.f32 %v3566_v3, %v10253_v44  ;;  %v7056_v31 = vld [vmem:[%s12115_s9 + $0x108] sm:$0xff]  ;;  %v7057_v44 = vld [vmem:[%s12115_s9 + $0x100] sm:$0xff] }
 0x7a1   : > { %v3501_v58 = vadd.f32 0.2548296, %v3469_v38  ;;  %v3343_v11 = vmul.f32 %v10299_v33, %v3311_v26  ;;  %v3185_v48 = vadd.f32 1.0, %v3153_v49  ;;  %4366 = vmatprep.subr.mxu0 %v7056_v31  ;;  %v10337_v12 = vadd.f32 %v9644_v5, %v2917_v40  ;;  %v12426_v3 = vld [vmem:[#allocation87_spill] sm:$0xff] }
 0x7a2   : > { %4012 = vmatprep.mubr.f32.mxu0 %v3819_v6  ;;  %v3786_v43 = vadd.f32 1.0, %v3754_v1  ;;  %v3468_v17 = vmul.f32 %v10249_v46, %v3436_v36  ;;  %v2877_v57 = vmul.f32 %v12425_v15, %v12424_v21  ;;  %4367 = vmatpush2.msra.mxu0 %v7057_v44  ;;  %vm3052_vm1 = vcmp.ge.f32.partialorder %v10112_v63, 0.0 }
 0x7a3   : > { %v3533_v45 = vmul.f32 %v10222_v14, %v3501_v58  ;;  %v3375_v27 = vadd.f32 1.4214138, %v3343_v11  ;;  %6730 = vrcp.f32 %v3185_v48  ;;  %v3085_v59 = vsel %vm3053_vm15, 1.0, %v12409_v7 }
 0x7a4   : > { %v3818_v29 = vmul.f32 %v3786_v43, %v10217_v28  ;;  %v3500_v55 = vadd.f32 0.2548296, %v3468_v17  ;;  %v2876_v32 = vmul.f32 %v12427_v10, %v12426_v3  ;;  %v10354_v22 = vmul.f32 0.70710677, %v10337_v12 }
 0x7a5   : > { %v3693_v39 = vmul.f32 %v6723_v8, %v3533_v45  ;;  %v3407_v16 = vmul.f32 %v10299_v33, %v3375_v27  ;;  %v2920_v63 = vmul.f32 %v9641_v9, %v2877_v57  ;;  %v2988_v14 = vmul.f32 0.5, %v10078_v42 }
 0x7a6   : > { %4013 = vmatmul.mubr.f32.gmra.mxu0 %v3818_v29  ;;  %v3084_v28 = vsel %vm3052_vm1, 1.0, %v12409_v7  ;;  %v3532_v62 = vmul.f32 %v10249_v46, %v3500_v55  ;;  %v3644_v38 = vmul.f32 1.442695, %v3598_v34  ;;  %v6725_v26 = vpop.eup %6724  ;;  %v10361_v13 = vmul.f32 0.5, %v10146_v24 }
 0x7a7   : > { %v3725_v49 = vsub.f32 1.0, %v3693_v39  ;;  %v3439_v6 = vadd.f32 -0.28449672, %v3407_v16  ;;  %v3120_v1 = vand.u32 2147483647, %v10354_v22  ;;  %v3569_v53 = vsub.f32 0.0, %v10294_v20 }
 0x7a8   : > { %v10364_v36 = vpop.eup %6726  ;;  %v3692_v40 = vmul.f32 %v6725_v26, %v3532_v62  ;;  %v10368_v42 = vadd.f32 %v9649_v52, %v2920_v63  ;;  %v2919_v8 = vmul.f32 %v9637_v41, %v2876_v32  ;;  %vm3055_vm2 = vcmp.ge.f32.partialorder %v10164_v35, 0.0  ;;  %v12428_v32 = vld [vmem:[#allocation75_spill] sm:$0xff] }
 0x7a9   : > { %v3757_v46 = vmul.f32 %v3725_v49, %v3085_v59  ;;  %v3471_v58 = vmul.f32 %v10299_v33, %v3439_v6  ;;  %v3278_v11 = vmul.f32 1.0614054, %v10364_v36  ;;  %v3152_v24 = vmul.f32 0.3275911, %v3120_v1 }
 0x7aa   : > { %v3724_v34 = vsub.f32 1.0, %v3692_v40  ;;  %6732 = vpow2.f32 %v3644_v38  ;;  %v10375_v48 = vmul.f32 0.70710677, %v10368_v42  ;;  %v3601_v44 = vmul.f32 %v3569_v53, %v10294_v20 }
 0x7ab   : > { %v3789_v31 = vadd.f32 1.0, %v3757_v46  ;;  %v3503_v43 = vadd.f32 0.2548296, %v3471_v58  ;;  %v3310_v17 = vadd.f32 -1.4531521, %v3278_v11  ;;  %v3184_v21 = vadd.f32 1.0, %v3152_v24  ;;  %v6729_v15 = vpop.eup %6728 }
 0x7ac   : > { %v3756_v57 = vmul.f32 %v3724_v34, %v3084_v28  ;;  %v10379_v45 = vand.u32 2147483647, %v10375_v48  ;;  %v10382_v27 = vadd.f32 %v9644_v5, %v2919_v8  ;;  %v3087_v10 = vsel %vm3055_vm2, 1.0, %v12409_v7  ;;  %v12429_v46 = vld [vmem:[#allocation56_spill] sm:$0xff] }
 0x7ad   : > { %v3821_v29 = vmul.f32 %v3789_v31, %v10308_v60  ;;  %v3535_v59 = vmul.f32 %v10299_v33, %v3503_v43  ;;  %v3342_v55 = vmul.f32 %v10364_v36, %v3310_v17  ;;  %6734 = vrcp.f32 %v3184_v21 }
 0x7ae   : > { %v3788_v3 = vadd.f32 1.0, %v3756_v57  ;;  %v3155_v20 = vmul.f32 0.3275911, %v10379_v45  ;;  %v2879_v39 = vmul.f32 %v9826_v30, %v12428_v32  ;;  %v10394_v63 = vmul.f32 0.5, %v10226_v47 }
 0x7af   : > { %4018 = vmatprep.mubr.f32.mxu0 %v3821_v29  ;;  %v3695_v16 = vmul.f32 %v6729_v15, %v3535_v59  ;;  %v3374_v60 = vadd.f32 1.4214138, %v3342_v55  ;;  %v10397_v33 = vmul.f32 0.5, %v10256_v54  ;;  %v3568_v38 = vsub.f32 0.0, %v3120_v1 }
 0x7b0   : > { %v10399_v28 = vpop.eup %6730  ;;  %v3820_v62 = vmul.f32 %v3788_v3, %v2988_v14  ;;  %v3187_v35 = vadd.f32 1.0, %v3155_v20  ;;  %v10402_v26 = vmul.f32 0.70710677, %v10382_v27  ;;  %v3650_v40 = vmul.f32 1.442695, %v3601_v44 }
 0x7b1   : > { %v3727_v49 = vsub.f32 1.0, %v3695_v16  ;;  %v3406_v30 = vmul.f32 %v10364_v36, %v3374_v60  ;;  %v3281_v6 = vmul.f32 1.0614054, %v10399_v28  ;;  %vm3054_vm3 = vcmp.ge.f32.partialorder %v10241_v23, 0.0 }
 0x7b2   : > { %4019 = vmatmul.mubr.f32.gmra.mxu0 %v3820_v62  ;;  %6736 = vrcp.f32 %v3187_v35  ;;  %v10408_v47 = vand.u32 2147483647, %v10402_v26  ;;  %v2922_v54 = vmul.f32 %v9641_v9, %v2879_v39  ;;  %v2878_v58 = vmul.f32 %v9818_v61, %v12429_v46  ;;  %v12430_v62 = vld [vmem:[#allocation74_spill] sm:$0xff] }
 0x7b3   : > { %v3759_v14 = vmul.f32 %v3727_v49, %v3087_v10  ;;  %v3438_v53 = vadd.f32 -0.28449672, %v3406_v30  ;;  %v3313_v8 = vadd.f32 -1.4531521, %v3281_v6  ;;  %vm3057_vm4 = vcmp.ge.f32.partialorder %v10282_v25, 0.0 }
 0x7b4   : > { %v3600_v11 = vmul.f32 %v3568_v38, %v3120_v1  ;;  %v3154_v24 = vmul.f32 0.3275911, %v10408_v47  ;;  %v10416_v34 = vadd.f32 %v9649_v52, %v2922_v54  ;;  %6738 = vpow2.f32 %v3650_v40 }
 0x7b5   : > { %v3791_v31 = vadd.f32 1.0, %v3759_v14  ;;  %v3470_v43 = vmul.f32 %v10364_v36, %v3438_v53  ;;  %v3345_v17 = vmul.f32 %v10399_v28, %v3313_v8  ;;  %vm3056_vm5 = vcmp.ge.f32.partialorder %v10354_v22, 0.0  ;;  %v12432_v8 = vld [vmem:[#allocation53_spill] sm:$0xff] }
 0x7b6   : > { %v3571_v21 = vsub.f32 0.0, %v10379_v45  ;;  %v3186_v15 = vadd.f32 1.0, %v3154_v24  ;;  %v10423_v61 = vmul.f32 0.70710677, %v10416_v34  ;;  %v2921_v59 = vmul.f32 %v9637_v41, %v2878_v58 }
 0x7b7   : > { %v6733_v1 = vpop.eup %6732  ;;  %v3823_v57 = vmul.f32 %v3791_v31, %v10361_v13  ;;  %v3502_v44 = vadd.f32 0.2548296, %v3470_v43  ;;  %v3377_v29 = vadd.f32 1.4214138, %v3345_v17  ;;  %v3086_v55 = vsel %vm3054_vm3, 1.0, %v12409_v7 }
 0x7b8   : > { %v3648_v3 = vmul.f32 1.442695, %v3600_v11  ;;  %6740 = vrcp.f32 %v3186_v15  ;;  %v10431_v10 = vand.u32 2147483647, %v10423_v61  ;;  %v3089_v13 = vsel %vm3057_vm4, 1.0, %v12409_v7 }
 0x7b9   : > { %4024 = vmatprep.mubr.f32.mxu0 %v3823_v57  ;;  %v3534_v20 = vmul.f32 %v10364_v36, %v3502_v44  ;;  %v3409_v32 = vmul.f32 %v10399_v28, %v3377_v29  ;;  %v10439_v39 = vadd.f32 %v9644_v5, %v2921_v59  ;;  %v10444_v23 = vmul.f32 0.5, %v10337_v12 }
 0x7ba   : > { %v10441_v16 = vpop.eup %6734  ;;  %v10449_v60 = vsel %vm3056_vm5, 1.0, %v12409_v7  ;;  %v3157_v36 = vmul.f32 0.3275911, %v10431_v10  ;;  %v2881_v25 = vmul.f32 %v9847_v19, %v12430_v62  ;;  %v3603_v30 = vmul.f32 %v3571_v21, %v10379_v45  ;;  %v12431_v45 = vld [vmem:[#allocation55_spill] sm:$0xff] }
 0x7bb   : > { %v3694_v38 = vmul.f32 %v6733_v1, %v3534_v20  ;;  %v3441_v35 = vadd.f32 -0.28449672, %v3409_v32  ;;  %v3280_v49 = vmul.f32 1.0614054, %v10441_v16  ;;  %6742 = vpow2.f32 %v3648_v3 }
 0x7bc   : > { %vm3059_vm6 = vcmp.ge.f32.partialorder %v10375_v48, 0.0  ;;  %v3189_v12 = vadd.f32 1.0, %v3157_v36  ;;  %v10458_v6 = vmul.f32 0.70710677, %v10439_v39  ;;  %v2924_v14 = vmul.f32 %v9641_v9, %v2881_v25 }
 0x7bd   : > { %v3726_v22 = vsub.f32 1.0, %v3694_v38  ;;  %v3473_v40 = vmul.f32 %v10399_v28, %v3441_v35  ;;  %v3312_v54 = vadd.f32 -1.4531521, %v3280_v49  ;;  %v3570_v19 = vsub.f32 0.0, %v10408_v47 }
 0x7be   : > { %6744 = vrcp.f32 %v3189_v12  ;;  %v10464_v53 = vand.u32 2147483647, %v10458_v6  ;;  %v2880_v46 = vmul.f32 %v12432_v8, %v12431_v45  ;;  %v3654_v43 = vmul.f32 1.442695, %v3603_v30 }
 0x7bf   : > { %v10468_v58 = vpop.eup %6736  ;;  %v3758_v11 = vmul.f32 %v3726_v22, %v3086_v55  ;;  %v3505_v24 = vadd.f32 0.2548296, %v3473_v40  ;;  %v3344_v31 = vmul.f32 %v10441_v16, %v3312_v54  ;;  %v10472_v17 = vmul.f32 0.5, %v10368_v42 }
 0x7c0   : > { %v10477_v21 = vsel %vm3059_vm6, 1.0, %v12409_v7  ;;  %v3283_v15 = vmul.f32 1.0614054, %v10468_v58  ;;  %v3156_v1 = vmul.f32 0.3275911, %v10464_v53  ;;  %v10483_v59 = vadd.f32 %v9649_v52, %v2924_v14 }
 0x7c1   : > { %v3790_v57 = vadd.f32 1.0, %v3758_v11  ;;  %v3537_v44 = vmul.f32 %v10399_v28, %v3505_v24  ;;  %v3376_v29 = vadd.f32 1.4214138, %v3344_v31  ;;  %v6739_v55 = vpop.eup %6738  ;;  %v3602_v42 = vmul.f32 %v3570_v19, %v10408_v47 }
 0x7c2   : > { %v3315_v3 = vadd.f32 -1.4531521, %v3283_v15  ;;  %v3188_v20 = vadd.f32 1.0, %v3156_v1  ;;  %v2923_v48 = vmul.f32 %v9637_v41, %v2880_v46  ;;  %6746 = vpow2.f32 %v3654_v43 }
 0x7c3   : > { %v3822_v32 = vmul.f32 %v3790_v57, %v10394_v63  ;;  %v3697_v36 = vmul.f32 %v6739_v55, %v3537_v44  ;;  %v3408_v62 = vmul.f32 %v10441_v16, %v3376_v29  ;;  %v3573_v28 = vsub.f32 0.0, %v10431_v10  ;;  %v12433_v55 = vld [vmem:[#allocation58_spill] sm:$0xff] }
 0x7c4   : > { %v3347_v25 = vmul.f32 %v10468_v58, %v3315_v3  ;;  %6748 = vrcp.f32 %v3188_v20  ;;  %v10492_v38 = vmul.f32 0.70710677, %v10483_v59  ;;  %v10497_v30 = vmul.f32 0.5, %v10382_v27 }
 0x7c5   : > { %v10494_v35 = vpop.eup %6740  ;;  %4025 = vmatmul.mubr.f32.gmra.mxu0 %v3822_v32  ;;  %v3729_v47 = vsub.f32 1.0, %v3697_v36  ;;  %v3440_v49 = vadd.f32 -0.28449672, %v3408_v62  ;;  %v10500_v63 = vadd.f32 %v9644_v5, %v2923_v48  ;;  %6750 = vrsqrt.f32 %v9950_v2 }
 0x7c6   : > { %v3379_v12 = vadd.f32 1.4214138, %v3347_v25  ;;  %v3282_v22 = vmul.f32 1.0614054, %v10494_v35  ;;  %v3652_v40 = vmul.f32 1.442695, %v3602_v42  ;;  %v3605_v8 = vmul.f32 %v3573_v28, %v10431_v10 }
 0x7c7   : > { %v3761_v54 = vmul.f32 %v3729_v47, %v3089_v13  ;;  %v3472_v14 = vmul.f32 %v10441_v16, %v3440_v49  ;;  %vm3058_vm7 = vcmp.ge.f32.partialorder %v10402_v26, 0.0  ;;  %v10507_v19 = vand.u32 2147483647, %v10492_v38 }
 0x7c8   : > { %v3411_v27 = vmul.f32 %v10468_v58, %v3379_v12  ;;  %v3314_v45 = vadd.f32 -1.4531521, %v3282_v22  ;;  %v10512_v46 = vmul.f32 0.70710677, %v10500_v63  ;;  %v6743_v2 = vpop.eup %6742  ;;  %v3572_v13 = vsub.f32 0.0, %v10464_v53 }
 0x7c9   : > { %v3793_v11 = vadd.f32 1.0, %v3761_v54  ;;  %v3504_v24 = vadd.f32 0.2548296, %v3472_v14  ;;  %v3159_v31 = vmul.f32 0.3275911, %v10507_v19  ;;  %6752 = vpow2.f32 %v3652_v40 }
 0x7ca   : > { %v3443_v43 = vadd.f32 -0.28449672, %v3411_v27  ;;  %v3346_v15 = vmul.f32 %v10494_v35, %v3314_v45  ;;  %v10518_v1 = vand.u32 2147483647, %v10512_v46  ;;  %v2883_v3 = vmul.f32 %v9909_v4, %v12433_v55 }
 0x7cb   : > { %v10520_v57 = vpop.eup %6744  ;;  %v3825_v10 = vmul.f32 %v3793_v11, %v10397_v33  ;;  %v3536_v44 = vmul.f32 %v10441_v16, %v3504_v24  ;;  %v3191_v29 = vadd.f32 1.0, %v3159_v31  ;;  %v3658_v32 = vmul.f32 1.442695, %v3605_v8 }
 0x7cc   : > { %v3475_v42 = vmul.f32 %v10468_v58, %v3443_v43  ;;  %v3378_v20 = vadd.f32 1.4214138, %v3346_v15  ;;  %v3285_v48 = vmul.f32 1.0614054, %v10520_v57  ;;  %v3604_v62 = vmul.f32 %v3572_v13, %v10464_v53 }
 0x7cd   : > { %4030 = vmatprep.mubr.f32.mxu0 %v3825_v10  ;;  %v3696_v36 = vmul.f32 %v6743_v2, %v3536_v44  ;;  %6754 = vrcp.f32 %v3191_v29  ;;  %v3158_v25 = vmul.f32 0.3275911, %v10518_v1  ;;  %v3090_v16 = vsel %vm3058_vm7, 1.0, %v12409_v7 }
 0x7ce   : > { %v3507_v33 = vadd.f32 0.2548296, %v3475_v42  ;;  %v3410_v4 = vmul.f32 %v10494_v35, %v3378_v20  ;;  %v3317_v28 = vadd.f32 -1.4531521, %v3285_v48  ;;  %vm3061_vm8 = vcmp.ge.f32.partialorder %v10423_v61, 0.0 }
 0x7cf   : > { %v3728_v47 = vsub.f32 1.0, %v3696_v36  ;;  %v3190_v49 = vadd.f32 1.0, %v3158_v25  ;;  %v2926_v12 = vmul.f32 %v9641_v9, %v2883_v3  ;;  %v6747_v22 = vpop.eup %6746  ;;  %6756 = vpow2.f32 %v3658_v32 }
 0x7d0   : > { %v3539_v53 = vmul.f32 %v10468_v58, %v3507_v33  ;;  %v3442_v40 = vadd.f32 -0.28449672, %v3410_v4  ;;  %v3349_v54 = vmul.f32 %v10520_v57, %v3317_v28  ;;  %v3656_v27 = vmul.f32 1.442695, %v3604_v62 }
 0x7d1   : > { %v10538_v14 = vpop.eup %6748  ;;  %v3760_v26 = vmul.f32 %v3728_v47, %v10449_v60  ;;  %6758 = vrcp.f32 %v3190_v49  ;;  %v10542_v45 = vadd.f32 %v9649_v52, %v2926_v12  ;;  %v3575_v31 = vsub.f32 0.0, %v10507_v19  ;;  %v12434_v60 = vld [vmem:[#allocation54_spill] sm:$0xff] }
 0x7d2   : > { %v3699_v8 = vmul.f32 %v6747_v22, %v3539_v53  ;;  %v3474_v2 = vmul.f32 %v10494_v35, %v3442_v40  ;;  %v3381_v11 = vadd.f32 1.4214138, %v3349_v54  ;;  %v3284_v24 = vmul.f32 1.0614054, %v10538_v14  ;;  %v10546_v58 = vpop.eup %6750  ;;  %v12435_v53 = vld [vmem:[#allocation77_spill] sm:$0xff] }
 0x7d3   : > { %v3792_v13 = vadd.f32 1.0, %v3760_v26  ;;  %v10550_v43 = vmul.f32 0.70710677, %v10542_v45  ;;  %v2882_v15 = vmul.f32 %v9856_v37, %v12434_v60  ;;  %6760 = vpow2.f32 %v3656_v27 }
 0x7d4   : > { %v3731_v10 = vsub.f32 1.0, %v3699_v8  ;;  %v3506_v44 = vadd.f32 0.2548296, %v3474_v2  ;;  %v3413_v29 = vmul.f32 %v10520_v57, %v3381_v11  ;;  %v3316_v55 = vadd.f32 -1.4531521, %v3284_v24 }
 0x7d5   : > { %v3824_v3 = vmul.f32 %v3792_v13, %v10444_v23  ;;  %v3574_v42 = vsub.f32 0.0, %v10518_v1  ;;  %v3129_v20 = vand.u32 2147483647, %v10550_v43  ;;  %v3093_v25 = vsel %vm3061_vm8, 1.0, %v12409_v7 }
 0x7d6   : > { %v3763_v48 = vmul.f32 %v3731_v10, %v10477_v21  ;;  %v3538_v32 = vmul.f32 %v10494_v35, %v3506_v44  ;;  %v3445_v36 = vadd.f32 -0.28449672, %v3413_v29  ;;  %v3348_v62 = vmul.f32 %v10538_v14, %v3316_v55  ;;  %v6753_v37 = vpop.eup %6752 }
 0x7d7   : > { %4031 = vmatmul.mubr.f32.gmra.mxu0 %v3824_v3  ;;  %v3607_v23 = vmul.f32 %v3575_v31, %v10507_v19  ;;  %v3161_v33 = vmul.f32 0.3275911, %v3129_v20  ;;  %v2925_v4 = vmul.f32 %v9637_v41, %v2882_v15  ;;  %v3606_v35 = vmul.f32 %v3574_v42, %v10518_v1  ;;  %v12436_v15 = vld [vmem:[#allocation57_spill] sm:$0xff] }
 0x7d8   : > { %v3795_v28 = vadd.f32 1.0, %v3763_v48  ;;  %v3698_v47 = vmul.f32 %v6753_v37, %v3538_v32  ;;  %v3477_v21 = vmul.f32 %v10520_v57, %v3445_v36  ;;  %v3380_v49 = vadd.f32 1.4214138, %v3348_v62 }
 0x7d9   : > { %v3193_v12 = vadd.f32 1.0, %v3161_v33  ;;  %v10569_v22 = vadd.f32 %v9644_v5, %v2925_v4  ;;  %v2885_v61 = vmul.f32 %v9996_v0, %v12435_v53  ;;  %vm3060_vm9 = vcmp.ge.f32.partialorder %v10458_v6, 0.0 }
 0x7da   : > { %v10573_v40 = vpop.eup %6754  ;;  %v3827_v19 = vmul.f32 %v3795_v28, %v10472_v17  ;;  %v3730_v54 = vsub.f32 1.0, %v3698_v47  ;;  %v3509_v26 = vadd.f32 0.2548296, %v3477_v21  ;;  %v3412_v27 = vmul.f32 %v10538_v14, %v3380_v49 }
 0x7db   : > { %v3287_v8 = vmul.f32 1.0614054, %v10573_v40  ;;  %v3662_v1 = vmul.f32 1.442695, %v3607_v23  ;;  %6762 = vrcp.f32 %v3193_v12  ;;  %v10581_v0 = vmul.f32 0.70710677, %v10569_v22 }
 0x7dc   : > { %4036 = vmatprep.mubr.f32.mxu0 %v3827_v19  ;;  %v3762_v2 = vmul.f32 %v3730_v54, %v3090_v16  ;;  %v3541_v11 = vmul.f32 %v10520_v57, %v3509_v26  ;;  %v3444_v24 = vadd.f32 -0.28449672, %v3412_v27  ;;  %v6757_v13 = vpop.eup %6756  ;;  %v3660_v31 = vmul.f32 1.442695, %v3606_v35 }
 0x7dd   : > { %v3319_v17 = vadd.f32 -1.4531521, %v3287_v8  ;;  %v2928_v60 = vmul.f32 %v9641_v9, %v2885_v61  ;;  %v2884_v10 = vmul.f32 %v9978_v51, %v12436_v15  ;;  %v3577_v3 = vsub.f32 0.0, %v3129_v20  ;;  %v12437_v15 = vld [vmem:[#allocation76_spill] sm:$0xff] }
 0x7de   : > { %v10586_v44 = vpop.eup %6758  ;;  %v3794_v29 = vadd.f32 1.0, %v3762_v2  ;;  %v3701_v55 = vmul.f32 %v6757_v13, %v3541_v11  ;;  %v3476_v16 = vmul.f32 %v10538_v14, %v3444_v24  ;;  %6764 = vpow2.f32 %v3662_v1 }
 0x7df   : > { %v3351_v57 = vmul.f32 %v10573_v40, %v3319_v17  ;;  %v3286_v42 = vmul.f32 1.0614054, %v10586_v44  ;;  %v10592_v48 = vand.u32 2147483647, %v10581_v0  ;;  %v10596_v51 = vadd.f32 %v9649_v52, %v2928_v60 }
 0x7e0   : > { %v3826_v32 = vmul.f32 %v3794_v29, %v10497_v30  ;;  %v3733_v36 = vsub.f32 1.0, %v3701_v55  ;;  %v3508_v62 = vadd.f32 0.2548296, %v3476_v16  ;;  %v2927_v4 = vmul.f32 %v9637_v41, %v2884_v10  ;;  %v6761_v28 = vpop.eup %6760 }
 0x7e1   : > { %v3383_v37 = vadd.f32 1.4214138, %v3351_v57  ;;  %v3318_v23 = vadd.f32 -1.4531521, %v3286_v42  ;;  %v3160_v33 = vmul.f32 0.3275911, %v10592_v48  ;;  %6766 = vpow2.f32 %v3660_v31 }
 0x7e2   : > { %4037 = vmatmul.mubr.f32.gmra.mxu0 %v3826_v32  ;;  %v3765_v47 = vmul.f32 %v3733_v36, %v3093_v25  ;;  %v3540_v21 = vmul.f32 %v10538_v14, %v3508_v62  ;;  %v3609_v49 = vmul.f32 %v3577_v3, %v3129_v20  ;;  %v10604_v53 = vmul.f32 0.70710677, %v10596_v51  ;;  %v12438_v62 = vld [vmem:[#allocation44_spill] sm:$0xff] }
 0x7e3   : > { %v3415_v30 = vmul.f32 %v10573_v40, %v3383_v37  ;;  %v3350_v35 = vmul.f32 %v10586_v44, %v3318_v23  ;;  %v3192_v12 = vadd.f32 1.0, %v3160_v33  ;;  %v2997_v61 = vmul.f32 0.5, %v10416_v34 }
 0x7e4   : > { %v3797_v19 = vadd.f32 1.0, %v3765_v47  ;;  %v3700_v54 = vmul.f32 %v6761_v28, %v3540_v21  ;;  %v10608_v26 = vadd.f32 %v9644_v5, %v2927_v4  ;;  %v3092_v20 = vsel %vm3060_vm9, 1.0, %v12409_v7 }
 0x7e5   : > { %v3447_v25 = vadd.f32 -0.28449672, %v3415_v30  ;;  %v3382_v27 = vadd.f32 1.4214138, %v3350_v35  ;;  %6768 = vrcp.f32 %v3192_v12  ;;  %v3666_v2 = vmul.f32 1.442695, %v3609_v49 }
 0x7e6   : > { %6770 = vrsqrt.f32 %v9984_v18  ;;  %v3829_v14 = vmul.f32 %v3797_v19, %v2997_v61  ;;  %v3732_v8 = vsub.f32 1.0, %v3700_v54  ;;  %v3131_v11 = vand.u32 2147483647, %v10604_v53 }
 0x7e7   : > { %v3479_v1 = vmul.f32 %v10573_v40, %v3447_v25  ;;  %v3414_v34 = vmul.f32 %v10586_v44, %v3382_v27  ;;  %6772 = vrsqrt.f32 %v9952_v56  ;;  %v2996_v18 = vmul.f32 0.5, %v10439_v39 }
 0x7e8   : > { %v10617_v24 = vpop.eup %6762  ;;  %4042 = vmatprep.mubr.f32.mxu0 %v3829_v14  ;;  %v3764_v13 = vmul.f32 %v3732_v8, %v3092_v20  ;;  %v10622_v17 = vmul.f32 0.70710677, %v10608_v26  ;;  %v2887_v10 = vmul.f32 %v10546_v58, %v12437_v15  ;;  %vm3063_vm10 = vcmp.ge.f32.partialorder %v10492_v38, 0.0 }
 0x7e9   : > { %v3511_v6 = vadd.f32 0.2548296, %v3479_v1  ;;  %v3446_v31 = vadd.f32 -0.28449672, %v3414_v34  ;;  %v3289_v60 = vmul.f32 1.0614054, %v10617_v24  ;;  %6774 = vpow2.f32 %v3666_v2 }
 0x7ea   : > { %v3796_v29 = vadd.f32 1.0, %v3764_v13  ;;  %v3576_v55 = vsub.f32 0.0, %v10592_v48  ;;  %v3163_v56 = vmul.f32 0.3275911, %v3131_v11  ;;  %v10632_v36 = vand.u32 2147483647, %v10622_v17 }
 0x7eb   : > { %v3543_v16 = vmul.f32 %v10573_v40, %v3511_v6  ;;  %v3478_v39 = vmul.f32 %v10586_v44, %v3446_v31  ;;  %v3321_v3 = vadd.f32 -1.4531521, %v3289_v60  ;;  %v6765_v57 = vpop.eup %6764  ;;  %v2886_v58 = vmul.f32 %v10023_v50, %v12438_v62 }
 0x7ec   : > { %v3828_v42 = vmul.f32 %v3796_v29, %v2996_v18  ;;  %v3195_v32 = vadd.f32 1.0, %v3163_v56  ;;  %v2930_v4 = vmul.f32 %v9641_v9, %v2887_v10  ;;  %v2999_v40 = vmul.f32 0.5, %v10483_v59 }
 0x7ed   : > { %v3703_v37 = vmul.f32 %v6765_v57, %v3543_v16  ;;  %v3510_v23 = vadd.f32 0.2548296, %v3478_v39  ;;  %v3353_v33 = vmul.f32 %v10617_v24, %v3321_v3  ;;  %v3608_v28 = vmul.f32 %v3576_v55, %v10592_v48  ;;  %v12439_v3 = vld [vmem:[#allocation59_spill] sm:$0xff] }
 0x7ee   : > { %4043 = vmatmul.mubr.f32.gmra.mxu0 %v3828_v42  ;;  %6776 = vrcp.f32 %v3195_v32  ;;  %v3162_v47 = vmul.f32 0.3275911, %v10632_v36  ;;  %v6767_v21 = vpop.eup %6766  ;;  %v10643_v50 = vadd.f32 %v9649_v52, %v2930_v4  ;;  %v3095_v12 = vsel %vm3063_vm10, 1.0, %v12409_v7 }
 0x7ef   : > { %v3735_v49 = vsub.f32 1.0, %v3703_v37  ;;  %v3542_v30 = vmul.f32 %v10586_v44, %v3510_v23  ;;  %v3385_v35 = vadd.f32 1.4214138, %v3353_v33  ;;  %v3579_v61 = vsub.f32 0.0, %v3131_v11 }
 0x7f0   : > { %v3194_v19 = vadd.f32 1.0, %v3162_v47  ;;  %v2929_v59 = vmul.f32 %v9637_v41, %v2886_v58  ;;  %vm3062_vm11 = vcmp.ge.f32.partialorder %v10512_v46, 0.0  ;;  %v3664_v44 = vmul.f32 1.442695, %v3608_v28 }
 0x7f1   : > { %v3767_v48 = vmul.f32 %v3735_v49, %v3095_v12  ;;  %v3702_v54 = vmul.f32 %v6767_v21, %v3542_v30  ;;  %v3417_v25 = vmul.f32 %v10617_v24, %v3385_v35  ;;  %v10654_v14 = vmul.f32 0.70710677, %v10643_v50  ;;  %v12440_v49 = vld [vmem:[#allocation52_spill] sm:$0xff] }
 0x7f2   : > { %v10651_v27 = vpop.eup %6768  ;;  %6778 = vrcp.f32 %v3194_v19  ;;  %v10657_v38 = vadd.f32 %v9644_v5, %v2929_v59  ;;  %v3094_v46 = vsel %vm3062_vm11, 1.0, %v12409_v7  ;;  %v3611_v18 = vmul.f32 %v3579_v61, %v3131_v11 }
 0x7f3   : > { %v6771_v20 = vpop.eup %6770  ;;  %v3799_v8 = vadd.f32 1.0, %v3767_v48  ;;  %v3734_v1 = vsub.f32 1.0, %v3702_v54  ;;  %v3449_v34 = vadd.f32 -0.28449672, %v3417_v25  ;;  %v3288_v2 = vmul.f32 1.0614054, %v10651_v27 }
 0x7f4   : > { %v10662_v13 = vand.u32 2147483647, %v10654_v14  ;;  %v6773_v6 = vpop.eup %6772  ;;  %v2998_v29 = vmul.f32 0.5, %v10500_v63  ;;  %6780 = vpow2.f32 %v3664_v44  ;;  %v10668_v56 = vmul.f32 0.70710677, %v10657_v38 }
 0x7f5   : > { %v3831_v31 = vmul.f32 %v3799_v8, %v2999_v40  ;;  %v3766_v60 = vmul.f32 %v3734_v1, %v3094_v46  ;;  %v3481_v15 = vmul.f32 %v10617_v24, %v3449_v34  ;;  %v3320_v10 = vadd.f32 -1.4531521, %v3288_v2 }
 0x7f6   : > { %v3165_v55 = vmul.f32 0.3275911, %v10662_v13  ;;  %v2889_v57 = vmul.f32 %v6771_v20, %v12439_v3  ;;  %v6775_v42 = vpop.eup %6774  ;;  %v3670_v32 = vmul.f32 1.442695, %v3611_v18  ;;  %v3578_v62 = vsub.f32 0.0, %v10632_v36 }
 0x7f7   : > { %4048 = vmatprep.mubr.f32.mxu0 %v3831_v31  ;;  %v3798_v16 = vadd.f32 1.0, %v3766_v60  ;;  %v3513_v11 = vadd.f32 0.2548296, %v3481_v15  ;;  %v3352_v39 = vmul.f32 %v10651_v27, %v3320_v10  ;;  %v3132_v63 = vand.u32 2147483647, %v10668_v56 }
 0x7f8   : > { %v3197_v58 = vadd.f32 1.0, %v3165_v55  ;;  %vm3065_vm12 = vcmp.ge.f32.partialorder %v10550_v43, 0.0  ;;  %v2932_v21 = vmul.f32 %v9641_v9, %v2889_v57  ;;  %v2888_v30 = vmul.f32 %v6773_v6, %v12440_v49 }
 0x7f9   : > { %v3830_v37 = vmul.f32 %v3798_v16, %v2998_v29  ;;  %v3545_v23 = vmul.f32 %v10617_v24, %v3513_v11  ;;  %v3384_v33 = vadd.f32 1.4214138, %v3352_v39  ;;  %v3164_v4 = vmul.f32 0.3275911, %v3132_v63 }
 0x7fa   : > { %6782 = vrcp.f32 %v3197_v58  ;;  %v3610_v24 = vmul.f32 %v3578_v62, %v10632_v36  ;;  %v10684_v59 = vadd.f32 %v9649_v52, %v2932_v21  ;;  %v2931_v48 = vmul.f32 %v9637_v41, %v2888_v30 }
 0x7fb   : > { %v10676_v40 = vpop.eup %6776  ;;  %4049 = vmatmul.mubr.f32.gmra.mxu0 %v3830_v37  ;;  %v3705_v28 = vmul.f32 %v6775_v42, %v3545_v23  ;;  %v3416_v47 = vmul.f32 %v10651_v27, %v3384_v33  ;;  %6784 = vpow2.f32 %v3670_v32  ;;  %v3196_v12 = vadd.f32 1.0, %v3164_v4 }
 0x7fc   : > { %v3291_v35 = vmul.f32 1.0614054, %v10676_v40  ;;  %v3001_v54 = vmul.f32 0.5, %v10542_v45  ;;  %v3097_v9 = vsel %vm3065_vm12, 1.0, %v12409_v7  ;;  %v3581_v8 = vsub.f32 0.0, %v10662_v13 }
 0x7fd   : > { %v3737_v61 = vsub.f32 1.0, %v3705_v28  ;;  %v3448_v19 = vadd.f32 -0.28449672, %v3416_v47  ;;  %6786 = vrcp.f32 %v3196_v12  ;;  %v10696_v52 = vmul.f32 0.70710677, %v10684_v59 }
 0x7fe   : > { %v3323_v25 = vadd.f32 -1.4531521, %v3291_v35  ;;  %v3668_v1 = vmul.f32 1.442695, %v3610_v24  ;;  %v10701_v43 = vadd.f32 %v9644_v5, %v2931_v48  ;;  %v3580_v46 = vsub.f32 0.0, %v3132_v63 }
 0x7ff   : > { %v10691_v44 = vpop.eup %6778  ;;  %v3769_v20 = vmul.f32 %v3737_v61, %v3097_v9  ;;  %v3480_v36 = vmul.f32 %v10651_v27, %v3448_v19  ;;  %v3135_v18 = vand.u32 2147483647, %v10696_v52  ;;  %vm3064_vm13 = vcmp.ge.f32.partialorder %v10581_v0, 0.0 }
 0x800   : > { %v3355_v41 = vmul.f32 %v10676_v40, %v3323_v25  ;;  %v3290_v45 = vmul.f32 1.0614054, %v10691_v44  ;;  %v3613_v29 = vmul.f32 %v3581_v8, %v10662_v13  ;;  %6788 = vpow2.f32 %v3668_v1 }
 0x801   : > { %v3801_v34 = vadd.f32 1.0, %v3769_v20  ;;  %v3512_v2 = vadd.f32 0.2548296, %v3480_v36  ;;  %v6781_v60 = vpop.eup %6780  ;;  %v3167_v55 = vmul.f32 0.3275911, %v3135_v18  ;;  %v3612_v3 = vmul.f32 %v3580_v46, %v3132_v63 }
 0x802   : > { %v3387_v6 = vadd.f32 1.4214138, %v3355_v41  ;;  %v3322_v31 = vadd.f32 -1.4531521, %v3290_v45  ;;  %v10710_v11 = vmul.f32 0.70710677, %v10701_v43 }
 0x803   : > { %v3833_v15 = vmul.f32 %v3801_v34, %v3001_v54  ;;  %v3544_v10 = vmul.f32 %v10651_v27, %v3512_v2  ;;  %v3199_v57 = vadd.f32 1.0, %v3167_v55  ;;  %v3096_v27 = vsel %vm3064_vm13, 1.0, %v12409_v7 }
 0x804   : > { %v3419_v16 = vmul.f32 %v10676_v40, %v3387_v6  ;;  %v3354_v5 = vmul.f32 %v10691_v44, %v3322_v31  ;;  %v3674_v58 = vmul.f32 1.442695, %v3613_v29  ;;  %v10721_v63 = vand.u32 2147483647, %v10710_v11 }
 0x805   : > { %4054 = vmatprep.mubr.f32.mxu0 %v3833_v15  ;;  %v3704_v39 = vmul.f32 %v6781_v60, %v3544_v10  ;;  %6790 = vrcp.f32 %v3199_v57  ;;  %v3000_v28 = vmul.f32 0.5, %v10569_v22  ;;  %v3672_v21 = vmul.f32 1.442695, %v3612_v3 }
 0x806   : > { %v3451_v42 = vadd.f32 -0.28449672, %v3419_v16  ;;  %v3386_v32 = vadd.f32 1.4214138, %v3354_v5  ;;  %vm3067_vm14 = vcmp.ge.f32.partialorder %v10604_v53, 0.0  ;;  %6792 = vpow2.f32 %v3674_v58 }
 0x807   : > { %v10712_v62 = vpop.eup %6782  ;;  %v3736_v13 = vsub.f32 1.0, %v3704_v39  ;;  %v3166_v12 = vmul.f32 0.3275911, %v10721_v63  ;;  %6794 = vpow2.f32 %v3672_v21  ;;  %v3583_v9 = vsub.f32 0.0, %v3135_v18 }
 0x808   : > { %v3483_v37 = vmul.f32 %v10676_v40, %v3451_v42  ;;  %v3418_v23 = vmul.f32 %v10691_v44, %v3386_v32  ;;  %v3293_v33 = vmul.f32 1.0614054, %v10712_v62  ;;  %v6785_v4 = vpop.eup %6784  ;;  %v3099_v46 = vsel %vm3067_vm14, 1.0, %v12409_v7 }
 0x809   : > { %v3768_v47 = vmul.f32 %v3736_v13, %v3096_v27  ;;  %v3198_v25 = vadd.f32 1.0, %v3166_v12  ;;  %vm3066_vm15 = vcmp.ge.f32.partialorder %v10622_v17, 0.0  ;;  %v3615_v6 = vmul.f32 %v3583_v9, %v3135_v18 }
 0x80a   : > { %v3515_v49 = vadd.f32 0.2548296, %v3483_v37  ;;  %v3450_v0 = vadd.f32 -0.28449672, %v3418_v23  ;;  %v3325_v30 = vadd.f32 -1.4531521, %v3293_v33  ;;  %v10724_v35 = vpop.eup %6786 }
 0x80b   : > { %v3800_v24 = vadd.f32 1.0, %v3768_v47  ;;  %v3292_v22 = vmul.f32 1.0614054, %v10724_v35  ;;  %6796 = vrcp.f32 %v3198_v25  ;;  %v3003_v29 = vmul.f32 0.5, %v10596_v51 }
 0x80c   : > { %v3547_v61 = vmul.f32 %v10676_v40, %v3515_v49  ;;  %v3482_v19 = vmul.f32 %v10691_v44, %v3450_v0  ;;  %v3357_v48 = vmul.f32 %v10712_v62, %v3325_v30  ;;  %v3098_v3 = vsel %vm3066_vm15, 1.0, %v12409_v7 }
 0x80d   : > { %v3832_v54 = vmul.f32 %v3800_v24, %v3000_v28  ;;  %v3324_v41 = vadd.f32 -1.4531521, %v3292_v22  ;;  %v6789_v2 = vpop.eup %6788  ;;  %v3678_v57 = vmul.f32 1.442695, %v3615_v6  ;;  %v3582_v17 = vsub.f32 0.0, %v10721_v63 }
 0x80e   : > { %v3707_v20 = vmul.f32 %v6785_v4, %v3547_v61  ;;  %v3514_v36 = vadd.f32 0.2548296, %v3482_v19  ;;  %v3389_v8 = vadd.f32 1.4214138, %v3357_v48  ;;  %v3002_v51 = vmul.f32 0.5, %v10608_v26 }
 0x80f   : > { %4055 = vmatmul.mubr.f32.gmra.mxu0 %v3832_v54  ;;  %v3356_v34 = vmul.f32 %v10724_v35, %v3324_v41  ;;  %vm3069_vm1 = vcmp.ge.f32.partialorder %v10654_v14, 0.0  ;;  %6798 = vpow2.f32 %v3678_v57  ;;  %v3614_v28 = vmul.f32 %v3582_v17, %v10721_v63  ;;  %v3904_v63 = vld [vmem:[#allocation19] sm:$0x3] }
 0x810   : > { %v3739_v45 = vsub.f32 1.0, %v3707_v20  ;;  %v3546_v1 = vmul.f32 %v10691_v44, %v3514_v36  ;;  %v3421_v40 = vmul.f32 %v10712_v62, %v3389_v8  ;;  %v3101_v26 = vsel %vm3069_vm1, 1.0, %v12409_v7  ;;  %v12441_v41 = vld [vmem:[#allocation72_spill] sm:$0xff] }
 0x811   : > { %v3388_v10 = vadd.f32 1.4214138, %v3356_v34  ;;  %vm3068_vm2 = vcmp.ge.f32.partialorder %v10668_v56, 0.0  ;;  %v3676_v19 = vmul.f32 1.442695, %v3614_v28  ;;  %v3005_v54 = vmul.f32 0.5, %v10643_v50 }
 0x812   : > { %v3771_v31 = vmul.f32 %v3739_v45, %v3099_v46  ;;  %v3706_v60 = vmul.f32 %v6789_v2, %v3546_v1  ;;  %v3453_v15 = vadd.f32 -0.28449672, %v3421_v40  ;;  %v6791_v55 = vpop.eup %6790  ;;  %v3100_v36 = vsel %vm3068_vm2, 1.0, %v12409_v7  ;;  %v12442_v56 = vld [vmem:[#allocation73_spill] sm:$0xff] }
 0x813   : > { %v3420_v39 = vmul.f32 %v10724_v35, %v3388_v10  ;;  %v3295_v53 = vmul.f32 1.0614054, %v6791_v55  ;;  %v6793_v58 = vpop.eup %6792  ;;  %v10755_v45 = vrot.slane %v3904_v63, %v12441_v41  ;;  %6800 = vpow2.f32 %v3676_v19 }
 0x814   : > { %v3803_v44 = vadd.f32 1.0, %v3771_v31  ;;  %v3738_v16 = vsub.f32 1.0, %v3706_v60  ;;  %v3485_v5 = vmul.f32 %v10712_v62, %v3453_v15  ;;  %v6795_v47 = vpop.eup %6794  ;;  %v10758_v40 = vrot.slane %v3904_v63, %v12442_v56 }
 0x815   : > { %v3452_v27 = vadd.f32 -0.28449672, %v3420_v39  ;;  %v3327_v13 = vadd.f32 -1.4531521, %v3295_v53  ;;  %v3004_v60 = vmul.f32 0.5, %v10657_v38  ;;  %vm3071_vm3 = vcmp.ge.f32.partialorder %v10696_v52, 0.0 }
 0x816   : > { %v3835_v18 = vmul.f32 %v3803_v44, %v3003_v29  ;;  %v3770_v42 = vmul.f32 %v3738_v16, %v3098_v3  ;;  %v3517_v32 = vadd.f32 0.2548296, %v3485_v5  ;;  %v3103_v17 = vsel %vm3071_vm3, 1.0, %v12409_v7 }
 0x817   : > { %v3484_v33 = vmul.f32 %v10724_v35, %v3452_v27  ;;  %v3359_v4 = vmul.f32 %v6791_v55, %v3327_v13  ;;  %v3007_v27 = vmul.f32 0.5, %v10684_v59  ;;  %vm3070_vm4 = vcmp.ge.f32.partialorder %v10710_v11, 0.0 }
 0x818   : > { %4060 = vmatprep.mubr.f32.mxu0 %v3835_v18  ;;  %v3802_v37 = vadd.f32 1.0, %v3770_v42  ;;  %v3549_v23 = vmul.f32 %v10712_v62, %v3517_v32  ;;  %v6797_v24 = vpop.eup %6796  ;;  %v3102_v59 = vsel %vm3070_vm4, 1.0, %v12409_v7 }
 0x819   : > { %v3516_v0 = vadd.f32 0.2548296, %v3484_v33  ;;  %v3391_v30 = vadd.f32 1.4214138, %v3359_v4  ;;  %v3294_v14 = vmul.f32 1.0614054, %v6797_v24 }
 0x81a   : > { %v3834_v21 = vmul.f32 %v3802_v37, %v3002_v51  ;;  %v3709_v49 = vmul.f32 %v6793_v58, %v3549_v23 }
 0x81b   : > { %v3548_v62 = vmul.f32 %v10724_v35, %v3516_v0  ;;  %v3423_v61 = vmul.f32 %v6791_v55, %v3391_v30  ;;  %v3326_v25 = vadd.f32 -1.4531521, %v3294_v14 }
 0x81c   : > { %4061 = vmatmul.mubr.f32.gmra.mxu0 %v3834_v21  ;;  %v3741_v12 = vsub.f32 1.0, %v3709_v49  ;;  %v6799_v5 = vpop.eup %6798 }
 0x81d   : > { %v3708_v22 = vmul.f32 %v6795_v47, %v3548_v62  ;;  %v3455_v9 = vadd.f32 -0.28449672, %v3423_v61  ;;  %v3358_v1 = vmul.f32 %v6797_v24, %v3326_v25  ;;  %v3006_v47 = vmul.f32 0.5, %v10701_v43 }
 0x81e   : > { %v3773_v48 = vmul.f32 %v3741_v12, %v3101_v26 }
 0x81f   : > { %v3740_v8 = vsub.f32 1.0, %v3708_v22  ;;  %v3487_v35 = vmul.f32 %v6791_v55, %v3455_v9  ;;  %v3390_v50 = vadd.f32 1.4214138, %v3358_v1 }
 0x820   : > { %v3805_v20 = vadd.f32 1.0, %v3773_v48  ;;  %v6801_v52 = vpop.eup %6800 }
 0x821   : > { %v3772_v46 = vmul.f32 %v3740_v8, %v3100_v36  ;;  %v3519_v6 = vadd.f32 0.2548296, %v3487_v35  ;;  %v3422_v44 = vmul.f32 %v6797_v24, %v3390_v50 }
 0x822   : > { %v3837_v2 = vmul.f32 %v3805_v20, %v3005_v54 }
 0x823   : > { %v3984_v34 = vpop.f32.mrf.mxu0  ;;  %v3804_v15 = vadd.f32 1.0, %v3772_v46  ;;  %v3551_v29 = vmul.f32 %v6791_v55, %v3519_v6  ;;  %v3454_v53 = vadd.f32 -0.28449672, %v3422_v44 }
 0x824   : > { %4066 = vmatprep.mubr.f32.mxu0 %v3837_v2  ;;  %v10765_v16 = vadd.f32 %v3984_v34, %v10758_v40 }
 0x825   : > { %v3986_v31 = vpop.f32.mrf.mxu0  ;;  %v3836_v39 = vmul.f32 %v3804_v15, %v3004_v60  ;;  %v3711_v3 = vmul.f32 %v6799_v5, %v3551_v29  ;;  %v3486_v57 = vmul.f32 %v6797_v24, %v3454_v53 }
 0x826   : > { %v10762_v10 = vadd.f32 %v3986_v31, %v10755_v45 }
 0x827   : > { %4067 = vmatmul.mubr.f32.gmra.mxu0 %v3836_v39  ;;  %v3743_v38 = vsub.f32 1.0, %v3711_v3  ;;  %v3518_v42 = vadd.f32 0.2548296, %v3486_v57 }
 0x828   : > { %4143 = vmatprep.mubr.f32.mxu1 %v10762_v10 }
 0x829   : > { %4144 = vmatmul.mubr.f32.vlgmr.msra.gmra.mxu1 %v10765_v16  ;;  %v3775_v18 = vmul.f32 %v3743_v38, %v3103_v17  ;;  %v3550_v58 = vmul.f32 %v6797_v24, %v3518_v42 }
 0x82b   : > { %v3990_v55 = vpop.f32.mrf.mxu0  ;;  %v3807_v13 = vadd.f32 1.0, %v3775_v18  ;;  %v3710_v33 = vmul.f32 %v6801_v52, %v3550_v58 }
 0x82c   : > { %v10776_v37 = vadd.f32 %v3990_v55, %v10758_v40 }
 0x82d   : > { %v3992_v32 = vpop.f32.mrf.mxu0  ;;  %v3839_v23 = vmul.f32 %v3807_v13, %v3007_v27  ;;  %v3742_v4 = vsub.f32 1.0, %v3710_v33 }
 0x82e   : > { %v10773_v51 = vadd.f32 %v3992_v32, %v10755_v45 }
 0x82f   : > { %4072 = vmatprep.mubr.f32.mxu0 %v3839_v23  ;;  %v3774_v28 = vmul.f32 %v3742_v4, %v3102_v59 }
 0x830   : > { %4149 = vmatprep.mubr.f32.mxu1 %v10773_v51 }
 0x831   : > { %4150 = vmatmul.mubr.f32.gmra.mxu1 %v10776_v37  ;;  %v3806_v21 = vadd.f32 1.0, %v3774_v28 }
 0x833   : > { %v3838_v0 = vmul.f32 %v3806_v21, %v3006_v47 }
 0x835   : > { %v3996_v49 = vpop.f32.mrf.mxu0  ;;  %4073 = vmatmul.mubr.f32.gmra.mxu0 %v3838_v0 }
 0x836   : > { %v10787_v11 = vadd.f32 %v3996_v49, %v10758_v40 }
 0x837   : > { %v3998_v30 = vpop.f32.mrf.mxu0 }
 0x838   : > { %v10784_v24 = vadd.f32 %v3998_v30, %v10755_v45 }
 0x83a   : > { %4155 = vmatprep.mubr.f32.mxu1 %v10784_v24 }
 0x83b   : > { %4156 = vmatmul.mubr.f32.gmra.mxu1 %v10787_v11 }
 0x84d   : > { %v4002_v26 = vpop.f32.mrf.mxu0 }
 0x84e   : > { %v10795_v43 = vadd.f32 %v4002_v26, %v10758_v40 }
 0x84f   : > { %v4004_v12 = vpop.f32.mrf.mxu0 }
 0x850   : > { %v10792_v62 = vadd.f32 %v4004_v12, %v10755_v45 }
 0x852   : > { %4161 = vmatprep.mubr.f32.mxu1 %v10792_v62 }
 0x853   : > { %4162 = vmatmul.mubr.f32.gmra.mxu1 %v10795_v43 }
 0x85b   : > { %v4008_v61 = vpop.f32.mrf.mxu0 }
 0x85c   : > { %v10803_v48 = vadd.f32 %v4008_v61, %v10758_v40 }
 0x85d   : > { %v4010_v14 = vpop.f32.mrf.mxu0 }
 0x85e   : > { %v10800_v19 = vadd.f32 %v4010_v14, %v10755_v45 }
 0x860   : > { %4167 = vmatprep.mubr.f32.mxu1 %v10800_v19 }
 0x861   : > { %4168 = vmatmul.mubr.f32.gmra.mxu1 %v10803_v48 }
 0x866   : > { %v4014_v22 = vpop.f32.mrf.mxu0 }
 0x867   : > { %v10811_v9 = vadd.f32 %v4014_v22, %v10758_v40 }
 0x868   : > { %v4016_v63 = vpop.f32.mrf.mxu0 }
 0x869   : > { %v10808_v54 = vadd.f32 %v4016_v63, %v10755_v45 }
 0x86b   : > { %4173 = vmatprep.mubr.f32.mxu1 %v10808_v54 }
 0x86c   : > { %4174 = vmatmul.mubr.f32.gmra.mxu1 %v10811_v9 }
 0x872   : > { %v4020_v25 = vpop.f32.mrf.mxu0 }
 0x873   : > { %v10819_v8 = vadd.f32 %v4020_v25, %v10758_v40 }
 0x874   : > { %v4022_v20 = vpop.f32.mrf.mxu0 }
 0x875   : > { %v10816_v36 = vadd.f32 %v4022_v20, %v10755_v45 }
 0x877   : > { %4179 = vmatprep.mubr.f32.mxu1 %v10816_v36 }
 0x878   : > { %4180 = vmatmul.mubr.f32.gmra.mxu1 %v10819_v8 }
 0x885   : > { %v4026_v35 = vpop.f32.mrf.mxu0 }
 0x886   : > { %v10827_v2 = vadd.f32 %v4026_v35, %v10758_v40 }
 0x887   : > { %v4028_v1 = vpop.f32.mrf.mxu0 }
 0x888   : > { %v10824_v34 = vadd.f32 %v4028_v1, %v10755_v45 }
 0x88a   : > { %4185 = vmatprep.mubr.f32.mxu1 %v10824_v34 }
 0x88b   : > { %4186 = vmatmul.mubr.f32.gmra.mxu1 %v10827_v2 }
 0x897   : > { %v4032_v46 = vpop.f32.mrf.mxu0 }
 0x898   : > { %v10835_v31 = vadd.f32 %v4032_v46, %v10758_v40 }
 0x899   : > { %v4034_v6 = vpop.f32.mrf.mxu0 }
 0x89a   : > { %v10832_v50 = vadd.f32 %v4034_v6, %v10755_v45 }
 0x89c   : > { %4191 = vmatprep.mubr.f32.mxu1 %v10832_v50 }
 0x89d   : > { %4192 = vmatmul.mubr.f32.gmra.mxu1 %v10835_v31 }
 0x8a2   : > { %v4038_v60 = vpop.f32.mrf.mxu0 }
 0x8a3   : > { %v10843_v44 = vadd.f32 %v4038_v60, %v10758_v40 }
 0x8a4   : > { %v4040_v15 = vpop.f32.mrf.mxu0 }
 0x8a5   : > { %v10840_v29 = vadd.f32 %v4040_v15, %v10755_v45 }
 0x8a7   : > { %4197 = vmatprep.mubr.f32.mxu1 %v10840_v29 }
 0x8a8   : > { %4198 = vmatmul.mubr.f32.gmra.mxu1 %v10843_v44 }
 0x8ae   : > { %v4044_v5 = vpop.f32.mrf.mxu0 }
 0x8af   : > { %v10851_v53 = vadd.f32 %v4044_v5, %v10758_v40 }
 0x8b0   : > { %v4046_v39 = vpop.f32.mrf.mxu0 }
 0x8b1   : > { %v10848_v3 = vadd.f32 %v4046_v39, %v10755_v45 }
 0x8b3   : > { %4203 = vmatprep.mubr.f32.mxu1 %v10848_v3 }
 0x8b4   : > { %4204 = vmatmul.mubr.f32.gmra.mxu1 %v10851_v53 }
 0x8bb   : > { %v4050_v38 = vpop.f32.mrf.mxu0 }
 0x8bc   : > { %v10859_v55 = vadd.f32 %v4050_v38, %v10758_v40 }
 0x8bd   : > { %v4052_v57 = vpop.f32.mrf.mxu0 }
 0x8be   : > { %v10856_v17 = vadd.f32 %v4052_v57, %v10755_v45 }
 0x8c0   : > { %4209 = vmatprep.mubr.f32.mxu1 %v10856_v17 }
 0x8c1   : > { %4210 = vmatmul.mubr.f32.gmra.mxu1 %v10859_v55 }
 0x8cf   : > { %v4056_v18 = vpop.f32.mrf.mxu0 }
 0x8d0   : > { %v10867_v27 = vadd.f32 %v4056_v18, %v10758_v40 }
 0x8d1   : > { %v4058_v42 = vpop.f32.mrf.mxu0 }
 0x8d2   : > { %v10864_v32 = vadd.f32 %v4058_v42, %v10755_v45 }
 0x8d4   : > { %4215 = vmatprep.mubr.f32.mxu1 %v10864_v32 }
 0x8d5   : > { %4216 = vmatmul.mubr.f32.gmra.mxu1 %v10867_v27 }
 0x8dc   : > { %v4062_v13 = vpop.f32.mrf.mxu0 }
 0x8dd   : > { %v10875_v23 = vadd.f32 %v4062_v13, %v10758_v40 }
 0x8de   : > { %v4064_v58 = vpop.f32.mrf.mxu0 }
 0x8df   : > { %v10872_v52 = vadd.f32 %v4064_v58, %v10755_v45 }
 0x8e1   : > { %4221 = vmatprep.mubr.f32.mxu1 %v10872_v52 }
 0x8e2   : > { %4222 = vmatmul.mubr.f32.gmra.mxu1 %v10875_v23 }
 0x8e7   : > { %v4068_v4 = vpop.f32.mrf.mxu0 }
 0x8e8   : > { %v10889_v0 = vadd.f32 %v4068_v4, %v10758_v40 }
 0x8e9   : > { %v4145_v33 = vpop.f32.mrf.mxu1  ;;  %v4070_v47 = vpop.f32.mrf.mxu0 }
 0x8ea   : > { %v10880_v59 = vsub.f32 %v10765_v16, %v4145_v33  ;;  %v10886_v49 = vadd.f32 %v4070_v47, %v10755_v45 }
 0x8eb   : > { %v4147_v28 = vpop.f32.mrf.mxu1 }
 0x8ec   : > { %v10883_v21 = vsub.f32 %v10762_v10, %v4147_v28  ;;  %4227 = vmatprep.mubr.f32.mxu1 %v10886_v49  ;;  %v4272_v16 = vmul.f32 %v10880_v59, %v10880_v59 }
 0x8ed   : > { %4228 = vmatmul.mubr.f32.gmra.mxu1 %v10889_v0 }
 0x8ee   : > { %v4273_v30 = vmul.f32 %v10883_v21, %v10883_v21 }
 0x8f0   : > { %4368 = vmatprep.mubr.f32.mxu0 %v4273_v30 }
 0x8f1   : > { %4369 = vmatmul.mubr.f32.vlgmr.msra.gmra.mxu0 %v4272_v16  ;;  %v4151_v10 = vpop.f32.mrf.mxu1 }
 0x8f2   : > { %v10898_v26 = vsub.f32 %v10776_v37, %v4151_v10 }
 0x8f3   : > { %v4153_v12 = vpop.f32.mrf.mxu1 }
 0x8f4   : > { %v10901_v61 = vsub.f32 %v10773_v51, %v4153_v12  ;;  %v4274_v22 = vmul.f32 %v10898_v26, %v10898_v26 }
 0x8f5   : > { %v4074_v63 = vpop.f32.mrf.mxu0 }
 0x8f6   : > { %v4275_v14 = vmul.f32 %v10901_v61, %v10901_v61  ;;  %v10911_v37 = vadd.f32 %v4074_v63, %v10758_v40 }
 0x8f7   : > { %v4076_v25 = vpop.f32.mrf.mxu0 }
 0x8f8   : > { %4374 = vmatprep.mubr.f32.mxu0 %v4275_v14  ;;  %v10908_v35 = vadd.f32 %v4076_v25, %v10755_v45 }
 0x8f9   : > { %4375 = vmatmul.mubr.f32.gmra.mxu0 %v4274_v22  ;;  %v5510_v22 = vld [vmem:[%s12124_s18 + $0xf8] sm:$0xff] }
 0x8fa   : > { %4233 = vmatprep.mubr.f32.mxu1 %v10908_v35  ;;  %6135 = vmatprep.subr.mxu1 %v5510_v22 }
 0x8fb   : > { %v4157_v20 = vpop.f32.mrf.mxu1  ;;  %4234 = vmatmul.mubr.f32.gmra.mxu1 %v10911_v37 }
 0x8fc   : > { %v10914_v51 = vsub.f32 %v10787_v11, %v4157_v20 }
 0x8fd   : > { %v4159_v1 = vpop.f32.mrf.mxu1 }
 0x8fe   : > { %v10918_v46 = vsub.f32 %v10784_v24, %v4159_v1  ;;  %v4276_v45 = vmul.f32 %v10914_v51, %v10914_v51 }
 0x900   : > { %v4277_v6 = vmul.f32 %v10918_v46, %v10918_v46 }
 0x902   : > { %4380 = vmatprep.mubr.f32.mxu0 %v4277_v6 }
 0x903   : > { %4381 = vmatmul.mubr.f32.gmra.mxu0 %v4276_v45 }
 0x913   : > { %v4163_v40 = vpop.f32.mrf.mxu1 }
 0x914   : > { %v10926_v11 = vsub.f32 %v10795_v43, %v4163_v40 }
 0x915   : > { %v4165_v60 = vpop.f32.mrf.mxu1 }
 0x916   : > { %v10929_v15 = vsub.f32 %v10792_v62, %v4165_v60  ;;  %v4278_v5 = vmul.f32 %v10926_v11, %v10926_v11  ;;  %v5509_v60 = vld [vmem:[%s12124_s18 + $0xf0] sm:$0xff] }
 0x918   : > { %v4279_v24 = vmul.f32 %v10929_v15, %v10929_v15 }
 0x91a   : > { %4386 = vmatprep.mubr.f32.mxu0 %v4279_v24 }
 0x91b   : > { %4387 = vmatmul.mubr.f32.gmra.mxu0 %v4278_v5 }
 0x921   : > { %v4169_v39 = vpop.f32.mrf.mxu1 }
 0x922   : > { %v10936_v38 = vsub.f32 %v10803_v48, %v4169_v39 }
 0x923   : > { %v4171_v57 = vpop.f32.mrf.mxu1 }
 0x924   : > { %v10939_v43 = vsub.f32 %v10800_v19, %v4171_v57  ;;  %v4280_v18 = vmul.f32 %v10936_v38, %v10936_v38 }
 0x926   : > { %v4281_v62 = vmul.f32 %v10939_v43, %v10939_v43 }
 0x928   : > { %4392 = vmatprep.mubr.f32.mxu0 %v4281_v62 }
 0x929   : > { %4393 = vmatmul.mubr.f32.gmra.mxu0 %v4280_v18 }
 0x92c   : > { %v4175_v42 = vpop.f32.mrf.mxu1 }
 0x92d   : > { %v10946_v13 = vsub.f32 %v10811_v9, %v4175_v42  ;;  %v5493_v42 = vld [vmem:[%s12124_s18 + $0x70] sm:$0xff] }
 0x92e   : > { %v4177_v58 = vpop.f32.mrf.mxu1 }
 0x92f   : > { %v10949_v48 = vsub.f32 %v10808_v54, %v4177_v58  ;;  %v4282_v33 = vmul.f32 %v10946_v13, %v10946_v13  ;;  %v5508_v58 = vld [vmem:[%s12124_s18 + $0xe8] sm:$0xff] }
 0x931   : > { %v4283_v19 = vmul.f32 %v10949_v48, %v10949_v48 }
 0x933   : > { %4398 = vmatprep.mubr.f32.mxu0 %v4283_v19 }
 0x934   : > { %4399 = vmatmul.mubr.f32.gmra.mxu0 %v4282_v33 }
 0x938   : > { %v4181_v4 = vpop.f32.mrf.mxu1 }
 0x939   : > { %v10956_v28 = vsub.f32 %v10819_v8, %v4181_v4  ;;  %v5492_v4 = vld [vmem:[%s12124_s18 + $0x68] sm:$0xff] }
 0x93a   : > { %v4183_v47 = vpop.f32.mrf.mxu1 }
 0x93b   : > { %v10959_v9 = vsub.f32 %v10816_v36, %v4183_v47  ;;  %v4284_v30 = vmul.f32 %v10956_v28, %v10956_v28  ;;  %v5507_v47 = vld [vmem:[%s12124_s18 + $0xe0] sm:$0xff] }
 0x93d   : > { %v4285_v54 = vmul.f32 %v10959_v9, %v10959_v9 }
 0x93f   : > { %4404 = vmatprep.mubr.f32.mxu0 %v4285_v54 }
 0x940   : > { %4405 = vmatmul.mubr.f32.gmra.mxu0 %v4284_v30  ;;  %v5506_v30 = vld [vmem:[%s12124_s18 + $0xd8] sm:$0xff] }
 0x94b   : > { %v4187_v16 = vpop.f32.mrf.mxu1 }
 0x94c   : > { %v10966_v10 = vsub.f32 %v10827_v2, %v4187_v16 }
 0x94d   : > { %v4189_v12 = vpop.f32.mrf.mxu1 }
 0x94e   : > { %v10969_v8 = vsub.f32 %v10824_v34, %v4189_v12  ;;  %v4286_v14 = vmul.f32 %v10966_v10, %v10966_v10 }
 0x950   : > { %v4287_v36 = vmul.f32 %v10969_v8, %v10969_v8 }
 0x952   : > { %4410 = vmatprep.mubr.f32.mxu0 %v4287_v36 }
 0x953   : > { %4411 = vmatmul.mubr.f32.gmra.mxu0 %v4286_v14 }
 0x95d   : > { %v4193_v63 = vpop.f32.mrf.mxu1 }
 0x95e   : > { %v10979_v2 = vsub.f32 %v10835_v31, %v4193_v63 }
 0x95f   : > { %v4195_v25 = vpop.f32.mrf.mxu1 }
 0x960   : > { %v10982_v34 = vsub.f32 %v10832_v50, %v4195_v25  ;;  %v4288_v1 = vmul.f32 %v10979_v2, %v10979_v2  ;;  %v5494_v50 = vld [vmem:[%s12124_s18 + $0x78] sm:$0xff] }
 0x961   : > { %6136 = vmatpush3.msra.mxu1 %v5494_v50 }
 0x962   : > { %v4289_v20 = vmul.f32 %v10982_v34, %v10982_v34  ;;  %6137 = vmatprep.subr.mxu1 %v5509_v60 }
 0x963   : > { %6138 = vmatpush3.msra.mxu1 %v5493_v42 }
 0x964   : > { %4416 = vmatprep.mubr.f32.mxu0 %v4289_v20  ;;  %6139 = vmatprep.subr.mxu1 %v5508_v58 }
 0x965   : > { %4417 = vmatmul.mubr.f32.gmra.mxu0 %v4288_v1  ;;  %6140 = vmatpush3.msra.mxu1 %v5492_v4 }
 0x966   : > { %6141 = vmatprep.subr.mxu1 %v5507_v47 }
 0x968   : > { %v4199_v6 = vpop.f32.mrf.mxu1 }
 0x969   : > { %v10989_v45 = vsub.f32 %v10843_v44, %v4199_v6 }
 0x96a   : > { %v4201_v40 = vpop.f32.mrf.mxu1 }
 0x96b   : > { %v10992_v31 = vsub.f32 %v10840_v29, %v4201_v40  ;;  %v4290_v44 = vmul.f32 %v10989_v45, %v10989_v45 }
 0x96d   : > { %v4291_v24 = vmul.f32 %v10992_v31, %v10992_v31 }
 0x96f   : > { %4422 = vmatprep.mubr.f32.mxu0 %v4291_v24 }
 0x970   : > { %4423 = vmatmul.mubr.f32.gmra.mxu0 %v4290_v44 }
 0x974   : > { %v4205_v29 = vpop.f32.mrf.mxu1 }
 0x975   : > { %v11005_v5 = vsub.f32 %v10851_v53, %v4205_v29 }
 0x976   : > { %v4207_v39 = vpop.f32.mrf.mxu1 }
 0x977   : > { %v11008_v57 = vsub.f32 %v10848_v3, %v4207_v39  ;;  %v4292_v18 = vmul.f32 %v11005_v5, %v11005_v5  ;;  %v5489_v39 = vld [vmem:[%s12124_s18 + $0x50] sm:$0xff] }
 0x979   : > { %12443 = vst [vmem:[#allocation81_spill] sm:$0xff] %v11008_v57  ;;  %v4293_v62 = vmul.f32 %v11008_v57, %v11008_v57 }
 0x97b   : > { %4428 = vmatprep.mubr.f32.mxu0 %v4293_v62 }
 0x97c   : > { %4429 = vmatmul.mubr.f32.gmra.mxu0 %v4292_v18 }
 0x981   : > { %v4211_v3 = vpop.f32.mrf.mxu1 }
 0x982   : > { %v11021_v53 = vsub.f32 %v10859_v55, %v4211_v3  ;;  %v5488_v3 = vld [vmem:[%s12124_s18 + $0x48] sm:$0xff] }
 0x983   : > { %v4213_v19 = vpop.f32.mrf.mxu1 }
 0x984   : > { %12444 = vst [vmem:[#allocation49_spill] sm:$0xff] %v11021_v53  ;;  %v11024_v33 = vsub.f32 %v10856_v17, %v4213_v19  ;;  %v4294_v55 = vmul.f32 %v11021_v53, %v11021_v53  ;;  %v5491_v17 = vld [vmem:[%s12124_s18 + $0x60] sm:$0xff] }
 0x985   : > { %6142 = vmatpush3.msra.mxu1 %v5491_v17  ;;  %v5503_v19 = vld [vmem:[%s12124_s18 + $0xc0] sm:$0xff] }
 0x986   : > { %12445 = vst [vmem:[#allocation80_spill] sm:$0xff] %v11024_v33  ;;  %v4295_v54 = vmul.f32 %v11024_v33, %v11024_v33  ;;  %6143 = vmatprep.subr.mxu1 %v5506_v30  ;;  %v3905_v30 = vld [vmem:[#allocation20] sm:$0x3] }
 0x988   : > { %4434 = vmatprep.mubr.f32.mxu0 %v4295_v54 }
 0x989   : > { %4435 = vmatmul.mubr.f32.gmra.mxu0 %v4294_v55 }
 0x995   : > { %v4217_v16 = vpop.f32.mrf.mxu1 }
 0x996   : > { %v11043_v12 = vsub.f32 %v10867_v27, %v4217_v16  ;;  %v5490_v27 = vld [vmem:[%s12124_s18 + $0x58] sm:$0xff] }
 0x997   : > { %v4219_v36 = vpop.f32.mrf.mxu1  ;;  %6144 = vmatpush3.msra.mxu1 %v5490_v27  ;;  %v3906_v27 = vld [vmem:[#allocation22] sm:$0x3] }
 0x998   : > { %12446 = vst [vmem:[#allocation41_spill] sm:$0xff] %v11043_v12  ;;  %v11046_v14 = vsub.f32 %v10864_v32, %v4219_v36  ;;  %v4296_v63 = vmul.f32 %v11043_v12, %v11043_v12  ;;  %v5505_v32 = vld [vmem:[%s12124_s18 + $0xd0] sm:$0xff] }
 0x999   : > { %6145 = vmatprep.subr.mxu1 %v5505_v32 }
 0x99a   : > { %12447 = vst [vmem:[#allocation43_spill] sm:$0xff] %v11046_v14  ;;  %v4297_v22 = vmul.f32 %v11046_v14, %v11046_v14  ;;  %6146 = vmatpush3.msra.mxu1 %v5489_v39  ;;  %v5486_v39 = vld [vmem:[%s12124_s18 + $0x38] sm:$0xff] }
 0x99c   : > { %4440 = vmatprep.mubr.f32.mxu0 %v4297_v22 }
 0x99d   : > { %4441 = vmatmul.mubr.f32.gmra.mxu0 %v4296_v63  ;;  %v5502_v63 = vld [vmem:[%s12124_s18 + $0xb8] sm:$0xff] }
 0x9a2   : > { %v4223_v25 = vpop.f32.mrf.mxu1 }
 0x9a3   : > { %v11053_v20 = vsub.f32 %v10875_v23, %v4223_v25 }
 0x9a4   : > { %v4225_v1 = vpop.f32.mrf.mxu1 }
 0x9a5   : > { %12448 = vst [vmem:[#allocation48_spill] sm:$0xff] %v11053_v20  ;;  %v11062_v6 = vsub.f32 %v10872_v52, %v4225_v1  ;;  %v4298_v23 = vmul.f32 %v11053_v20, %v11053_v20  ;;  %v11108_v1 = vrot.slane %v3905_v30, %v12442_v56 }
 0x9a7   : > { %12449 = vst [vmem:[#allocation47_spill] sm:$0xff] %v11062_v6  ;;  %v4299_v40 = vmul.f32 %v11062_v6, %v11062_v6 }
 0x9a9   : > { %4446 = vmatprep.mubr.f32.mxu0 %v4299_v40 }
 0x9aa   : > { %4447 = vmatmul.mubr.f32.gmra.mxu0 %v4298_v23 }
 0x9ad   : > { %v4229_v50 = vpop.f32.mrf.mxu1 }
 0x9ae   : > { %v11069_v60 = vsub.f32 %v10889_v0, %v4229_v50  ;;  %v5504_v0 = vld [vmem:[%s12124_s18 + $0xc8] sm:$0xff]  ;;  %v11112_v50 = vrot.slane %v3906_v27, %v12442_v56 }
 0x9af   : > { %v4231_v24 = vpop.f32.mrf.mxu1  ;;  %6147 = vmatprep.subr.mxu1 %v5504_v0  ;;  %v5501_v0 = vld [vmem:[%s12124_s18 + $0xb0] sm:$0xff] }
 0x9b0   : > { %12450 = vst [vmem:[#allocation82_spill] sm:$0xff] %v11069_v60  ;;  %v11072_v44 = vsub.f32 %v10886_v49, %v4231_v24  ;;  %v4300_v29 = vmul.f32 %v11069_v60, %v11069_v60  ;;  %6148 = vmatpush3.msra.mxu1 %v5488_v3 }
 0x9b1   : > { %v4370_v62 = vpop.f32.mrf.mxu0  ;;  %6149 = vmatprep.subr.mxu1 %v5503_v19 }
 0x9b2   : > { %12451 = vst [vmem:[#allocation46_spill] sm:$0xff] %v11072_v44  ;;  %v4301_v52 = vmul.f32 %v11072_v44, %v11072_v44  ;;  %v4371_v49 = vadd.f32 1e-05, %v4370_v62 }
 0x9b3   : > { %v4372_v54 = vpop.f32.mrf.mxu0 }
 0x9b4   : > { %4452 = vmatprep.mubr.f32.mxu0 %v4301_v52  ;;  %6802 = vrsqrt.f32 %v4371_v49  ;;  %v4373_v16 = vadd.f32 1e-05, %v4372_v54 }
 0x9b5   : > { %4453 = vmatmul.mubr.f32.gmra.mxu0 %v4300_v29 }
 0x9b6   : > { %6804 = vrsqrt.f32 %v4373_v16 }
 0x9b9   : > { %v4376_v55 = vpop.f32.mrf.mxu0 }
 0x9ba   : > { %v4377_v36 = vadd.f32 1e-05, %v4376_v55  ;;  %v11127_v55 = vrot.slane %v3905_v30, %v12441_v41 }
 0x9bb   : > { %v4235_v18 = vpop.f32.mrf.mxu1  ;;  %v4378_v22 = vpop.f32.mrf.mxu0 }
 0x9bc   : > { %v11085_v42 = vsub.f32 %v10911_v37, %v4235_v18  ;;  %6806 = vrsqrt.f32 %v4377_v36  ;;  %v4379_v32 = vadd.f32 1e-05, %v4378_v22  ;;  %v11131_v22 = vrot.slane %v3906_v27, %v12441_v41 }
 0x9bd   : > { %v4237_v58 = vpop.f32.mrf.mxu1 }
 0x9be   : > { %12452 = vst [vmem:[#allocation60_spill] sm:$0xff] %v11085_v42  ;;  %v11094_v4 = vsub.f32 %v10908_v35, %v4237_v58  ;;  %v4302_v37 = vmul.f32 %v11085_v42, %v11085_v42  ;;  %v5487_v35 = vld [vmem:[%s12124_s18 + $0x40] sm:$0xff]  ;;  %6808 = vrsqrt.f32 %v4379_v32 }
 0x9bf   : > { %6150 = vmatpush3.msra.mxu1 %v5487_v35 }
 0x9c0   : > { %12453 = vst [vmem:[#allocation61_spill] sm:$0xff] %v11094_v4  ;;  %v4303_v47 = vmul.f32 %v11094_v4, %v11094_v4  ;;  %6151 = vmatprep.subr.mxu1 %v5502_v63 }
 0x9c1   : > { %v6803_v17 = vpop.eup %6802  ;;  %6152 = vmatpush3.msra.mxu1 %v5486_v39 }
 0x9c2   : > { %4458 = vmatprep.mubr.f32.mxu0 %v4303_v47  ;;  %v4497_v25 = vmul.f32 %v6803_v17, %v10880_v59  ;;  %6153 = vmatprep.subr.mxu1 %v5501_v0 }
 0x9c3   : > { %4459 = vmatmul.mubr.f32.gmra.mxu0 %v4302_v37  ;;  %v4382_v40 = vpop.f32.mrf.mxu0  ;;  %v6805_v56 = vpop.eup %6804 }
 0x9c4   : > { %v4540_v23 = vmul.f32 %v11108_v1, %v4497_v25  ;;  %v4383_v29 = vadd.f32 1e-05, %v4382_v40  ;;  %v4498_v54 = vmul.f32 %v6805_v56, %v10883_v21 }
 0x9c5   : > { %v4384_v24 = vpop.f32.mrf.mxu0 }
 0x9c6   : > { %v4583_v52 = vadd.f32 %v11112_v50, %v4540_v23  ;;  %v4385_v59 = vadd.f32 1e-05, %v4384_v24  ;;  %6810 = vrsqrt.f32 %v4383_v29  ;;  %v4541_v36 = vmul.f32 %v11127_v55, %v4498_v54 }
 0x9c8   : > { %v11121_v62 = vmul.f32 0.70710677, %v4583_v52  ;;  %6812 = vrsqrt.f32 %v4385_v59  ;;  %v4584_v35 = vadd.f32 %v11131_v22, %v4541_v36 }
 0x9c9   : > { %v6807_v58 = vpop.eup %6806 }
 0x9ca   : > { %v4743_v19 = vand.u32 2147483647, %v11121_v62  ;;  %v4499_v37 = vmul.f32 %v6807_v58, %v10898_v26  ;;  %v4648_v21 = vmul.f32 0.70710677, %v4584_v35  ;;  %vm4679_vm5 = vcmp.ge.f32.partialorder %v11121_v62, 0.0 }
 0x9cb   : > { %v6809_v17 = vpop.eup %6808 }
 0x9cc   : > { %v4775_v16 = vmul.f32 0.3275911, %v4743_v19  ;;  %v4500_v63 = vmul.f32 %v6809_v17, %v10901_v61  ;;  %v4542_v26 = vmul.f32 %v11108_v1, %v4499_v37  ;;  %v5191_v32 = vsub.f32 0.0, %v4743_v19  ;;  %v5500_v37 = vld [vmem:[%s12124_s18 + $0xa8] sm:$0xff] }
 0x9cd   : > { %v4744_v29 = vand.u32 2147483647, %v4648_v21  ;;  %vm4680_vm6 = vcmp.ge.f32.partialorder %v4648_v21, 0.0 }
 0x9ce   : > { %v4807_v25 = vadd.f32 1.0, %v4775_v16  ;;  %v4543_v30 = vmul.f32 %v11127_v55, %v4500_v63  ;;  %v4585_v23 = vadd.f32 %v11112_v50, %v4542_v26  ;;  %v5223_v27 = vmul.f32 %v5191_v32, %v4743_v19 }
 0x9cf   : > { %v4776_v39 = vmul.f32 0.3275911, %v4744_v29  ;;  %v11154_v16 = vmul.f32 0.5, %v4584_v35  ;;  %v5192_v32 = vsub.f32 0.0, %v4744_v29 }
 0x9d0   : > { %v4586_v59 = vadd.f32 %v11131_v22, %v4543_v30  ;;  %v11139_v41 = vmul.f32 0.70710677, %v4585_v23  ;;  %v11150_v54 = vmul.f32 1.442695, %v5223_v27 }
 0x9d2   : > { %v4650_v61 = vmul.f32 0.70710677, %v4586_v59  ;;  %v4745_v19 = vand.u32 2147483647, %v11139_v41  ;;  %vm4681_vm7 = vcmp.ge.f32.partialorder %v11139_v41, 0.0 }
 0x9d3   : > { %v6811_v40 = vpop.eup %6810 }
 0x9d4   : > { %v4501_v0 = vmul.f32 %v6811_v40, %v10914_v51  ;;  %v4746_v58 = vand.u32 2147483647, %v4650_v61  ;;  %v11152_v51 = vmul.f32 0.5, %v4583_v52  ;;  %v4777_v36 = vmul.f32 0.3275911, %v4745_v19 }
 0x9d5   : > { %v6813_v24 = vpop.eup %6812  ;;  %vm4682_vm8 = vcmp.ge.f32.partialorder %v4650_v61, 0.0 }
 0x9d6   : > { %v4544_v26 = vmul.f32 %v11108_v1, %v4501_v0  ;;  %v4809_v52 = vadd.f32 1.0, %v4777_v36  ;;  %v11187_v36 = vmul.f32 0.5, %v4585_v23 }
 0x9db   : > { %v4388_v49 = vpop.f32.mrf.mxu0 }
 0x9dc   : > { %v4389_v47 = vadd.f32 1e-05, %v4388_v49  ;;  %v4502_v49 = vmul.f32 %v6813_v24, %v10918_v46  ;;  %v4778_v46 = vmul.f32 0.3275911, %v4746_v58 }
 0x9dd   : > { %v4390_v18 = vpop.f32.mrf.mxu0 }
 0x9de   : > { %v4391_v3 = vadd.f32 1e-05, %v4390_v18  ;;  %v4808_v18 = vadd.f32 1.0, %v4776_v39  ;;  %v4545_v63 = vmul.f32 %v11127_v55, %v4502_v49  ;;  %v4810_v30 = vadd.f32 1.0, %v4778_v46 }
 0x9df   : > { %v11162_v39 = vadd.f32 %v11112_v50, %v4544_v26  ;;  %v5194_v49 = vsub.f32 0.0, %v4746_v58 }
 0x9e0   : > { %6814 = vrsqrt.f32 %v4391_v3  ;;  %v4588_v27 = vadd.f32 %v11131_v22, %v4545_v63 }
 0x9e1   : > { %6816 = vrsqrt.f32 %v4389_v47  ;;  %v5485_v47 = vld [vmem:[%s12124_s18 + $0x30] sm:$0xff]  ;;  %v5226_v46 = vmul.f32 %v5194_v49, %v4746_v58  ;;  %v11198_v58 = vsel %vm4681_vm7, 1.0, %v12409_v7 }
 0x9e2   : > { %6818 = vrcp.f32 %v4807_v25  ;;  %6154 = vmatpush3.msra.mxu1 %v5485_v47  ;;  %v11166_v47 = vmul.f32 0.70710677, %v4588_v27  ;;  %v11220_v60 = vmul.f32 0.5, %v4588_v27 }
 0x9e3   : > { %6820 = vrcp.f32 %v4808_v18  ;;  %6155 = vmatprep.subr.mxu1 %v5500_v37  ;;  %v5224_v37 = vmul.f32 %v5192_v32, %v4744_v29  ;;  %v11182_v29 = vsel %vm4680_vm6, 1.0, %v12409_v7  ;;  %v11193_v32 = vsel %vm4682_vm8, 1.0, %v12409_v7 }
 0x9e4   : > { %6822 = vrcp.f32 %v4810_v30  ;;  %v5261_v41 = vmul.f32 1.442695, %v5226_v46  ;;  %vm4684_vm9 = vcmp.ge.f32.partialorder %v11166_v47, 0.0 }
 0x9e5   : > { %6824 = vrcp.f32 %v4809_v52 }
 0x9e9   : > { %v4394_v56 = vpop.f32.mrf.mxu0 }
 0x9ea   : > { %v4395_v24 = vadd.f32 1e-05, %v4394_v56  ;;  %v11175_v56 = vmul.f32 0.70710677, %v11162_v39 }
 0x9eb   : > { %v4396_v25 = vpop.f32.mrf.mxu0 }
 0x9ec   : > { %v4397_v18 = vadd.f32 1e-05, %v4396_v25  ;;  %6826 = vrsqrt.f32 %v4395_v24  ;;  %v4747_v61 = vand.u32 2147483647, %v11175_v56  ;;  %v11190_v25 = vmul.f32 0.5, %v4586_v59  ;;  %v5484_v59 = vld [vmem:[%s12124_s18 + $0x28] sm:$0xff] }
 0x9ed   : > { %v6815_v3 = vpop.eup %6814  ;;  %6156 = vmatpush3.msra.mxu1 %v5484_v59  ;;  %vm4683_vm10 = vcmp.ge.f32.partialorder %v11175_v56, 0.0 }
 0x9ee   : > { %v6817_v17 = vpop.eup %6816  ;;  %v4504_v40 = vmul.f32 %v6815_v3, %v10929_v15  ;;  %v11171_v15 = vsel %vm4679_vm5, 1.0, %v12409_v7  ;;  %v4748_v3 = vand.u32 2147483647, %v11166_v47  ;;  %6828 = vrsqrt.f32 %v4397_v18 }
 0x9ef   : > { %v4503_v35 = vmul.f32 %v6817_v17, %v10926_v11  ;;  %v5193_v11 = vsub.f32 0.0, %v4745_v19  ;;  %v11185_v17 = vpop.eup %6818  ;;  %v4779_v52 = vmul.f32 0.3275911, %v4747_v61 }
 0x9f0   : > { %v4547_v0 = vmul.f32 %v11127_v55, %v4504_v40  ;;  %v4780_v63 = vmul.f32 0.3275911, %v4748_v3  ;;  %v5257_v40 = vmul.f32 1.442695, %v5224_v37  ;;  %v4903_v49 = vmul.f32 1.0614054, %v11185_v17  ;;  %v11213_v18 = vpop.eup %6820 }
 0x9f1   : > { %v4546_v62 = vmul.f32 %v11108_v1, %v4503_v35  ;;  %v5225_v23 = vmul.f32 %v5193_v11, %v4745_v19  ;;  %v5499_v35 = vld [vmem:[%s12124_s18 + $0xa0] sm:$0xff]  ;;  %v5196_v19 = vsub.f32 0.0, %v4748_v3  ;;  %v4811_v37 = vadd.f32 1.0, %v4779_v52 }
 0x9f2   : > { %v11179_v21 = vadd.f32 %v11131_v22, %v4547_v0  ;;  %v4812_v24 = vadd.f32 1.0, %v4780_v63  ;;  %v5195_v11 = vsub.f32 0.0, %v4747_v61  ;;  %6157 = vmatprep.subr.mxu1 %v5499_v35  ;;  %v4904_v42 = vmul.f32 1.0614054, %v11213_v18 }
 0x9f3   : > { %v11211_v0 = vadd.f32 %v11112_v50, %v4546_v62  ;;  %v4935_v4 = vadd.f32 -1.4531521, %v4903_v49  ;;  %v5259_v62 = vmul.f32 1.442695, %v5225_v23  ;;  %v5228_v49 = vmul.f32 %v5196_v19, %v4748_v3 }
 0x9f4   : > { %v4400_v26 = vpop.f32.mrf.mxu0  ;;  %v11201_v30 = vmul.f32 0.70710677, %v11179_v21  ;;  %6830 = vrcp.f32 %v4812_v24  ;;  %v4936_v59 = vadd.f32 -1.4531521, %v4904_v42  ;;  %v11235_v23 = vmul.f32 0.5, %v11162_v39 }
 0x9f5   : > { %6832 = vpow2.f32 %v11150_v54  ;;  %v4401_v46 = vadd.f32 1e-05, %v4400_v26  ;;  %v4967_v24 = vmul.f32 %v11185_v17, %v4935_v4  ;;  %v11224_v52 = vmul.f32 0.70710677, %v11211_v0  ;;  %v11226_v54 = vpop.eup %6822 }
 0x9f6   : > { %v4402_v63 = vpop.f32.mrf.mxu0  ;;  %v11218_v44 = vand.u32 2147483647, %v11201_v30  ;;  %6834 = vpow2.f32 %v5257_v40  ;;  %v11229_v6 = vpop.eup %6824  ;;  %v4968_v26 = vmul.f32 %v11213_v18, %v4936_v59  ;;  %v4906_v42 = vmul.f32 1.0614054, %v11226_v54 }
 0x9f7   : > { %6836 = vrcp.f32 %v4811_v37  ;;  %v4403_v35 = vadd.f32 1e-05, %v4402_v63  ;;  %v4999_v27 = vadd.f32 1.4214138, %v4967_v24  ;;  %v5227_v40 = vmul.f32 %v5195_v11, %v4747_v61 }
 0x9f8   : > { %6838 = vpow2.f32 %v5261_v41  ;;  %v4782_v20 = vmul.f32 0.3275911, %v11218_v44  ;;  %v4905_v4 = vmul.f32 1.0614054, %v11229_v6  ;;  %v5000_v3 = vadd.f32 1.4214138, %v4968_v26 }
 0x9f9   : > { %6840 = vpow2.f32 %v5259_v62  ;;  %v5031_v19 = vmul.f32 %v11185_v17, %v4999_v27  ;;  %v11239_v63 = vand.u32 2147483647, %v11224_v52  ;;  %v6827_v59 = vpop.eup %6826  ;;  %v4938_v24 = vadd.f32 -1.4531521, %v4906_v42 }
 0x9fa   : > { %v4814_v37 = vadd.f32 1.0, %v4782_v20  ;;  %6842 = vrsqrt.f32 %v4401_v46  ;;  %v4937_v12 = vadd.f32 -1.4531521, %v4905_v4  ;;  %v5265_v14 = vmul.f32 1.442695, %v5228_v49  ;;  %v5483_v49 = vld [vmem:[%s12124_s18 + $0x20] sm:$0xff] }
 0x9fb   : > { %v6829_v61 = vpop.eup %6828  ;;  %v5032_v11 = vmul.f32 %v11213_v18, %v5000_v3  ;;  %v5063_v39 = vadd.f32 -0.28449672, %v5031_v19  ;;  %v5263_v62 = vmul.f32 1.442695, %v5227_v40  ;;  %v4970_v46 = vmul.f32 %v11226_v54, %v4938_v24  ;;  %6158 = vmatpush3.msra.mxu1 %v5483_v49 }
 0x9fc   : > { %6844 = vrcp.f32 %v4814_v37  ;;  %v4969_v26 = vmul.f32 %v11229_v6, %v4937_v12  ;;  %v5198_v27 = vsub.f32 0.0, %v11218_v44  ;;  %v11246_v33 = vmul.f32 %v6827_v59, %v10936_v38 }
 0x9fd   : > { %6846 = vrsqrt.f32 %v4403_v35  ;;  %v5498_v35 = vld [vmem:[%s12124_s18 + $0x98] sm:$0xff]  ;;  %v5064_v42 = vadd.f32 -0.28449672, %v5032_v11  ;;  %v5095_v40 = vmul.f32 %v11185_v17, %v5063_v39  ;;  %v4781_v4 = vmul.f32 0.3275911, %v11239_v63 }
 0x9fe   : > { %v5002_v12 = vadd.f32 1.4214138, %v4970_v46  ;;  %v5001_v37 = vadd.f32 1.4214138, %v4969_v26  ;;  %6848 = vpow2.f32 %v5265_v14  ;;  %v4506_v38 = vmul.f32 %v6829_v61, %v10939_v43  ;;  %6159 = vmatprep.subr.mxu1 %v5498_v35 }
 0x9ff   : > { %v5096_v3 = vmul.f32 %v11213_v18, %v5064_v42  ;;  %v5127_v19 = vadd.f32 0.2548296, %v5095_v40  ;;  %6850 = vpow2.f32 %v5263_v62  ;;  %v4813_v59 = vadd.f32 1.0, %v4781_v4 }
 0xa00   : > { %v4406_v41 = vpop.f32.mrf.mxu0  ;;  %v5034_v11 = vmul.f32 %v11226_v54, %v5002_v12  ;;  %v5033_v39 = vmul.f32 %v11229_v6, %v5001_v37  ;;  %v5230_v61 = vmul.f32 %v5198_v27, %v11218_v44  ;;  %vm4686_vm11 = vcmp.ge.f32.partialorder %v11201_v30, 0.0 }
 0xa01   : > { %v4407_v20 = vadd.f32 1e-05, %v4406_v41  ;;  %v11257_v41 = vpop.eup %6830  ;;  %v5128_v49 = vadd.f32 0.2548296, %v5096_v3  ;;  %v5159_v43 = vmul.f32 %v11185_v17, %v5127_v19  ;;  %v5197_v3 = vsub.f32 0.0, %v11239_v63 }
 0xa02   : > { %v6833_v24 = vpop.eup %6832  ;;  %v4908_v46 = vmul.f32 1.0614054, %v11257_v41  ;;  %v4408_v14 = vpop.f32.mrf.mxu0  ;;  %v5066_v62 = vadd.f32 -0.28449672, %v5034_v11  ;;  %v5065_v42 = vadd.f32 -0.28449672, %v5033_v39 }
 0xa03   : > { %6852 = vrsqrt.f32 %v4407_v20  ;;  %v6835_v26 = vpop.eup %6834  ;;  %v4549_v20 = vmul.f32 %v11127_v55, %v4506_v38  ;;  %v5160_v12 = vmul.f32 %v11213_v18, %v5128_v49  ;;  %v5319_v37 = vmul.f32 %v6833_v24, %v5159_v43 }
 0xa04   : > { %6854 = vrcp.f32 %v4813_v59  ;;  %v11265_v35 = vpop.eup %6836  ;;  %v4940_v40 = vadd.f32 -1.4531521, %v4908_v46  ;;  %v4409_v57 = vadd.f32 1e-05, %v4408_v14  ;;  %v5098_v17 = vmul.f32 %v11226_v54, %v5066_v62 }
 0xa05   : > { %v6839_v4 = vpop.eup %6838  ;;  %v4907_v53 = vmul.f32 1.0614054, %v11265_v35  ;;  %v5097_v44 = vmul.f32 %v11229_v6, %v5065_v42  ;;  %v5320_v59 = vmul.f32 %v6835_v26, %v5160_v12  ;;  %v5351_v11 = vsub.f32 1.0, %v5319_v37 }
 0xa06   : > { %v4972_v27 = vmul.f32 %v11257_v41, %v4940_v40  ;;  %v6841_v19 = vpop.eup %6840  ;;  %v5269_v38 = vmul.f32 1.442695, %v5230_v61  ;;  %v5130_v18 = vadd.f32 0.2548296, %v5098_v17  ;;  %v11277_v43 = vadd.f32 %v11131_v22, %v4549_v20 }
 0xa07   : > { %v4939_v39 = vadd.f32 -1.4531521, %v4907_v53  ;;  %v11274_v46 = vpop.eup %6842  ;;  %v5129_v24 = vadd.f32 0.2548296, %v5097_v44  ;;  %v5352_v62 = vsub.f32 1.0, %v5320_v59  ;;  %v5383_v42 = vmul.f32 %v5351_v11, %v11171_v15  ;;  %v5482_v53 = vld [vmem:[%s12124_s18 + $0x18] sm:$0xff] }
 0xa08   : > { %v5004_v49 = vadd.f32 1.4214138, %v4972_v27  ;;  %v5229_v26 = vmul.f32 %v5197_v3, %v11239_v63  ;;  %v5162_v61 = vmul.f32 %v11226_v54, %v5130_v18  ;;  %6856 = vrsqrt.f32 %v4409_v57  ;;  %6160 = vmatpush3.msra.mxu1 %v5482_v53  ;;  %v5497_v15 = vld [vmem:[%s12124_s18 + $0x90] sm:$0xff]  ;;  %v5495_v53 = vld [vmem:[%s12124_s18 + $0x80] sm:$0xff] }
 0xa09   : > { %v11279_v14 = vpop.eup %6844  ;;  %v4971_v40 = vmul.f32 %v11265_v35, %v4939_v39  ;;  %v5161_v20 = vmul.f32 %v11229_v6, %v5129_v24  ;;  %v5384_v63 = vmul.f32 %v5352_v62, %v11182_v29  ;;  %v4548_v54 = vmul.f32 %v11108_v1, %v11246_v33  ;;  %6161 = vmatprep.subr.mxu1 %v5497_v15  ;;  %v5481_v6 = vld [vmem:[%s12124_s18 + $0x10] sm:$0xff]  ;;  %v5496_v29 = vld [vmem:[%s12124_s18 + $0x88] sm:$0xff] }
 0xa0a   : > { %v11284_v12 = vpop.eup %6846  ;;  %v5036_v37 = vmul.f32 %v11257_v41, %v5004_v49  ;;  %v4910_v17 = vmul.f32 1.0614054, %v11279_v14  ;;  %v5415_v44 = vadd.f32 1.0, %v5383_v42  ;;  %v5322_v57 = vmul.f32 %v6839_v4, %v5162_v61  ;;  %6162 = vmatpush3.msra.mxu1 %v5481_v6  ;;  %v5480_v62 = vld [vmem:[%s12124_s18 + $0x8] sm:$0xff] }
 0xa0b   : > { %v5003_v3 = vadd.f32 1.4214138, %v4971_v40  ;;  %v5321_v27 = vmul.f32 %v6841_v19, %v5161_v20  ;;  %v6849_v11 = vpop.eup %6848  ;;  %v5416_v39 = vadd.f32 1.0, %v5384_v63  ;;  %v5267_v33 = vmul.f32 1.442695, %v5229_v26  ;;  %6163 = vmatprep.subr.mxu1 %v5496_v29 }
 0xa0c   : > { %v5068_v59 = vadd.f32 -0.28449672, %v5036_v37  ;;  %v4942_v24 = vadd.f32 -1.4531521, %v4910_v17  ;;  %v6851_v49 = vpop.eup %6850  ;;  %v5354_v4 = vsub.f32 1.0, %v5322_v57  ;;  %6858 = vpow2.f32 %v5269_v38  ;;  %6164 = vmatpush3.msra.mxu1 %v5480_v62  ;;  %v5479_v38 = vld [vmem:[%s12124_s18] sm:$0xff] }
 0xa0d   : > { %v5035_v18 = vmul.f32 %v11265_v35, %v5003_v3  ;;  %v5353_v19 = vsub.f32 1.0, %v5321_v27  ;;  %v11311_v42 = vmul.f32 0.70710677, %v11277_v43  ;;  %v5448_v26 = vmul.f32 %v5416_v39, %v11154_v16  ;;  %6165 = vmatprep.subr.mxu1 %v5495_v53 }
 0xa0e   : > { %v5100_v61 = vmul.f32 %v11257_v41, %v5068_v59  ;;  %v4974_v37 = vmul.f32 %v11279_v14, %v4942_v24  ;;  %v5447_v15 = vmul.f32 %v5415_v44, %v11152_v51  ;;  %v5386_v63 = vmul.f32 %v5354_v4, %v11193_v32  ;;  %6166 = vmatpush3.msra.mxu1 %v5479_v38 }
 0xa0f   : > { %v5067_v20 = vadd.f32 -0.28449672, %v5035_v18  ;;  %v5385_v3 = vmul.f32 %v5353_v19, %v11198_v58  ;;  %v11330_v16 = vadd.f32 %v11112_v50, %v4548_v54  ;;  %5582 = vmatprep.mubr.f32.mxu1 %v5448_v26  ;;  %6860 = vpow2.f32 %v5267_v33 }
 0xa10   : > { %v11313_v40 = vpop.eup %6852  ;;  %v5132_v6 = vadd.f32 0.2548296, %v5100_v61  ;;  %v5006_v27 = vadd.f32 1.4214138, %v4974_v37  ;;  %5583 = vmatmul.mubr.f32.vlgmr.msra.gmra.mxu1 %v5447_v15  ;;  %v5418_v29 = vadd.f32 1.0, %v5386_v63  ;;  %v4508_v4 = vmul.f32 %v11284_v12, %v10949_v48 }
 0xa11   : > { %v11321_v17 = vpop.eup %6854  ;;  %v5099_v57 = vmul.f32 %v11265_v35, %v5067_v20  ;;  %v5417_v39 = vadd.f32 1.0, %v5385_v3  ;;  %v11335_v51 = vand.u32 2147483647, %v11311_v42  ;;  %v4716_v61 = vsel %vm4684_vm9, 1.0, %v12409_v7 }
 0xa12   : > { %v4909_v59 = vmul.f32 1.0614054, %v11321_v17  ;;  %v5164_v32 = vmul.f32 %v11257_v41, %v5132_v6  ;;  %v5038_v54 = vmul.f32 %v11279_v14, %v5006_v27  ;;  %v5450_v18 = vmul.f32 %v5418_v29, %v11190_v25 }
 0xa13   : > { %v5131_v58 = vadd.f32 0.2548296, %v5099_v57  ;;  %v5449_v24 = vmul.f32 %v5417_v39, %v11187_v36  ;;  %v4784_v62 = vmul.f32 0.3275911, %v11335_v51  ;;  %v4412_v19 = vpop.f32.mrf.mxu0  ;;  %v11351_v25 = vmul.f32 0.70710677, %v11330_v16 }
 0xa14   : > { %v4941_v44 = vadd.f32 -1.4531521, %v4909_v59  ;;  %v5324_v33 = vmul.f32 %v6849_v11, %v5164_v32  ;;  %v5070_v26 = vadd.f32 -0.28449672, %v5038_v54  ;;  %5587 = vmatprep.mubr.f32.mxu1 %v5450_v18  ;;  %v4413_v37 = vadd.f32 1e-05, %v4412_v19 }
 0xa15   : > { %v5163_v53 = vmul.f32 %v11265_v35, %v5131_v58  ;;  %v4816_v36 = vadd.f32 1.0, %v4784_v62  ;;  %5588 = vmatmul.mubr.f32.gmra.mxu1 %v5449_v24  ;;  %v6857_v20 = vpop.eup %6856  ;;  %v4751_v38 = vand.u32 2147483647, %v11351_v25  ;;  %v4551_v47 = vmul.f32 %v11127_v55, %v4508_v4  ;;  %v4414_v15 = vpop.f32.mrf.mxu0 }
 0xa16   : > { %v4973_v41 = vmul.f32 %v11321_v17, %v4941_v44  ;;  %v5356_v48 = vsub.f32 1.0, %v5324_v33  ;;  %v5102_v11 = vmul.f32 %v11279_v14, %v5070_v26  ;;  %v4507_v27 = vmul.f32 %v11274_v46, %v10946_v13 }
 0xa17   : > { %v5323_v12 = vmul.f32 %v6851_v49, %v5163_v53  ;;  %6862 = vrcp.f32 %v4816_v36  ;;  %v4715_v49 = vsel %vm4683_vm10, 1.0, %v12409_v7  ;;  %v4783_v59 = vmul.f32 0.3275911, %v4751_v38 }
 0xa18   : > { %v5005_v35 = vadd.f32 1.4214138, %v4973_v41  ;;  %v5388_v63 = vmul.f32 %v5356_v48, %v4716_v61  ;;  %v5134_v6 = vadd.f32 0.2548296, %v5102_v11  ;;  %6864 = vrsqrt.f32 %v4413_v37 }
 0xa19   : > { %v5355_v3 = vsub.f32 1.0, %v5323_v12  ;;  %v6859_v29 = vpop.eup %6858  ;;  %v4415_v44 = vadd.f32 1e-05, %v4414_v15  ;;  %v4815_v18 = vadd.f32 1.0, %v4783_v59  ;;  %v11365_v24 = vadd.f32 %v11131_v22, %v4551_v47 }
 0xa1a   : > { %v5037_v57 = vmul.f32 %v11321_v17, %v5005_v35  ;;  %v5420_v39 = vadd.f32 1.0, %v5388_v63  ;;  %v5166_v58 = vmul.f32 %v11279_v14, %v5134_v6  ;;  %v5200_v4 = vsub.f32 0.0, %v11335_v51 }
 0xa1b   : > { %v5387_v32 = vmul.f32 %v5355_v3, %v4715_v49  ;;  %6866 = vrcp.f32 %v4815_v18  ;;  %v11372_v26 = vmul.f32 0.70710677, %v11365_v24  ;;  %v4550_v41 = vmul.f32 %v11108_v1, %v4507_v27 }
 0xa1c   : > { %v5069_v54 = vadd.f32 -0.28449672, %v5037_v57  ;;  %v5452_v13 = vmul.f32 %v5420_v39, %v11220_v60  ;;  %v5326_v56 = vmul.f32 %v6859_v29, %v5166_v58  ;;  %v6861_v19 = vpop.eup %6860  ;;  %6868 = vrsqrt.f32 %v4415_v44 }
 0xa1d   : > { %v5419_v46 = vadd.f32 1.0, %v5387_v32  ;;  %v4718_v60 = vsel %vm4686_vm11, 1.0, %v12409_v7  ;;  %v4510_v61 = vmul.f32 %v6857_v20, %v10959_v9  ;;  %v4622_v36 = vmul.f32 0.5, %v11179_v21 }
 0xa1e   : > { %v5101_v62 = vmul.f32 %v11321_v17, %v5069_v54  ;;  %5592 = vmatprep.mubr.f32.mxu1 %v5452_v13  ;;  %v5358_v33 = vsub.f32 1.0, %v5326_v56  ;;  %v5199_v12 = vsub.f32 0.0, %v4751_v38  ;;  %vm4685_vm12 = vcmp.ge.f32.partialorder %v11224_v52, 0.0 }
 0xa1f   : > { %v5451_v14 = vmul.f32 %v5419_v46, %v11235_v23  ;;  %v5232_v11 = vmul.f32 %v5200_v4, %v11335_v51  ;;  %v11384_v35 = vand.u32 2147483647, %v11372_v26  ;;  %v11387_v30 = vadd.f32 %v11112_v50, %v4550_v41 }
 0xa20   : > { %v5133_v53 = vadd.f32 0.2548296, %v5101_v62  ;;  %v5390_v48 = vmul.f32 %v5358_v33, %v4718_v60  ;;  %v4509_v9 = vmul.f32 %v11313_v40, %v10956_v28  ;;  %v4553_v21 = vmul.f32 %v11127_v55, %v4510_v61 }
 0xa21   : > { %5593 = vmatmul.mubr.f32.gmra.mxu1 %v5451_v14  ;;  %v11394_v15 = vmul.f32 0.70710677, %v11387_v30  ;;  %v5231_v6 = vmul.f32 %v5199_v12, %v4751_v38  ;;  %v4717_v28 = vsel %vm4685_vm12, 1.0, %v12409_v7  ;;  %v5273_v27 = vmul.f32 1.442695, %v5232_v11 }
 0xa22   : > { %v5165_v23 = vmul.f32 %v11321_v17, %v5133_v53  ;;  %v5422_v20 = vadd.f32 1.0, %v5390_v48  ;;  %v4786_v17 = vmul.f32 0.3275911, %v11384_v35  ;;  %v11399_v57 = vadd.f32 %v11131_v22, %v4553_v21 }
 0xa23   : > { %v4753_v29 = vand.u32 2147483647, %v11394_v15  ;;  %v4552_v39 = vmul.f32 %v11108_v1, %v4509_v9  ;;  %v4621_v38 = vmul.f32 0.5, %v11211_v0  ;;  %vm4688_vm13 = vcmp.ge.f32.partialorder %v11311_v42, 0.0 }
 0xa24   : > { %v5325_v37 = vmul.f32 %v6861_v19, %v5165_v23  ;;  %v11396_v51 = vpop.eup %6862  ;;  %v5454_v63 = vmul.f32 %v5422_v20, %v4622_v36  ;;  %v4818_v49 = vadd.f32 1.0, %v4786_v17  ;;  %v11409_v54 = vmul.f32 0.70710677, %v11399_v57 }
 0xa25   : > { %v4418_v47 = vpop.f32.mrf.mxu0  ;;  %v4912_v40 = vmul.f32 1.0614054, %v11396_v51  ;;  %v6865_v52 = vpop.eup %6864  ;;  %v5271_v18 = vmul.f32 1.442695, %v5231_v6  ;;  %v4785_v13 = vmul.f32 0.3275911, %v4753_v29  ;;  %v11422_v33 = vadd.f32 %v11112_v50, %v4552_v39 }
 0xa26   : > { %v5357_v3 = vsub.f32 1.0, %v5325_v37  ;;  %5597 = vmatprep.mubr.f32.mxu1 %v5454_v63  ;;  %6870 = vrcp.f32 %v4818_v49  ;;  %v11413_v46 = vmul.f32 0.5, %v11277_v43  ;;  %v11417_v62 = vand.u32 2147483647, %v11409_v54 }
 0xa27   : > { %v4420_v32 = vpop.f32.mrf.mxu0  ;;  %v4944_v58 = vadd.f32 -1.4531521, %v4912_v40  ;;  %6872 = vpow2.f32 %v5273_v27  ;;  %v4817_v14 = vadd.f32 1.0, %v4785_v13  ;;  %v11425_v42 = vsel %vm4688_vm13, 1.0, %v12409_v7 }
 0xa28   : > { %v5389_v59 = vmul.f32 %v5357_v3, %v4717_v28  ;;  %v11419_v0 = vpop.eup %6866  ;;  %v4421_v4 = vadd.f32 1e-05, %v4420_v32  ;;  %v11428_v43 = vmul.f32 0.5, %v11330_v16  ;;  %v4511_v61 = vmul.f32 %v6865_v52, %v10966_v10 }
 0xa29   : > { %v4976_v56 = vmul.f32 %v11396_v51, %v4944_v58  ;;  %v4911_v60 = vmul.f32 1.0614054, %v11419_v0  ;;  %v6869_v41 = vpop.eup %6868  ;;  %vm4687_vm14 = vcmp.ge.f32.partialorder %v11351_v25, 0.0  ;;  %6874 = vpow2.f32 %v5271_v18 }
 0xa2a   : > { %v5421_v44 = vadd.f32 1.0, %v5389_v59  ;;  %v4788_v36 = vmul.f32 0.3275911, %v11417_v62  ;;  %v5202_v12 = vsub.f32 0.0, %v11384_v35  ;;  %6876 = vrcp.f32 %v4817_v14 }
 0xa2b   : > { %v5008_v53 = vadd.f32 1.4214138, %v4976_v56  ;;  %v4943_v23 = vadd.f32 -1.4531521, %v4911_v60  ;;  %v4419_v11 = vadd.f32 1e-05, %v4418_v47  ;;  %6878 = vrsqrt.f32 %v4421_v4 }
 0xa2c   : > { %v5453_v19 = vmul.f32 %v5421_v44, %v4621_v38  ;;  %v4820_v16 = vadd.f32 1.0, %v4788_v36  ;;  %v11437_v9 = vmul.f32 0.70710677, %v11422_v33  ;;  %v5201_v21 = vsub.f32 0.0, %v4753_v29 }
 0xa2d   : > { %v5040_v48 = vmul.f32 %v11396_v51, %v5008_v53  ;;  %v4975_v37 = vmul.f32 %v11419_v0, %v4943_v23  ;;  %v4512_v17 = vmul.f32 %v6869_v41, %v10969_v8  ;;  %v11444_v63 = vsel %vm4687_vm14, 1.0, %v12409_v7 }
 0xa2e   : > { %5598 = vmatmul.mubr.f32.gmra.mxu1 %v5453_v19  ;;  %v11447_v3 = vmul.f32 0.5, %v11365_v24  ;;  %v4755_v47 = vand.u32 2147483647, %v11437_v9  ;;  %v4554_v6 = vmul.f32 %v11108_v1, %v4511_v61  ;;  %v5234_v27 = vmul.f32 %v5202_v12, %v11384_v35 }
 0xa2f   : > { %v5072_v10 = vadd.f32 -0.28449672, %v5040_v48  ;;  %v5007_v40 = vadd.f32 1.4214138, %v4975_v37  ;;  %6880 = vrcp.f32 %v4820_v16  ;;  %vm4690_vm15 = vcmp.ge.f32.partialorder %v11372_v26, 0.0 }
 0xa30   : > { %v4424_v20 = vpop.f32.mrf.mxu0  ;;  %6882 = vrsqrt.f32 %v4419_v11  ;;  %v4787_v8 = vmul.f32 0.3275911, %v4755_v47  ;;  %v4555_v25 = vmul.f32 %v11127_v55, %v4512_v17  ;;  %vm4689_vm1 = vcmp.ge.f32.partialorder %v11394_v15, 0.0 }
 0xa31   : > { %v5104_v28 = vmul.f32 %v11396_v51, %v5072_v10  ;;  %v5039_v24 = vmul.f32 %v11419_v0, %v5007_v40  ;;  %v5233_v39 = vmul.f32 %v5201_v21, %v4753_v29  ;;  %v5204_v38 = vsub.f32 0.0, %v11417_v62 }
 0xa32   : > { %v4426_v49 = vpop.f32.mrf.mxu0  ;;  %v4819_v58 = vadd.f32 1.0, %v4787_v8  ;;  %v11461_v35 = vadd.f32 %v11131_v22, %v4555_v25  ;;  %v11464_v52 = vadd.f32 %v11112_v50, %v4554_v6  ;;  %v5277_v56 = vmul.f32 1.442695, %v5234_v27 }
 0xa33   : > { %v5136_v59 = vadd.f32 0.2548296, %v5104_v28  ;;  %v11457_v32 = vpop.eup %6870  ;;  %v5071_v18 = vadd.f32 -0.28449672, %v5039_v24  ;;  %v4427_v15 = vadd.f32 1e-05, %v4426_v49  ;;  %v5236_v61 = vmul.f32 %v5204_v38, %v11417_v62 }
 0xa34   : > { %v4914_v13 = vmul.f32 1.0614054, %v11457_v32  ;;  %v6873_v4 = vpop.eup %6872  ;;  %v11471_v29 = vsel %vm4690_vm15, 1.0, %v12409_v7  ;;  %v11474_v19 = vmul.f32 0.5, %v11387_v30  ;;  %v11477_v14 = vsel %vm4689_vm1, 1.0, %v12409_v7 }
 0xa35   : > { %v5168_v44 = vmul.f32 %v11396_v51, %v5136_v59  ;;  %v5103_v51 = vmul.f32 %v11419_v0, %v5071_v18  ;;  %6884 = vrcp.f32 %v4819_v58  ;;  %v5275_v41 = vmul.f32 1.442695, %v5233_v39 }
 0xa36   : > { %v4946_v60 = vadd.f32 -1.4531521, %v4914_v13  ;;  %v11482_v36 = vmul.f32 0.70710677, %v11461_v35  ;;  %v11485_v26 = vmul.f32 0.70710677, %v11464_v52  ;;  %v6875_v48 = vpop.eup %6874  ;;  %6886 = vpow2.f32 %v5277_v56 }
 0xa37   : > { %v5328_v53 = vmul.f32 %v6873_v4, %v5168_v44  ;;  %v5135_v23 = vadd.f32 0.2548296, %v5103_v51  ;;  %v11488_v11 = vpop.eup %6876  ;;  %6888 = vrsqrt.f32 %v4427_v15  ;;  %v5203_v16 = vsub.f32 0.0, %v4755_v47 }
 0xa38   : > { %v4978_v12 = vmul.f32 %v11457_v32, %v4946_v60  ;;  %v11491_v10 = vand.u32 2147483647, %v11482_v36  ;;  %v11494_v62 = vand.u32 2147483647, %v11485_v26  ;;  %v6879_v37 = vpop.eup %6878  ;;  %v4913_v28 = vmul.f32 1.0614054, %v11488_v11 }
 0xa39   : > { %v5360_v30 = vsub.f32 1.0, %v5328_v53  ;;  %v5167_v17 = vmul.f32 %v11419_v0, %v5135_v23  ;;  %v4425_v40 = vadd.f32 1e-05, %v4424_v20  ;;  %6890 = vpow2.f32 %v5275_v41 }
 0xa3a   : > { %v5010_v6 = vadd.f32 1.4214138, %v4978_v12  ;;  %v5281_v27 = vmul.f32 1.442695, %v5236_v61  ;;  %v4790_v8 = vmul.f32 0.3275911, %v11491_v10  ;;  %v5235_v38 = vmul.f32 %v5203_v16, %v4755_v47 }
 0xa3b   : > { %v5392_v21 = vmul.f32 %v5360_v30, %v11425_v42  ;;  %v5327_v49 = vmul.f32 %v6875_v48, %v5167_v17  ;;  %v4945_v24 = vadd.f32 -1.4531521, %v4913_v28  ;;  %v4789_v42 = vmul.f32 0.3275911, %v11494_v62 }
 0xa3c   : > { %v5042_v59 = vmul.f32 %v11457_v32, %v5010_v6  ;;  %v11501_v39 = vpop.eup %6880  ;;  %v4822_v58 = vadd.f32 1.0, %v4790_v8  ;;  %v4514_v0 = vmul.f32 %v6879_v37, %v10982_v34  ;;  %v4430_v4 = vpop.f32.mrf.mxu0  ;;  %v11508_v15 = vmul.f32 0.5, %v11399_v57 }
 0xa3d   : > { %v5424_v25 = vadd.f32 1.0, %v5392_v21  ;;  %v6883_v44 = vpop.eup %6882  ;;  %v5359_v18 = vsub.f32 1.0, %v5327_v49  ;;  %v4977_v56 = vmul.f32 %v11488_v11, %v4945_v24  ;;  %v4916_v53 = vmul.f32 1.0614054, %v11501_v39 }
 0xa3e   : > { %v5074_v13 = vadd.f32 -0.28449672, %v5042_v59  ;;  %6892 = vrcp.f32 %v4822_v58  ;;  %v4821_v47 = vadd.f32 1.0, %v4789_v42  ;;  %vm4692_vm2 = vcmp.ge.f32.partialorder %v11409_v54, 0.0  ;;  %v4432_v12 = vpop.f32.mrf.mxu0 }
 0xa3f   : > { %v5456_v20 = vmul.f32 %v5424_v25, %v11413_v46  ;;  %6894 = vrsqrt.f32 %v4425_v40  ;;  %v5391_v51 = vmul.f32 %v5359_v18, %v11444_v63  ;;  %v5009_v60 = vadd.f32 1.4214138, %v4977_v56 }
 0xa40   : > { %v5106_v34 = vmul.f32 %v11457_v32, %v5074_v13  ;;  %v4513_v46 = vmul.f32 %v6883_v44, %v10979_v2  ;;  %v4948_v41 = vadd.f32 -1.4531521, %v4916_v53  ;;  %v4557_v61 = vmul.f32 %v11127_v55, %v4514_v0 }
 0xa41   : > { %5602 = vmatprep.mubr.f32.mxu1 %v5456_v20  ;;  %v5423_v57 = vadd.f32 1.0, %v5391_v51  ;;  %6896 = vpow2.f32 %v5281_v27  ;;  %v5279_v30 = vmul.f32 1.442695, %v5235_v38  ;;  %v5041_v16 = vmul.f32 %v11488_v11, %v5009_v60 }
 0xa42   : > { %v5138_v48 = vadd.f32 0.2548296, %v5106_v34  ;;  %v11516_v23 = vpop.eup %6884  ;;  %v4980_v63 = vmul.f32 %v11501_v39, %v4948_v41  ;;  %v5206_v37 = vsub.f32 0.0, %v11491_v10  ;;  %6898 = vrcp.f32 %v4821_v47 }
 0xa43   : > { %v5455_v2 = vmul.f32 %v5423_v57, %v11428_v43  ;;  %v4915_v17 = vmul.f32 1.0614054, %v11516_v23  ;;  %v5205_v6 = vsub.f32 0.0, %v11494_v62  ;;  %v6887_v28 = vpop.eup %6886  ;;  %v4431_v40 = vadd.f32 1e-05, %v4430_v4 }
 0xa44   : > { %v5170_v21 = vmul.f32 %v11457_v32, %v5138_v48  ;;  %v5073_v27 = vadd.f32 -0.28449672, %v5041_v16  ;;  %v5012_v8 = vadd.f32 1.4214138, %v4980_v63  ;;  %v11526_v25 = vadd.f32 %v11131_v22, %v4557_v61  ;;  %v6889_v49 = vpop.eup %6888 }
 0xa45   : > { %v4433_v59 = vadd.f32 1e-05, %v4432_v12  ;;  %5603 = vmatmul.mubr.f32.gmra.mxu1 %v5455_v2  ;;  %v4947_v38 = vadd.f32 -1.4531521, %v4915_v17  ;;  %v4556_v43 = vmul.f32 %v11108_v1, %v4513_v46  ;;  %6900 = vpow2.f32 %v5279_v30 }
 0xa46   : > { %v5330_v24 = vmul.f32 %v6887_v28, %v5170_v21  ;;  %v5105_v32 = vmul.f32 %v11488_v11, %v5073_v27  ;;  %v5044_v58 = vmul.f32 %v11501_v39, %v5012_v8  ;;  %v5238_v42 = vmul.f32 %v5206_v37, %v11491_v10  ;;  %v6891_v0 = vpop.eup %6890 }
 0xa47   : > { %v4979_v20 = vmul.f32 %v11516_v23, %v4947_v38  ;;  %v5237_v18 = vmul.f32 %v5205_v6, %v11494_v62  ;;  %v11535_v13 = vmul.f32 0.70710677, %v11526_v25  ;;  %6902 = vrsqrt.f32 %v4431_v40 }
 0xa48   : > { %v5362_v44 = vsub.f32 1.0, %v5330_v24  ;;  %v5137_v56 = vadd.f32 0.2548296, %v5105_v32  ;;  %v4724_v4 = vsel %vm4692_vm2, 1.0, %v12409_v7  ;;  %v5076_v53 = vadd.f32 -0.28449672, %v5044_v58 }
 0xa49   : > { %v5011_v51 = vadd.f32 1.4214138, %v4979_v20  ;;  %v11542_v10 = vand.u32 2147483647, %v11535_v13  ;;  %v11545_v34 = vadd.f32 %v11112_v50, %v4556_v43  ;;  %6904 = vrsqrt.f32 %v4433_v59  ;;  %v4436_v30 = vpop.f32.mrf.mxu0 }
 0xa4a   : > { %v5394_v47 = vmul.f32 %v5362_v44, %v11471_v29  ;;  %v5169_v62 = vmul.f32 %v11488_v11, %v5137_v56  ;;  %v5108_v60 = vmul.f32 %v11501_v39, %v5076_v53  ;;  %vm4691_vm3 = vcmp.ge.f32.partialorder %v11437_v9, 0.0 }
 0xa4b   : > { %v5285_v46 = vmul.f32 1.442695, %v5238_v42  ;;  %v11550_v54 = vpop.eup %6892  ;;  %v5043_v29 = vmul.f32 %v11516_v23, %v5011_v51  ;;  %v5283_v61 = vmul.f32 1.442695, %v5237_v18  ;;  %v4792_v57 = vmul.f32 0.3275911, %v11542_v10 }
 0xa4c   : > { %v5426_v41 = vadd.f32 1.0, %v5394_v47  ;;  %v6895_v48 = vpop.eup %6894  ;;  %v5329_v12 = vmul.f32 %v6891_v0, %v5169_v62  ;;  %v5140_v16 = vadd.f32 0.2548296, %v5108_v60  ;;  %v4918_v63 = vmul.f32 1.0614054, %v11550_v54 }
 0xa4d   : > { %v4516_v11 = vmul.f32 %v6889_v49, %v10992_v31  ;;  %v5075_v2 = vadd.f32 -0.28449672, %v5043_v29  ;;  %v4824_v21 = vadd.f32 1.0, %v4792_v57  ;;  %v11558_v17 = vmul.f32 0.70710677, %v11545_v34 }
 0xa4e   : > { %v5458_v37 = vmul.f32 %v5426_v41, %v11447_v3  ;;  %v6897_v6 = vpop.eup %6896  ;;  %v5361_v28 = vsub.f32 1.0, %v5329_v12  ;;  %v5172_v40 = vmul.f32 %v11501_v39, %v5140_v16  ;;  %v4950_v27 = vadd.f32 -1.4531521, %v4918_v63 }
 0xa4f   : > { %6906 = vpow2.f32 %v5285_v46  ;;  %v11561_v8 = vpop.eup %6898  ;;  %v4515_v59 = vmul.f32 %v6895_v48, %v10989_v45  ;;  %v4437_v24 = vadd.f32 1e-05, %v4436_v30  ;;  %v5107_v31 = vmul.f32 %v11516_v23, %v5075_v2  ;;  %v4438_v45 = vpop.f32.mrf.mxu0 }
 0xa50   : > { %5607 = vmatprep.mubr.f32.mxu1 %v5458_v37  ;;  %6908 = vrcp.f32 %v4824_v21  ;;  %v5393_v3 = vmul.f32 %v5361_v28, %v11477_v14  ;;  %v5332_v49 = vmul.f32 %v6897_v6, %v5172_v40  ;;  %v4982_v38 = vmul.f32 %v11550_v54, %v4950_v27 }
 0xa51   : > { %v4917_v43 = vmul.f32 1.0614054, %v11561_v8  ;;  %v5139_v32 = vadd.f32 0.2548296, %v5107_v31  ;;  %6910 = vpow2.f32 %v5283_v61  ;;  %v11569_v39 = vand.u32 2147483647, %v11558_v17 }
 0xa52   : > { %v4559_v58 = vmul.f32 %v11127_v55, %v4516_v11  ;;  %v5425_v42 = vadd.f32 1.0, %v5393_v3  ;;  %v5364_v0 = vsub.f32 1.0, %v5332_v49  ;;  %v5014_v44 = vadd.f32 1.4214138, %v4982_v38  ;;  %v6901_v18 = vpop.eup %6900 }
 0xa53   : > { %v4949_v20 = vadd.f32 -1.4531521, %v4917_v43  ;;  %v5171_v14 = vmul.f32 %v11516_v23, %v5139_v32  ;;  %v5208_v56 = vsub.f32 0.0, %v11542_v10  ;;  %v4791_v53 = vmul.f32 0.3275911, %v11569_v39 }
 0xa54   : > { %v4558_v47 = vmul.f32 %v11108_v1, %v4515_v59  ;;  %v5457_v51 = vmul.f32 %v5425_v42, %v11474_v19  ;;  %v5396_v62 = vmul.f32 %v5364_v0, %v4724_v4  ;;  %v5046_v60 = vmul.f32 %v11550_v54, %v5014_v44  ;;  %v6903_v41 = vpop.eup %6902 }
 0xa55   : > { %v4981_v46 = vmul.f32 %v11561_v8, %v4949_v20  ;;  %v4439_v29 = vadd.f32 1e-05, %v4438_v45  ;;  %v4723_v61 = vsel %vm4691_vm3, 1.0, %v12409_v7  ;;  %v5331_v23 = vmul.f32 %v6901_v18, %v5171_v14 }
 0xa56   : > { %v4823_v57 = vadd.f32 1.0, %v4791_v53  ;;  %6912 = vrsqrt.f32 %v4437_v24  ;;  %5608 = vmatmul.mubr.f32.gmra.mxu1 %v5457_v51  ;;  %v5428_v48 = vadd.f32 1.0, %v5396_v62  ;;  %v5078_v30 = vadd.f32 -0.28449672, %v5046_v60  ;;  %v6905_v16 = vpop.eup %6904 }
 0xa57   : > { %v5013_v12 = vadd.f32 1.4214138, %v4981_v46  ;;  %v5363_v19 = vsub.f32 1.0, %v5331_v23  ;;  %v5240_v4 = vmul.f32 %v5208_v56, %v11542_v10  ;;  %v11584_v63 = vadd.f32 %v11131_v22, %v4559_v58 }
 0xa58   : > { %v11587_v11 = vadd.f32 %v11112_v50, %v4558_v47  ;;  %v5460_v9 = vmul.f32 %v5428_v48, %v11508_v15  ;;  %v5110_v37 = vmul.f32 %v11550_v54, %v5078_v30  ;;  %6914 = vrcp.f32 %v4823_v57 }
 0xa59   : > { %v5045_v2 = vmul.f32 %v11561_v8, %v5013_v12  ;;  %v4627_v21 = vmul.f32 0.5, %v11422_v33  ;;  %v5395_v6 = vmul.f32 %v5363_v19, %v4723_v61  ;;  %v11594_v28 = vmul.f32 0.5, %v11464_v52 }
 0xa5a   : > { %v11597_v10 = vmul.f32 0.70710677, %v11584_v63  ;;  %6916 = vrsqrt.f32 %v4439_v29  ;;  %5612 = vmatprep.mubr.f32.mxu1 %v5460_v9  ;;  %vm4694_vm4 = vcmp.ge.f32.partialorder %v11482_v36, 0.0  ;;  %v5142_v40 = vadd.f32 0.2548296, %v5110_v37  ;;  %v12454_v29 = vld [vmem:[#allocation81_spill] sm:$0xff] }
 0xa5b   : > { %v5077_v15 = vadd.f32 -0.28449672, %v5045_v2  ;;  %v5427_v59 = vadd.f32 1.0, %v5395_v6  ;;  %vm4693_vm5 = vcmp.ge.f32.partialorder %v11485_v26, 0.0  ;;  %v5289_v24 = vmul.f32 1.442695, %v5240_v4 }
 0xa5c   : > { %v6907_v27 = vpop.eup %6906  ;;  %v4762_v33 = vand.u32 2147483647, %v11597_v10  ;;  %v5174_v3 = vmul.f32 %v11550_v54, %v5142_v40  ;;  %v5207_v38 = vsub.f32 0.0, %v11569_v39  ;;  %v11608_v43 = vmul.f32 0.70710677, %v11587_v11  ;;  %v12455_v37 = vld [vmem:[#allocation49_spill] sm:$0xff] }
 0xa5d   : > { %v11602_v31 = vpop.eup %6908  ;;  %v4442_v52 = vpop.f32.mrf.mxu0  ;;  %v5109_v49 = vmul.f32 %v11561_v8, %v5077_v15  ;;  %v5459_v32 = vmul.f32 %v5427_v59, %v4627_v21  ;;  %v4630_v58 = vmul.f32 0.5, %v11461_v35  ;;  %v4726_v44 = vsel %vm4694_vm4, 1.0, %v12409_v7 }
 0xa5e   : > { %v4920_v45 = vmul.f32 1.0614054, %v11602_v31  ;;  %v4794_v42 = vmul.f32 0.3275911, %v4762_v33  ;;  %v6911_v0 = vpop.eup %6910  ;;  %v5334_v20 = vmul.f32 %v6907_v27, %v5174_v3  ;;  %v11616_v18 = vand.u32 2147483647, %v11608_v43 }
 0xa5f   : > { %v5141_v54 = vadd.f32 0.2548296, %v5109_v49  ;;  %5613 = vmatmul.mubr.f32.gmra.mxu1 %v5459_v32  ;;  %v4725_v14 = vsel %vm4693_vm5, 1.0, %v12409_v7  ;;  %6918 = vpow2.f32 %v5289_v24  ;;  %v4444_v53 = vpop.f32.mrf.mxu0  ;;  %v5239_v36 = vmul.f32 %v5207_v38, %v11569_v39 }
 0xa60   : > { %v4952_v56 = vadd.f32 -1.4531521, %v4920_v45  ;;  %v4826_v35 = vadd.f32 1.0, %v4794_v42  ;;  %v5366_v47 = vsub.f32 1.0, %v5334_v20  ;;  %v4793_v62 = vmul.f32 0.3275911, %v11616_v18 }
 0xa61   : > { %v5173_v51 = vmul.f32 %v11561_v8, %v5141_v54  ;;  %v4517_v60 = vmul.f32 %v6903_v41, %v11005_v5  ;;  %v4518_v61 = vmul.f32 %v6905_v16, %v12454_v29  ;;  %v11628_v57 = vmul.f32 0.5, %v11526_v25 }
 0xa62   : > { %v4984_v46 = vmul.f32 %v11602_v31, %v4952_v56  ;;  %6920 = vrcp.f32 %v4826_v35  ;;  %v5398_v26 = vmul.f32 %v5366_v47, %v4726_v44  ;;  %vm4696_vm6 = vcmp.ge.f32.partialorder %v11535_v13, 0.0 }
 0xa63   : > { %v5333_v23 = vmul.f32 %v6911_v0, %v5173_v51  ;;  %v6913_v48 = vpop.eup %6912  ;;  %v4445_v8 = vadd.f32 1e-05, %v4444_v53  ;;  %vm4695_vm7 = vcmp.ge.f32.partialorder %v11558_v17, 0.0  ;;  %v4825_v39 = vadd.f32 1.0, %v4793_v62 }
 0xa64   : > { %v5016_v30 = vadd.f32 1.4214138, %v4984_v46  ;;  %v5430_v12 = vadd.f32 1.0, %v5398_v26  ;;  %v5287_v41 = vmul.f32 1.442695, %v5239_v36  ;;  %v5210_v19 = vsub.f32 0.0, %v4762_v33 }
 0xa65   : > { %v5365_v5 = vsub.f32 1.0, %v5333_v23  ;;  %v11632_v4 = vpop.eup %6914  ;;  %6922 = vrcp.f32 %v4825_v39  ;;  %v4561_v25 = vmul.f32 %v11127_v55, %v4518_v61  ;;  %v4560_v9 = vmul.f32 %v11108_v1, %v4517_v60 }
 0xa66   : > { %v5048_v16 = vmul.f32 %v11602_v31, %v5016_v30  ;;  %v4519_v2 = vmul.f32 %v6913_v48, %v12455_v37  ;;  %v5462_v21 = vmul.f32 %v5430_v12, %v4630_v58  ;;  %v4919_v40 = vmul.f32 1.0614054, %v11632_v4 }
 0xa67   : > { %v5397_v6 = vmul.f32 %v5365_v5, %v4725_v14  ;;  %v6917_v15 = vpop.eup %6916  ;;  %6924 = vrsqrt.f32 %v4445_v8  ;;  %v11640_v59 = vadd.f32 %v11131_v22, %v4561_v25  ;;  %v11643_v24 = vadd.f32 %v11112_v50, %v4560_v9 }
 0xa68   : > { %v5080_v27 = vadd.f32 -0.28449672, %v5048_v16  ;;  %v4443_v3 = vadd.f32 1e-05, %v4442_v52  ;;  %5617 = vmatprep.mubr.f32.mxu1 %v5462_v21  ;;  %v4951_v32 = vadd.f32 -1.4531521, %v4919_v40  ;;  %v5242_v45 = vmul.f32 %v5210_v19, %v4762_v33 }
 0xa69   : > { %v5429_v38 = vadd.f32 1.0, %v5397_v6  ;;  %6926 = vpow2.f32 %v5287_v41  ;;  %v5209_v42 = vsub.f32 0.0, %v11616_v18  ;;  %v11648_v0 = vmul.f32 0.70710677, %v11640_v59  ;;  %v12456_v52 = vld [vmem:[#allocation80_spill] sm:$0xff] }
 0xa6a   : > { %v4448_v49 = vpop.f32.mrf.mxu0  ;;  %v5112_v58 = vmul.f32 %v11602_v31, %v5080_v27  ;;  %v4983_v20 = vmul.f32 %v11632_v4, %v4951_v32  ;;  %v11653_v54 = vmul.f32 0.70710677, %v11643_v24  ;;  %v4520_v14 = vmul.f32 %v6917_v15, %v12456_v52 }
 0xa6b   : > { %v5461_v44 = vmul.f32 %v5429_v38, %v11594_v28  ;;  %v4728_v33 = vsel %vm4696_vm6, 1.0, %v12409_v7  ;;  %v11660_v35 = vmul.f32 0.5, %v11545_v34  ;;  %v11663_v53 = vand.u32 2147483647, %v11648_v0 }
 0xa6c   : > { %v5144_v56 = vadd.f32 0.2548296, %v5112_v58  ;;  %v6919_v47 = vpop.eup %6918  ;;  %6928 = vrsqrt.f32 %v4443_v3  ;;  %v4450_v28 = vpop.f32.mrf.mxu0  ;;  %v11668_v51 = vsel %vm4695_vm7, 1.0, %v12409_v7  ;;  %v5015_v36 = vadd.f32 1.4214138, %v4983_v20 }
 0xa6d   : > { %5618 = vmatmul.mubr.f32.gmra.mxu1 %v5461_v44  ;;  %v5293_v62 = vmul.f32 1.442695, %v5242_v45  ;;  %v11672_v60 = vmul.f32 0.5, %v11584_v63  ;;  %v5241_v34 = vmul.f32 %v5209_v42, %v11616_v18  ;;  %v4796_v46 = vmul.f32 0.3275911, %v11663_v53 }
 0xa6e   : > { %v5176_v13 = vmul.f32 %v11602_v31, %v5144_v56  ;;  %v5047_v61 = vmul.f32 %v11632_v4, %v5015_v36  ;;  %v11680_v26 = vand.u32 2147483647, %v11653_v54  ;;  %v4563_v17 = vmul.f32 %v11127_v55, %v4520_v14  ;;  %v12457_v14 = vld [vmem:[#allocation43_spill] sm:$0xff] }
 0xa6f   : > { %v11676_v29 = vpop.eup %6920  ;;  %v4562_v23 = vmul.f32 %v11108_v1, %v4519_v2  ;;  %v4451_v48 = vadd.f32 1e-05, %v4450_v28  ;;  %v4828_v8 = vadd.f32 1.0, %v4796_v46  ;;  %vm4698_vm8 = vcmp.ge.f32.partialorder %v11597_v10, 0.0 }
 0xa70   : > { %v5336_v31 = vmul.f32 %v6919_v47, %v5176_v13  ;;  %v4922_v63 = vmul.f32 1.0614054, %v11676_v29  ;;  %v5079_v30 = vadd.f32 -0.28449672, %v5047_v61  ;;  %6930 = vpow2.f32 %v5293_v62 }
 0xa71   : > { %v4795_v18 = vmul.f32 0.3275911, %v11680_v26  ;;  %v5291_v5 = vmul.f32 1.442695, %v5241_v34  ;;  %6932 = vrcp.f32 %v4828_v8  ;;  %v11691_v25 = vadd.f32 %v11131_v22, %v4563_v17 }
 0xa72   : > { %v5368_v39 = vsub.f32 1.0, %v5336_v31  ;;  %v4954_v12 = vadd.f32 -1.4531521, %v4922_v63  ;;  %v11687_v41 = vpop.eup %6922  ;;  %v5111_v19 = vmul.f32 %v11632_v4, %v5079_v30  ;;  %v11694_v9 = vadd.f32 %v11112_v50, %v4562_v23 }
 0xa73   : > { %v4827_v16 = vadd.f32 1.0, %v4795_v18  ;;  %6934 = vrsqrt.f32 %v4451_v48  ;;  %v4921_v21 = vmul.f32 1.0614054, %v11687_v41  ;;  %v4449_v40 = vadd.f32 1e-05, %v4448_v49  ;;  %v12458_v18 = vld [vmem:[#allocation41_spill] sm:$0xff] }
 0xa74   : > { %v5400_v37 = vmul.f32 %v5368_v39, %v4728_v33  ;;  %v4986_v2 = vmul.f32 %v11676_v29, %v4954_v12  ;;  %v6925_v6 = vpop.eup %6924  ;;  %v5143_v15 = vadd.f32 0.2548296, %v5111_v19  ;;  %vm4697_vm9 = vcmp.ge.f32.partialorder %v11608_v43, 0.0 }
 0xa75   : > { %6936 = vrcp.f32 %v4827_v16  ;;  %v4953_v38 = vadd.f32 -1.4531521, %v4921_v21  ;;  %v5212_v58 = vsub.f32 0.0, %v11663_v53  ;;  %v11702_v42 = vmul.f32 0.70710677, %v11691_v25  ;;  %v4454_v34 = vpop.f32.mrf.mxu0 }
 0xa76   : > { %v5432_v27 = vadd.f32 1.0, %v5400_v37  ;;  %v5018_v3 = vadd.f32 1.4214138, %v4986_v2  ;;  %6938 = vpow2.f32 %v5291_v5  ;;  %v6927_v32 = vpop.eup %6926  ;;  %v5175_v45 = vmul.f32 %v11632_v4, %v5143_v15 }
 0xa77   : > { %v11705_v44 = vmul.f32 0.70710677, %v11694_v9  ;;  %v4985_v52 = vmul.f32 %v11687_v41, %v4953_v38  ;;  %v4522_v33 = vmul.f32 %v6925_v6, %v12457_v14  ;;  %v11714_v4 = vsel %vm4698_vm8, 1.0, %v12409_v7  ;;  %v4456_v37 = vpop.f32.mrf.mxu0 }
 0xa78   : > { %v5464_v49 = vmul.f32 %v5432_v27, %v11628_v57  ;;  %v5050_v20 = vmul.f32 %v11676_v29, %v5018_v3  ;;  %v5335_v56 = vmul.f32 %v6927_v32, %v5175_v45  ;;  %v11717_v47 = vmul.f32 0.5, %v11587_v11 }
 0xa79   : > { %v4766_v28 = vand.u32 2147483647, %v11702_v42  ;;  %v6929_v36 = vpop.eup %6928  ;;  %6940 = vrsqrt.f32 %v4449_v40  ;;  %v11723_v62 = vsel %vm4697_vm9, 1.0, %v12409_v7  ;;  %v5017_v13 = vadd.f32 1.4214138, %v4985_v52 }
 0xa7a   : > { %5622 = vmatprep.mubr.f32.mxu1 %v5464_v49  ;;  %v5082_v57 = vadd.f32 -0.28449672, %v5050_v20  ;;  %v5367_v46 = vsub.f32 1.0, %v5335_v56  ;;  %v5244_v10 = vmul.f32 %v5212_v58, %v11663_v53  ;;  %v5211_v61 = vsub.f32 0.0, %v11680_v26 }
 0xa7b   : > { %v4798_v11 = vmul.f32 0.3275911, %v4766_v28  ;;  %v5049_v23 = vmul.f32 %v11687_v41, %v5017_v13  ;;  %v11730_v48 = vand.u32 2147483647, %v11705_v44  ;;  %v4565_v31 = vmul.f32 %v11127_v55, %v4522_v33 }
 0xa7c   : > { %v5114_v17 = vmul.f32 %v11676_v29, %v5082_v57  ;;  %v5399_v43 = vmul.f32 %v5367_v46, %v11668_v51  ;;  %v11735_v63 = vmul.f32 0.5, %v11640_v59  ;;  %v11738_v8 = vmul.f32 0.5, %v11643_v24 }
 0xa7d   : > { %v4830_v53 = vadd.f32 1.0, %v4798_v11  ;;  %v6931_v30 = vpop.eup %6930  ;;  %v4521_v39 = vmul.f32 %v6929_v36, %v12458_v18  ;;  %v4455_v12 = vadd.f32 1e-05, %v4454_v34  ;;  %v5081_v19 = vadd.f32 -0.28449672, %v5049_v23 }
 0xa7e   : > { %v5146_v5 = vadd.f32 0.2548296, %v5114_v17  ;;  %v11741_v16 = vpop.eup %6932  ;;  %v5431_v2 = vadd.f32 1.0, %v5399_v43  ;;  %v5243_v21 = vmul.f32 %v5211_v61, %v11680_v26  ;;  %v4797_v59 = vmul.f32 0.3275911, %v11730_v48 }
 0xa7f   : > { %6942 = vrcp.f32 %v4830_v53  ;;  %v5113_v24 = vmul.f32 %v11687_v41, %v5081_v19  ;;  %v5297_v6 = vmul.f32 1.442695, %v5244_v10  ;;  %v11748_v40 = vadd.f32 %v11131_v22, %v4565_v31 }
 0xa80   : > { %v5178_v51 = vmul.f32 %v11676_v29, %v5146_v5  ;;  %v6935_v15 = vpop.eup %6934  ;;  %v5463_v27 = vmul.f32 %v5431_v2, %v11660_v35  ;;  %v4924_v3 = vmul.f32 1.0614054, %v11741_v16  ;;  %v5214_v38 = vsub.f32 0.0, %v4766_v28 }
 0xa81   : > { %v4829_v32 = vadd.f32 1.0, %v4797_v59  ;;  %6944 = vrsqrt.f32 %v4455_v12  ;;  %v4457_v26 = vadd.f32 1e-05, %v4456_v37  ;;  %v5145_v49 = vadd.f32 0.2548296, %v5113_v24 }
 0xa82   : > { %v11752_v45 = vpop.eup %6936  ;;  %v5338_v58 = vmul.f32 %v6931_v30, %v5178_v51  ;;  %5623 = vmatmul.mubr.f32.gmra.mxu1 %v5463_v27  ;;  %vm4700_vm10 = vcmp.ge.f32.partialorder %v11648_v0, 0.0  ;;  %v4956_v20 = vadd.f32 -1.4531521, %v4924_v3  ;;  %v5295_v14 = vmul.f32 1.442695, %v5243_v21  ;;  %v12459_v30 = vld [vmem:[#allocation47_spill] sm:$0xff] }
 0xa83   : > { %v6939_v29 = vpop.eup %6938  ;;  %v4923_v52 = vmul.f32 1.0614054, %v11752_v45  ;;  %6946 = vrcp.f32 %v4829_v32  ;;  %v5177_v33 = vmul.f32 %v11687_v41, %v5145_v49  ;;  %v11758_v56 = vmul.f32 0.70710677, %v11748_v40  ;;  %v11760_v36 = vpop.f32.mrf.mxu0 }
 0xa84   : > { %v5370_v35 = vsub.f32 1.0, %v5338_v58  ;;  %6948 = vpow2.f32 %v5297_v6  ;;  %v4988_v57 = vmul.f32 %v11741_v16, %v4956_v20  ;;  %v5246_v34 = vmul.f32 %v5214_v38, %v4766_v28 }
 0xa85   : > { %v4955_v13 = vadd.f32 -1.4531521, %v4923_v52  ;;  %v4564_v46 = vmul.f32 %v11108_v1, %v4521_v39  ;;  %6950 = vrsqrt.f32 %v4457_v26  ;;  %v5337_v61 = vmul.f32 %v6939_v29, %v5177_v33  ;;  %v4462_v39 = vpop.f32.mrf.mxu0 }
 0xa86   : > { %v5402_v10 = vmul.f32 %v5370_v35, %v11714_v4  ;;  %v5213_v11 = vsub.f32 0.0, %v11730_v48  ;;  %v6941_v17 = vpop.eup %6940  ;;  %v5020_v41 = vadd.f32 1.4214138, %v4988_v57  ;;  %6952 = vpow2.f32 %v5295_v14  ;;  %v12460_v57 = vld [vmem:[#allocation48_spill] sm:$0xff] }
 0xa87   : > { %v4987_v23 = vmul.f32 %v11752_v45, %v4955_v13  ;;  %v11768_v31 = vand.u32 2147483647, %v11758_v56  ;;  %v5369_v53 = vsub.f32 1.0, %v5337_v61  ;;  %v11771_v28 = vadd.f32 %v11112_v50, %v4564_v46 }
 0xa88   : > { %v5434_v43 = vadd.f32 1.0, %v5402_v10  ;;  %v4524_v18 = vmul.f32 %v6935_v15, %v12459_v30  ;;  %v5052_v4 = vmul.f32 %v11741_v16, %v5020_v41  ;;  %v5301_v5 = vmul.f32 1.442695, %v5246_v34 }
 0xa89   : > { %v5019_v12 = vadd.f32 1.4214138, %v4987_v23  ;;  %v4800_v19 = vmul.f32 0.3275911, %v11768_v31  ;;  %v5401_v2 = vmul.f32 %v5369_v53, %v11723_v62  ;;  %v5245_v21 = vmul.f32 %v5213_v11, %v11730_v48 }
 0xa8a   : > { %v5466_v37 = vmul.f32 %v5434_v43, %v11672_v60  ;;  %v11780_v59 = vmul.f32 0.70710677, %v11771_v28  ;;  %v5084_v51 = vadd.f32 -0.28449672, %v5052_v4  ;;  %vm4699_vm11 = vcmp.ge.f32.partialorder %v11653_v54, 0.0 }
 0xa8b   : > { %v5051_v24 = vmul.f32 %v11752_v45, %v5019_v12  ;;  %v4832_v6 = vadd.f32 1.0, %v4800_v19  ;;  %v4463_v27 = vadd.f32 1e-05, %v4462_v39  ;;  %v5433_v3 = vadd.f32 1.0, %v5401_v2 }
 0xa8c   : > { %v11784_v15 = vpop.eup %6942  ;;  %5627 = vmatprep.mubr.f32.mxu1 %v5466_v37  ;;  %v11787_v60 = vand.u32 2147483647, %v11780_v59  ;;  %v4567_v62 = vmul.f32 %v11127_v55, %v4524_v18  ;;  %v5116_v48 = vmul.f32 %v11741_v16, %v5084_v51  ;;  %v4732_v58 = vsel %vm4700_vm10, 1.0, %v12409_v7 }
 0xa8d   : > { %v5083_v38 = vadd.f32 -0.28449672, %v5051_v24  ;;  %v4926_v32 = vmul.f32 1.0614054, %v11784_v15  ;;  %6954 = vrcp.f32 %v4832_v6  ;;  %v5465_v26 = vmul.f32 %v5433_v3, %v11717_v47 }
 0xa8e   : > { %6956 = vpow2.f32 %v5301_v5  ;;  %v5299_v49 = vmul.f32 1.442695, %v5245_v21  ;;  %v6945_v29 = vpop.eup %6944  ;;  %v5148_v20 = vadd.f32 0.2548296, %v5116_v48  ;;  %v4799_v35 = vmul.f32 0.3275911, %v11787_v60 }
 0xa8f   : > { %v5115_v52 = vmul.f32 %v11752_v45, %v5083_v38  ;;  %v4958_v14 = vadd.f32 -1.4531521, %v4926_v32  ;;  %v4523_v13 = vmul.f32 %v6941_v17, %v12460_v57  ;;  %6958 = vrsqrt.f32 %v4463_v27  ;;  %5628 = vmatmul.mubr.f32.gmra.mxu1 %v5465_v26  ;;  %v12461_v21 = vld [vmem:[#allocation82_spill] sm:$0xff] }
 0xa90   : > { %v11798_v33 = vpop.eup %6946  ;;  %v4731_v0 = vsel %vm4699_vm11, 1.0, %v12409_v7  ;;  %v11805_v47 = vadd.f32 %v11131_v22, %v4567_v62  ;;  %v5180_v46 = vmul.f32 %v11741_v16, %v5148_v20  ;;  %6960 = vpow2.f32 %v5299_v49 }
 0xa91   : > { %v6949_v34 = vpop.eup %6948  ;;  %v5147_v10 = vadd.f32 0.2548296, %v5115_v52  ;;  %v4990_v61 = vmul.f32 %v11784_v15, %v4958_v14  ;;  %v4925_v11 = vmul.f32 1.0614054, %v11798_v33  ;;  %v5216_v17 = vsub.f32 0.0, %v11768_v31  ;;  %v12462_v52 = vld [vmem:[#allocation46_spill] sm:$0xff] }
 0xa92   : > { %v4831_v41 = vadd.f32 1.0, %v4799_v35  ;;  %v11812_v23 = vmul.f32 0.70710677, %v11805_v47  ;;  %v6951_v54 = vpop.eup %6950  ;;  %v5340_v43 = vmul.f32 %v6949_v34, %v5180_v46  ;;  %v4461_v16 = vadd.f32 1e-05, %v11760_v36 }
 0xa93   : > { %v5179_v53 = vmul.f32 %v11752_v45, %v5147_v10  ;;  %v5022_v30 = vadd.f32 1.4214138, %v4990_v61  ;;  %v4957_v18 = vadd.f32 -1.4531521, %v4925_v11  ;;  %v6953_v39 = vpop.eup %6952  ;;  %v4566_v12 = vmul.f32 %v11108_v1, %v4523_v13 }
 0xa94   : > { %6962 = vrcp.f32 %v4831_v41  ;;  %v4770_v4 = vand.u32 2147483647, %v11812_v23  ;;  %v5372_v5 = vsub.f32 1.0, %v5340_v43  ;;  %v4525_v51 = vmul.f32 %v6945_v29, %v12461_v21 }
 0xa95   : > { %v5339_v19 = vmul.f32 %v6953_v39, %v5179_v53  ;;  %v5054_v37 = vmul.f32 %v11784_v15, %v5022_v30  ;;  %v4989_v2 = vmul.f32 %v11798_v33, %v4957_v18  ;;  %vm4702_vm12 = vcmp.ge.f32.partialorder %v11702_v42, 0.0 }
 0xa96   : > { %v5248_v45 = vmul.f32 %v5216_v17, %v11768_v31  ;;  %v4802_v24 = vmul.f32 0.3275911, %v4770_v4  ;;  %v5404_v6 = vmul.f32 %v5372_v5, %v4732_v58  ;;  %6964 = vrsqrt.f32 %v4461_v16 }
 0xa97   : > { %v5371_v36 = vsub.f32 1.0, %v5339_v19  ;;  %v5086_v27 = vadd.f32 -0.28449672, %v5054_v37  ;;  %v5021_v3 = vadd.f32 1.4214138, %v4989_v2  ;;  %v5215_v62 = vsub.f32 0.0, %v11787_v60 }
 0xa98   : > { %v4834_v48 = vadd.f32 1.0, %v4802_v24  ;;  %v11825_v38 = vadd.f32 %v11112_v50, %v4566_v12  ;;  %v5436_v32 = vadd.f32 1.0, %v5404_v6  ;;  %v5305_v31 = vmul.f32 1.442695, %v5248_v45 }
 0xa99   : > { %v5403_v26 = vmul.f32 %v5371_v36, %v4731_v0  ;;  %v5118_v49 = vmul.f32 %v11784_v15, %v5086_v27  ;;  %v5053_v29 = vmul.f32 %v11798_v33, %v5021_v3  ;;  %v4526_v14 = vmul.f32 %v6951_v54, %v12462_v52  ;;  %v12463_v3 = vld [vmem:[#allocation61_spill] sm:$0xff] }
 0xa9a   : > { %v11829_v20 = vpop.eup %6954  ;;  %6966 = vrcp.f32 %v4834_v48  ;;  %v11832_v58 = vmul.f32 0.70710677, %v11825_v38  ;;  %v5468_v57 = vmul.f32 %v5436_v32, %v11735_v63  ;;  %v4638_v0 = vmul.f32 0.5, %v11691_v25 }
 0xa9b   : > { %v6957_v35 = vpop.eup %6956  ;;  %v5435_v13 = vadd.f32 1.0, %v5403_v26  ;;  %v5150_v34 = vadd.f32 0.2548296, %v5118_v49  ;;  %v5085_v46 = vadd.f32 -0.28449672, %v5053_v29  ;;  %v5247_v61 = vmul.f32 %v5215_v62, %v11787_v60 }
 0xa9c   : > { %v4928_v10 = vmul.f32 1.0614054, %v11829_v20  ;;  %v11840_v11 = vand.u32 2147483647, %v11832_v58  ;;  %v6959_v17 = vpop.eup %6958  ;;  %5632 = vmatprep.mubr.f32.mxu1 %v5468_v57  ;;  %v5218_v43 = vsub.f32 0.0, %v4770_v4  ;;  %v4734_v25 = vsel %vm4702_vm12, 1.0, %v12409_v7 }
 0xa9d   : > { %v5467_v41 = vmul.f32 %v5435_v13, %v11738_v8  ;;  %v5182_v54 = vmul.f32 %v11784_v15, %v5150_v34  ;;  %v5117_v63 = vmul.f32 %v11798_v33, %v5085_v46  ;;  %v4569_v60 = vmul.f32 %v11127_v55, %v4526_v14  ;;  %v6961_v18 = vpop.eup %6960 }
 0xa9e   : > { %v4960_v53 = vadd.f32 -1.4531521, %v4928_v10  ;;  %v4801_v30 = vmul.f32 0.3275911, %v11840_v11  ;;  %6968 = vpow2.f32 %v5305_v31  ;;  %v4568_v8 = vmul.f32 %v11108_v1, %v4525_v51 }
 0xa9f   : > { %5633 = vmatmul.mubr.f32.gmra.mxu1 %v5467_v41  ;;  %v5342_v39 = vmul.f32 %v6957_v35, %v5182_v54  ;;  %v5149_v16 = vadd.f32 0.2548296, %v5117_v63  ;;  %v5303_v12 = vmul.f32 1.442695, %v5247_v61  ;;  %v11853_v19 = vadd.f32 %v11131_v22, %v4569_v60  ;;  %v12464_v63 = vld [vmem:[#allocation60_spill] sm:$0xff] }
 0xaa0   : > { %v4992_v15 = vmul.f32 %v11829_v20, %v4960_v53  ;;  %v4833_v5 = vadd.f32 1.0, %v4801_v30  ;;  %vm4701_vm13 = vcmp.ge.f32.partialorder %v11705_v44, 0.0  ;;  %v5250_v21 = vmul.f32 %v5218_v43, %v4770_v4 }
 0xaa1   : > { %v11855_v42 = vpop.eup %6962  ;;  %v5374_v37 = vsub.f32 1.0, %v5342_v39  ;;  %v5181_v2 = vmul.f32 %v11798_v33, %v5149_v16  ;;  %v11861_v51 = vadd.f32 %v11112_v50, %v4568_v8  ;;  %v11864_v27 = vmul.f32 0.70710677, %v11853_v19 }
 0xaa2   : > { %v5024_v45 = vadd.f32 1.4214138, %v4992_v15  ;;  %v4927_v24 = vmul.f32 1.0614054, %v11855_v42  ;;  %6970 = vrcp.f32 %v4833_v5  ;;  %v4528_v62 = vmul.f32 %v6959_v17, %v12463_v3 }
 0xaa3   : > { %v5406_v6 = vmul.f32 %v5374_v37, %v4734_v25  ;;  %v5341_v36 = vmul.f32 %v6961_v18, %v5181_v2  ;;  %v4733_v48 = vsel %vm4701_vm13, 1.0, %v12409_v7  ;;  %6972 = vpow2.f32 %v5303_v12  ;;  %v6965_v4 = vpop.eup %6964 }
 0xaa4   : > { %v5056_v44 = vmul.f32 %v11829_v20, %v5024_v45  ;;  %v4959_v33 = vadd.f32 -1.4531521, %v4927_v24  ;;  %v5309_v49 = vmul.f32 1.442695, %v5250_v21  ;;  %v4772_v29 = vand.u32 2147483647, %v11864_v27 }
 0xaa5   : > { %v5438_v32 = vadd.f32 1.0, %v5406_v6  ;;  %v5373_v26 = vsub.f32 1.0, %v5341_v36  ;;  %v5217_v14 = vsub.f32 0.0, %v11840_v11  ;;  %v11873_v35 = vmul.f32 0.70710677, %v11861_v51 }
 0xaa6   : > { %v5088_v31 = vadd.f32 -0.28449672, %v5056_v44  ;;  %v4991_v52 = vmul.f32 %v11855_v42, %v4959_v33  ;;  %v4804_v46 = vmul.f32 0.3275911, %v4772_v29  ;;  %v4571_v10 = vmul.f32 %v11127_v55, %v4528_v62 }
 0xaa7   : > { %v11875_v57 = vpop.eup %6966  ;;  %v5470_v13 = vmul.f32 %v5438_v32, %v4638_v0  ;;  %v5405_v34 = vmul.f32 %v5373_v26, %v4733_v48  ;;  %v4637_v61 = vmul.f32 0.5, %v11694_v9  ;;  %v4527_v43 = vmul.f32 %v6965_v4, %v12464_v63 }
 0xaa8   : > { %v5120_v17 = vmul.f32 %v11829_v20, %v5088_v31  ;;  %v5023_v41 = vadd.f32 1.4214138, %v4991_v52  ;;  %v4930_v54 = vmul.f32 1.0614054, %v11875_v57  ;;  %6974 = vpow2.f32 %v5309_v49 }
 0xaa9   : > { %5637 = vmatprep.mubr.f32.mxu1 %v5470_v13  ;;  %v5437_v25 = vadd.f32 1.0, %v5405_v34  ;;  %v4836_v53 = vadd.f32 1.0, %v4804_v46  ;;  %v11884_v18 = vand.u32 2147483647, %v11873_v35  ;;  %v5249_v9 = vmul.f32 %v5217_v14, %v11840_v11 }
 0xaaa   : > { %v5152_v30 = vadd.f32 0.2548296, %v5120_v17  ;;  %v5055_v0 = vmul.f32 %v11855_v42, %v5023_v41  ;;  %v4962_v60 = vadd.f32 -1.4531521, %v4930_v54  ;;  %v11888_v39 = vadd.f32 %v11131_v22, %v4571_v10 }
 0xaab   : > { %v5469_v55 = vmul.f32 %v5437_v25, %v4637_v61  ;;  %6976 = vrcp.f32 %v4836_v53  ;;  %v6969_v16 = vpop.eup %6968  ;;  %v4803_v5 = vmul.f32 0.3275911, %v11884_v18  ;;  %v4640_v37 = vmul.f32 0.5, %v11748_v40 }
 0xaac   : > { %v5184_v8 = vmul.f32 %v11829_v20, %v5152_v30  ;;  %v5087_v15 = vadd.f32 -0.28449672, %v5055_v0  ;;  %v4994_v12 = vmul.f32 %v11875_v57, %v4962_v60  ;;  %vm4704_vm14 = vcmp.ge.f32.partialorder %v11758_v56, 0.0 }
 0xaad   : > { %5638 = vmatmul.mubr.f32.gmra.mxu1 %v5469_v55  ;;  %v11896_v2 = vmul.f32 0.70710677, %v11888_v39  ;;  %v4835_v45 = vadd.f32 1.0, %v4803_v5  ;;  %v5307_v20 = vmul.f32 1.442695, %v5249_v9  ;;  %v5220_v6 = vsub.f32 0.0, %v4772_v29 }
 0xaae   : > { %v5344_v11 = vmul.f32 %v6969_v16, %v5184_v8  ;;  %v5119_v22 = vmul.f32 %v11855_v42, %v5087_v15  ;;  %v5026_v21 = vadd.f32 1.4214138, %v4994_v12  ;;  %v4570_v3 = vmul.f32 %v11108_v1, %v4527_v43 }
 0xaaf   : > { %v11899_v24 = vpop.eup %6970  ;;  %v11902_v36 = vand.u32 2147483647, %v11896_v2  ;;  %v4736_v4 = vsel %vm4704_vm14, 1.0, %v12409_v7  ;;  %vm4703_vm15 = vcmp.ge.f32.partialorder %v11780_v59, 0.0  ;;  %6978 = vrcp.f32 %v4835_v45 }
 0xab0   : > { %v5376_v40 = vsub.f32 1.0, %v5344_v11  ;;  %v5151_v62 = vadd.f32 0.2548296, %v5119_v22  ;;  %v5058_v48 = vmul.f32 %v11875_v57, %v5026_v21  ;;  %v4929_v44 = vmul.f32 1.0614054, %v11899_v24  ;;  %v6973_v33 = vpop.eup %6972 }
 0xab1   : > { %v4806_v32 = vmul.f32 0.3275911, %v11902_v36  ;;  %6980 = vpow2.f32 %v5307_v20  ;;  %v5252_v52 = vmul.f32 %v5220_v6, %v4772_v29  ;;  %v11914_v13 = vadd.f32 %v11112_v50, %v4570_v3 }
 0xab2   : > { %v5408_v26 = vmul.f32 %v5376_v40, %v4736_v4  ;;  %v5183_v49 = vmul.f32 %v11855_v42, %v5151_v62  ;;  %v5090_v1 = vadd.f32 -0.28449672, %v5058_v48  ;;  %v4961_v31 = vadd.f32 -1.4531521, %v4929_v44 }
 0xab3   : > { %v4838_v14 = vadd.f32 1.0, %v4806_v32  ;;  %v5219_v61 = vsub.f32 0.0, %v11884_v18  ;;  %v11920_v17 = vmul.f32 0.70710677, %v11914_v13  ;;  %v4735_v50 = vsel %vm4703_vm15, 1.0, %v12409_v7 }
 0xab4   : > { %v5440_v34 = vadd.f32 1.0, %v5408_v26  ;;  %v5343_v46 = vmul.f32 %v6973_v33, %v5183_v49  ;;  %v5122_v56 = vmul.f32 %v11875_v57, %v5090_v1  ;;  %v4993_v10 = vmul.f32 %v11899_v24, %v4961_v31 }
 0xab5   : > { %6982 = vrcp.f32 %v4838_v14  ;;  %v6975_v42 = vpop.eup %6974  ;;  %v4773_v43 = vand.u32 2147483647, %v11920_v17  ;;  %v5313_v60 = vmul.f32 1.442695, %v5252_v52  ;;  %v4639_v55 = vmul.f32 0.5, %v11771_v28 }
 0xab6   : > { %v5472_v41 = vmul.f32 %v5440_v34, %v4640_v37  ;;  %v5375_v54 = vsub.f32 1.0, %v5343_v46  ;;  %v5154_v29 = vadd.f32 0.2548296, %v5122_v56  ;;  %v5025_v63 = vadd.f32 1.4214138, %v4993_v10 }
 0xab7   : > { %vm4706_vm1 = vcmp.ge.f32.partialorder %v11812_v23, 0.0  ;;  %v4805_v16 = vmul.f32 0.3275911, %v4773_v43  ;;  %v5251_v12 = vmul.f32 %v5219_v61, %v11884_v18  ;;  %v5222_v37 = vsub.f32 0.0, %v11902_v36 }
 0xab8   : > { %v11926_v25 = vpop.eup %6976  ;;  %5642 = vmatprep.mubr.f32.mxu1 %v5472_v41  ;;  %v5407_v53 = vmul.f32 %v5375_v54, %v4735_v50  ;;  %v5186_v30 = vmul.f32 %v11875_v57, %v5154_v29  ;;  %v5057_v0 = vmul.f32 %v11899_v24, %v5025_v63  ;;  %6984 = vpow2.f32 %v5313_v60 }
 0xab9   : > { %v4932_v9 = vmul.f32 1.0614054, %v11926_v25  ;;  %v4837_v11 = vadd.f32 1.0, %v4805_v16  ;;  %v4738_v28 = vsel %vm4706_vm1, 1.0, %v12409_v7  ;;  %v5311_v3 = vmul.f32 1.442695, %v5251_v12 }
 0xaba   : > { %v5439_v59 = vadd.f32 1.0, %v5407_v53  ;;  %v5346_v8 = vmul.f32 %v6975_v42, %v5186_v30  ;;  %v5089_v15 = vadd.f32 -0.28449672, %v5057_v0  ;;  %v5254_v62 = vmul.f32 %v5222_v37, %v11902_v36 }
 0xabb   : > { %v4964_v5 = vadd.f32 -1.4531521, %v4932_v9  ;;  %6986 = vrcp.f32 %v4837_v11  ;;  %v4642_v44 = vmul.f32 0.5, %v11805_v47  ;;  %vm4705_vm2 = vcmp.ge.f32.partialorder %v11832_v58, 0.0 }
 0xabc   : > { %v5471_v57 = vmul.f32 %v5439_v59, %v4639_v55  ;;  %v5378_v22 = vsub.f32 1.0, %v5346_v8  ;;  %v5121_v21 = vmul.f32 %v11899_v24, %v5089_v15  ;;  %v6979_v45 = vpop.eup %6978  ;;  %6988 = vpow2.f32 %v5311_v3 }
 0xabd   : > { %v4996_v23 = vmul.f32 %v11926_v25, %v4964_v5  ;;  %v4931_v40 = vmul.f32 1.0614054, %v6979_v45  ;;  %v5317_v46 = vmul.f32 1.442695, %v5254_v62  ;;  %v5221_v56 = vsub.f32 0.0, %v4773_v43 }
 0xabe   : > { %5643 = vmatmul.mubr.f32.gmra.mxu1 %v5471_v57  ;;  %v5410_v20 = vmul.f32 %v5378_v22, %v4738_v28  ;;  %v5153_v6 = vadd.f32 0.2548296, %v5121_v21  ;;  %v6981_v48 = vpop.eup %6980  ;;  %v4737_v47 = vsel %vm4705_vm2, 1.0, %v12409_v7  ;;  %v4641_v58 = vmul.f32 0.5, %v11825_v38 }
 0xabf   : > { %v5028_v18 = vadd.f32 1.4214138, %v4996_v23  ;;  %v4963_v26 = vadd.f32 -1.4531521, %v4931_v40  ;;  %6990 = vpow2.f32 %v5317_v46  ;;  %v5253_v50 = vmul.f32 %v5221_v56, %v4773_v43  ;;  %v11958_v40 = vld [vmem:[#allocation23] ss:$0 sm:$0xff] }
 0xac0   : > { %v5442_v33 = vadd.f32 1.0, %v5410_v20  ;;  %v5185_v4 = vmul.f32 %v11899_v24, %v5153_v6  ;;  %vm4708_vm3 = vcmp.ge.f32.partialorder %v11864_v27, 0.0  ;;  %v4644_v27 = vmul.f32 0.5, %v11853_v19 }
 0xac1   : > { %v5060_v32 = vmul.f32 %v11926_v25, %v5028_v18  ;;  %v4995_v14 = vmul.f32 %v6979_v45, %v4963_v26  ;;  %v5315_v38 = vmul.f32 1.442695, %v5253_v50  ;;  %vm4707_vm4 = vcmp.ge.f32.partialorder %v11873_v35, 0.0 }
 0xac2   : > { %v6983_v49 = vpop.eup %6982  ;;  %v5474_v1 = vmul.f32 %v5442_v33, %v4642_v44  ;;  %v5345_v31 = vmul.f32 %v6981_v48, %v5185_v4  ;;  %v4739_v4 = vsel %vm4707_vm4, 1.0, %v12409_v7  ;;  %vm4710_vm5 = vcmp.ge.f32.partialorder %v11896_v2, 0.0 }
 0xac3   : > { %v5092_v52 = vadd.f32 -0.28449672, %v5060_v32  ;;  %v4934_v34 = vmul.f32 1.0614054, %v6983_v49  ;;  %v5027_v10 = vadd.f32 1.4214138, %v4995_v14  ;;  %6992 = vpow2.f32 %v5315_v38  ;;  %v5680_v14 = vpop.permute.xlu0 %5679 }
 0xac4   : > { %5647 = vmatprep.mubr.f32.mxu1 %v5474_v1  ;;  %v5377_v36 = vsub.f32 1.0, %v5345_v31  ;;  %vm5727_vm6 = vcmask 1048064   ;;  %v4742_v56 = vsel %vm4710_vm5, 1.0, %v12409_v7  ;;  %vm4709_vm7 = vcmp.ge.f32.partialorder %v11920_v17, 0.0 }
 0xac5   : > { %v5124_v24 = vmul.f32 %v11926_v25, %v5092_v52  ;;  %v4966_v61 = vadd.f32 -1.4531521, %v4934_v34  ;;  %v5059_v54 = vmul.f32 %v6979_v45, %v5027_v10  ;;  %v6985_v53 = vpop.eup %6984  ;;  %v4643_v34 = vmul.f32 0.5, %v11861_v51 }
 0xac6   : > { %v5409_v42 = vmul.f32 %v5377_v36, %v4737_v47 }
 0xac7   : > { %v5156_v41 = vadd.f32 0.2548296, %v5124_v24  ;;  %v4998_v29 = vmul.f32 %v6983_v49, %v4966_v61  ;;  %v5091_v0 = vadd.f32 -0.28449672, %v5059_v54  ;;  %v5682_v61 = vpop.permute.xlu1 %5681  ;;  %v4646_v54 = vmul.f32 0.5, %v11888_v39 }
 0xac8   : > { %v5441_v63 = vadd.f32 1.0, %v5409_v42  ;;  %v11947_v55 = vpop.eup %6986  ;;  %v4741_v39 = vsel %vm4709_vm7, 1.0, %v12409_v7 }
 0xac9   : > { %v5188_v30 = vmul.f32 %v11926_v25, %v5156_v41  ;;  %v5030_v60 = vadd.f32 1.4214138, %v4998_v29  ;;  %v5123_v59 = vmul.f32 %v6979_v45, %v5091_v0  ;;  %v4933_v15 = vmul.f32 1.0614054, %v11947_v55  ;;  %v6989_v11 = vpop.eup %6988 }
 0xaca   : > { %v5473_v9 = vmul.f32 %v5441_v63, %v4641_v58  ;;  %v4740_v25 = vsel %vm4708_vm3, 1.0, %v12409_v7 }
 0xacb   : > { %v5348_v16 = vmul.f32 %v6985_v53, %v5188_v30  ;;  %v5062_v8 = vmul.f32 %v6983_v49, %v5030_v60  ;;  %v5155_v43 = vadd.f32 0.2548296, %v5123_v59  ;;  %v4965_v37 = vadd.f32 -1.4531521, %v4933_v15  ;;  %v5686_v30 = vpop.permute.xlu1 %5685 }
 0xacc   : > { %5648 = vmatmul.mubr.f32.gmra.mxu1 %v5473_v9  ;;  %v6991_v19 = vpop.eup %6990 }
 0xacd   : > { %v5380_v12 = vsub.f32 1.0, %v5348_v16  ;;  %v5094_v5 = vadd.f32 -0.28449672, %v5062_v8  ;;  %v5187_v22 = vmul.f32 %v6979_v45, %v5155_v43  ;;  %v4997_v28 = vmul.f32 %v11947_v55, %v4965_v37 }
 0xace   : > { %v4645_v16 = vmul.f32 0.5, %v11914_v13 }
 0xacf   : > { %v5412_v57 = vmul.f32 %v5380_v12, %v4740_v25  ;;  %v5126_v21 = vmul.f32 %v6983_v49, %v5094_v5  ;;  %v5347_v6 = vmul.f32 %v6989_v11, %v5187_v22  ;;  %v5029_v18 = vadd.f32 1.4214138, %v4997_v28  ;;  %v5684_v15 = vpop.permute.xlu1 %5683  ;;  %v5688_v11 = vpop.permute.xlu0 %5687 }
 0xad0   : > { %v6167_v23 = vpop.f32.mrf.mxu1  ;;  %v6993_v2 = vpop.eup %6992 }
 0xad1   : > { %v5444_v20 = vadd.f32 1.0, %v5412_v57  ;;  %v5158_v3 = vadd.f32 0.2548296, %v5126_v21  ;;  %v5379_v45 = vsub.f32 1.0, %v5347_v6  ;;  %v5061_v32 = vmul.f32 %v11947_v55, %v5029_v18 }
 0xad2   : > { %v6168_v62 = vpop.f32.mrf.mxu1 }
 0xad3   : > { %v5476_v48 = vmul.f32 %v5444_v20, %v4644_v27  ;;  %v5190_v44 = vmul.f32 %v6983_v49, %v5158_v3  ;;  %v6169_v33 = vadd.f32 %v6168_v62, %v6167_v23  ;;  %v5411_v35 = vmul.f32 %v5379_v45, %v4739_v4  ;;  %v5690_v28 = vpop.permute.xlu1 %5689  ;;  %v5692_v18 = vpop.permute.xlu0 %5691 }
 0xad4   : > { %v5093_v52 = vadd.f32 -0.28449672, %v5061_v32 }
 0xad5   : > { %5652 = vmatprep.mubr.f32.mxu1 %v5476_v48  ;;  %v5350_v26 = vmul.f32 %v6991_v19, %v5190_v44  ;;  %v5585_v1 = vadd.f32 %v6169_v33, %v11958_v40  ;;  %v6170_v31 = vpop.f32.mrf.mxu1  ;;  %v5443_v49 = vadd.f32 1.0, %v5411_v35 }
 0xad6   : > { %v5125_v47 = vmul.f32 %v11947_v55, %v5093_v52 }
 0xad7   : > { %v5382_v46 = vsub.f32 1.0, %v5350_v26  ;;  %5663 = vst.msk [vmem:[%s11965_s26] sm:$0xff] %vm906_vm0, %v5585_v1  ;;  %v6171_v36 = vpop.f32.mrf.mxu1  ;;  %v5475_v24 = vmul.f32 %v5443_v49, %v4643_v34  ;;  %v5694_v33 = vpop.permute.xlu1 %5693 }
 0xad8   : > { %5728 = vst.msk [vmem:[%s11965_s26] sm:$0xff] %vm5727_vm6, %v5680_v14  ;;  %v6172_v51 = vadd.f32 %v6171_v36, %v6170_v31  ;;  %v5157_v42 = vadd.f32 0.2548296, %v5125_v47  ;;  %v5696_v26 = vpop.permute.xlu0 %5695 }
 0xad9   : > { %v5414_v10 = vmul.f32 %v5382_v46, %v4742_v56  ;;  %5653 = vmatmul.mubr.f32.gmra.mxu1 %v5475_v24 }
 0xada   : > { %v5590_v41 = vadd.f32 %v6172_v51, %v11958_v40  ;;  %v5189_v58 = vmul.f32 %v11947_v55, %v5157_v42 }
 0xadb   : > { %v5446_v29 = vadd.f32 1.0, %v5414_v10  ;;  %v5698_v34 = vpop.permute.xlu1 %5697 }
 0xadc   : > { %5664 = vst.msk [vmem:[%s11965_s26 + $0x8] sm:$0xff] %vm906_vm0, %v5590_v41  ;;  %v5349_v50 = vmul.f32 %v6993_v2, %v5189_v58  ;;  %v5700_v47 = vpop.permute.xlu0 %5699 }
 0xadd   : > { %v5478_v63 = vmul.f32 %v5446_v29, %v4646_v54  ;;  %5729 = vst.msk [vmem:[%s11965_s26 + $0x8] sm:$0xff] %vm5727_vm6, %v5682_v61 }
 0xade   : > { %v5381_v0 = vsub.f32 1.0, %v5349_v50 }
 0xadf   : > { %5657 = vmatprep.mubr.f32.mxu1 %v5478_v63  ;;  %v5702_v42 = vpop.permute.xlu1 %5701 }
 0xae0   : > { %v5413_v55 = vmul.f32 %v5381_v0, %v4741_v39  ;;  %v5704_v2 = vpop.permute.xlu0 %5703 }
 0xae1   : > { %v6173_v53 = vpop.f32.mrf.mxu1 }
 0xae2   : > { %v5445_v59 = vadd.f32 1.0, %v5413_v55 }
 0xae3   : > { %v6174_v60 = vpop.f32.mrf.mxu1  ;;  %v5706_v0 = vpop.permute.xlu1 %5705 }
 0xae4   : > { %v6175_v9 = vadd.f32 %v6174_v60, %v6173_v53  ;;  %v5477_v17 = vmul.f32 %v5445_v59, %v4645_v16  ;;  %v5708_v16 = vpop.permute.xlu0 %5707 }
 0xae6   : > { %v5595_v8 = vadd.f32 %v6175_v9, %v11958_v40  ;;  %5658 = vmatmul.mubr.f32.gmra.mxu1 %v5477_v17 }
 0xae8   : > { %5665 = vst.msk [vmem:[%s11965_s26 + $0x10] sm:$0xff] %vm906_vm0, %v5595_v8 }
 0xae9   : > { %5730 = vst.msk [vmem:[%s11965_s26 + $0x10] sm:$0xff] %vm5727_vm6, %v5684_v15 }
 0xaee   : > { %v6176_v7 = vpop.f32.mrf.mxu1 }
 0xaf0   : > { %v6177_v38 = vpop.f32.mrf.mxu1 }
 0xaf1   : > { %v6178_v12 = vadd.f32 %v6177_v38, %v6176_v7  ;;  %v5710_v7 = vpop.permute.xlu1 %5709 }
 0xaf3   : > { %v5600_v43 = vadd.f32 %v6178_v12, %v11958_v40 }
 0xaf5   : > { %5666 = vst.msk [vmem:[%s11965_s26 + $0x18] sm:$0xff] %vm906_vm0, %v5600_v43 }
 0xaf6   : > { %5731 = vst.msk [vmem:[%s11965_s26 + $0x18] sm:$0xff] %vm5727_vm6, %v5686_v30 }
 0xb05   : > { %v6179_v13 = vpop.f32.mrf.mxu1 }
 0xb07   : > { %v6180_v5 = vpop.f32.mrf.mxu1 }
 0xb08   : > { %v6181_v25 = vadd.f32 %v6180_v5, %v6179_v13 }
 0xb0a   : > { %v5605_v37 = vadd.f32 %v6181_v25, %v11958_v40 }
 0xb0c   : > { %5667 = vst.msk [vmem:[%s11965_s26 + $0x20] sm:$0xff] %vm906_vm0, %v5605_v37 }
 0xb0d   : > { %5732 = vst.msk [vmem:[%s11965_s26 + $0x20] sm:$0xff] %vm5727_vm6, %v5688_v11 }
 0xb16   : > { %v6182_v57 = vpop.f32.mrf.mxu1 }
 0xb18   : > { %v6183_v22 = vpop.f32.mrf.mxu1 }
 0xb19   : > { %v6184_v21 = vadd.f32 %v6183_v22, %v6182_v57 }
 0xb1b   : > { %v5610_v27 = vadd.f32 %v6184_v21, %v11958_v40 }
 0xb1d   : > { %5668 = vst.msk [vmem:[%s11965_s26 + $0x28] sm:$0xff] %vm906_vm0, %v5610_v27 }
 0xb1e   : > { %5733 = vst.msk [vmem:[%s11965_s26 + $0x28] sm:$0xff] %vm5727_vm6, %v5690_v28 }
 0xb1f   : > { %v6185_v23 = vpop.f32.mrf.mxu1 }
 0xb21   : > { %v6186_v20 = vpop.f32.mrf.mxu1 }
 0xb22   : > { %v6187_v6 = vadd.f32 %v6186_v20, %v6185_v23 }
 0xb24   : > { %v5615_v3 = vadd.f32 %v6187_v6, %v11958_v40 }
 0xb26   : > { %5669 = vst.msk [vmem:[%s11965_s26 + $0x30] sm:$0xff] %vm906_vm0, %v5615_v3 }
 0xb27   : > { %5734 = vst.msk [vmem:[%s11965_s26 + $0x30] sm:$0xff] %vm5727_vm6, %v5692_v18 }
 0xb2d   : > { %v6188_v62 = vpop.f32.mrf.mxu1 }
 0xb2f   : > { %v6189_v48 = vpop.f32.mrf.mxu1 }
 0xb30   : > { %v6190_v45 = vadd.f32 %v6189_v48, %v6188_v62 }
 0xb32   : > { %v5620_v44 = vadd.f32 %v6190_v45, %v11958_v40 }
 0xb34   : > { %5670 = vst.msk [vmem:[%s11965_s26 + $0x38] sm:$0xff] %vm906_vm0, %v5620_v44 }
 0xb35   : > { %5735 = vst.msk [vmem:[%s11965_s26 + $0x38] sm:$0xff] %vm5727_vm6, %v5694_v33 }
 0xb42   : > { %v6191_v19 = vpop.f32.mrf.mxu1 }
 0xb44   : > { %v6192_v4 = vpop.f32.mrf.mxu1 }
 0xb45   : > { %v6193_v32 = vadd.f32 %v6192_v4, %v6191_v19 }
 0xb47   : > { %v5625_v35 = vadd.f32 %v6193_v32, %v11958_v40 }
 0xb49   : > { %5671 = vst.msk [vmem:[%s11965_s26 + $0x40] sm:$0xff] %vm906_vm0, %v5625_v35 }
 0xb4a   : > { %5736 = vst.msk [vmem:[%s11965_s26 + $0x40] sm:$0xff] %vm5727_vm6, %v5696_v26 }
 0xb4f   : > { %v6194_v1 = vpop.f32.mrf.mxu1 }
 0xb51   : > { %v6195_v31 = vpop.f32.mrf.mxu1 }
 0xb52   : > { %v6196_v52 = vadd.f32 %v6195_v31, %v6194_v1 }
 0xb54   : > { %v5630_v14 = vadd.f32 %v6196_v52, %v11958_v40 }
 0xb56   : > { %5672 = vst.msk [vmem:[%s11965_s26 + $0x48] sm:$0xff] %vm906_vm0, %v5630_v14 }
 0xb57   : > { %5737 = vst.msk [vmem:[%s11965_s26 + $0x48] sm:$0xff] %vm5727_vm6, %v5698_v34 }
 0xb5f   : > { %v6197_v49 = vpop.f32.mrf.mxu1 }
 0xb61   : > { %v6198_v46 = vpop.f32.mrf.mxu1 }
 0xb62   : > { %v6199_v36 = vadd.f32 %v6198_v46, %v6197_v49 }
 0xb64   : > { %v5635_v56 = vadd.f32 %v6199_v36, %v11958_v40 }
 0xb66   : > { %5673 = vst.msk [vmem:[%s11965_s26 + $0x50] sm:$0xff] %vm906_vm0, %v5635_v56 }
 0xb67   : > { %5738 = vst.msk [vmem:[%s11965_s26 + $0x50] sm:$0xff] %vm5727_vm6, %v5700_v47 }
 0xb6d   : > { %v6200_v51 = vpop.f32.mrf.mxu1 }
 0xb6f   : > { %v6201_v24 = vpop.f32.mrf.mxu1 }
 0xb70   : > { %v6202_v10 = vadd.f32 %v6201_v24, %v6200_v51 }
 0xb72   : > { %v5640_v61 = vadd.f32 %v6202_v10, %v11958_v40 }
 0xb74   : > { %5674 = vst.msk [vmem:[%s11965_s26 + $0x58] sm:$0xff] %vm906_vm0, %v5640_v61 }
 0xb75   : > { %5739 = vst.msk [vmem:[%s11965_s26 + $0x58] sm:$0xff] %vm5727_vm6, %v5702_v42 }
 0xb7e   : > { %v6203_v41 = vpop.f32.mrf.mxu1 }
 0xb80   : > { %v6204_v54 = vpop.f32.mrf.mxu1 }
 0xb81   : > { %v6205_v29 = vadd.f32 %v6204_v54, %v6203_v41 }
 0xb83   : > { %v5645_v58 = vadd.f32 %v6205_v29, %v11958_v40 }
 0xb85   : > { %5675 = vst.msk [vmem:[%s11965_s26 + $0x60] sm:$0xff] %vm906_vm0, %v5645_v58 }
 0xb86   : > { %5740 = vst.msk [vmem:[%s11965_s26 + $0x60] sm:$0xff] %vm5727_vm6, %v5704_v2 }
 0xb8c   : > { %v6206_v63 = vpop.f32.mrf.mxu1 }
 0xb8e   : > { %v6207_v50 = vpop.f32.mrf.mxu1 }
 0xb8f   : > { %v6208_v53 = vadd.f32 %v6207_v50, %v6206_v63 }
 0xb91   : > { %v5650_v30 = vadd.f32 %v6208_v53, %v11958_v40 }
 0xb93   : > { %5676 = vst.msk [vmem:[%s11965_s26 + $0x68] sm:$0xff] %vm906_vm0, %v5650_v30 }
 0xb94   : > { %5741 = vst.msk [vmem:[%s11965_s26 + $0x68] sm:$0xff] %vm5727_vm6, %v5706_v0 }
 0xb99   : > { %v6209_v39 = vpop.f32.mrf.mxu1 }
 0xb9b   : > { %v6210_v60 = vpop.f32.mrf.mxu1 }
 0xb9c   : > { %v6211_v55 = vadd.f32 %v6210_v60, %v6209_v39 }
 0xb9e   : > { %v5655_v9 = vadd.f32 %v6211_v55, %v11958_v40 }
 0xba0   : > { %5677 = vst.msk [vmem:[%s11965_s26 + $0x70] sm:$0xff] %vm906_vm0, %v5655_v9 }
 0xba1   : > { %5742 = vst.msk [vmem:[%s11965_s26 + $0x70] sm:$0xff] %vm5727_vm6, %v5708_v16 }
 0xba6   : > { %v6212_v59 = vpop.f32.mrf.mxu1 }
 0xba8   : > { %v6213_v8 = vpop.f32.mrf.mxu1 }
 0xba9   : > { %v6214_v15 = vadd.f32 %v6213_v8, %v6212_v59 }
 0xbab   : > { %v5660_v17 = vadd.f32 %v6214_v15, %v11958_v40 }
 0xbad   : > { %5678 = vst.msk [vmem:[%s11965_s26 + $0x78] sm:$0xff] %vm906_vm0, %v5660_v17 }
 0xbae   : > { %5743 = vst.msk [vmem:[%s11965_s26 + $0x78] sm:$0xff] %vm5727_vm6, %v5710_v7 }
 0xbaf   : > { %7435 = shalt.err (!%p7432_p10)
}
 0xbb0   : > { %s7436_s23 = scalar_lea.hbm %s12056_s28, 2048  ;;  %s7440_s25 = scalar_lea.hbm %s12466_s0, 8192 }
 0xbb1   : > { %p7437_p0 = scmp.ne.s32.totalorder %s12056_s28, %s7436_s23  ;;  %p7441_p3 = scmp.lt.s32.totalorder %s12056_s28, %s12466_s0 }
 0xbb2   : > { %p7442_p13 = scmp.lt.s32.totalorder %s7440_s25, %s7436_s23 }
 0xbb3   : > { %p7438_p1 = pnand %p7437_p0, %p12467_p7 }
 0xbb4   : > { %p7443_p4 = por %p7442_p13, %p7441_p3 }
 0xbb5   : > { %p7439_p2 = pneg %p7438_p1 }
 0xbb7   : > { %p7444_p9 = pnand %p7443_p4, %p7439_p2 }
 0xbb9   : > { %7447 = shalt.err (!%p7444_p9)
}
 0xbba   : > { %s7536_s24 = smov 128   ;;  %s7537_s29 = smov 8  }
 0xbbb   : > { %6383 = dma.vmem_to_hbm [thread:$0]  (%p12467_p7), %s12058_s21, 2048, %s12056_s28, %s12066_s2, %s7536_s24, %s7536_s24, %s7537_s29  }
 0xbbc PF: > { %s12468_s3 = sld [smem:[#allocation37_spill]] }
 0xbbd   : > { %s12469_s30 = sld [smem:[#allocation35_spill]] }
 0xbbe   : > { %s12470_s27 = sld [smem:[#allocation40_spill]] }
 0xbc2   : > { %p6460_p12 = scmp.ge.s32.totalorder %s12468_s3, 2 }
 0xbc3   : > { %s5773_s20 = sand.u32 1, %s12469_s30  }
 0xbc4   : > { %p12471_p8 = scmp.ne.s32.totalorder %s12470_s27, 0  ;;  %s5774_s23 = scalar_lea.sflag [#allocation4], %s5773_s20 }
 0xbc6   : > { %p6429_p11 = pnand %p6460_p12, %p12471_p8 }
 0xbc8   : > { %p6430_p5 = pneg %p6429_p11 }
 0xbca   : > { %7497 = dma.done.wait (%p6430_p5), %s5774_s23, 2048  }
 0xbcb   : > { %7499 = vsyncadd (%p6430_p5), %s5774_s23, 4294965248  ;;  %s12472_s24 = sld [smem:[#allocation38_spill]]  ;;  %s12475_s1 = smov %s7506_s22 }
 0xbcc   : > { %s12473_s26 = sld [smem:[#allocation36_spill]] }
 0xbcd   : > { %s12474_s23 = sld [smem:[#allocation39_spill]] }
 0xbd1   : > { %p38_p6 = scmp.ge.s32.totalorder %s12472_s24, 6  }
 0xbd2   : > { %s12476_s22 = smov %s12473_s26 }
 0xbd3   :  { %40 = sbr.rel (!%p38_p6) target bundleno = 20 (0x14), region = 192 }
 0xbd8   :  { %5779 = vsyncpa [#allocation3], 1 }
 0xbd9   :  { %5781 = vsyncpa [#allocation3 + $0x1], 1 }
 0xbda   :  { %5782 = vsyncpa [#allocation6], 1 }
 0xbdb   :  { %5783 = vsyncpa [#allocation9], 1 }
 0xbdc   :  { %5784 = vsyncpa [#allocation12], 1 }
 0xbdd   :  { %5785 = vsyncpa [#allocation15], 1 }
 0xbde   :  { %5786 = vsyncpa [#allocation18], 1 }
 0xbdf   :  { %5787 = vsyncpa [#allocation21], 1 }
 0xbe0   :  { %5788 = vsyncpa [#allocation24], 1 }
 0xbe1   :  { %5789 = vsyncpa [#allocation4], 1 }
 0xbe2   :  { %5791 = vsyncpa [#allocation4 + $0x1], 1 }

</bundles_post_ra>
